<compile_context>
chip_gen: v7x
topology: tpu7x:2x2x1
jax: 0.10.0
libtpu: 0.0.40
codegen_flags: <defaults>
</compile_context>

<pallas_src>
from functools import partial

import jax
import jax.numpy as jnp
from jax.experimental import pallas as pl
from jax.experimental.pallas import tpu as pltpu

EPS = 1e-5                       # nn.InstanceNorm3d default eps
INV_SQRT2 = 0.7071067811865476   # for exact (erf) GELU, PyTorch nn.GELU default
LANE = 128
MATMUL_DTYPE = jnp.float32       # set to jnp.bfloat16 on v6e/v7x if tolerance allows


def _round_up(x, m):
    return (x + m - 1) // m * m


def _vmem_capacity_bytes():
    try:
        return int(pltpu.get_tpu_info().vmem_capacity_bytes)
    except Exception:
        return 64 * 1024 * 1024  # conservative fallback (v7x per-TC VMEM)


def _pick_td(D, H, W, Cp, Cop, itemsize, budget_bytes):
    """Largest divisor of D whose per-step footprint fits the VMEM budget."""
    best = 1
    for td in range(1, D + 1):
        if D % td:
            continue
        m = td * H * W
        need = (
            2 * (td + 2) * (H + 2) * (W + 2) * Cp * itemsize   # double-buffered halo window
            + 2 * td * H * W * Cop * 4                         # double-buffered out block
            + 2 * 27 * Cp * Cop * itemsize                     # weights
            + m * 3 * Cp * itemsize + 2 * m * Cop * 4          # patch / acc temporaries
        )
        if need <= budget_bytes:
            best = td
    return best


# --------------------------------------------------------------------------------------
# Kernel A: 3x3x3 conv on a D-tile + per-channel partial InstanceNorm statistics.
# --------------------------------------------------------------------------------------
def _conv3d_stats_kernel(xp_hbm, w_ref, y_ref, stats_ref, xwin, sem):
    n, dt = pl.program_id(0), pl.program_id(1)
    n_dt = pl.num_programs(1)

    _, tdp2, hp2, wp2, cp = xwin.shape
    td = tdp2 - 2
    h, w = hp2 - 2, wp2 - 2
    cop = y_ref.shape[-1]
    m = td * h * w

    slot = dt % 2

    def window_copy(dt_target, s):
        d0 = pl.multiple_of(dt_target * td, td)
        return pltpu.make_async_copy(
            xp_hbm.at[n, pl.ds(d0, td + 2)], xwin.at[s], sem.at[s])

    # Prime the double buffer at the start of every n-sweep (dt axis is sequential).
    @pl.when(dt == 0)
    def _():
        window_copy(dt, slot).start()

    # Prefetch the next D-tile's halo window while we compute on the current one.
    @pl.when(dt + 1 < n_dt)
    def _():
        window_copy(dt + 1, 1 - slot).start()

    window_copy(dt, slot).wait()

    # 3x3x3 conv as 9 MXU matmuls with a fat contraction (K = 3*Cp): the three kw taps
    # are folded into the channel axis (weights pre-reshaped to (3, 3, 3*Cp, Cop)).
    acc = jnp.zeros((m, cop), jnp.float32)
    for kd in range(3):
        for kh in range(3):
            win = xwin[slot, kd:kd + td, kh:kh + h, :, :]        # (td, h, w+2, cp)
            patch = jnp.concatenate(
                [win[:, :, 0:w, :], win[:, :, 1:w + 1, :], win[:, :, 2:w + 2, :]],
                axis=-1,
            ).reshape(m, 3 * cp)
            acc = acc + jnp.dot(patch, w_ref[kd, kh],
                                preferred_element_type=jnp.float32)

    # Raw (pre-normalization) conv output for this tile.  No bias: it is a no-op under
    # the following mean subtraction of InstanceNorm (no affine).
    y_ref[0] = acc.reshape(td, h, w, cop).astype(y_ref.dtype)

    # One-pass per-channel partial statistics, accumulated across D-tiles.
    part = jnp.concatenate(
        [jnp.sum(acc, axis=0, keepdims=True),
         jnp.sum(acc * acc, axis=0, keepdims=True)],
        axis=0,
    )  # (2, cop)

    @pl.when(dt == 0)
    def _():
        stats_ref[0] = part

    @pl.when(dt > 0)
    def _():
        stats_ref[0] = stats_ref[0] + part


# --------------------------------------------------------------------------------------
# Kernel B: normalize with the accumulated statistics + exact (erf) GELU.
# --------------------------------------------------------------------------------------
def _instnorm_gelu_kernel(y_ref, stats_ref, o_ref, *, inv_count):
    y = y_ref[0].astype(jnp.float32)                       # (td, h, w, cop)
    stats = stats_ref[0].astype(jnp.float32)               # (2, cop)
    mean = stats[0:1] * inv_count                          # (1, cop)
    var = jnp.maximum(stats[1:2] * inv_count - mean * mean, 0.0)
    inv_std = jax.lax.rsqrt(var + EPS)                     # EUP rsqrt
    # Single-FMA normalize: yn = y * scale + shift.
    scale = inv_std.reshape(1, 1, 1, -1)
    shift = (-mean * inv_std).reshape(1, 1, 1, -1)
    yn = y * scale + shift
    g = 0.5 * yn * (1.0 + jax.lax.erf(yn * INV_SQRT2))     # exact GELU (PyTorch default)
    o_ref[0] = g.astype(o_ref.dtype)


# --------------------------------------------------------------------------------------
# Wrapper for one Conv3d(k=3, p=1) + InstanceNorm3d + GELU block.
# --------------------------------------------------------------------------------------
def conv_in_gelu(x_ndhwc, w, *, td=None, out_dtype=None):
    """x_ndhwc: (N, D, H, W, Cx) with Cx >= w.shape[3]; extra channels must be zero.
    Returns (N, D, H, W, Cop) with Cop = round_up(Cout, 128); channels >= Cout are zero."""
    N, D, H, W, Cx = x_ndhwc.shape
    Cin, Cout = w.shape[3], w.shape[4]
    Cp = _round_up(Cx, LANE)
    Cop = _round_up(Cout, LANE)
    out_dtype = out_dtype or x_ndhwc.dtype
    itemsize = jnp.dtype(MATMUL_DTYPE).itemsize

    vmem_cap = _vmem_capacity_bytes()
    if td is None:
        td = _pick_td(D, H, W, Cp, Cop, itemsize, budget_bytes=int(0.45 * vmem_cap))
    assert D % td == 0, (D, td)
    n_dt = D // td
    vmem_limit = min(int(0.85 * vmem_cap), 128 * 1024 * 1024)

    # Lane-dense channel padding + conv halo padding in a single copy.
    xp = jnp.pad(x_ndhwc, ((0, 0), (1, 1), (1, 1), (1, 1), (0, Cp - Cx)))
    xp = xp.astype(MATMUL_DTYPE)

    # Pad channels and fold the three kw taps into the contraction: (3, 3, 3*Cp, Cop).
    wp = jnp.pad(w, ((0, 0), (0, 0), (0, 0), (0, Cp - Cin), (0, Cop - Cout)))
    wf = wp.reshape(3, 3, 3 * Cp, Cop).astype(MATMUL_DTYPE)

    # --- pass 1: conv + partial stats (D-tile reduction axis last, "arbitrary") ------
    cost_a = pl.CostEstimate(
        flops=int(2 * 27 * Cp * Cop * N * D * H * W),
        transcendentals=0,
        bytes_accessed=int(xp.size * itemsize + wf.size * itemsize
                           + N * D * H * W * Cop * 4 + N * 2 * Cop * 4),
    )
    y_raw, stats = pl.pallas_call(
        _conv3d_stats_kernel,
        out_shape=(
            jax.ShapeDtypeStruct((N, D, H, W, Cop), jnp.float32),
            jax.ShapeDtypeStruct((N, 2, Cop), jnp.float32),
        ),
        grid_spec=pltpu.PrefetchScalarGridSpec(
            num_scalar_prefetch=0,
            grid=(N, n_dt),
            in_specs=[
                pl.BlockSpec(memory_space=pl.ANY),                 # padded input: manual halo DMA
                pl.BlockSpec((3, 3, 3 * Cp, Cop), lambda n, d: (0, 0, 0, 0)),
            ],
            out_specs=(
                pl.BlockSpec((1, td, H, W, Cop), lambda n, d: (n, d, 0, 0, 0)),
                pl.BlockSpec((1, 2, Cop), lambda n, d: (n, 0, 0)),  # accumulated across d
            ),
            scratch_shapes=[
                pltpu.VMEM((2, td + 2, H + 2, W + 2, Cp), MATMUL_DTYPE),
                pltpu.SemaphoreType.DMA((2,)),
            ],
        ),
        compiler_params=pltpu.CompilerParams(
            dimension_semantics=("parallel", "arbitrary"),
            vmem_limit_bytes=vmem_limit,
        ),
        cost_estimate=cost_a,
    )(xp, wf)

    # --- pass 2: normalize + GELU (cheap, fully parallel, lane-dense output) ----------
    inv_count = 1.0 / float(D * H * W)
    cost_b = pl.CostEstimate(
        flops=int(10 * N * D * H * W * Cop),
        transcendentals=int(N * D * H * W * Cop),
        bytes_accessed=int(2 * N * D * H * W * Cop * 4 + N * 2 * Cop * 4),
    )
    out = pl.pallas_call(
        partial(_instnorm_gelu_kernel, inv_count=inv_count),
        out_shape=jax.ShapeDtypeStruct((N, D, H, W, Cop), out_dtype),
        grid_spec=pltpu.PrefetchScalarGridSpec(
            num_scalar_prefetch=0,
            grid=(N, n_dt),
            in_specs=[
                pl.BlockSpec((1, td, H, W, Cop), lambda n, d: (n, d, 0, 0, 0)),
                pl.BlockSpec((1, 2, Cop), lambda n, d: (n, 0, 0)),
            ],
            out_specs=pl.BlockSpec((1, td, H, W, Cop), lambda n, d: (n, d, 0, 0, 0)),
        ),
        compiler_params=pltpu.CompilerParams(
            dimension_semantics=("parallel", "parallel"),
            vmem_limit_bytes=vmem_limit,
        ),
        cost_estimate=cost_b,
    )(y_raw, stats)
    return out


@partial(jax.jit, static_argnames=("td",))
def double_conv(x_ncdhw, params, td=None):
    """DoubleConv forward. Input/output are NCDHW to match the PyTorch module."""
    cout = params["w2"].shape[-1]
    x = jnp.transpose(x_ncdhw, (0, 2, 3, 4, 1))            # NCDHW -> NDHWC (channels -> lanes)
    h = conv_in_gelu(x, params["w1"], td=td)                # lane-padded channels out
    h = conv_in_gelu(h, params["w2"], td=td)                # consumes padded channels directly
    h = h[..., :cout]                                       # drop lane padding once, at the end
    return jnp.transpose(h, (0, 4, 1, 2, 3))                # NDHWC -> NCDHW


def _reference(x_ncdhw, params):
    """Pure-JAX (XLA conv) reference; keeps the conv bias to show it is a no-op."""
    x = jnp.transpose(x_ncdhw, (0, 2, 3, 4, 1)).astype(jnp.float32)

    def block(h, w, b):
        y = jax.lax.conv_general_dilated(
            h, w.astype(jnp.float32),
            window_strides=(1, 1, 1),
            padding=((1, 1), (1, 1), (1, 1)),
            dimension_numbers=("NDHWC", "DHWIO", "NDHWC"),
        ) + b.astype(jnp.float32)
        mean = jnp.mean(y, axis=(1, 2, 3), keepdims=True)
        var = jnp.mean((y - mean) ** 2, axis=(1, 2, 3), keepdims=True)
        yn = (y - mean) * jax.lax.rsqrt(var + EPS)
        return 0.5 * yn * (1.0 + jax.lax.erf(yn * INV_SQRT2))

    y = block(x, params["w1"], params["b1"])
    y = block(y, params["w2"], params["b2"])
    return jnp.transpose(y, (0, 4, 1, 2, 3))


def init_params(key, in_channels, out_channels):
    k1, k2, k3, k4 = jax.random.split(key, 4)
    # DHWIO weight layout.  Biases are kept in the param dict (and in the reference) but
    # are not fed to the kernels: non-affine InstanceNorm makes them an exact no-op.
    w1 = 0.1 * jax.random.normal(k1, (3, 3, 3, in_channels, out_channels), jnp.float32)
    b1 = 0.1 * jax.random.normal(k2, (out_channels,), jnp.float32)
    w2 = 0.1 * jax.random.normal(k3, (3, 3, 3, out_channels, out_channels), jnp.float32)
    b2 = 0.1 * jax.random.normal(k4, (out_channels,), jnp.float32)
    return {"w1": w1, "b1": b1, "w2": w2, "b2": b2}


if __name__ == "__main__":
    key = jax.random.PRNGKey(0)
    kx, kp = jax.random.split(key)

    N, C_in, C_out = 2, 4, 8
    D = H = W = 8
    x = jax.random.normal(kx, (N, C_in, D, H, W), jnp.float32)  # NCDHW like PyTorch
    params = init_params(kp, C_in, C_out)

    # td=4 forces two D-tiles so the tiled-statistics / halo-DMA path is exercised.
    out = jax.block_until_ready(double_conv(x, params, td=4))

    ref = _reference(x, params)
    assert out.shape == (N, C_out, D, H, W), out.shape
    max_err = float(jnp.max(jnp.abs(out - ref)))
    assert jnp.allclose(out, ref, atol=2e-4, rtol=2e-4), max_err

    print("KERNEL_OK")
</pallas_src>

<mosaic_0001>
module attributes {stable_mosaic.version = 11 : i64} {
  func.func @_conv3d_stats_kernel(%arg0: i32, %arg1: i32, %arg2: memref<2x10x10x10x128xf32, #tpu.memory_space<any>>, %arg3: memref<3x3x384x128xf32, #tpu.memory_space<vmem>>, %arg4: memref<1x4x8x8x128xf32, #tpu.memory_space<vmem>>, %arg5: memref<1x2x128xf32, #tpu.memory_space<vmem>>, %arg6: memref<2x6x10x10x128xf32, #tpu.memory_space<vmem>>, %arg7: memref<2x!tpu.dma_semaphore, #tpu.memory_space<semaphore_mem>>) attributes {dimension_semantics = [#tpu.dimension_semantics<parallel>, #tpu.dimension_semantics<arbitrary>], iteration_bounds = array<i64: 2, 2>, scalar_prefetch = 0 : i64, scratch_operands = 2 : i64, tpu.core_type = #tpu.core_type<tc>, window_params = [{}, {pipeline_mode = #tpu.pipeline_mode<synchronous>, transform_indices = @transform_1, window_bounds = array<i64: 3, 3, 384, 128>}, {transform_indices = @transform_2, window_bounds = array<i64: 1, 4, 8, 8, 128>}, {transform_indices = @transform_3, window_bounds = array<i64: 1, 2, 128>}]} {
    %c2_i32 = arith.constant 2 : i32
    %c0_i32 = arith.constant 0 : i32
    %0 = arith.cmpi eq, %c2_i32, %c0_i32 : i32
    %c1_i32 = arith.constant 1 : i32
    %1 = arith.select %0, %c1_i32, %c2_i32 : i32
    %2 = arith.remsi %arg1, %1 : i32
    %c0_i32_0 = arith.constant 0 : i32
    %3 = arith.cmpi ne, %2, %c0_i32_0 : i32
    %c0_i32_1 = arith.constant 0 : i32
    %4 = arith.cmpi slt, %2, %c0_i32_1 : i32
    %c0_i32_2 = arith.constant 0 : i32
    %5 = arith.cmpi slt, %1, %c0_i32_2 : i32
    %6 = arith.xori %4, %5 : i1
    %7 = arith.andi %6, %3 : i1
    %8 = arith.addi %2, %1 : i32
    %9 = arith.select %7, %8, %2 : i32
    %c0_i32_3 = arith.constant 0 : i32
    %10 = arith.cmpi eq, %arg1, %c0_i32_3 : i32
    %11 = arith.extui %10 : i1 to i32
    %c0_i32_4 = arith.constant 0 : i32
    %12 = arith.cmpi ne, %11, %c0_i32_4 : i32
    scf.if %12 {
      %c4_i32_104 = arith.constant 4 : i32
      %150 = arith.muli %arg1, %c4_i32_104 : i32
      %151 = tpu.assume_multiple %150, 4 : i32
      %c0_i32_105 = arith.constant 0 : i32
      %c0_i32_106 = arith.constant 0 : i32
      %c0_i32_107 = arith.constant 0 : i32
      %152 = tpu.memref_slice %arg2[%arg0, %151, %c0_i32_105, %c0_i32_106, %c0_i32_107] : memref<2x10x10x10x128xf32, #tpu.memory_space<any>> -> memref<1x6x10x10x128xf32, #tpu.memory_space<any>>
      %153 = tpu.memref_squeeze %152 : memref<1x6x10x10x128xf32, #tpu.memory_space<any>> -> memref<6x10x10x128xf32, #tpu.memory_space<any>>
      %c0_i32_108 = arith.constant 0 : i32
      %c0_i32_109 = arith.constant 0 : i32
      %c0_i32_110 = arith.constant 0 : i32
      %c0_i32_111 = arith.constant 0 : i32
      %154 = tpu.memref_slice %arg6[%9, %c0_i32_108, %c0_i32_109, %c0_i32_110, %c0_i32_111] : memref<2x6x10x10x128xf32, #tpu.memory_space<vmem>> -> memref<1x6x10x10x128xf32, #tpu.memory_space<vmem>>
      %155 = tpu.memref_squeeze %154 : memref<1x6x10x10x128xf32, #tpu.memory_space<vmem>> -> memref<6x10x10x128xf32, #tpu.memory_space<vmem>>
      %156 = tpu.memref_slice %arg7[%9] : memref<2x!tpu.dma_semaphore, #tpu.memory_space<semaphore_mem>> -> memref<1x!tpu.dma_semaphore, #tpu.memory_space<semaphore_mem>>
      %157 = tpu.memref_squeeze %156 : memref<1x!tpu.dma_semaphore, #tpu.memory_space<semaphore_mem>> -> memref<!tpu.dma_semaphore, #tpu.memory_space<semaphore_mem>>
      tpu.enqueue_dma source(%153 : memref<6x10x10x128xf32, #tpu.memory_space<any>>) target(%155 : memref<6x10x10x128xf32, #tpu.memory_space<vmem>>) target_semaphore(%157 : memref<!tpu.dma_semaphore, #tpu.memory_space<semaphore_mem>>)
    } else {
    }
    %c1_i32_5 = arith.constant 1 : i32
    %13 = arith.addi %arg1, %c1_i32_5 : i32
    %c2_i32_6 = arith.constant 2 : i32
    %14 = arith.cmpi slt, %13, %c2_i32_6 : i32
    %15 = arith.extui %14 : i1 to i32
    %c0_i32_7 = arith.constant 0 : i32
    %16 = arith.cmpi ne, %15, %c0_i32_7 : i32
    scf.if %16 {
      %c1_i32_104 = arith.constant 1 : i32
      %150 = arith.addi %arg1, %c1_i32_104 : i32
      %c1_i32_105 = arith.constant 1 : i32
      %151 = arith.subi %c1_i32_105, %9 : i32
      %c4_i32_106 = arith.constant 4 : i32
      %152 = arith.muli %150, %c4_i32_106 : i32
      %153 = tpu.assume_multiple %152, 4 : i32
      %c0_i32_107 = arith.constant 0 : i32
      %c0_i32_108 = arith.constant 0 : i32
      %c0_i32_109 = arith.constant 0 : i32
      %154 = tpu.memref_slice %arg2[%arg0, %153, %c0_i32_107, %c0_i32_108, %c0_i32_109] : memref<2x10x10x10x128xf32, #tpu.memory_space<any>> -> memref<1x6x10x10x128xf32, #tpu.memory_space<any>>
      %155 = tpu.memref_squeeze %154 : memref<1x6x10x10x128xf32, #tpu.memory_space<any>> -> memref<6x10x10x128xf32, #tpu.memory_space<any>>
      %c0_i32_110 = arith.constant 0 : i32
      %c0_i32_111 = arith.constant 0 : i32
      %c0_i32_112 = arith.constant 0 : i32
      %c0_i32_113 = arith.constant 0 : i32
      %156 = tpu.memref_slice %arg6[%151, %c0_i32_110, %c0_i32_111, %c0_i32_112, %c0_i32_113] : memref<2x6x10x10x128xf32, #tpu.memory_space<vmem>> -> memref<1x6x10x10x128xf32, #tpu.memory_space<vmem>>
      %157 = tpu.memref_squeeze %156 : memref<1x6x10x10x128xf32, #tpu.memory_space<vmem>> -> memref<6x10x10x128xf32, #tpu.memory_space<vmem>>
      %158 = tpu.memref_slice %arg7[%151] : memref<2x!tpu.dma_semaphore, #tpu.memory_space<semaphore_mem>> -> memref<1x!tpu.dma_semaphore, #tpu.memory_space<semaphore_mem>>
      %159 = tpu.memref_squeeze %158 : memref<1x!tpu.dma_semaphore, #tpu.memory_space<semaphore_mem>> -> memref<!tpu.dma_semaphore, #tpu.memory_space<semaphore_mem>>
      tpu.enqueue_dma source(%155 : memref<6x10x10x128xf32, #tpu.memory_space<any>>) target(%157 : memref<6x10x10x128xf32, #tpu.memory_space<vmem>>) target_semaphore(%159 : memref<!tpu.dma_semaphore, #tpu.memory_space<semaphore_mem>>)
    } else {
    }
    %c4_i32 = arith.constant 4 : i32
    %17 = arith.muli %arg1, %c4_i32 : i32
    %18 = tpu.assume_multiple %17, 4 : i32
    %c0_i32_8 = arith.constant 0 : i32
    %c0_i32_9 = arith.constant 0 : i32
    %c0_i32_10 = arith.constant 0 : i32
    %19 = tpu.memref_slice %arg2[%arg0, %18, %c0_i32_8, %c0_i32_9, %c0_i32_10] : memref<2x10x10x10x128xf32, #tpu.memory_space<any>> -> memref<1x6x10x10x128xf32, #tpu.memory_space<any>>
    %20 = tpu.memref_squeeze %19 : memref<1x6x10x10x128xf32, #tpu.memory_space<any>> -> memref<6x10x10x128xf32, #tpu.memory_space<any>>
    %c0_i32_11 = arith.constant 0 : i32
    %c0_i32_12 = arith.constant 0 : i32
    %c0_i32_13 = arith.constant 0 : i32
    %c0_i32_14 = arith.constant 0 : i32
    %21 = tpu.memref_slice %arg6[%9, %c0_i32_11, %c0_i32_12, %c0_i32_13, %c0_i32_14] : memref<2x6x10x10x128xf32, #tpu.memory_space<vmem>> -> memref<1x6x10x10x128xf32, #tpu.memory_space<vmem>>
    %22 = tpu.memref_squeeze %21 : memref<1x6x10x10x128xf32, #tpu.memory_space<vmem>> -> memref<6x10x10x128xf32, #tpu.memory_space<vmem>>
    %23 = tpu.memref_slice %arg7[%9] : memref<2x!tpu.dma_semaphore, #tpu.memory_space<semaphore_mem>> -> memref<1x!tpu.dma_semaphore, #tpu.memory_space<semaphore_mem>>
    %24 = tpu.memref_squeeze %23 : memref<1x!tpu.dma_semaphore, #tpu.memory_space<semaphore_mem>> -> memref<!tpu.dma_semaphore, #tpu.memory_space<semaphore_mem>>
    tpu.wait_dma2 semaphore(%24 : memref<!tpu.dma_semaphore, #tpu.memory_space<semaphore_mem>>) src(%20 : memref<6x10x10x128xf32, #tpu.memory_space<any>>) dst(%22 : memref<6x10x10x128xf32, #tpu.memory_space<vmem>>)
    %cst = arith.constant 0.000000e+00 : f32
    %25 = vector.broadcast %cst : f32 to vector<256x128xf32>
    %26 = arith.index_cast %9 : i32 to index
    %c0 = arith.constant 0 : index
    %c0_15 = arith.constant 0 : index
    %c0_16 = arith.constant 0 : index
    %c0_17 = arith.constant 0 : index
    %27 = vector.load %arg6[%26, %c0, %c0_15, %c0_16, %c0_17] : memref<2x6x10x10x128xf32, #tpu.memory_space<vmem>>, vector<1x4x8x10x128xf32>
    %28 = vector.shape_cast %27 : vector<1x4x8x10x128xf32> to vector<4x8x10x128xf32>
    %29 = vector.extract_strided_slice %28 {offsets = [0, 0, 0, 0], sizes = [4, 8, 8, 128], strides = [1, 1, 1, 1]} : vector<4x8x10x128xf32> to vector<4x8x8x128xf32>
    %30 = vector.extract_strided_slice %28 {offsets = [0, 0, 1, 0], sizes = [4, 8, 8, 128], strides = [1, 1, 1, 1]} : vector<4x8x10x128xf32> to vector<4x8x8x128xf32>
    %31 = vector.extract_strided_slice %28 {offsets = [0, 0, 2, 0], sizes = [4, 8, 8, 128], strides = [1, 1, 1, 1]} : vector<4x8x10x128xf32> to vector<4x8x8x128xf32>
    %32 = tpu.concatenate %29, %30, %31 in 3 : vector<4x8x8x128xf32>, vector<4x8x8x128xf32>, vector<4x8x8x128xf32> -> vector<4x8x8x384xf32>
    %33 = vector.shape_cast %32 : vector<4x8x8x384xf32> to vector<256x384xf32>
    %c0_18 = arith.constant 0 : index
    %c0_19 = arith.constant 0 : index
    %c0_20 = arith.constant 0 : index
    %c0_21 = arith.constant 0 : index
    %34 = vector.load %arg3[%c0_18, %c0_19, %c0_20, %c0_21] : memref<3x3x384x128xf32, #tpu.memory_space<vmem>>, vector<1x1x384x128xf32>
    %35 = vector.shape_cast %34 : vector<1x1x384x128xf32> to vector<384x128xf32>
    %cst_22 = arith.constant dense<0.000000e+00> : vector<256x128xf32>
    %36 = tpu.matmul %33, %35, %cst_22 {dimension_numbers = #tpu.dot_dimension_numbers<[1], [0], [0], [1], [0, 0, 1, 1], [], []>} : vector<256x384xf32>, vector<384x128xf32>, vector<256x128xf32> -> vector<256x128xf32>
    %37 = arith.addf %25, %36 : vector<256x128xf32>
    %38 = arith.index_cast %9 : i32 to index
    %c0_23 = arith.constant 0 : index
    %c1 = arith.constant 1 : index
    %c0_24 = arith.constant 0 : index
    %c0_25 = arith.constant 0 : index
    %39 = vector.load %arg6[%38, %c0_23, %c1, %c0_24, %c0_25] : memref<2x6x10x10x128xf32, #tpu.memory_space<vmem>>, vector<1x4x8x10x128xf32>
    %40 = vector.shape_cast %39 : vector<1x4x8x10x128xf32> to vector<4x8x10x128xf32>
    %41 = vector.extract_strided_slice %40 {offsets = [0, 0, 0, 0], sizes = [4, 8, 8, 128], strides = [1, 1, 1, 1]} : vector<4x8x10x128xf32> to vector<4x8x8x128xf32>
    %42 = vector.extract_strided_slice %40 {offsets = [0, 0, 1, 0], sizes = [4, 8, 8, 128], strides = [1, 1, 1, 1]} : vector<4x8x10x128xf32> to vector<4x8x8x128xf32>
    %43 = vector.extract_strided_slice %40 {offsets = [0, 0, 2, 0], sizes = [4, 8, 8, 128], strides = [1, 1, 1, 1]} : vector<4x8x10x128xf32> to vector<4x8x8x128xf32>
    %44 = tpu.concatenate %41, %42, %43 in 3 : vector<4x8x8x128xf32>, vector<4x8x8x128xf32>, vector<4x8x8x128xf32> -> vector<4x8x8x384xf32>
    %45 = vector.shape_cast %44 : vector<4x8x8x384xf32> to vector<256x384xf32>
    %c0_26 = arith.constant 0 : index
    %c1_27 = arith.constant 1 : index
    %c0_28 = arith.constant 0 : index
    %c0_29 = arith.constant 0 : index
    %46 = vector.load %arg3[%c0_26, %c1_27, %c0_28, %c0_29] : memref<3x3x384x128xf32, #tpu.memory_space<vmem>>, vector<1x1x384x128xf32>
    %47 = vector.shape_cast %46 : vector<1x1x384x128xf32> to vector<384x128xf32>
    %cst_30 = arith.constant dense<0.000000e+00> : vector<256x128xf32>
    %48 = tpu.matmul %45, %47, %cst_30 {dimension_numbers = #tpu.dot_dimension_numbers<[1], [0], [0], [1], [0, 0, 1, 1], [], []>} : vector<256x384xf32>, vector<384x128xf32>, vector<256x128xf32> -> vector<256x128xf32>
    %49 = arith.addf %37, %48 : vector<256x128xf32>
    %50 = arith.index_cast %9 : i32 to index
    %c0_31 = arith.constant 0 : index
    %c2 = arith.constant 2 : index
    %c0_32 = arith.constant 0 : index
    %c0_33 = arith.constant 0 : index
    %51 = vector.load %arg6[%50, %c0_31, %c2, %c0_32, %c0_33] : memref<2x6x10x10x128xf32, #tpu.memory_space<vmem>>, vector<1x4x8x10x128xf32>
    %52 = vector.shape_cast %51 : vector<1x4x8x10x128xf32> to vector<4x8x10x128xf32>
    %53 = vector.extract_strided_slice %52 {offsets = [0, 0, 0, 0], sizes = [4, 8, 8, 128], strides = [1, 1, 1, 1]} : vector<4x8x10x128xf32> to vector<4x8x8x128xf32>
    %54 = vector.extract_strided_slice %52 {offsets = [0, 0, 1, 0], sizes = [4, 8, 8, 128], strides = [1, 1, 1, 1]} : vector<4x8x10x128xf32> to vector<4x8x8x128xf32>
    %55 = vector.extract_strided_slice %52 {offsets = [0, 0, 2, 0], sizes = [4, 8, 8, 128], strides = [1, 1, 1, 1]} : vector<4x8x10x128xf32> to vector<4x8x8x128xf32>
    %56 = tpu.concatenate %53, %54, %55 in 3 : vector<4x8x8x128xf32>, vector<4x8x8x128xf32>, vector<4x8x8x128xf32> -> vector<4x8x8x384xf32>
    %57 = vector.shape_cast %56 : vector<4x8x8x384xf32> to vector<256x384xf32>
    %c0_34 = arith.constant 0 : index
    %c2_35 = arith.constant 2 : index
    %c0_36 = arith.constant 0 : index
    %c0_37 = arith.constant 0 : index
    %58 = vector.load %arg3[%c0_34, %c2_35, %c0_36, %c0_37] : memref<3x3x384x128xf32, #tpu.memory_space<vmem>>, vector<1x1x384x128xf32>
    %59 = vector.shape_cast %58 : vector<1x1x384x128xf32> to vector<384x128xf32>
    %cst_38 = arith.constant dense<0.000000e+00> : vector<256x128xf32>
    %60 = tpu.matmul %57, %59, %cst_38 {dimension_numbers = #tpu.dot_dimension_numbers<[1], [0], [0], [1], [0, 0, 1, 1], [], []>} : vector<256x384xf32>, vector<384x128xf32>, vector<256x128xf32> -> vector<256x128xf32>
    %61 = arith.addf %49, %60 : vector<256x128xf32>
    %62 = arith.index_cast %9 : i32 to index
    %c1_39 = arith.constant 1 : index
    %c0_40 = arith.constant 0 : index
    %c0_41 = arith.constant 0 : index
    %c0_42 = arith.constant 0 : index
    %63 = vector.load %arg6[%62, %c1_39, %c0_40, %c0_41, %c0_42] : memref<2x6x10x10x128xf32, #tpu.memory_space<vmem>>, vector<1x4x8x10x128xf32>
    %64 = vector.shape_cast %63 : vector<1x4x8x10x128xf32> to vector<4x8x10x128xf32>
    %65 = vector.extract_strided_slice %64 {offsets = [0, 0, 0, 0], sizes = [4, 8, 8, 128], strides = [1, 1, 1, 1]} : vector<4x8x10x128xf32> to vector<4x8x8x128xf32>
    %66 = vector.extract_strided_slice %64 {offsets = [0, 0, 1, 0], sizes = [4, 8, 8, 128], strides = [1, 1, 1, 1]} : vector<4x8x10x128xf32> to vector<4x8x8x128xf32>
    %67 = vector.extract_strided_slice %64 {offsets = [0, 0, 2, 0], sizes = [4, 8, 8, 128], strides = [1, 1, 1, 1]} : vector<4x8x10x128xf32> to vector<4x8x8x128xf32>
    %68 = tpu.concatenate %65, %66, %67 in 3 : vector<4x8x8x128xf32>, vector<4x8x8x128xf32>, vector<4x8x8x128xf32> -> vector<4x8x8x384xf32>
    %69 = vector.shape_cast %68 : vector<4x8x8x384xf32> to vector<256x384xf32>
    %c1_43 = arith.constant 1 : index
    %c0_44 = arith.constant 0 : index
    %c0_45 = arith.constant 0 : index
    %c0_46 = arith.constant 0 : index
    %70 = vector.load %arg3[%c1_43, %c0_44, %c0_45, %c0_46] : memref<3x3x384x128xf32, #tpu.memory_space<vmem>>, vector<1x1x384x128xf32>
    %71 = vector.shape_cast %70 : vector<1x1x384x128xf32> to vector<384x128xf32>
    %cst_47 = arith.constant dense<0.000000e+00> : vector<256x128xf32>
    %72 = tpu.matmul %69, %71, %cst_47 {dimension_numbers = #tpu.dot_dimension_numbers<[1], [0], [0], [1], [0, 0, 1, 1], [], []>} : vector<256x384xf32>, vector<384x128xf32>, vector<256x128xf32> -> vector<256x128xf32>
    %73 = arith.addf %61, %72 : vector<256x128xf32>
    %74 = arith.index_cast %9 : i32 to index
    %c1_48 = arith.constant 1 : index
    %c1_49 = arith.constant 1 : index
    %c0_50 = arith.constant 0 : index
    %c0_51 = arith.constant 0 : index
    %75 = vector.load %arg6[%74, %c1_48, %c1_49, %c0_50, %c0_51] : memref<2x6x10x10x128xf32, #tpu.memory_space<vmem>>, vector<1x4x8x10x128xf32>
    %76 = vector.shape_cast %75 : vector<1x4x8x10x128xf32> to vector<4x8x10x128xf32>
    %77 = vector.extract_strided_slice %76 {offsets = [0, 0, 0, 0], sizes = [4, 8, 8, 128], strides = [1, 1, 1, 1]} : vector<4x8x10x128xf32> to vector<4x8x8x128xf32>
    %78 = vector.extract_strided_slice %76 {offsets = [0, 0, 1, 0], sizes = [4, 8, 8, 128], strides = [1, 1, 1, 1]} : vector<4x8x10x128xf32> to vector<4x8x8x128xf32>
    %79 = vector.extract_strided_slice %76 {offsets = [0, 0, 2, 0], sizes = [4, 8, 8, 128], strides = [1, 1, 1, 1]} : vector<4x8x10x128xf32> to vector<4x8x8x128xf32>
    %80 = tpu.concatenate %77, %78, %79 in 3 : vector<4x8x8x128xf32>, vector<4x8x8x128xf32>, vector<4x8x8x128xf32> -> vector<4x8x8x384xf32>
    %81 = vector.shape_cast %80 : vector<4x8x8x384xf32> to vector<256x384xf32>
    %c1_52 = arith.constant 1 : index
    %c1_53 = arith.constant 1 : index
    %c0_54 = arith.constant 0 : index
    %c0_55 = arith.constant 0 : index
    %82 = vector.load %arg3[%c1_52, %c1_53, %c0_54, %c0_55] : memref<3x3x384x128xf32, #tpu.memory_space<vmem>>, vector<1x1x384x128xf32>
    %83 = vector.shape_cast %82 : vector<1x1x384x128xf32> to vector<384x128xf32>
    %cst_56 = arith.constant dense<0.000000e+00> : vector<256x128xf32>
    %84 = tpu.matmul %81, %83, %cst_56 {dimension_numbers = #tpu.dot_dimension_numbers<[1], [0], [0], [1], [0, 0, 1, 1], [], []>} : vector<256x384xf32>, vector<384x128xf32>, vector<256x128xf32> -> vector<256x128xf32>
    %85 = arith.addf %73, %84 : vector<256x128xf32>
    %86 = arith.index_cast %9 : i32 to index
    %c1_57 = arith.constant 1 : index
    %c2_58 = arith.constant 2 : index
    %c0_59 = arith.constant 0 : index
    %c0_60 = arith.constant 0 : index
    %87 = vector.load %arg6[%86, %c1_57, %c2_58, %c0_59, %c0_60] : memref<2x6x10x10x128xf32, #tpu.memory_space<vmem>>, vector<1x4x8x10x128xf32>
    %88 = vector.shape_cast %87 : vector<1x4x8x10x128xf32> to vector<4x8x10x128xf32>
    %89 = vector.extract_strided_slice %88 {offsets = [0, 0, 0, 0], sizes = [4, 8, 8, 128], strides = [1, 1, 1, 1]} : vector<4x8x10x128xf32> to vector<4x8x8x128xf32>
    %90 = vector.extract_strided_slice %88 {offsets = [0, 0, 1, 0], sizes = [4, 8, 8, 128], strides = [1, 1, 1, 1]} : vector<4x8x10x128xf32> to vector<4x8x8x128xf32>
    %91 = vector.extract_strided_slice %88 {offsets = [0, 0, 2, 0], sizes = [4, 8, 8, 128], strides = [1, 1, 1, 1]} : vector<4x8x10x128xf32> to vector<4x8x8x128xf32>
    %92 = tpu.concatenate %89, %90, %91 in 3 : vector<4x8x8x128xf32>, vector<4x8x8x128xf32>, vector<4x8x8x128xf32> -> vector<4x8x8x384xf32>
    %93 = vector.shape_cast %92 : vector<4x8x8x384xf32> to vector<256x384xf32>
    %c1_61 = arith.constant 1 : index
    %c2_62 = arith.constant 2 : index
    %c0_63 = arith.constant 0 : index
    %c0_64 = arith.constant 0 : index
    %94 = vector.load %arg3[%c1_61, %c2_62, %c0_63, %c0_64] : memref<3x3x384x128xf32, #tpu.memory_space<vmem>>, vector<1x1x384x128xf32>
    %95 = vector.shape_cast %94 : vector<1x1x384x128xf32> to vector<384x128xf32>
    %cst_65 = arith.constant dense<0.000000e+00> : vector<256x128xf32>
    %96 = tpu.matmul %93, %95, %cst_65 {dimension_numbers = #tpu.dot_dimension_numbers<[1], [0], [0], [1], [0, 0, 1, 1], [], []>} : vector<256x384xf32>, vector<384x128xf32>, vector<256x128xf32> -> vector<256x128xf32>
    %97 = arith.addf %85, %96 : vector<256x128xf32>
    %98 = arith.index_cast %9 : i32 to index
    %c2_66 = arith.constant 2 : index
    %c0_67 = arith.constant 0 : index
    %c0_68 = arith.constant 0 : index
    %c0_69 = arith.constant 0 : index
    %99 = vector.load %arg6[%98, %c2_66, %c0_67, %c0_68, %c0_69] : memref<2x6x10x10x128xf32, #tpu.memory_space<vmem>>, vector<1x4x8x10x128xf32>
    %100 = vector.shape_cast %99 : vector<1x4x8x10x128xf32> to vector<4x8x10x128xf32>
    %101 = vector.extract_strided_slice %100 {offsets = [0, 0, 0, 0], sizes = [4, 8, 8, 128], strides = [1, 1, 1, 1]} : vector<4x8x10x128xf32> to vector<4x8x8x128xf32>
    %102 = vector.extract_strided_slice %100 {offsets = [0, 0, 1, 0], sizes = [4, 8, 8, 128], strides = [1, 1, 1, 1]} : vector<4x8x10x128xf32> to vector<4x8x8x128xf32>
    %103 = vector.extract_strided_slice %100 {offsets = [0, 0, 2, 0], sizes = [4, 8, 8, 128], strides = [1, 1, 1, 1]} : vector<4x8x10x128xf32> to vector<4x8x8x128xf32>
    %104 = tpu.concatenate %101, %102, %103 in 3 : vector<4x8x8x128xf32>, vector<4x8x8x128xf32>, vector<4x8x8x128xf32> -> vector<4x8x8x384xf32>
    %105 = vector.shape_cast %104 : vector<4x8x8x384xf32> to vector<256x384xf32>
    %c2_70 = arith.constant 2 : index
    %c0_71 = arith.constant 0 : index
    %c0_72 = arith.constant 0 : index
    %c0_73 = arith.constant 0 : index
    %106 = vector.load %arg3[%c2_70, %c0_71, %c0_72, %c0_73] : memref<3x3x384x128xf32, #tpu.memory_space<vmem>>, vector<1x1x384x128xf32>
    %107 = vector.shape_cast %106 : vector<1x1x384x128xf32> to vector<384x128xf32>
    %cst_74 = arith.constant dense<0.000000e+00> : vector<256x128xf32>
    %108 = tpu.matmul %105, %107, %cst_74 {dimension_numbers = #tpu.dot_dimension_numbers<[1], [0], [0], [1], [0, 0, 1, 1], [], []>} : vector<256x384xf32>, vector<384x128xf32>, vector<256x128xf32> -> vector<256x128xf32>
    %109 = arith.addf %97, %108 : vector<256x128xf32>
    %110 = arith.index_cast %9 : i32 to index
    %c2_75 = arith.constant 2 : index
    %c1_76 = arith.constant 1 : index
    %c0_77 = arith.constant 0 : index
    %c0_78 = arith.constant 0 : index
    %111 = vector.load %arg6[%110, %c2_75, %c1_76, %c0_77, %c0_78] : memref<2x6x10x10x128xf32, #tpu.memory_space<vmem>>, vector<1x4x8x10x128xf32>
    %112 = vector.shape_cast %111 : vector<1x4x8x10x128xf32> to vector<4x8x10x128xf32>
    %113 = vector.extract_strided_slice %112 {offsets = [0, 0, 0, 0], sizes = [4, 8, 8, 128], strides = [1, 1, 1, 1]} : vector<4x8x10x128xf32> to vector<4x8x8x128xf32>
    %114 = vector.extract_strided_slice %112 {offsets = [0, 0, 1, 0], sizes = [4, 8, 8, 128], strides = [1, 1, 1, 1]} : vector<4x8x10x128xf32> to vector<4x8x8x128xf32>
    %115 = vector.extract_strided_slice %112 {offsets = [0, 0, 2, 0], sizes = [4, 8, 8, 128], strides = [1, 1, 1, 1]} : vector<4x8x10x128xf32> to vector<4x8x8x128xf32>
    %116 = tpu.concatenate %113, %114, %115 in 3 : vector<4x8x8x128xf32>, vector<4x8x8x128xf32>, vector<4x8x8x128xf32> -> vector<4x8x8x384xf32>
    %117 = vector.shape_cast %116 : vector<4x8x8x384xf32> to vector<256x384xf32>
    %c2_79 = arith.constant 2 : index
    %c1_80 = arith.constant 1 : index
    %c0_81 = arith.constant 0 : index
    %c0_82 = arith.constant 0 : index
    %118 = vector.load %arg3[%c2_79, %c1_80, %c0_81, %c0_82] : memref<3x3x384x128xf32, #tpu.memory_space<vmem>>, vector<1x1x384x128xf32>
    %119 = vector.shape_cast %118 : vector<1x1x384x128xf32> to vector<384x128xf32>
    %cst_83 = arith.constant dense<0.000000e+00> : vector<256x128xf32>
    %120 = tpu.matmul %117, %119, %cst_83 {dimension_numbers = #tpu.dot_dimension_numbers<[1], [0], [0], [1], [0, 0, 1, 1], [], []>} : vector<256x384xf32>, vector<384x128xf32>, vector<256x128xf32> -> vector<256x128xf32>
    %121 = arith.addf %109, %120 : vector<256x128xf32>
    %122 = arith.index_cast %9 : i32 to index
    %c2_84 = arith.constant 2 : index
    %c2_85 = arith.constant 2 : index
    %c0_86 = arith.constant 0 : index
    %c0_87 = arith.constant 0 : index
    %123 = vector.load %arg6[%122, %c2_84, %c2_85, %c0_86, %c0_87] : memref<2x6x10x10x128xf32, #tpu.memory_space<vmem>>, vector<1x4x8x10x128xf32>
    %124 = vector.shape_cast %123 : vector<1x4x8x10x128xf32> to vector<4x8x10x128xf32>
    %125 = vector.extract_strided_slice %124 {offsets = [0, 0, 0, 0], sizes = [4, 8, 8, 128], strides = [1, 1, 1, 1]} : vector<4x8x10x128xf32> to vector<4x8x8x128xf32>
    %126 = vector.extract_strided_slice %124 {offsets = [0, 0, 1, 0], sizes = [4, 8, 8, 128], strides = [1, 1, 1, 1]} : vector<4x8x10x128xf32> to vector<4x8x8x128xf32>
    %127 = vector.extract_strided_slice %124 {offsets = [0, 0, 2, 0], sizes = [4, 8, 8, 128], strides = [1, 1, 1, 1]} : vector<4x8x10x128xf32> to vector<4x8x8x128xf32>
    %128 = tpu.concatenate %125, %126, %127 in 3 : vector<4x8x8x128xf32>, vector<4x8x8x128xf32>, vector<4x8x8x128xf32> -> vector<4x8x8x384xf32>
    %129 = vector.shape_cast %128 : vector<4x8x8x384xf32> to vector<256x384xf32>
    %c2_88 = arith.constant 2 : index
    %c2_89 = arith.constant 2 : index
    %c0_90 = arith.constant 0 : index
    %c0_91 = arith.constant 0 : index
    %130 = vector.load %arg3[%c2_88, %c2_89, %c0_90, %c0_91] : memref<3x3x384x128xf32, #tpu.memory_space<vmem>>, vector<1x1x384x128xf32>
    %131 = vector.shape_cast %130 : vector<1x1x384x128xf32> to vector<384x128xf32>
    %cst_92 = arith.constant dense<0.000000e+00> : vector<256x128xf32>
    %132 = tpu.matmul %129, %131, %cst_92 {dimension_numbers = #tpu.dot_dimension_numbers<[1], [0], [0], [1], [0, 0, 1, 1], [], []>} : vector<256x384xf32>, vector<384x128xf32>, vector<256x128xf32> -> vector<256x128xf32>
    %133 = arith.addf %121, %132 : vector<256x128xf32>
    %134 = vector.shape_cast %133 : vector<256x128xf32> to vector<4x8x8x128xf32>
    %c0_93 = arith.constant 0 : index
    %c0_94 = arith.constant 0 : index
    %c0_95 = arith.constant 0 : index
    %c0_96 = arith.constant 0 : index
    %c0_97 = arith.constant 0 : index
    %135 = vector.load %arg4[%c0_93, %c0_94, %c0_95, %c0_96, %c0_97] : memref<1x4x8x8x128xf32, #tpu.memory_space<vmem>>, vector<1x4x8x8x128xf32>
    %136 = vector.shape_cast %135 : vector<1x4x8x8x128xf32> to vector<4x8x8x128xf32>
    %137 = vector.shape_cast %134 : vector<4x8x8x128xf32> to vector<1x4x8x8x128xf32>
    tpu.vector_store %arg4[%c0_93, %c0_94, %c0_95, %c0_96, %c0_97], %137 {strides = array<i32>} : memref<1x4x8x8x128xf32, #tpu.memory_space<vmem>>, vector<1x4x8x8x128xf32>,
    %cst_98 = arith.constant dense<0.000000e+00> : vector<128xf32>
    %138 = vector.multi_reduction <add>, %133, %cst_98 [0] : vector<256x128xf32> to vector<128xf32>
    %139 = vector.shape_cast %138 : vector<128xf32> to vector<1x128xf32>
    %140 = arith.mulf %133, %133 : vector<256x128xf32>
    %cst_99 = arith.constant dense<0.000000e+00> : vector<128xf32>
    %141 = vector.multi_reduction <add>, %140, %cst_99 [0] : vector<256x128xf32> to vector<128xf32>
    %142 = vector.shape_cast %141 : vector<128xf32> to vector<1x128xf32>
    %143 = tpu.concatenate %139, %142 in 0 : vector<1x128xf32>, vector<1x128xf32> -> vector<2x128xf32>
    %c0_i32_100 = arith.constant 0 : i32
    %144 = arith.cmpi eq, %arg1, %c0_i32_100 : i32
    %145 = arith.extui %144 : i1 to i32
    %c0_i32_101 = arith.constant 0 : i32
    %146 = arith.cmpi ne, %145, %c0_i32_101 : i32
    scf.if %146 {
      %c0_104 = arith.constant 0 : index
      %c0_105 = arith.constant 0 : index
      %c0_106 = arith.constant 0 : index
      %150 = vector.load %arg5[%c0_104, %c0_105, %c0_106] : memref<1x2x128xf32, #tpu.memory_space<vmem>>, vector<1x2x128xf32>
      %151 = vector.shape_cast %150 : vector<1x2x128xf32> to vector<2x128xf32>
      %152 = vector.shape_cast %143 : vector<2x128xf32> to vector<1x2x128xf32>
      tpu.vector_store %arg5[%c0_104, %c0_105, %c0_106], %152 {strides = array<i32>} : memref<1x2x128xf32, #tpu.memory_space<vmem>>, vector<1x2x128xf32>,
    } else {
    }
    %c0_i32_102 = arith.constant 0 : i32
    %147 = arith.cmpi sgt, %arg1, %c0_i32_102 : i32
    %148 = arith.extui %147 : i1 to i32
    %c0_i32_103 = arith.constant 0 : i32
    %149 = arith.cmpi ne, %148, %c0_i32_103 : i32
    scf.if %149 {
      %c0_104 = arith.constant 0 : index
      %c0_105 = arith.constant 0 : index
      %c0_106 = arith.constant 0 : index
      %150 = vector.load %arg5[%c0_104, %c0_105, %c0_106] : memref<1x2x128xf32, #tpu.memory_space<vmem>>, vector<1x2x128xf32>
      %151 = vector.shape_cast %150 : vector<1x2x128xf32> to vector<2x128xf32>
      %152 = arith.addf %151, %143 : vector<2x128xf32>
      %c0_107 = arith.constant 0 : index
      %c0_108 = arith.constant 0 : index
      %c0_109 = arith.constant 0 : index
      %153 = vector.load %arg5[%c0_107, %c0_108, %c0_109] : memref<1x2x128xf32, #tpu.memory_space<vmem>>, vector<1x2x128xf32>
      %154 = vector.shape_cast %153 : vector<1x2x128xf32> to vector<2x128xf32>
      %155 = vector.shape_cast %152 : vector<2x128xf32> to vector<1x2x128xf32>
      tpu.vector_store %arg5[%c0_107, %c0_108, %c0_109], %155 {strides = array<i32>} : memref<1x2x128xf32, #tpu.memory_space<vmem>>, vector<1x2x128xf32>,
    } else {
    }
    return
  }
  func.func @transform_1(%arg0: i32, %arg1: i32) -> (i32, i32, i32, i32) {
    %c0_i32 = arith.constant 0 : i32
    %c0_i32_0 = arith.constant 0 : i32
    %c0_i32_1 = arith.constant 0 : i32
    %c0_i32_2 = arith.constant 0 : i32
    %c0_i32_3 = arith.constant 0 : i32
    return %c0_i32, %c0_i32_0, %c0_i32_1, %c0_i32_2 : i32, i32, i32, i32
  }
  func.func @transform_2(%arg0: i32, %arg1: i32) -> (i32, i32, i32, i32, i32) {
    %c0_i32 = arith.constant 0 : i32
    %c0_i32_0 = arith.constant 0 : i32
    %c0_i32_1 = arith.constant 0 : i32
    %c0_i32_2 = arith.constant 0 : i32
    return %arg0, %arg1, %c0_i32, %c0_i32_0, %c0_i32_1 : i32, i32, i32, i32, i32
  }
  func.func @transform_3(%arg0: i32, %arg1: i32) -> (i32, i32, i32) {
    %c0_i32 = arith.constant 0 : i32
    %c0_i32_0 = arith.constant 0 : i32
    %c0_i32_1 = arith.constant 0 : i32
    return %arg0, %c0_i32, %c0_i32_0 : i32, i32, i32
  }
}

module attributes {stable_mosaic.version = 11 : i64} {
  func.func @_instnorm_gelu_kernel(%arg0: i32, %arg1: i32, %arg2: memref<1x4x8x8x128xf32, #tpu.memory_space<vmem>>, %arg3: memref<1x2x128xf32, #tpu.memory_space<vmem>>, %arg4: memref<1x4x8x8x128xf32, #tpu.memory_space<vmem>>) attributes {dimension_semantics = [#tpu.dimension_semantics<parallel>, #tpu.dimension_semantics<parallel>], iteration_bounds = array<i64: 2, 2>, scalar_prefetch = 0 : i64, scratch_operands = 0 : i64, tpu.core_type = #tpu.core_type<tc>, window_params = [{transform_indices = @transform_0, window_bounds = array<i64: 1, 4, 8, 8, 128>}, {transform_indices = @transform_1, window_bounds = array<i64: 1, 2, 128>}, {transform_indices = @transform_2, window_bounds = array<i64: 1, 4, 8, 8, 128>}]} {
    %c0 = arith.constant 0 : index
    %c0_0 = arith.constant 0 : index
    %c0_1 = arith.constant 0 : index
    %c0_2 = arith.constant 0 : index
    %c0_3 = arith.constant 0 : index
    %0 = vector.load %arg2[%c0, %c0_0, %c0_1, %c0_2, %c0_3] : memref<1x4x8x8x128xf32, #tpu.memory_space<vmem>>, vector<1x4x8x8x128xf32>
    %1 = vector.shape_cast %0 : vector<1x4x8x8x128xf32> to vector<4x8x8x128xf32>
    %c0_4 = arith.constant 0 : index
    %c0_5 = arith.constant 0 : index
    %c0_6 = arith.constant 0 : index
    %2 = vector.load %arg3[%c0_4, %c0_5, %c0_6] : memref<1x2x128xf32, #tpu.memory_space<vmem>>, vector<1x2x128xf32>
    %3 = vector.shape_cast %2 : vector<1x2x128xf32> to vector<2x128xf32>
    %4 = vector.extract_strided_slice %3 {offsets = [0, 0], sizes = [1, 128], strides = [1, 1]} : vector<2x128xf32> to vector<1x128xf32>
    %cst = arith.constant 0.001953125 : f32
    %5 = vector.broadcast %cst : f32 to vector<1x128xf32>
    %6 = arith.mulf %4, %5 : vector<1x128xf32>
    %7 = vector.extract_strided_slice %3 {offsets = [1, 0], sizes = [1, 128], strides = [1, 1]} : vector<2x128xf32> to vector<1x128xf32>
    %cst_7 = arith.constant 0.001953125 : f32
    %8 = vector.broadcast %cst_7 : f32 to vector<1x128xf32>
    %9 = arith.mulf %7, %8 : vector<1x128xf32>
    %10 = arith.mulf %6, %6 : vector<1x128xf32>
    %11 = arith.subf %9, %10 : vector<1x128xf32>
    %cst_8 = arith.constant 0.000000e+00 : f32
    %12 = vector.broadcast %cst_8 : f32 to vector<1x128xf32>
    %13 = arith.maximumf %11, %12 : vector<1x128xf32>
    %cst_9 = arith.constant 9.99999974E-6 : f32
    %14 = vector.broadcast %cst_9 : f32 to vector<1x128xf32>
    %15 = arith.addf %13, %14 : vector<1x128xf32>
    %16 = math.rsqrt %15 : vector<1x128xf32>
    %17 = vector.shape_cast %16 : vector<1x128xf32> to vector<1x1x1x128xf32>
    %cst_10 = arith.constant 0.000000e+00 : f32
    %18 = vector.broadcast %cst_10 : f32 to vector<1x128xf32>
    %19 = arith.subf %18, %6 : vector<1x128xf32>
    %20 = arith.mulf %19, %16 : vector<1x128xf32>
    %21 = vector.shape_cast %20 : vector<1x128xf32> to vector<1x1x1x128xf32>
    %22 = vector.broadcast %17 : vector<1x1x1x128xf32> to vector<4x8x8x128xf32>
    %23 = arith.mulf %1, %22 : vector<4x8x8x128xf32>
    %24 = vector.broadcast %21 : vector<1x1x1x128xf32> to vector<4x8x8x128xf32>
    %25 = arith.addf %23, %24 : vector<4x8x8x128xf32>
    %cst_11 = arith.constant 5.000000e-01 : f32
    %26 = vector.broadcast %cst_11 : f32 to vector<4x8x8x128xf32>
    %27 = arith.mulf %26, %25 : vector<4x8x8x128xf32>
    %cst_12 = arith.constant 0.707106769 : f32
    %28 = vector.broadcast %cst_12 : f32 to vector<4x8x8x128xf32>
    %29 = arith.mulf %25, %28 : vector<4x8x8x128xf32>
    %30 = math.erf %29 : vector<4x8x8x128xf32>
    %cst_13 = arith.constant 1.000000e+00 : f32
    %31 = vector.broadcast %cst_13 : f32 to vector<4x8x8x128xf32>
    %32 = arith.addf %31, %30 : vector<4x8x8x128xf32>
    %33 = arith.mulf %27, %32 : vector<4x8x8x128xf32>
    %c0_14 = arith.constant 0 : index
    %c0_15 = arith.constant 0 : index
    %c0_16 = arith.constant 0 : index
    %c0_17 = arith.constant 0 : index
    %c0_18 = arith.constant 0 : index
    %34 = vector.load %arg4[%c0_14, %c0_15, %c0_16, %c0_17, %c0_18] : memref<1x4x8x8x128xf32, #tpu.memory_space<vmem>>, vector<1x4x8x8x128xf32>
    %35 = vector.shape_cast %34 : vector<1x4x8x8x128xf32> to vector<4x8x8x128xf32>
    %36 = vector.shape_cast %33 : vector<4x8x8x128xf32> to vector<1x4x8x8x128xf32>
    tpu.vector_store %arg4[%c0_14, %c0_15, %c0_16, %c0_17, %c0_18], %36 {strides = array<i32>} : memref<1x4x8x8x128xf32, #tpu.memory_space<vmem>>, vector<1x4x8x8x128xf32>,
    return
  }
  func.func @transform_0(%arg0: i32, %arg1: i32) -> (i32, i32, i32, i32, i32) {
    %c0_i32 = arith.constant 0 : i32
    %c0_i32_0 = arith.constant 0 : i32
    %c0_i32_1 = arith.constant 0 : i32
    %c0_i32_2 = arith.constant 0 : i32
    return %arg0, %arg1, %c0_i32, %c0_i32_0, %c0_i32_1 : i32, i32, i32, i32, i32
  }
  func.func @transform_1(%arg0: i32, %arg1: i32) -> (i32, i32, i32) {
    %c0_i32 = arith.constant 0 : i32
    %c0_i32_0 = arith.constant 0 : i32
    %c0_i32_1 = arith.constant 0 : i32
    return %arg0, %c0_i32, %c0_i32_0 : i32, i32, i32
  }
  func.func @transform_2(%arg0: i32, %arg1: i32) -> (i32, i32, i32, i32, i32) {
    %c0_i32 = arith.constant 0 : i32
    %c0_i32_0 = arith.constant 0 : i32
    %c0_i32_1 = arith.constant 0 : i32
    %c0_i32_2 = arith.constant 0 : i32
    return %arg0, %arg1, %c0_i32, %c0_i32_0, %c0_i32_1 : i32, i32, i32, i32, i32
  }
}

</mosaic_0001>

<bundles_post_ra>
// kernel: double_conv.5
= control target key start
LH: loop header
LB: loop body
LE: loop exit
PB: predicated region body
PF: predicated region fallthrough
CT: control target
= control target key end

     0   :  { %s804_s9 = smov 0   ;;  %s806_s10 = smov 0   ;;  %s1074_s0 = inlined_call_operand.vmem [shape: f32[2,8,8,8,128], index: 0, kind: input, shape index: {}]   ;;  %s1075_s1 = inlined_call_operand.vmem [shape: f32[2,2,128], index: 1, kind: input, shape index: {}]   ;;  %s1076_s2 = inlined_call_operand.vmem [shape: f32[2,8,8,8,128], index: 2, kind: output, shape index: {}]  }
   0x1   :  { %s808_s11 = smov 0   ;;  %s810_s12 = smov 0  }
   0x2   :  { %s812_s13 = smov 0  }
   0x3 LB: > { %s21_s14 = sadd.s32 1, %s779_s11  ;;  %s24_s15 = sadd.s32 1, %s783_s12  ;;  %s787_s13 = sphi %s812_s13, %s12_s13   ;;  %s783_s12 = sphi %s810_s12, %s1080_s12   ;;  %s779_s11 = sphi %s808_s11, %s1079_s11   ;;  %s775_s10 = sphi %s806_s10, %s1078_s10   ;;  %s771_s9 = sphi %s804_s9, %s1077_s9  }
   0x4   : > { %p22_p0 = scmp.ge.s32.totalorder %s21_s14, 2  ;;  %p631_p1 = scmp.ge.s32.totalorder %s787_s13, 1 }
   0x5   : > { %p143_p2 = scmp.lt.s32.totalorder %s787_s13, 5 }
   0x6   : > { %s1082_s14 = smov (%p22_p0, %s21_s14), 0  ;;  %s1084_s15 = smov (!%p22_p0, %s24_s15), %s783_s12 }
   0x7   : > { %p144_p3 = pnand %p631_p1, %p143_p2  ;;  %p26_p4 = scmp.ge.s32.totalorder %s1084_s15, 2 }
   0x8   : > { %p180_p5 = scmp.lt.s32.totalorder (!%p144_p3), %s775_s10, 1  ;;  %s632_s20 = sshll.u32 (!%p144_p3), %s771_s9, 2  ;;  %v252_v7 = vlaneseq (!%p144_p3) }
   0x9   : > { %s1086_s15 = smov (%p26_p4, %s1084_s15), 0  ;;  %147 = sbr.rel (%p144_p3) target bundleno = 112 (0x70), region = 28 }
   0xa   : > { %p182_p6 = scmp.lt.s32.totalorder (!%p144_p3), %s632_s20, 7  ;;  %v253_v8 = vshrl.u32 (!%p144_p3), %v252_v7, 7 }
   0xc   : > { %v254_v9 = vsub.s32 (!%p144_p3), 1, %v253_v8  ;;  %v290_v17 = vsub.s32 (!%p144_p3), 0, %v253_v8 }
  0x10   : > { %s1088_s10 = smov (!%p180_p5, %s775_s10), 1  ;;  %s1090_s20 = smov (!%p182_p6, %s632_s20), 7 }
  0x11   : > { %s636_s16 = sshll.u32 %s1088_s10, 1  ;;  %s633_s21 = sshll.u32 %s1090_s20, 3 }
  0x12   : > { %s193_s19 = scalar_lea.vmem %s1075_s1, %s636_s16  ;;  %s634_s22 = sshll.u32 %s1088_s10, 6 }
  0x13   : > { %v237_v0 = vld [vmem:[%s193_s19] sm:$0x3]  ;;  %s837_s23 = sadd.s32 %s634_s22, %s633_s21 }
  0x14   : > { %v238_v1 = vmul.f32 0.001953125, %v237_v0  ;;  %s635_s24 = sshll.u32 %s837_s23, 3 }
  0x15   : > { %s845_s27 = scalar_lea.vmem %s1074_s0, %s635_s24  ;;  %s936_s30 = scalar_lea.vmem %s1076_s2, %s635_s24 }
  0x16   : > { %v239_v2 = vmul.f32 %v238_v1, %v238_v1  ;;  %v247_v10 = vsub.f32 0.0, %v238_v1  ;;  %v205_v12 = vld [vmem:[%s845_s27] sm:$0xff]  ;;  %v206_v13 = vld [vmem:[%s845_s27 + $0x8] sm:$0xff]  ;;  %v207_v14 = vld [vmem:[%s845_s27 + $0x10] sm:$0xff] }
  0x17   : > { %v208_v18 = vld [vmem:[%s845_s27 + $0x18] sm:$0xff]  ;;  %v209_v19 = vld [vmem:[%s845_s27 + $0x20] sm:$0xff]  ;;  %v210_v20 = vld [vmem:[%s845_s27 + $0x28] sm:$0xff] }
  0x18   : > { %v241_v3 = vrot.slane %v239_v2, 7  ;;  %v211_v21 = vld [vmem:[%s845_s27 + $0x30] sm:$0xff]  ;;  %v212_v22 = vld [vmem:[%s845_s27 + $0x38] sm:$0xff]  ;;  %v213_v27 = vld [vmem:[%s845_s27 + $0x40] sm:$0xff] }
  0x19   : > { %v214_v28 = vld [vmem:[%s845_s27 + $0x48] sm:$0xff]  ;;  %v215_v35 = vld [vmem:[%s845_s27 + $0x50] sm:$0xff]  ;;  %v216_v36 = vld [vmem:[%s845_s27 + $0x58] sm:$0xff] }
  0x1a   : > { %v243_v4 = vsub.f32 %v238_v1, %v241_v3  ;;  %v217_v43 = vld [vmem:[%s845_s27 + $0x60] sm:$0xff]  ;;  %v218_v44 = vld [vmem:[%s845_s27 + $0x68] sm:$0xff]  ;;  %v219_v8 = vld [vmem:[%s845_s27 + $0x70] sm:$0xff] }
  0x1c   : > { %v244_v5 = vmax.f32 %v243_v4, 0.0 }
  0x1e   : > { %v245_v6 = vadd.f32 1e-05, %v244_v5 }
  0x20   : > { %683 = vrsqrt.f32 %v245_v6 }
  0x2a   : > { %v684_v11 = vpop.eup %683 }
  0x2b   : > { %v249_v15 = vrot.slane %v684_v11, 1  ;;  %v850_v16 = vrot.slane %v684_v11, %v254_v9 }
  0x2d   : > { %v251_v23 = vmul.f32 %v249_v15, %v247_v10  ;;  %v256_v24 = vmul.f32 %v850_v16, %v205_v12  ;;  %v257_v25 = vmul.f32 %v850_v16, %v206_v13  ;;  %v258_v26 = vmul.f32 %v850_v16, %v207_v14  ;;  %v220_v12 = vld [vmem:[%s845_s27 + $0x78] sm:$0xff]  ;;  %v221_v13 = vld [vmem:[%s845_s27 + $0x80] sm:$0xff] }
  0x2e   : > { %v259_v29 = vmul.f32 %v850_v16, %v208_v18  ;;  %v260_v30 = vmul.f32 %v850_v16, %v209_v19  ;;  %v261_v31 = vmul.f32 %v850_v16, %v210_v20  ;;  %v262_v33 = vmul.f32 %v850_v16, %v211_v21  ;;  %v222_v18 = vld [vmem:[%s845_s27 + $0x88] sm:$0xff] }
  0x2f   : > { %v865_v32 = vrot.slane %v251_v23, %v290_v17  ;;  %v263_v34 = vmul.f32 %v850_v16, %v212_v22  ;;  %v264_v37 = vmul.f32 %v850_v16, %v213_v27  ;;  %v265_v38 = vmul.f32 %v850_v16, %v214_v28 }
  0x30   : > { %v266_v47 = vmul.f32 %v850_v16, %v215_v35  ;;  %v267_v48 = vmul.f32 %v850_v16, %v216_v36  ;;  %v268_v55 = vmul.f32 %v850_v16, %v217_v43  ;;  %v269_v56 = vmul.f32 %v850_v16, %v218_v44 }
  0x31   : > { %v292_v39 = vadd.f32 %v865_v32, %v256_v24  ;;  %v293_v40 = vadd.f32 %v865_v32, %v257_v25  ;;  %v294_v41 = vadd.f32 %v865_v32, %v258_v26  ;;  %v295_v42 = vadd.f32 %v865_v32, %v259_v29 }
  0x32   : > { %v296_v45 = vadd.f32 %v865_v32, %v260_v30  ;;  %v297_v46 = vadd.f32 %v865_v32, %v261_v31  ;;  %v298_v51 = vadd.f32 %v865_v32, %v262_v33  ;;  %v299_v52 = vadd.f32 %v865_v32, %v263_v34  ;;  %v223_v33 = vld [vmem:[%s845_s27 + $0x90] sm:$0xff] }
  0x33   : > { %v356_v49 = vmul.f32 0.70710677, %v292_v39  ;;  %v357_v50 = vmul.f32 0.70710677, %v293_v40  ;;  %v358_v53 = vmul.f32 0.70710677, %v294_v41  ;;  %v300_v1 = vadd.f32 %v865_v32, %v264_v37 }
  0x34   : > { %v359_v54 = vmul.f32 0.70710677, %v295_v42  ;;  %v324_v57 = vmul.f32 0.5, %v292_v39  ;;  %v887_v58 = vmul.f32 0.5, %v293_v40  ;;  %v360_v59 = vmul.f32 0.70710677, %v296_v45 }
  0x35   : > { %685 = verf.f32 %v356_v49  ;;  %v889_v60 = vmul.f32 0.5, %v294_v41  ;;  %v891_v61 = vmul.f32 0.5, %v295_v42  ;;  %v361_v62 = vmul.f32 0.70710677, %v297_v46 }
  0x36   : > { %687 = verf.f32 %v357_v50  ;;  %v362_v63 = vmul.f32 0.70710677, %v298_v51  ;;  %v363_v0 = vmul.f32 0.70710677, %v299_v52  ;;  %v301_v2 = vadd.f32 %v865_v32, %v265_v38 }
  0x37   : > { %689 = verf.f32 %v358_v53  ;;  %v302_v3 = vadd.f32 %v865_v32, %v266_v47  ;;  %v303_v4 = vadd.f32 %v865_v32, %v267_v48  ;;  %v897_v5 = vmul.f32 0.5, %v296_v45 }
  0x38   : > { %691 = verf.f32 %v359_v54  ;;  %v364_v6 = vmul.f32 0.70710677, %v300_v1  ;;  %v304_v7 = vadd.f32 %v865_v32, %v268_v55  ;;  %v901_v9 = vmul.f32 0.5, %v297_v46  ;;  %v224_v55 = vld [vmem:[%s845_s27 + $0x98] sm:$0xff] }
  0x39   : > { %693 = verf.f32 %v360_v59  ;;  %v903_v10 = vmul.f32 0.5, %v298_v51  ;;  %v365_v11 = vmul.f32 0.70710677, %v301_v2  ;;  %v907_v14 = vmul.f32 0.5, %v299_v52 }
  0x3a   : > { %695 = verf.f32 %v361_v62  ;;  %v909_v15 = vmul.f32 0.5, %v300_v1  ;;  %v366_v17 = vmul.f32 0.70710677, %v302_v3  ;;  %v367_v19 = vmul.f32 0.70710677, %v303_v4  ;;  %v225_v62 = vld [vmem:[%s845_s27 + $0xa0] sm:$0xff] }
  0x3b   : > { %697 = verf.f32 %v362_v63  ;;  %v368_v20 = vmul.f32 0.70710677, %v304_v7  ;;  %v305_v21 = vadd.f32 %v865_v32, %v269_v56  ;;  %v270_v22 = vmul.f32 %v850_v16, %v219_v8 }
  0x3c   : > { %699 = verf.f32 %v363_v0  ;;  %v271_v23 = vmul.f32 %v850_v16, %v220_v12  ;;  %v272_v24 = vmul.f32 %v850_v16, %v221_v13  ;;  %v916_v25 = vmul.f32 0.5, %v301_v2  ;;  %v226_v12 = vld [vmem:[%s845_s27 + $0xa8] sm:$0xff] }
  0x3d   : > { %701 = verf.f32 %v364_v6  ;;  %v369_v26 = vmul.f32 0.70710677, %v305_v21  ;;  %v273_v27 = vmul.f32 %v850_v16, %v222_v18  ;;  %v919_v29 = vmul.f32 0.5, %v302_v3 }
  0x3e   : > { %703 = verf.f32 %v365_v11  ;;  %v306_v30 = vadd.f32 %v865_v32, %v270_v22  ;;  %v923_v31 = vadd.f32 %v865_v32, %v271_v23  ;;  %v926_v36 = vmul.f32 0.5, %v303_v4 }
  0x3f   : > { %v686_v28 = vpop.eup %685  ;;  %705 = verf.f32 %v366_v17  ;;  %v929_v37 = vadd.f32 %v865_v32, %v272_v24  ;;  %v939_v41 = vadd.f32 %v865_v32, %v273_v27  ;;  %v274_v45 = vmul.f32 %v850_v16, %v223_v33 }
  0x40   : > { %v688_v34 = vpop.eup %687  ;;  %v420_v35 = vadd.f32 1.0, %v686_v28  ;;  %707 = verf.f32 %v367_v19  ;;  %v370_v40 = vmul.f32 0.70710677, %v306_v30  ;;  %v371_v49 = vmul.f32 0.70710677, %v923_v31 }
  0x41   : > { %v690_v38 = vpop.eup %689  ;;  %v421_v39 = vadd.f32 1.0, %v688_v34  ;;  %709 = verf.f32 %v368_v20  ;;  %v336_v53 = vmul.f32 0.5, %v304_v7  ;;  %v372_v54 = vmul.f32 0.70710677, %v929_v37 }
  0x42   : > { %v692_v42 = vpop.eup %691  ;;  %v452_v43 = vmul.f32 %v420_v35, %v324_v57  ;;  %v422_v44 = vadd.f32 1.0, %v690_v38  ;;  %711 = verf.f32 %v369_v26  ;;  %v337_v59 = vmul.f32 0.5, %v305_v21  ;;  %v227_v35 = vld [vmem:[%s845_s27 + $0xb0] sm:$0xff]  ;;  %v228_v38 = vld [vmem:[%s845_s27 + $0xb8] sm:$0xff] }
  0x43   : > { %v694_v46 = vpop.eup %693  ;;  %v453_v47 = vmul.f32 %v421_v39, %v887_v58  ;;  %v423_v48 = vadd.f32 1.0, %v692_v42  ;;  %713 = verf.f32 %v370_v40  ;;  %v373_v1 = vmul.f32 0.70710677, %v939_v41 }
  0x44   : > { %v696_v50 = vpop.eup %695  ;;  %484 = vst [vmem:[%s936_s30] sm:$0xff] %v452_v43  ;;  %v454_v51 = vmul.f32 %v422_v44, %v889_v60  ;;  %v424_v52 = vadd.f32 1.0, %v694_v46  ;;  %715 = verf.f32 %v371_v49  ;;  %v957_v4 = vadd.f32 %v865_v32, %v274_v45  ;;  %v229_v45 = vld [vmem:[%s845_s27 + $0xc0] sm:$0xff]  ;;  %v231_v49 = vld [vmem:[%s845_s27 + $0xd0] sm:$0xff] }
  0x45   : > { %v698_v56 = vpop.eup %697  ;;  %485 = vst [vmem:[%s936_s30 + $0x8] sm:$0xff] %v453_v47  ;;  %v455_v57 = vmul.f32 %v423_v48, %v891_v61  ;;  %v425_v58 = vadd.f32 1.0, %v696_v50  ;;  %717 = verf.f32 %v372_v54  ;;  %v275_v6 = vmul.f32 %v850_v16, %v224_v55  ;;  %v230_v48 = vld [vmem:[%s845_s27 + $0xc8] sm:$0xff] }
  0x46   : > { %v700_v63 = vpop.eup %699  ;;  %486 = vst [vmem:[%s936_s30 + $0x10] sm:$0xff] %v454_v51  ;;  %v456_v0 = vmul.f32 %v424_v52, %v897_v5  ;;  %v426_v60 = vadd.f32 1.0, %v698_v56  ;;  %719 = verf.f32 %v373_v1  ;;  %v276_v11 = vmul.f32 %v850_v16, %v225_v62 }
  0x47   : > { %v702_v2 = vpop.eup %701  ;;  %487 = vst [vmem:[%s936_s30 + $0x18] sm:$0xff] %v455_v57  ;;  %v457_v3 = vmul.f32 %v425_v58, %v901_v9  ;;  %v427_v61 = vadd.f32 1.0, %v700_v63  ;;  %v338_v18 = vmul.f32 0.5, %v306_v30  ;;  %v374_v19 = vmul.f32 0.70710677, %v957_v4 }
  0x48   : > { %v704_v7 = vpop.eup %703  ;;  %488 = vst [vmem:[%s936_s30 + $0x20] sm:$0xff] %v456_v0  ;;  %v458_v5 = vmul.f32 %v426_v60, %v903_v10  ;;  %v428_v8 = vadd.f32 1.0, %v702_v2  ;;  %v970_v22 = vadd.f32 %v865_v32, %v275_v6  ;;  %v973_v23 = vadd.f32 %v865_v32, %v276_v11  ;;  %v232_v0 = vld [vmem:[%s845_s27 + $0xd8] sm:$0xff] }
  0x49   : > { %v706_v13 = vpop.eup %705  ;;  %489 = vst [vmem:[%s936_s30 + $0x28] sm:$0xff] %v457_v3  ;;  %v459_v9 = vmul.f32 %v427_v61, %v907_v14  ;;  %v429_v17 = vadd.f32 1.0, %v704_v7  ;;  %721 = verf.f32 %v374_v19  ;;  %v277_v27 = vmul.f32 %v850_v16, %v226_v12 }
  0x4a   : > { %v708_v20 = vpop.eup %707  ;;  %490 = vst [vmem:[%s936_s30 + $0x30] sm:$0xff] %v458_v5  ;;  %v460_v21 = vmul.f32 %v428_v8, %v909_v15  ;;  %v430_v10 = vadd.f32 1.0, %v706_v13  ;;  %v339_v33 = vmul.f32 0.5, %v923_v31  ;;  %v375_v34 = vmul.f32 0.70710677, %v970_v22  ;;  %v233_v13 = vld [vmem:[%s845_s27 + $0xe0] sm:$0xff] }
  0x4b   : > { %v710_v14 = vpop.eup %709  ;;  %491 = vst [vmem:[%s936_s30 + $0x38] sm:$0xff] %v459_v9  ;;  %v461_v24 = vmul.f32 %v429_v17, %v916_v25  ;;  %v431_v26 = vadd.f32 1.0, %v708_v20  ;;  %v340_v42 = vmul.f32 0.5, %v929_v37  ;;  %v990_v44 = vadd.f32 %v865_v32, %v277_v27  ;;  %v234_v17 = vld [vmem:[%s845_s27 + $0xe8] sm:$0xff] }
  0x4c   : > { %v712_v15 = vpop.eup %711  ;;  %492 = vst [vmem:[%s936_s30 + $0x40] sm:$0xff] %v460_v21  ;;  %v462_v28 = vmul.f32 %v430_v10, %v919_v29  ;;  %v432_v30 = vadd.f32 1.0, %v710_v14  ;;  %v376_v29 = vmul.f32 0.70710677, %v973_v23  ;;  %723 = verf.f32 %v375_v34 }
  0x4d   : > { %v714_v39 = vpop.eup %713  ;;  %493 = vst [vmem:[%s936_s30 + $0x48] sm:$0xff] %v461_v24  ;;  %v463_v25 = vmul.f32 %v431_v26, %v926_v36  ;;  %v433_v40 = vadd.f32 1.0, %v712_v15  ;;  %v278_v47 = vmul.f32 %v850_v16, %v227_v35  ;;  %v279_v37 = vmul.f32 %v850_v16, %v228_v38 }
  0x4e   : > { %494 = vst [vmem:[%s936_s30 + $0x50] sm:$0xff] %v462_v28  ;;  %v464_v43 = vmul.f32 %v432_v30, %v336_v53  ;;  %v434_v31 = vadd.f32 1.0, %v714_v39  ;;  %v716_v46 = vpop.eup %715  ;;  %725 = verf.f32 %v376_v29  ;;  %v341_v53 = vmul.f32 0.5, %v939_v41 }
  0x4f   : > { %495 = vst [vmem:[%s936_s30 + $0x58] sm:$0xff] %v463_v25  ;;  %v465_v36 = vmul.f32 %v433_v40, %v337_v59  ;;  %v718_v50 = vpop.eup %717  ;;  %v435_v52 = vadd.f32 1.0, %v716_v46  ;;  %v377_v54 = vmul.f32 0.70710677, %v990_v44  ;;  %v314_v56 = vadd.f32 %v865_v32, %v278_v47 }
  0x50   : > { %496 = vst [vmem:[%s936_s30 + $0x60] sm:$0xff] %v464_v43  ;;  %v466_v51 = vmul.f32 %v434_v31, %v338_v18  ;;  %v436_v55 = vadd.f32 1.0, %v718_v50  ;;  %v1004_v57 = vadd.f32 %v865_v32, %v279_v37  ;;  %v280_v58 = vmul.f32 %v850_v16, %v229_v45  ;;  %v720_v59 = vpop.eup %719  ;;  %v235_v18 = vld [vmem:[%s845_s27 + $0xf0] sm:$0xff] }
  0x51   : > { %497 = vst [vmem:[%s936_s30 + $0x68] sm:$0xff] %v465_v36  ;;  %v467_v62 = vmul.f32 %v435_v52, %v339_v33  ;;  %727 = verf.f32 %v377_v54  ;;  %v281_v63 = vmul.f32 %v850_v16, %v230_v48  ;;  %v282_v41 = vmul.f32 %v850_v16, %v231_v49 }
  0x52   : > { %498 = vst [vmem:[%s936_s30 + $0x70] sm:$0xff] %v466_v51  ;;  %v468_v60 = vmul.f32 %v436_v55, %v340_v42  ;;  %v437_v1 = vadd.f32 1.0, %v720_v59  ;;  %v378_v2 = vmul.f32 0.70710677, %v314_v56  ;;  %v342_v3 = vmul.f32 0.5, %v957_v4 }
  0x53   : > { %499 = vst [vmem:[%s936_s30 + $0x78] sm:$0xff] %v467_v62  ;;  %v379_v61 = vmul.f32 0.70710677, %v1004_v57  ;;  %v316_v6 = vadd.f32 %v865_v32, %v280_v58  ;;  %v1016_v7 = vadd.f32 %v865_v32, %v281_v63  ;;  %v722_v5 = vpop.eup %721  ;;  %v1020_v11 = vadd.f32 %v865_v32, %v282_v41 }
  0x54   : > { %500 = vst [vmem:[%s936_s30 + $0x80] sm:$0xff] %v468_v60  ;;  %v469_v8 = vmul.f32 %v437_v1, %v341_v53  ;;  %729 = verf.f32 %v378_v2  ;;  %v283_v12 = vmul.f32 %v850_v16, %v232_v0  ;;  %v438_v9 = vadd.f32 1.0, %v722_v5 }
  0x55   : > { %731 = verf.f32 %v379_v61  ;;  %v380_v4 = vmul.f32 0.70710677, %v316_v6  ;;  %v343_v19 = vmul.f32 0.5, %v970_v22  ;;  %v344_v20 = vmul.f32 0.5, %v973_v23  ;;  %v236_v23 = vld [vmem:[%s845_s27 + $0xf8] sm:$0xff] }
  0x56   : > { %501 = vst [vmem:[%s936_s30 + $0x88] sm:$0xff] %v469_v8  ;;  %v381_v21 = vmul.f32 0.70710677, %v1016_v7  ;;  %v382_v10 = vmul.f32 0.70710677, %v1020_v11  ;;  %v724_v14 = vpop.eup %723  ;;  %v470_v24 = vmul.f32 %v438_v9, %v342_v3  ;;  %v319_v26 = vadd.f32 %v865_v32, %v283_v12 }
  0x57   : > { %733 = verf.f32 %v380_v4  ;;  %v284_v27 = vmul.f32 %v850_v16, %v233_v13  ;;  %v439_v28 = vadd.f32 1.0, %v724_v14  ;;  %v285_v30 = vmul.f32 %v850_v16, %v234_v17 }
  0x58   : > { %v726_v15 = vpop.eup %725  ;;  %735 = verf.f32 %v381_v21  ;;  %v286_v22 = vmul.f32 %v850_v16, %v235_v18  ;;  %502 = vst [vmem:[%s936_s30 + $0x90] sm:$0xff] %v470_v24  ;;  %v345_v34 = vmul.f32 0.5, %v990_v44  ;;  %v383_v35 = vmul.f32 0.70710677, %v319_v26 }
  0x59   : > { %v440_v33 = vadd.f32 1.0, %v726_v15  ;;  %737 = verf.f32 %v382_v10  ;;  %v471_v38 = vmul.f32 %v439_v28, %v343_v19  ;;  %v320_v39 = vadd.f32 %v865_v32, %v284_v27 }
  0x5a   : > { %v321_v25 = vadd.f32 %v865_v32, %v285_v30  ;;  %v322_v40 = vadd.f32 %v865_v32, %v286_v22  ;;  %739 = verf.f32 %v383_v35  ;;  %v287_v43 = vmul.f32 %v850_v16, %v236_v23 }
  0x5b   : > { %v728_v42 = vpop.eup %727  ;;  %v472_v29 = vmul.f32 %v440_v33, %v344_v20  ;;  %503 = vst [vmem:[%s936_s30 + $0x98] sm:$0xff] %v471_v38  ;;  %v384_v45 = vmul.f32 0.70710677, %v320_v39  ;;  %v346_v44 = vmul.f32 0.5, %v314_v56  ;;  %v347_v49 = vmul.f32 0.5, %v1004_v57 }
  0x5c   : > { %v441_v31 = vadd.f32 1.0, %v728_v42  ;;  %v385_v46 = vmul.f32 0.70710677, %v321_v25  ;;  %v386_v36 = vmul.f32 0.70710677, %v322_v40  ;;  %v323_v47 = vadd.f32 %v865_v32, %v287_v43 }
  0x5d   : > { %504 = vst [vmem:[%s936_s30 + $0xa0] sm:$0xff] %v472_v29  ;;  %741 = verf.f32 %v384_v45  ;;  %v348_v53 = vmul.f32 0.5, %v316_v6  ;;  %v349_v32 = vmul.f32 0.5, %v1016_v7  ;;  %v350_v59 = vmul.f32 0.5, %v1020_v11 }
  0x5e   : > { %v730_v37 = vpop.eup %729  ;;  %v473_v48 = vmul.f32 %v441_v31, %v345_v34  ;;  %743 = verf.f32 %v385_v46  ;;  %v387_v16 = vmul.f32 0.70710677, %v323_v47  ;;  %v351_v60 = vmul.f32 0.5, %v319_v26 }
  0x5f   : > { %v732_v50 = vpop.eup %731  ;;  %v442_v51 = vadd.f32 1.0, %v730_v37  ;;  %745 = verf.f32 %v386_v36  ;;  %v352_v6 = vmul.f32 0.5, %v320_v39  ;;  %v353_v8 = vmul.f32 0.5, %v321_v25 }
  0x60   : > { %505 = vst [vmem:[%s936_s30 + $0xa8] sm:$0xff] %v473_v48  ;;  %v443_v52 = vadd.f32 1.0, %v732_v50  ;;  %747 = verf.f32 %v387_v16  ;;  %v354_v13 = vmul.f32 0.5, %v322_v40  ;;  %v355_v17 = vmul.f32 0.5, %v323_v47 }
  0x61   : > { %v734_v54 = vpop.eup %733  ;;  %v474_v55 = vmul.f32 %v442_v51, %v346_v44 }
  0x62   : > { %v736_v56 = vpop.eup %735  ;;  %v475_v57 = vmul.f32 %v443_v52, %v347_v49  ;;  %v444_v58 = vadd.f32 1.0, %v734_v54 }
  0x63   : > { %v738_v62 = vpop.eup %737  ;;  %506 = vst [vmem:[%s936_s30 + $0xb0] sm:$0xff] %v474_v55  ;;  %v445_v63 = vadd.f32 1.0, %v736_v56 }
  0x64   : > { %507 = vst [vmem:[%s936_s30 + $0xb8] sm:$0xff] %v475_v57  ;;  %v476_v41 = vmul.f32 %v444_v58, %v348_v53  ;;  %v446_v0 = vadd.f32 1.0, %v738_v62  ;;  %v740_v1 = vpop.eup %739 }
  0x65   : > { %v477_v2 = vmul.f32 %v445_v63, %v349_v32  ;;  %v447_v61 = vadd.f32 1.0, %v740_v1 }
  0x66   : > { %508 = vst [vmem:[%s936_s30 + $0xc0] sm:$0xff] %v476_v41  ;;  %v478_v3 = vmul.f32 %v446_v0, %v350_v59 }
  0x67   : > { %509 = vst [vmem:[%s936_s30 + $0xc8] sm:$0xff] %v477_v2  ;;  %v742_v7 = vpop.eup %741  ;;  %v479_v5 = vmul.f32 %v447_v61, %v351_v60 }
  0x68   : > { %510 = vst [vmem:[%s936_s30 + $0xd0] sm:$0xff] %v478_v3  ;;  %v744_v11 = vpop.eup %743  ;;  %v448_v12 = vadd.f32 1.0, %v742_v7 }
  0x69   : > { %v746_v9 = vpop.eup %745  ;;  %511 = vst [vmem:[%s936_s30 + $0xd8] sm:$0xff] %v479_v5  ;;  %v449_v4 = vadd.f32 1.0, %v744_v11 }
  0x6a   : > { %v748_v18 = vpop.eup %747  ;;  %v480_v19 = vmul.f32 %v448_v12, %v352_v6  ;;  %v450_v20 = vadd.f32 1.0, %v746_v9 }
  0x6b   : > { %v481_v21 = vmul.f32 %v449_v4, %v353_v8  ;;  %v451_v10 = vadd.f32 1.0, %v748_v18 }
  0x6c   : > { %512 = vst [vmem:[%s936_s30 + $0xe0] sm:$0xff] %v480_v19  ;;  %v482_v14 = vmul.f32 %v450_v20, %v354_v13 }
  0x6d   : > { %513 = vst [vmem:[%s936_s30 + $0xe8] sm:$0xff] %v481_v21  ;;  %v483_v24 = vmul.f32 %v451_v10, %v355_v17 }
  0x6e   : > { %514 = vst [vmem:[%s936_s30 + $0xf0] sm:$0xff] %v482_v14 }
  0x6f   : > { %515 = vst [vmem:[%s936_s30 + $0xf8] sm:$0xff] %v483_v24 }
  0x70 PF: > { %s12_s13 = sadd.s32 1, %s787_s13   ;;  %s1077_s9 = smov %s779_s11 }
  0x71   : > { %p9_p7 = scmp.ge.s32.totalorder %s12_s13, 6   ;;  %s1078_s10 = smov %s783_s12 }
  0x72   : > { %s1079_s11 = smov %s1082_s14  ;;  %s1080_s12 = smov %s1086_s15 }
  0x73   :  { %11 = sbr.rel (!%p9_p7) target bundleno = 3 (0x3), region = 61 }

// kernel: double_conv.4
= control target key start
LH: loop header
LB: loop body
LE: loop exit
PB: predicated region body
PF: predicated region fallthrough
CT: control target
= control target key end

     0   :  { %s12856_s12 = smov 0   ;;  %s12858_s13 = smov 0   ;;  %s19936_s0 = inlined_call_operand.vmem [shape: f32[2,10,10,10,128], index: 0, kind: input, shape index: {}]   ;;  %s19937_s1 = inlined_call_operand.vmem [shape: f32[3,3,384,128], index: 1, kind: input, shape index: {}]   ;;  %s19938_s2 = inlined_call_operand.vmem [shape: f32[2,8,8,8,128], index: 2, kind: output, shape index: {0}]   ;;  %s19939_s3 = inlined_call_operand.vmem [shape: f32[2,2,128], index: 3, kind: output, shape index: {1}]  }
   0x1   :  { %s12860_s14 = smov 0   ;;  %s12862_s15 = smov 0  }
   0x2   :  { %s12864_s16 = smov 0  }
   0x3 LB: > { %s23_s17 = sadd.s32 1, %s12825_s14  ;;  %s26_s18 = sadd.s32 1, %s12829_s15  ;;  %s12833_s16 = sphi %s12864_s16, %s14_s16   ;;  %s12829_s15 = sphi %s12862_s15, %s20320_s15   ;;  %s12825_s14 = sphi %s12860_s14, %s20319_s14   ;;  %s12821_s13 = sphi %s12858_s13, %s20318_s13   ;;  %s12817_s12 = sphi %s12856_s12, %s20317_s12  }
   0x4   : > { %p24_p0 = scmp.ge.s32.totalorder %s23_s17, 2  ;;  %p9559_p1 = scmp.ge.s32.totalorder %s12833_s16, 1 }
   0x5   : > { %p120_p2 = scmp.lt.s32.totalorder %s12833_s16, 5 }
   0x6   : > { %s20322_s17 = smov (%p24_p0, %s23_s17), 0  ;;  %s20324_s18 = smov (!%p24_p0, %s26_s18), %s12829_s15 }
   0x7   : > { %p121_p3 = pnand %p9559_p1, %p120_p2  ;;  %p28_p4 = scmp.ge.s32.totalorder %s20324_s18, 2 }
   0x9   : > { %s20326_s18 = smov (%p28_p4, %s20324_s18), 0  ;;  %124 = sbr.rel (%p121_p3) target bundleno = 1359 (0x54f), region = 24 }
  0x10   : > { %s9560_s19 = sshll.u32 %s12817_s12, 2  ;;  %p147_p5 = scmp.lt.s32.totalorder %s12821_s13, 1 }
  0x11   : > { %p149_p6 = scmp.lt.s32.totalorder %s9560_s19, 7  ;;  %p161_p7 = scmp.lt.s32.totalorder %s12817_s12, 0 }
  0x12   : > { %s148_s20 = scalar_select %p147_p5, %s12821_s13, 1 }
  0x13   : > { %s20328_s19 = smov (!%p149_p6, %s9560_s19), 7  ;;  %s162_s28 = ssub.s32 0, %s12817_s12 }
  0x14   : > { %s9562_s21 = sshll.u32 %s148_s20, 6  ;;  %s9564_s22 = sshll.u32 %s148_s20, 1 }
  0x15   : > { %s9561_s23 = sshll.u32 %s20328_s19, 3  ;;  %s12897_s26 = scalar_lea.vmem %s19939_s3, %s9564_s22 }
  0x16   : > { %s153_s27 = sadd.s32 %s9562_s21, %s9561_s23  ;;  %s9565_s30 = smin.u32 %s12817_s12, %s162_s28 }
  0x17   : > { %s9563_s29 = sshll.u32 %s153_s27, 3  ;;  %s164_s7 = sand.u32 1, %s9565_s30  }
  0x18   : > { %s12904_s6 = scalar_lea.vmem %s19938_s2, %s9563_s29  ;;  %s165_s8 = ssub.s32 0, %s164_s7 }
  0x19   : > { %s20330_s8 = smov (!%p161_p7, %s165_s8), %s164_s7  ;;  %p9568_p9 = scmp.ne.s32.totalorder %s12817_s12, 0 }
  0x1a   : > { %p9567_p8 = scmp.lt.s32.totalorder %s20330_s8, 0  ;;  %s171_s9 = sadd.s32 2, %s20330_s8 }
  0x1b   : > { %176 = sbr.rel (%p9568_p9) target bundleno = 105 (0x69), region = 28 }
  0x1c   : > { %s20332_s9 = smov (!%p9567_p8, %s171_s9), %s20330_s8  ;;  %s9570_s10 = smul.u32 (!%p9568_p9), 640, %s12817_s12 }
  0x1d   : > { %s179_s11 = smul.u32 (!%p9568_p9), 1600, %s12821_s13  ;;  %s184_s25 = scalar_lea.sflag (!%p9568_p9), [#allocation3], %s20332_s9 }
  0x1e   : > { %s182_s19 = smul.u32 (!%p9568_p9), 960, %s20332_s9 }
  0x1f   : > { %s180_s20 = sadd.s32 (!%p9568_p9), %s9570_s10, %s179_s11 }
  0x20   : > { %s12919_s23 = scalar_lea.vmem (!%p9568_p9), %s19936_s0, %s180_s20  ;;  %s12924_s24 = scalar_lea.vmem (!%p9568_p9), [#allocation2], %s182_s19 }
  0x21   : > { %v340_v0 = vld [vmem:[%s12919_s23] sm:$0xff] (!%p9568_p9)  ;;  %v342_v1 = vld [vmem:[%s12919_s23 + $0x10] sm:$0xff] (!%p9568_p9)  ;;  %v9571_v60 = vld [vmem:[%s12919_s23 + $0x8] sm:$0x3] (!%p9568_p9) }
  0x22   : > { %v344_v2 = vld [vmem:[%s12919_s23 + $0x20] sm:$0xff]  ;;  %341 = vst [vmem:[%s12924_s24] sm:$0xff] %v340_v0  ;;  %343 = vst [vmem:[%s12924_s24 + $0x10] sm:$0xff] %v342_v1  ;;  %v346_v3 = vld [vmem:[%s12919_s23 + $0x30] sm:$0xff] }
  0x23   : > { %345 = vst [vmem:[%s12924_s24 + $0x20] sm:$0xff] %v344_v2  ;;  %v348_v4 = vld [vmem:[%s12919_s23 + $0x40] sm:$0xff]  ;;  %v350_v5 = vld [vmem:[%s12919_s23 + $0x50] sm:$0xff]  ;;  %347 = vst [vmem:[%s12924_s24 + $0x30] sm:$0xff] %v346_v3 }
  0x24   : > { %349 = vst [vmem:[%s12924_s24 + $0x40] sm:$0xff] %v348_v4  ;;  %351 = vst [vmem:[%s12924_s24 + $0x50] sm:$0xff] %v350_v5  ;;  %v352_v6 = vld [vmem:[%s12919_s23 + $0x60] sm:$0xff]  ;;  %v354_v7 = vld [vmem:[%s12919_s23 + $0x70] sm:$0xff] }
  0x25   : > { %v356_v8 = vld [vmem:[%s12919_s23 + $0x80] sm:$0xff]  ;;  %353 = vst [vmem:[%s12924_s24 + $0x60] sm:$0xff] %v352_v6  ;;  %355 = vst [vmem:[%s12924_s24 + $0x70] sm:$0xff] %v354_v7  ;;  %v358_v9 = vld [vmem:[%s12919_s23 + $0x90] sm:$0xff] }
  0x26   : > { %357 = vst [vmem:[%s12924_s24 + $0x80] sm:$0xff] %v356_v8  ;;  %v360_v10 = vld [vmem:[%s12919_s23 + $0xa0] sm:$0xff]  ;;  %v362_v11 = vld [vmem:[%s12919_s23 + $0xb0] sm:$0xff]  ;;  %359 = vst [vmem:[%s12924_s24 + $0x90] sm:$0xff] %v358_v9 }
  0x27   : > { %361 = vst [vmem:[%s12924_s24 + $0xa0] sm:$0xff] %v360_v10  ;;  %363 = vst [vmem:[%s12924_s24 + $0xb0] sm:$0xff] %v362_v11  ;;  %v364_v12 = vld [vmem:[%s12919_s23 + $0xc0] sm:$0xff]  ;;  %v366_v13 = vld [vmem:[%s12919_s23 + $0xd0] sm:$0xff] }
  0x28   : > { %v368_v14 = vld [vmem:[%s12919_s23 + $0xe0] sm:$0xff]  ;;  %365 = vst [vmem:[%s12924_s24 + $0xc0] sm:$0xff] %v364_v12  ;;  %367 = vst [vmem:[%s12924_s24 + $0xd0] sm:$0xff] %v366_v13  ;;  %v370_v15 = vld [vmem:[%s12919_s23 + $0xf0] sm:$0xff] }
  0x29   : > { %369 = vst [vmem:[%s12924_s24 + $0xe0] sm:$0xff] %v368_v14  ;;  %v372_v16 = vld [vmem:[%s12919_s23 + $0x100] sm:$0xff]  ;;  %v374_v17 = vld [vmem:[%s12919_s23 + $0x110] sm:$0xff]  ;;  %371 = vst [vmem:[%s12924_s24 + $0xf0] sm:$0xff] %v370_v15 }
  0x2a   : > { %373 = vst [vmem:[%s12924_s24 + $0x100] sm:$0xff] %v372_v16  ;;  %375 = vst [vmem:[%s12924_s24 + $0x110] sm:$0xff] %v374_v17  ;;  %v376_v18 = vld [vmem:[%s12919_s23 + $0x120] sm:$0xff]  ;;  %v378_v19 = vld [vmem:[%s12919_s23 + $0x130] sm:$0xff] }
  0x2b   : > { %v380_v20 = vld [vmem:[%s12919_s23 + $0x140] sm:$0xff]  ;;  %377 = vst [vmem:[%s12924_s24 + $0x120] sm:$0xff] %v376_v18  ;;  %379 = vst [vmem:[%s12924_s24 + $0x130] sm:$0xff] %v378_v19  ;;  %v382_v21 = vld [vmem:[%s12919_s23 + $0x150] sm:$0xff] }
  0x2c   : > { %381 = vst [vmem:[%s12924_s24 + $0x140] sm:$0xff] %v380_v20  ;;  %v384_v22 = vld [vmem:[%s12919_s23 + $0x160] sm:$0xff]  ;;  %v386_v23 = vld [vmem:[%s12919_s23 + $0x170] sm:$0xff]  ;;  %383 = vst [vmem:[%s12924_s24 + $0x150] sm:$0xff] %v382_v21 }
  0x2d   : > { %385 = vst [vmem:[%s12924_s24 + $0x160] sm:$0xff] %v384_v22  ;;  %387 = vst [vmem:[%s12924_s24 + $0x170] sm:$0xff] %v386_v23  ;;  %v388_v24 = vld [vmem:[%s12919_s23 + $0x180] sm:$0xff]  ;;  %v390_v25 = vld [vmem:[%s12919_s23 + $0x190] sm:$0xff] }
  0x2e   : > { %v392_v26 = vld [vmem:[%s12919_s23 + $0x1a0] sm:$0xff]  ;;  %389 = vst [vmem:[%s12924_s24 + $0x180] sm:$0xff] %v388_v24  ;;  %391 = vst [vmem:[%s12924_s24 + $0x190] sm:$0xff] %v390_v25  ;;  %v394_v27 = vld [vmem:[%s12919_s23 + $0x1b0] sm:$0xff] }
  0x2f   : > { %393 = vst [vmem:[%s12924_s24 + $0x1a0] sm:$0xff] %v392_v26  ;;  %v396_v28 = vld [vmem:[%s12919_s23 + $0x1c0] sm:$0xff]  ;;  %v398_v29 = vld [vmem:[%s12919_s23 + $0x1d0] sm:$0xff]  ;;  %395 = vst [vmem:[%s12924_s24 + $0x1b0] sm:$0xff] %v394_v27 }
  0x30   : > { %397 = vst [vmem:[%s12924_s24 + $0x1c0] sm:$0xff] %v396_v28  ;;  %399 = vst [vmem:[%s12924_s24 + $0x1d0] sm:$0xff] %v398_v29  ;;  %v400_v30 = vld [vmem:[%s12919_s23 + $0x1e0] sm:$0xff]  ;;  %v402_v31 = vld [vmem:[%s12919_s23 + $0x1f0] sm:$0xff] }
  0x31   : > { %v404_v32 = vld [vmem:[%s12919_s23 + $0x200] sm:$0xff]  ;;  %401 = vst [vmem:[%s12924_s24 + $0x1e0] sm:$0xff] %v400_v30  ;;  %403 = vst [vmem:[%s12924_s24 + $0x1f0] sm:$0xff] %v402_v31  ;;  %v406_v33 = vld [vmem:[%s12919_s23 + $0x210] sm:$0xff] }
  0x32   : > { %405 = vst [vmem:[%s12924_s24 + $0x200] sm:$0xff] %v404_v32  ;;  %v408_v34 = vld [vmem:[%s12919_s23 + $0x220] sm:$0xff]  ;;  %v410_v35 = vld [vmem:[%s12919_s23 + $0x230] sm:$0xff]  ;;  %407 = vst [vmem:[%s12924_s24 + $0x210] sm:$0xff] %v406_v33 }
  0x33   : > { %409 = vst [vmem:[%s12924_s24 + $0x220] sm:$0xff] %v408_v34  ;;  %411 = vst [vmem:[%s12924_s24 + $0x230] sm:$0xff] %v410_v35  ;;  %v412_v36 = vld [vmem:[%s12919_s23 + $0x240] sm:$0xff]  ;;  %v414_v37 = vld [vmem:[%s12919_s23 + $0x250] sm:$0xff] }
  0x34   : > { %v416_v38 = vld [vmem:[%s12919_s23 + $0x260] sm:$0xff]  ;;  %413 = vst [vmem:[%s12924_s24 + $0x240] sm:$0xff] %v412_v36  ;;  %415 = vst [vmem:[%s12924_s24 + $0x250] sm:$0xff] %v414_v37  ;;  %v418_v39 = vld [vmem:[%s12919_s23 + $0x270] sm:$0xff] }
  0x35   : > { %417 = vst [vmem:[%s12924_s24 + $0x260] sm:$0xff] %v416_v38  ;;  %v420_v40 = vld [vmem:[%s12919_s23 + $0x280] sm:$0xff]  ;;  %v422_v41 = vld [vmem:[%s12919_s23 + $0x290] sm:$0xff]  ;;  %419 = vst [vmem:[%s12924_s24 + $0x270] sm:$0xff] %v418_v39 }
  0x36   : > { %421 = vst [vmem:[%s12924_s24 + $0x280] sm:$0xff] %v420_v40  ;;  %423 = vst [vmem:[%s12924_s24 + $0x290] sm:$0xff] %v422_v41  ;;  %v424_v42 = vld [vmem:[%s12919_s23 + $0x2a0] sm:$0xff]  ;;  %v426_v43 = vld [vmem:[%s12919_s23 + $0x2b0] sm:$0xff] }
  0x37   : > { %v428_v44 = vld [vmem:[%s12919_s23 + $0x2c0] sm:$0xff]  ;;  %425 = vst [vmem:[%s12924_s24 + $0x2a0] sm:$0xff] %v424_v42  ;;  %427 = vst [vmem:[%s12924_s24 + $0x2b0] sm:$0xff] %v426_v43  ;;  %v430_v45 = vld [vmem:[%s12919_s23 + $0x2d0] sm:$0xff] }
  0x38   : > { %429 = vst [vmem:[%s12924_s24 + $0x2c0] sm:$0xff] %v428_v44  ;;  %v432_v46 = vld [vmem:[%s12919_s23 + $0x2e0] sm:$0xff]  ;;  %v434_v47 = vld [vmem:[%s12919_s23 + $0x2f0] sm:$0xff]  ;;  %431 = vst [vmem:[%s12924_s24 + $0x2d0] sm:$0xff] %v430_v45 }
  0x39   : > { %433 = vst [vmem:[%s12924_s24 + $0x2e0] sm:$0xff] %v432_v46  ;;  %435 = vst [vmem:[%s12924_s24 + $0x2f0] sm:$0xff] %v434_v47  ;;  %v436_v48 = vld [vmem:[%s12919_s23 + $0x300] sm:$0xff]  ;;  %v438_v49 = vld [vmem:[%s12919_s23 + $0x310] sm:$0xff] }
  0x3a   : > { %v440_v50 = vld [vmem:[%s12919_s23 + $0x320] sm:$0xff]  ;;  %437 = vst [vmem:[%s12924_s24 + $0x300] sm:$0xff] %v436_v48  ;;  %439 = vst [vmem:[%s12924_s24 + $0x310] sm:$0xff] %v438_v49  ;;  %v442_v51 = vld [vmem:[%s12919_s23 + $0x330] sm:$0xff] }
  0x3b   : > { %441 = vst [vmem:[%s12924_s24 + $0x320] sm:$0xff] %v440_v50  ;;  %v444_v52 = vld [vmem:[%s12919_s23 + $0x340] sm:$0xff]  ;;  %v446_v53 = vld [vmem:[%s12919_s23 + $0x350] sm:$0xff]  ;;  %443 = vst [vmem:[%s12924_s24 + $0x330] sm:$0xff] %v442_v51 }
  0x3c   : > { %445 = vst [vmem:[%s12924_s24 + $0x340] sm:$0xff] %v444_v52  ;;  %447 = vst [vmem:[%s12924_s24 + $0x350] sm:$0xff] %v446_v53  ;;  %v448_v54 = vld [vmem:[%s12919_s23 + $0x360] sm:$0xff]  ;;  %v450_v55 = vld [vmem:[%s12919_s23 + $0x370] sm:$0xff] }
  0x3d   : > { %v452_v56 = vld [vmem:[%s12919_s23 + $0x380] sm:$0xff]  ;;  %449 = vst [vmem:[%s12924_s24 + $0x360] sm:$0xff] %v448_v54  ;;  %451 = vst [vmem:[%s12924_s24 + $0x370] sm:$0xff] %v450_v55  ;;  %v454_v57 = vld [vmem:[%s12919_s23 + $0x390] sm:$0xff] }
  0x3e   : > { %453 = vst [vmem:[%s12924_s24 + $0x380] sm:$0xff] %v452_v56  ;;  %v456_v58 = vld [vmem:[%s12919_s23 + $0x3a0] sm:$0xff]  ;;  %v458_v59 = vld [vmem:[%s12919_s23 + $0x3b0] sm:$0xff]  ;;  %455 = vst [vmem:[%s12924_s24 + $0x390] sm:$0xff] %v454_v57 }
  0x3f   : > { %457 = vst [vmem:[%s12924_s24 + $0x3a0] sm:$0xff] %v456_v58  ;;  %459 = vst [vmem:[%s12924_s24 + $0x3b0] sm:$0xff] %v458_v59  ;;  %v9573_v61 = vld [vmem:[%s12919_s23 + $0x18] sm:$0x3]  ;;  %v9575_v62 = vld [vmem:[%s12919_s23 + $0x28] sm:$0x3] }
  0x40   : > { %9572 = vst [vmem:[%s12924_s24 + $0x8] sm:$0x3] %v9571_v60  ;;  %9574 = vst [vmem:[%s12924_s24 + $0x18] sm:$0x3] %v9573_v61  ;;  %v9577_v63 = vld [vmem:[%s12919_s23 + $0x38] sm:$0x3] }
  0x41   : > { %9576 = vst [vmem:[%s12924_s24 + $0x28] sm:$0x3] %v9575_v62  ;;  %v9579_v0 = vld [vmem:[%s12919_s23 + $0x48] sm:$0x3]  ;;  %v9581_v1 = vld [vmem:[%s12919_s23 + $0x58] sm:$0x3] }
  0x42   : > { %9578 = vst [vmem:[%s12924_s24 + $0x38] sm:$0x3] %v9577_v63  ;;  %9580 = vst [vmem:[%s12924_s24 + $0x48] sm:$0x3] %v9579_v0  ;;  %v9583_v2 = vld [vmem:[%s12919_s23 + $0x68] sm:$0x3] }
  0x43   : > { %9582 = vst [vmem:[%s12924_s24 + $0x58] sm:$0x3] %v9581_v1  ;;  %v9585_v3 = vld [vmem:[%s12919_s23 + $0x78] sm:$0x3]  ;;  %v9587_v4 = vld [vmem:[%s12919_s23 + $0x88] sm:$0x3] }
  0x44   : > { %9584 = vst [vmem:[%s12924_s24 + $0x68] sm:$0x3] %v9583_v2  ;;  %9586 = vst [vmem:[%s12924_s24 + $0x78] sm:$0x3] %v9585_v3  ;;  %v9589_v5 = vld [vmem:[%s12919_s23 + $0x98] sm:$0x3] }
  0x45   : > { %9588 = vst [vmem:[%s12924_s24 + $0x88] sm:$0x3] %v9587_v4  ;;  %v9591_v6 = vld [vmem:[%s12919_s23 + $0xa8] sm:$0x3]  ;;  %v9593_v7 = vld [vmem:[%s12919_s23 + $0xb8] sm:$0x3] }
  0x46   : > { %9590 = vst [vmem:[%s12924_s24 + $0x98] sm:$0x3] %v9589_v5  ;;  %9592 = vst [vmem:[%s12924_s24 + $0xa8] sm:$0x3] %v9591_v6  ;;  %v9595_v8 = vld [vmem:[%s12919_s23 + $0xc8] sm:$0x3] }
  0x47   : > { %9594 = vst [vmem:[%s12924_s24 + $0xb8] sm:$0x3] %v9593_v7  ;;  %v9597_v9 = vld [vmem:[%s12919_s23 + $0xd8] sm:$0x3]  ;;  %v9599_v10 = vld [vmem:[%s12919_s23 + $0xe8] sm:$0x3] }
  0x48   : > { %9596 = vst [vmem:[%s12924_s24 + $0xc8] sm:$0x3] %v9595_v8  ;;  %9598 = vst [vmem:[%s12924_s24 + $0xd8] sm:$0x3] %v9597_v9  ;;  %v9601_v11 = vld [vmem:[%s12919_s23 + $0xf8] sm:$0x3] }
  0x49   : > { %9600 = vst [vmem:[%s12924_s24 + $0xe8] sm:$0x3] %v9599_v10  ;;  %v9603_v12 = vld [vmem:[%s12919_s23 + $0x108] sm:$0x3]  ;;  %v9605_v13 = vld [vmem:[%s12919_s23 + $0x118] sm:$0x3] }
  0x4a   : > { %9602 = vst [vmem:[%s12924_s24 + $0xf8] sm:$0x3] %v9601_v11  ;;  %9604 = vst [vmem:[%s12924_s24 + $0x108] sm:$0x3] %v9603_v12  ;;  %v9607_v14 = vld [vmem:[%s12919_s23 + $0x128] sm:$0x3] }
  0x4b   : > { %9606 = vst [vmem:[%s12924_s24 + $0x118] sm:$0x3] %v9605_v13  ;;  %v9609_v15 = vld [vmem:[%s12919_s23 + $0x138] sm:$0x3]  ;;  %v9611_v16 = vld [vmem:[%s12919_s23 + $0x148] sm:$0x3] }
  0x4c   : > { %9608 = vst [vmem:[%s12924_s24 + $0x128] sm:$0x3] %v9607_v14  ;;  %9610 = vst [vmem:[%s12924_s24 + $0x138] sm:$0x3] %v9609_v15  ;;  %v9613_v17 = vld [vmem:[%s12919_s23 + $0x158] sm:$0x3] }
  0x4d   : > { %9612 = vst [vmem:[%s12924_s24 + $0x148] sm:$0x3] %v9611_v16  ;;  %v9615_v18 = vld [vmem:[%s12919_s23 + $0x168] sm:$0x3]  ;;  %v9617_v19 = vld [vmem:[%s12919_s23 + $0x178] sm:$0x3] }
  0x4e   : > { %9614 = vst [vmem:[%s12924_s24 + $0x158] sm:$0x3] %v9613_v17  ;;  %9616 = vst [vmem:[%s12924_s24 + $0x168] sm:$0x3] %v9615_v18  ;;  %v9619_v20 = vld [vmem:[%s12919_s23 + $0x188] sm:$0x3] }
  0x4f   : > { %9618 = vst [vmem:[%s12924_s24 + $0x178] sm:$0x3] %v9617_v19  ;;  %v9621_v21 = vld [vmem:[%s12919_s23 + $0x198] sm:$0x3]  ;;  %v9623_v22 = vld [vmem:[%s12919_s23 + $0x1a8] sm:$0x3] }
  0x50   : > { %9620 = vst [vmem:[%s12924_s24 + $0x188] sm:$0x3] %v9619_v20  ;;  %9622 = vst [vmem:[%s12924_s24 + $0x198] sm:$0x3] %v9621_v21  ;;  %v9625_v23 = vld [vmem:[%s12919_s23 + $0x1b8] sm:$0x3] }
  0x51   : > { %9624 = vst [vmem:[%s12924_s24 + $0x1a8] sm:$0x3] %v9623_v22  ;;  %v9627_v24 = vld [vmem:[%s12919_s23 + $0x1c8] sm:$0x3]  ;;  %v9629_v25 = vld [vmem:[%s12919_s23 + $0x1d8] sm:$0x3] }
  0x52   : > { %9626 = vst [vmem:[%s12924_s24 + $0x1b8] sm:$0x3] %v9625_v23  ;;  %9628 = vst [vmem:[%s12924_s24 + $0x1c8] sm:$0x3] %v9627_v24  ;;  %v9631_v26 = vld [vmem:[%s12919_s23 + $0x1e8] sm:$0x3] }
  0x53   : > { %9630 = vst [vmem:[%s12924_s24 + $0x1d8] sm:$0x3] %v9629_v25  ;;  %v9633_v27 = vld [vmem:[%s12919_s23 + $0x1f8] sm:$0x3]  ;;  %v9635_v28 = vld [vmem:[%s12919_s23 + $0x208] sm:$0x3] }
  0x54   : > { %9632 = vst [vmem:[%s12924_s24 + $0x1e8] sm:$0x3] %v9631_v26  ;;  %9634 = vst [vmem:[%s12924_s24 + $0x1f8] sm:$0x3] %v9633_v27  ;;  %v9637_v29 = vld [vmem:[%s12919_s23 + $0x218] sm:$0x3] }
  0x55   : > { %9636 = vst [vmem:[%s12924_s24 + $0x208] sm:$0x3] %v9635_v28  ;;  %v9639_v30 = vld [vmem:[%s12919_s23 + $0x228] sm:$0x3]  ;;  %v9641_v31 = vld [vmem:[%s12919_s23 + $0x238] sm:$0x3] }
  0x56   : > { %9638 = vst [vmem:[%s12924_s24 + $0x218] sm:$0x3] %v9637_v29  ;;  %9640 = vst [vmem:[%s12924_s24 + $0x228] sm:$0x3] %v9639_v30  ;;  %v9643_v32 = vld [vmem:[%s12919_s23 + $0x248] sm:$0x3] }
  0x57   : > { %9642 = vst [vmem:[%s12924_s24 + $0x238] sm:$0x3] %v9641_v31  ;;  %v9645_v33 = vld [vmem:[%s12919_s23 + $0x258] sm:$0x3]  ;;  %v9647_v34 = vld [vmem:[%s12919_s23 + $0x268] sm:$0x3] }
  0x58   : > { %9644 = vst [vmem:[%s12924_s24 + $0x248] sm:$0x3] %v9643_v32  ;;  %9646 = vst [vmem:[%s12924_s24 + $0x258] sm:$0x3] %v9645_v33  ;;  %v9649_v35 = vld [vmem:[%s12919_s23 + $0x278] sm:$0x3] }
  0x59   : > { %9648 = vst [vmem:[%s12924_s24 + $0x268] sm:$0x3] %v9647_v34  ;;  %v9651_v36 = vld [vmem:[%s12919_s23 + $0x288] sm:$0x3]  ;;  %v9653_v37 = vld [vmem:[%s12919_s23 + $0x298] sm:$0x3] }
  0x5a   : > { %9650 = vst [vmem:[%s12924_s24 + $0x278] sm:$0x3] %v9649_v35  ;;  %9652 = vst [vmem:[%s12924_s24 + $0x288] sm:$0x3] %v9651_v36  ;;  %v9655_v38 = vld [vmem:[%s12919_s23 + $0x2a8] sm:$0x3] }
  0x5b   : > { %9654 = vst [vmem:[%s12924_s24 + $0x298] sm:$0x3] %v9653_v37  ;;  %v9657_v39 = vld [vmem:[%s12919_s23 + $0x2b8] sm:$0x3]  ;;  %v9659_v40 = vld [vmem:[%s12919_s23 + $0x2c8] sm:$0x3] }
  0x5c   : > { %9656 = vst [vmem:[%s12924_s24 + $0x2a8] sm:$0x3] %v9655_v38  ;;  %9658 = vst [vmem:[%s12924_s24 + $0x2b8] sm:$0x3] %v9657_v39  ;;  %v9661_v41 = vld [vmem:[%s12919_s23 + $0x2d8] sm:$0x3] }
  0x5d   : > { %9660 = vst [vmem:[%s12924_s24 + $0x2c8] sm:$0x3] %v9659_v40  ;;  %v9663_v42 = vld [vmem:[%s12919_s23 + $0x2e8] sm:$0x3]  ;;  %v9665_v43 = vld [vmem:[%s12919_s23 + $0x2f8] sm:$0x3] }
  0x5e   : > { %9662 = vst [vmem:[%s12924_s24 + $0x2d8] sm:$0x3] %v9661_v41  ;;  %9664 = vst [vmem:[%s12924_s24 + $0x2e8] sm:$0x3] %v9663_v42  ;;  %v9667_v44 = vld [vmem:[%s12919_s23 + $0x308] sm:$0x3] }
  0x5f   : > { %9666 = vst [vmem:[%s12924_s24 + $0x2f8] sm:$0x3] %v9665_v43  ;;  %v9669_v45 = vld [vmem:[%s12919_s23 + $0x318] sm:$0x3]  ;;  %v9671_v46 = vld [vmem:[%s12919_s23 + $0x328] sm:$0x3] }
  0x60   : > { %9668 = vst [vmem:[%s12924_s24 + $0x308] sm:$0x3] %v9667_v44  ;;  %9670 = vst [vmem:[%s12924_s24 + $0x318] sm:$0x3] %v9669_v45  ;;  %v9673_v47 = vld [vmem:[%s12919_s23 + $0x338] sm:$0x3] }
  0x61   : > { %9672 = vst [vmem:[%s12924_s24 + $0x328] sm:$0x3] %v9671_v46  ;;  %v9675_v48 = vld [vmem:[%s12919_s23 + $0x348] sm:$0x3]  ;;  %v9677_v49 = vld [vmem:[%s12919_s23 + $0x358] sm:$0x3] }
  0x62   : > { %9674 = vst [vmem:[%s12924_s24 + $0x338] sm:$0x3] %v9673_v47  ;;  %9676 = vst [vmem:[%s12924_s24 + $0x348] sm:$0x3] %v9675_v48  ;;  %v9679_v50 = vld [vmem:[%s12919_s23 + $0x368] sm:$0x3] }
  0x63   : > { %9678 = vst [vmem:[%s12924_s24 + $0x358] sm:$0x3] %v9677_v49  ;;  %v9681_v51 = vld [vmem:[%s12919_s23 + $0x378] sm:$0x3]  ;;  %v9683_v52 = vld [vmem:[%s12919_s23 + $0x388] sm:$0x3] }
  0x64   : > { %9680 = vst [vmem:[%s12924_s24 + $0x368] sm:$0x3] %v9679_v50  ;;  %9682 = vst [vmem:[%s12924_s24 + $0x378] sm:$0x3] %v9681_v51  ;;  %v9685_v53 = vld [vmem:[%s12919_s23 + $0x398] sm:$0x3] }
  0x65   : > { %9684 = vst [vmem:[%s12924_s24 + $0x388] sm:$0x3] %v9683_v52  ;;  %v9687_v54 = vld [vmem:[%s12919_s23 + $0x3a8] sm:$0x3]  ;;  %v9689_v55 = vld [vmem:[%s12919_s23 + $0x3b8] sm:$0x3] }
  0x66   : > { %9686 = vst [vmem:[%s12924_s24 + $0x398] sm:$0x3] %v9685_v53  ;;  %9688 = vst [vmem:[%s12924_s24 + $0x3a8] sm:$0x3] %v9687_v54 }
  0x67   : > { %9690 = vst [vmem:[%s12924_s24 + $0x3b8] sm:$0x3] %v9689_v55 }
  0x68   : > { %592 = vsyncadd %s184_s25, 9600 }
  0x69 PF: > { %s593_s27 = sadd.s32 1, %s12817_s12 }
  0x6a   : > { %p9691_p10 = scmp.ge.s32.totalorder %s593_s27, 2 }
  0x6b   : > { %s598_s28 = ssub.s32 (!%p9691_p10), 1, %s20332_s9  ;;  %s9445_s29 = smul.u32 (!%p9691_p10), 640, %s12817_s12 }
  0x6c   : > { %597 = sbr.rel (%p9691_p10) target bundleno = 185 (0xb9), region = 69  ;;  %s606_s11 = scalar_lea.sflag (!%p9691_p10), [#allocation3], %s598_s28 }
  0x6d   : > { %s9446_s30 = smul.u32 (!%p9691_p10), 1600, %s12821_s13 }
  0x6e   : > { %s604_s4 = smul.u32 (!%p9691_p10), 960, %s598_s28 }
  0x6f   : > { %s9447_s5 = sadd.s32 (!%p9691_p10), %s9446_s30, %s9445_s29 }
  0x70   : > { %s13173_s10 = scalar_lea.vmem (!%p9691_p10), %s19936_s0, %s9447_s5  ;;  %s13178_s13 = scalar_lea.vmem (!%p9691_p10), [#allocation2], %s604_s4 }
  0x71   : > { %v9693_v56 = vld [vmem:[%s13173_s10 + $0x280] sm:$0xff] (!%p9691_p10)  ;;  %v9694_v57 = vld [vmem:[%s13173_s10 + $0x290] sm:$0xff] (!%p9691_p10)  ;;  %v9753_v52 = vld [vmem:[%s13173_s10 + $0x288] sm:$0x3] (!%p9691_p10) }
  0x72   : > { %v9695_v58 = vld [vmem:[%s13173_s10 + $0x2a0] sm:$0xff] (!%p9691_p10)  ;;  %763 = vst [vmem:[%s13178_s13] sm:$0xff] (!%p9691_p10), %v9693_v56  ;;  %765 = vst [vmem:[%s13178_s13 + $0x10] sm:$0xff] (!%p9691_p10), %v9694_v57  ;;  %v9696_v59 = vld [vmem:[%s13173_s10 + $0x2b0] sm:$0xff] (!%p9691_p10) }
  0x73   : > { %767 = vst [vmem:[%s13178_s13 + $0x20] sm:$0xff] %v9695_v58  ;;  %v9697_v60 = vld [vmem:[%s13173_s10 + $0x2c0] sm:$0xff]  ;;  %v9698_v61 = vld [vmem:[%s13173_s10 + $0x2d0] sm:$0xff]  ;;  %769 = vst [vmem:[%s13178_s13 + $0x30] sm:$0xff] %v9696_v59 }
  0x74   : > { %771 = vst [vmem:[%s13178_s13 + $0x40] sm:$0xff] %v9697_v60  ;;  %773 = vst [vmem:[%s13178_s13 + $0x50] sm:$0xff] %v9698_v61  ;;  %v9699_v62 = vld [vmem:[%s13173_s10 + $0x2e0] sm:$0xff]  ;;  %v9700_v63 = vld [vmem:[%s13173_s10 + $0x2f0] sm:$0xff] }
  0x75   : > { %v9701_v0 = vld [vmem:[%s13173_s10 + $0x300] sm:$0xff]  ;;  %775 = vst [vmem:[%s13178_s13 + $0x60] sm:$0xff] %v9699_v62  ;;  %777 = vst [vmem:[%s13178_s13 + $0x70] sm:$0xff] %v9700_v63  ;;  %v9702_v1 = vld [vmem:[%s13173_s10 + $0x310] sm:$0xff] }
  0x76   : > { %779 = vst [vmem:[%s13178_s13 + $0x80] sm:$0xff] %v9701_v0  ;;  %v9703_v2 = vld [vmem:[%s13173_s10 + $0x320] sm:$0xff]  ;;  %v9704_v3 = vld [vmem:[%s13173_s10 + $0x330] sm:$0xff]  ;;  %781 = vst [vmem:[%s13178_s13 + $0x90] sm:$0xff] %v9702_v1 }
  0x77   : > { %783 = vst [vmem:[%s13178_s13 + $0xa0] sm:$0xff] %v9703_v2  ;;  %785 = vst [vmem:[%s13178_s13 + $0xb0] sm:$0xff] %v9704_v3  ;;  %v9705_v4 = vld [vmem:[%s13173_s10 + $0x340] sm:$0xff]  ;;  %v9706_v5 = vld [vmem:[%s13173_s10 + $0x350] sm:$0xff] }
  0x78   : > { %v9707_v6 = vld [vmem:[%s13173_s10 + $0x360] sm:$0xff]  ;;  %787 = vst [vmem:[%s13178_s13 + $0xc0] sm:$0xff] %v9705_v4  ;;  %789 = vst [vmem:[%s13178_s13 + $0xd0] sm:$0xff] %v9706_v5  ;;  %v9708_v7 = vld [vmem:[%s13173_s10 + $0x370] sm:$0xff] }
  0x79   : > { %791 = vst [vmem:[%s13178_s13 + $0xe0] sm:$0xff] %v9707_v6  ;;  %v9709_v8 = vld [vmem:[%s13173_s10 + $0x380] sm:$0xff]  ;;  %v9710_v9 = vld [vmem:[%s13173_s10 + $0x390] sm:$0xff]  ;;  %793 = vst [vmem:[%s13178_s13 + $0xf0] sm:$0xff] %v9708_v7 }
  0x7a   : > { %795 = vst [vmem:[%s13178_s13 + $0x100] sm:$0xff] %v9709_v8  ;;  %797 = vst [vmem:[%s13178_s13 + $0x110] sm:$0xff] %v9710_v9  ;;  %v9711_v10 = vld [vmem:[%s13173_s10 + $0x3a0] sm:$0xff]  ;;  %v9712_v11 = vld [vmem:[%s13173_s10 + $0x3b0] sm:$0xff] }
  0x7b   : > { %v9713_v12 = vld [vmem:[%s13173_s10 + $0x3c0] sm:$0xff]  ;;  %799 = vst [vmem:[%s13178_s13 + $0x120] sm:$0xff] %v9711_v10  ;;  %801 = vst [vmem:[%s13178_s13 + $0x130] sm:$0xff] %v9712_v11  ;;  %v9714_v13 = vld [vmem:[%s13173_s10 + $0x3d0] sm:$0xff] }
  0x7c   : > { %803 = vst [vmem:[%s13178_s13 + $0x140] sm:$0xff] %v9713_v12  ;;  %v9715_v14 = vld [vmem:[%s13173_s10 + $0x3e0] sm:$0xff]  ;;  %v9716_v15 = vld [vmem:[%s13173_s10 + $0x3f0] sm:$0xff]  ;;  %805 = vst [vmem:[%s13178_s13 + $0x150] sm:$0xff] %v9714_v13 }
  0x7d   : > { %807 = vst [vmem:[%s13178_s13 + $0x160] sm:$0xff] %v9715_v14  ;;  %809 = vst [vmem:[%s13178_s13 + $0x170] sm:$0xff] %v9716_v15  ;;  %v9717_v16 = vld [vmem:[%s13173_s10 + $0x400] sm:$0xff]  ;;  %v9718_v17 = vld [vmem:[%s13173_s10 + $0x410] sm:$0xff] }
  0x7e   : > { %v9719_v18 = vld [vmem:[%s13173_s10 + $0x420] sm:$0xff]  ;;  %811 = vst [vmem:[%s13178_s13 + $0x180] sm:$0xff] %v9717_v16  ;;  %813 = vst [vmem:[%s13178_s13 + $0x190] sm:$0xff] %v9718_v17  ;;  %v9720_v19 = vld [vmem:[%s13173_s10 + $0x430] sm:$0xff] }
  0x7f   : > { %815 = vst [vmem:[%s13178_s13 + $0x1a0] sm:$0xff] %v9719_v18  ;;  %v9721_v20 = vld [vmem:[%s13173_s10 + $0x440] sm:$0xff]  ;;  %v9722_v21 = vld [vmem:[%s13173_s10 + $0x450] sm:$0xff]  ;;  %817 = vst [vmem:[%s13178_s13 + $0x1b0] sm:$0xff] %v9720_v19 }
  0x80   : > { %819 = vst [vmem:[%s13178_s13 + $0x1c0] sm:$0xff] %v9721_v20  ;;  %821 = vst [vmem:[%s13178_s13 + $0x1d0] sm:$0xff] %v9722_v21  ;;  %v9723_v22 = vld [vmem:[%s13173_s10 + $0x460] sm:$0xff]  ;;  %v9724_v23 = vld [vmem:[%s13173_s10 + $0x470] sm:$0xff] }
  0x81   : > { %v9725_v24 = vld [vmem:[%s13173_s10 + $0x480] sm:$0xff]  ;;  %823 = vst [vmem:[%s13178_s13 + $0x1e0] sm:$0xff] %v9723_v22  ;;  %825 = vst [vmem:[%s13178_s13 + $0x1f0] sm:$0xff] %v9724_v23  ;;  %v9726_v25 = vld [vmem:[%s13173_s10 + $0x490] sm:$0xff] }
  0x82   : > { %827 = vst [vmem:[%s13178_s13 + $0x200] sm:$0xff] %v9725_v24  ;;  %v9727_v26 = vld [vmem:[%s13173_s10 + $0x4a0] sm:$0xff]  ;;  %v9728_v27 = vld [vmem:[%s13173_s10 + $0x4b0] sm:$0xff]  ;;  %829 = vst [vmem:[%s13178_s13 + $0x210] sm:$0xff] %v9726_v25 }
  0x83   : > { %831 = vst [vmem:[%s13178_s13 + $0x220] sm:$0xff] %v9727_v26  ;;  %833 = vst [vmem:[%s13178_s13 + $0x230] sm:$0xff] %v9728_v27  ;;  %v9729_v28 = vld [vmem:[%s13173_s10 + $0x4c0] sm:$0xff]  ;;  %v9730_v29 = vld [vmem:[%s13173_s10 + $0x4d0] sm:$0xff] }
  0x84   : > { %v9731_v30 = vld [vmem:[%s13173_s10 + $0x4e0] sm:$0xff]  ;;  %835 = vst [vmem:[%s13178_s13 + $0x240] sm:$0xff] %v9729_v28  ;;  %837 = vst [vmem:[%s13178_s13 + $0x250] sm:$0xff] %v9730_v29  ;;  %v9732_v31 = vld [vmem:[%s13173_s10 + $0x4f0] sm:$0xff] }
  0x85   : > { %839 = vst [vmem:[%s13178_s13 + $0x260] sm:$0xff] %v9731_v30  ;;  %v9733_v32 = vld [vmem:[%s13173_s10 + $0x500] sm:$0xff]  ;;  %v9734_v33 = vld [vmem:[%s13173_s10 + $0x510] sm:$0xff]  ;;  %841 = vst [vmem:[%s13178_s13 + $0x270] sm:$0xff] %v9732_v31 }
  0x86   : > { %843 = vst [vmem:[%s13178_s13 + $0x280] sm:$0xff] %v9733_v32  ;;  %845 = vst [vmem:[%s13178_s13 + $0x290] sm:$0xff] %v9734_v33  ;;  %v9735_v34 = vld [vmem:[%s13173_s10 + $0x520] sm:$0xff]  ;;  %v9736_v35 = vld [vmem:[%s13173_s10 + $0x530] sm:$0xff] }
  0x87   : > { %v9737_v36 = vld [vmem:[%s13173_s10 + $0x540] sm:$0xff]  ;;  %847 = vst [vmem:[%s13178_s13 + $0x2a0] sm:$0xff] %v9735_v34  ;;  %849 = vst [vmem:[%s13178_s13 + $0x2b0] sm:$0xff] %v9736_v35  ;;  %v9738_v37 = vld [vmem:[%s13173_s10 + $0x550] sm:$0xff] }
  0x88   : > { %851 = vst [vmem:[%s13178_s13 + $0x2c0] sm:$0xff] %v9737_v36  ;;  %v9739_v38 = vld [vmem:[%s13173_s10 + $0x560] sm:$0xff]  ;;  %v9740_v39 = vld [vmem:[%s13173_s10 + $0x570] sm:$0xff]  ;;  %853 = vst [vmem:[%s13178_s13 + $0x2d0] sm:$0xff] %v9738_v37 }
  0x89   : > { %855 = vst [vmem:[%s13178_s13 + $0x2e0] sm:$0xff] %v9739_v38  ;;  %857 = vst [vmem:[%s13178_s13 + $0x2f0] sm:$0xff] %v9740_v39  ;;  %v9741_v40 = vld [vmem:[%s13173_s10 + $0x580] sm:$0xff]  ;;  %v9742_v41 = vld [vmem:[%s13173_s10 + $0x590] sm:$0xff] }
  0x8a   : > { %v9743_v42 = vld [vmem:[%s13173_s10 + $0x5a0] sm:$0xff]  ;;  %859 = vst [vmem:[%s13178_s13 + $0x300] sm:$0xff] %v9741_v40  ;;  %861 = vst [vmem:[%s13178_s13 + $0x310] sm:$0xff] %v9742_v41  ;;  %v9744_v43 = vld [vmem:[%s13173_s10 + $0x5b0] sm:$0xff] }
  0x8b   : > { %863 = vst [vmem:[%s13178_s13 + $0x320] sm:$0xff] %v9743_v42  ;;  %v9745_v44 = vld [vmem:[%s13173_s10 + $0x5c0] sm:$0xff]  ;;  %v9746_v45 = vld [vmem:[%s13173_s10 + $0x5d0] sm:$0xff]  ;;  %865 = vst [vmem:[%s13178_s13 + $0x330] sm:$0xff] %v9744_v43 }
  0x8c   : > { %867 = vst [vmem:[%s13178_s13 + $0x340] sm:$0xff] %v9745_v44  ;;  %869 = vst [vmem:[%s13178_s13 + $0x350] sm:$0xff] %v9746_v45  ;;  %v9747_v46 = vld [vmem:[%s13173_s10 + $0x5e0] sm:$0xff]  ;;  %v9748_v47 = vld [vmem:[%s13173_s10 + $0x5f0] sm:$0xff] }
  0x8d   : > { %v9749_v48 = vld [vmem:[%s13173_s10 + $0x600] sm:$0xff]  ;;  %871 = vst [vmem:[%s13178_s13 + $0x360] sm:$0xff] %v9747_v46  ;;  %873 = vst [vmem:[%s13178_s13 + $0x370] sm:$0xff] %v9748_v47  ;;  %v9750_v49 = vld [vmem:[%s13173_s10 + $0x610] sm:$0xff] }
  0x8e   : > { %875 = vst [vmem:[%s13178_s13 + $0x380] sm:$0xff] %v9749_v48  ;;  %v9751_v50 = vld [vmem:[%s13173_s10 + $0x620] sm:$0xff]  ;;  %v9752_v51 = vld [vmem:[%s13173_s10 + $0x630] sm:$0xff]  ;;  %877 = vst [vmem:[%s13178_s13 + $0x390] sm:$0xff] %v9750_v49 }
  0x8f   : > { %879 = vst [vmem:[%s13178_s13 + $0x3a0] sm:$0xff] %v9751_v50  ;;  %881 = vst [vmem:[%s13178_s13 + $0x3b0] sm:$0xff] %v9752_v51  ;;  %v9755_v53 = vld [vmem:[%s13173_s10 + $0x298] sm:$0x3]  ;;  %v9757_v54 = vld [vmem:[%s13173_s10 + $0x2a8] sm:$0x3] }
  0x90   : > { %9754 = vst [vmem:[%s13178_s13 + $0x8] sm:$0x3] %v9753_v52  ;;  %9756 = vst [vmem:[%s13178_s13 + $0x18] sm:$0x3] %v9755_v53  ;;  %v9759_v55 = vld [vmem:[%s13173_s10 + $0x2b8] sm:$0x3] }
  0x91   : > { %9758 = vst [vmem:[%s13178_s13 + $0x28] sm:$0x3] %v9757_v54  ;;  %v9761_v56 = vld [vmem:[%s13173_s10 + $0x2c8] sm:$0x3]  ;;  %v9763_v57 = vld [vmem:[%s13173_s10 + $0x2d8] sm:$0x3] }
  0x92   : > { %9760 = vst [vmem:[%s13178_s13 + $0x38] sm:$0x3] %v9759_v55  ;;  %9762 = vst [vmem:[%s13178_s13 + $0x48] sm:$0x3] %v9761_v56  ;;  %v9765_v58 = vld [vmem:[%s13173_s10 + $0x2e8] sm:$0x3] }
  0x93   : > { %9764 = vst [vmem:[%s13178_s13 + $0x58] sm:$0x3] %v9763_v57  ;;  %v9767_v59 = vld [vmem:[%s13173_s10 + $0x2f8] sm:$0x3]  ;;  %v9769_v60 = vld [vmem:[%s13173_s10 + $0x308] sm:$0x3] }
  0x94   : > { %9766 = vst [vmem:[%s13178_s13 + $0x68] sm:$0x3] %v9765_v58  ;;  %9768 = vst [vmem:[%s13178_s13 + $0x78] sm:$0x3] %v9767_v59  ;;  %v9771_v61 = vld [vmem:[%s13173_s10 + $0x318] sm:$0x3] }
  0x95   : > { %9770 = vst [vmem:[%s13178_s13 + $0x88] sm:$0x3] %v9769_v60  ;;  %v9773_v62 = vld [vmem:[%s13173_s10 + $0x328] sm:$0x3]  ;;  %v9775_v63 = vld [vmem:[%s13173_s10 + $0x338] sm:$0x3] }
  0x96   : > { %9772 = vst [vmem:[%s13178_s13 + $0x98] sm:$0x3] %v9771_v61  ;;  %9774 = vst [vmem:[%s13178_s13 + $0xa8] sm:$0x3] %v9773_v62  ;;  %v9777_v0 = vld [vmem:[%s13173_s10 + $0x348] sm:$0x3] }
  0x97   : > { %9776 = vst [vmem:[%s13178_s13 + $0xb8] sm:$0x3] %v9775_v63  ;;  %v9779_v1 = vld [vmem:[%s13173_s10 + $0x358] sm:$0x3]  ;;  %v9781_v2 = vld [vmem:[%s13173_s10 + $0x368] sm:$0x3] }
  0x98   : > { %9778 = vst [vmem:[%s13178_s13 + $0xc8] sm:$0x3] %v9777_v0  ;;  %9780 = vst [vmem:[%s13178_s13 + $0xd8] sm:$0x3] %v9779_v1  ;;  %v9783_v3 = vld [vmem:[%s13173_s10 + $0x378] sm:$0x3] }
  0x99   : > { %9782 = vst [vmem:[%s13178_s13 + $0xe8] sm:$0x3] %v9781_v2  ;;  %v9785_v4 = vld [vmem:[%s13173_s10 + $0x388] sm:$0x3]  ;;  %v9787_v5 = vld [vmem:[%s13173_s10 + $0x398] sm:$0x3] }
  0x9a   : > { %9784 = vst [vmem:[%s13178_s13 + $0xf8] sm:$0x3] %v9783_v3  ;;  %9786 = vst [vmem:[%s13178_s13 + $0x108] sm:$0x3] %v9785_v4  ;;  %v9789_v6 = vld [vmem:[%s13173_s10 + $0x3a8] sm:$0x3] }
  0x9b   : > { %9788 = vst [vmem:[%s13178_s13 + $0x118] sm:$0x3] %v9787_v5  ;;  %v9791_v7 = vld [vmem:[%s13173_s10 + $0x3b8] sm:$0x3]  ;;  %v9793_v8 = vld [vmem:[%s13173_s10 + $0x3c8] sm:$0x3] }
  0x9c   : > { %9790 = vst [vmem:[%s13178_s13 + $0x128] sm:$0x3] %v9789_v6  ;;  %9792 = vst [vmem:[%s13178_s13 + $0x138] sm:$0x3] %v9791_v7  ;;  %v9795_v9 = vld [vmem:[%s13173_s10 + $0x3d8] sm:$0x3] }
  0x9d   : > { %9794 = vst [vmem:[%s13178_s13 + $0x148] sm:$0x3] %v9793_v8  ;;  %v9797_v10 = vld [vmem:[%s13173_s10 + $0x3e8] sm:$0x3]  ;;  %v9799_v11 = vld [vmem:[%s13173_s10 + $0x3f8] sm:$0x3] }
  0x9e   : > { %9796 = vst [vmem:[%s13178_s13 + $0x158] sm:$0x3] %v9795_v9  ;;  %9798 = vst [vmem:[%s13178_s13 + $0x168] sm:$0x3] %v9797_v10  ;;  %v9801_v12 = vld [vmem:[%s13173_s10 + $0x408] sm:$0x3] }
  0x9f   : > { %9800 = vst [vmem:[%s13178_s13 + $0x178] sm:$0x3] %v9799_v11  ;;  %v9803_v13 = vld [vmem:[%s13173_s10 + $0x418] sm:$0x3]  ;;  %v9805_v14 = vld [vmem:[%s13173_s10 + $0x428] sm:$0x3] }
  0xa0   : > { %9802 = vst [vmem:[%s13178_s13 + $0x188] sm:$0x3] %v9801_v12  ;;  %9804 = vst [vmem:[%s13178_s13 + $0x198] sm:$0x3] %v9803_v13  ;;  %v9807_v15 = vld [vmem:[%s13173_s10 + $0x438] sm:$0x3] }
  0xa1   : > { %9806 = vst [vmem:[%s13178_s13 + $0x1a8] sm:$0x3] %v9805_v14  ;;  %v9809_v16 = vld [vmem:[%s13173_s10 + $0x448] sm:$0x3]  ;;  %v9811_v17 = vld [vmem:[%s13173_s10 + $0x458] sm:$0x3] }
  0xa2   : > { %9808 = vst [vmem:[%s13178_s13 + $0x1b8] sm:$0x3] %v9807_v15  ;;  %9810 = vst [vmem:[%s13178_s13 + $0x1c8] sm:$0x3] %v9809_v16  ;;  %v9813_v18 = vld [vmem:[%s13173_s10 + $0x468] sm:$0x3] }
  0xa3   : > { %9812 = vst [vmem:[%s13178_s13 + $0x1d8] sm:$0x3] %v9811_v17  ;;  %v9815_v19 = vld [vmem:[%s13173_s10 + $0x478] sm:$0x3]  ;;  %v9817_v20 = vld [vmem:[%s13173_s10 + $0x488] sm:$0x3] }
  0xa4   : > { %9814 = vst [vmem:[%s13178_s13 + $0x1e8] sm:$0x3] %v9813_v18  ;;  %9816 = vst [vmem:[%s13178_s13 + $0x1f8] sm:$0x3] %v9815_v19  ;;  %v9819_v21 = vld [vmem:[%s13173_s10 + $0x498] sm:$0x3] }
  0xa5   : > { %9818 = vst [vmem:[%s13178_s13 + $0x208] sm:$0x3] %v9817_v20  ;;  %v9821_v22 = vld [vmem:[%s13173_s10 + $0x4a8] sm:$0x3]  ;;  %v9823_v23 = vld [vmem:[%s13173_s10 + $0x4b8] sm:$0x3] }
  0xa6   : > { %9820 = vst [vmem:[%s13178_s13 + $0x218] sm:$0x3] %v9819_v21  ;;  %9822 = vst [vmem:[%s13178_s13 + $0x228] sm:$0x3] %v9821_v22  ;;  %v9825_v24 = vld [vmem:[%s13173_s10 + $0x4c8] sm:$0x3] }
  0xa7   : > { %9824 = vst [vmem:[%s13178_s13 + $0x238] sm:$0x3] %v9823_v23  ;;  %v9827_v25 = vld [vmem:[%s13173_s10 + $0x4d8] sm:$0x3]  ;;  %v9829_v26 = vld [vmem:[%s13173_s10 + $0x4e8] sm:$0x3] }
  0xa8   : > { %9826 = vst [vmem:[%s13178_s13 + $0x248] sm:$0x3] %v9825_v24  ;;  %9828 = vst [vmem:[%s13178_s13 + $0x258] sm:$0x3] %v9827_v25  ;;  %v9831_v27 = vld [vmem:[%s13173_s10 + $0x4f8] sm:$0x3] }
  0xa9   : > { %9830 = vst [vmem:[%s13178_s13 + $0x268] sm:$0x3] %v9829_v26  ;;  %v9833_v28 = vld [vmem:[%s13173_s10 + $0x508] sm:$0x3]  ;;  %v9835_v29 = vld [vmem:[%s13173_s10 + $0x518] sm:$0x3] }
  0xaa   : > { %9832 = vst [vmem:[%s13178_s13 + $0x278] sm:$0x3] %v9831_v27  ;;  %9834 = vst [vmem:[%s13178_s13 + $0x288] sm:$0x3] %v9833_v28  ;;  %v9837_v30 = vld [vmem:[%s13173_s10 + $0x528] sm:$0x3] }
  0xab   : > { %9836 = vst [vmem:[%s13178_s13 + $0x298] sm:$0x3] %v9835_v29  ;;  %v9839_v31 = vld [vmem:[%s13173_s10 + $0x538] sm:$0x3]  ;;  %v9841_v32 = vld [vmem:[%s13173_s10 + $0x548] sm:$0x3] }
  0xac   : > { %9838 = vst [vmem:[%s13178_s13 + $0x2a8] sm:$0x3] %v9837_v30  ;;  %9840 = vst [vmem:[%s13178_s13 + $0x2b8] sm:$0x3] %v9839_v31  ;;  %v9843_v33 = vld [vmem:[%s13173_s10 + $0x558] sm:$0x3] }
  0xad   : > { %9842 = vst [vmem:[%s13178_s13 + $0x2c8] sm:$0x3] %v9841_v32  ;;  %v9845_v34 = vld [vmem:[%s13173_s10 + $0x568] sm:$0x3]  ;;  %v9847_v35 = vld [vmem:[%s13173_s10 + $0x578] sm:$0x3] }
  0xae   : > { %9844 = vst [vmem:[%s13178_s13 + $0x2d8] sm:$0x3] %v9843_v33  ;;  %9846 = vst [vmem:[%s13178_s13 + $0x2e8] sm:$0x3] %v9845_v34  ;;  %v9849_v36 = vld [vmem:[%s13173_s10 + $0x588] sm:$0x3] }
  0xaf   : > { %9848 = vst [vmem:[%s13178_s13 + $0x2f8] sm:$0x3] %v9847_v35  ;;  %v9851_v37 = vld [vmem:[%s13173_s10 + $0x598] sm:$0x3]  ;;  %v9853_v38 = vld [vmem:[%s13173_s10 + $0x5a8] sm:$0x3] }
  0xb0   : > { %9850 = vst [vmem:[%s13178_s13 + $0x308] sm:$0x3] %v9849_v36  ;;  %9852 = vst [vmem:[%s13178_s13 + $0x318] sm:$0x3] %v9851_v37  ;;  %v9855_v39 = vld [vmem:[%s13173_s10 + $0x5b8] sm:$0x3] }
  0xb1   : > { %9854 = vst [vmem:[%s13178_s13 + $0x328] sm:$0x3] %v9853_v38  ;;  %v9857_v40 = vld [vmem:[%s13173_s10 + $0x5c8] sm:$0x3]  ;;  %v9859_v41 = vld [vmem:[%s13173_s10 + $0x5d8] sm:$0x3] }
  0xb2   : > { %9856 = vst [vmem:[%s13178_s13 + $0x338] sm:$0x3] %v9855_v39  ;;  %9858 = vst [vmem:[%s13178_s13 + $0x348] sm:$0x3] %v9857_v40  ;;  %v9861_v42 = vld [vmem:[%s13173_s10 + $0x5e8] sm:$0x3] }
  0xb3   : > { %9860 = vst [vmem:[%s13178_s13 + $0x358] sm:$0x3] %v9859_v41  ;;  %v9863_v43 = vld [vmem:[%s13173_s10 + $0x5f8] sm:$0x3]  ;;  %v9865_v44 = vld [vmem:[%s13173_s10 + $0x608] sm:$0x3] }
  0xb4   : > { %9862 = vst [vmem:[%s13178_s13 + $0x368] sm:$0x3] %v9861_v42  ;;  %9864 = vst [vmem:[%s13178_s13 + $0x378] sm:$0x3] %v9863_v43  ;;  %v9867_v45 = vld [vmem:[%s13173_s10 + $0x618] sm:$0x3] }
  0xb5   : > { %9866 = vst [vmem:[%s13178_s13 + $0x388] sm:$0x3] %v9865_v44  ;;  %v9869_v46 = vld [vmem:[%s13173_s10 + $0x628] sm:$0x3]  ;;  %v9871_v47 = vld [vmem:[%s13173_s10 + $0x638] sm:$0x3] }
  0xb6   : > { %9868 = vst [vmem:[%s13178_s13 + $0x398] sm:$0x3] %v9867_v45  ;;  %9870 = vst [vmem:[%s13178_s13 + $0x3a8] sm:$0x3] %v9869_v46 }
  0xb7   : > { %9872 = vst [vmem:[%s13178_s13 + $0x3b8] sm:$0x3] %v9871_v47 }
  0xb8   : > { %1014 = vsyncadd %s606_s11, 9600 }
  0xb9 PF: > { %s1016_s19 = scalar_lea.sflag [#allocation3], %s20332_s9 }
  0xba   : > { %12813 = dma.done.wait %s1016_s19, 9600 }
  0xbb   : > { %12814 = vsyncadd %s1016_s19, 4294957696  ;;  %v19942_v48 = vmov 0.0|0.0   ;;  %v9997_v49 = vld [vmem:[%s19937_s1 + $0x180] sm:$0xff]  ;;  %v9998_v50 = vld [vmem:[%s19937_s1 + $0x188] sm:$0xff]  ;;  %s1022_s22 = smul.u32 960, %s20332_s9  ;;  %vm1281_vm0 = vcmask 1045504  }
  0xbc   : > { %11987 = vmatprep.subr.bf16.mxu0 %v19942_v48  ;;  %v10029_v51 = vld [vmem:[%s19937_s1 + $0x280] sm:$0xff]  ;;  %v11988_v52 = vpack.c.bf16 %v9998_v50, %v9997_v49  ;;  %v10030_v53 = vld [vmem:[%s19937_s1 + $0x288] sm:$0xff]  ;;  %v9999_v54 = vld [vmem:[%s19937_s1 + $0x190] sm:$0xff]  ;;  %vm1152_vm1 = vcmask 1046528   ;;  %vm9350_vm2 = vcmask 1040384  }
  0xbd   : > { %v10000_v55 = vld [vmem:[%s19937_s1 + $0x198] sm:$0xff]  ;;  %v12035_v56 = vpack.c.bf16 %v10030_v53, %v10029_v51  ;;  %v10031_v57 = vld [vmem:[%s19937_s1 + $0x290] sm:$0xff]  ;;  %v10033_v61 = vld [vmem:[%s19937_s1 + $0x2a0] sm:$0xff]  ;;  %s13472_s10 = scalar_lea.vmem [#allocation2], %s1022_s22 }
  0xbe   : > { %v10032_v58 = vld [vmem:[%s19937_s1 + $0x298] sm:$0xff]  ;;  %11989 = vmatpush1.bf16.msra.mxu0 %v11988_v52  ;;  %v11991_v59 = vpack.c.bf16 %v10000_v55, %v9999_v54  ;;  %v10034_v62 = vld [vmem:[%s19937_s1 + $0x2a8] sm:$0xff]  ;;  %v10001_v63 = vld [vmem:[%s19937_s1 + $0x1a0] sm:$0xff] }
  0xbf   : > { %v12039_v60 = vpack.c.bf16 %v10032_v58, %v10031_v57  ;;  %12036 = vmatprep.subr.bf16.mxu1 %v12035_v56  ;;  %11990 = vmatprep.subr.bf16.mxu0 %v19942_v48  ;;  %v10002_v0 = vld [vmem:[%s19937_s1 + $0x1a8] sm:$0xff]  ;;  %v12043_v1 = vpack.c.bf16 %v10034_v62, %v10033_v61  ;;  %v10035_v3 = vld [vmem:[%s19937_s1 + $0x2b0] sm:$0xff]  ;;  %v10036_v4 = vld [vmem:[%s19937_s1 + $0x2b8] sm:$0xff] }
  0xc0   : > { %12038 = vmatpush3.bf16.msra.mxu1 %v12035_v56  ;;  %v11994_v2 = vpack.c.bf16 %v10002_v0, %v10001_v63  ;;  %v10003_v5 = vld [vmem:[%s19937_s1 + $0x1b0] sm:$0xff]  ;;  %v10004_v6 = vld [vmem:[%s19937_s1 + $0x1b8] sm:$0xff]  ;;  %v12047_v7 = vpack.c.bf16 %v10036_v4, %v10035_v3  ;;  %v10037_v10 = vld [vmem:[%s19937_s1 + $0x2c0] sm:$0xff] }
  0xc1   : > { %12040 = vmatprep.subr.bf16.mxu1 %v12039_v60  ;;  %v13475_v8 = vld [vmem:[%s13472_s10 + $0x10] sm:$0xff]  ;;  %v11997_v9 = vpack.c.bf16 %v10004_v6, %v10003_v5  ;;  %v10038_v11 = vld [vmem:[%s19937_s1 + $0x2c8] sm:$0xff]  ;;  %v9934_v12 = vld [vmem:[%s13472_s10 + $0x18] sm:$0x3] }
  0xc2   : > { %11992 = vmatpush1.bf16.msra.mxu0 %v11991_v59  ;;  %v1716_v13 = vrot.slane %v13475_v8, 2  ;;  %v19941_v14 = vrot.slane %v13475_v8, 1  ;;  %v10005_v15 = vld [vmem:[%s19937_s1 + $0x1c0] sm:$0xff]  ;;  %v10006_v16 = vld [vmem:[%s19937_s1 + $0x1c8] sm:$0xff]  ;;  %v1717_v17 = vrot.slane %v9934_v12, 2  ;;  %v1589_v18 = vrot.slane %v9934_v12, 1 }
  0xc3   : > { %11993 = vmatprep.subr.bf16.mxu0 %v19942_v48  ;;  %v12051_v19 = vpack.c.bf16 %v10038_v11, %v10037_v10  ;;  %v12000_v21 = vpack.c.bf16 %v10006_v16, %v10005_v15  ;;  %v10039_v22 = vld [vmem:[%s19937_s1 + $0x2d0] sm:$0xff]  ;;  %v10040_v23 = vld [vmem:[%s19937_s1 + $0x2d8] sm:$0xff]  ;;  %v10041_v29 = vld [vmem:[%s19937_s1 + $0x2e0] sm:$0xff] }
  0xc4   : > { %12042 = vmatpush3.bf16.msra.mxu1 %v12039_v60  ;;  %v1718_v20 = vsel %vm1281_vm0, %v1716_v13, %v1717_v17  ;;  %v1590_v24 = vsel %vm1152_vm1, %v19941_v14, %v1589_v18  ;;  %v10007_v25 = vld [vmem:[%s19937_s1 + $0x1d0] sm:$0xff]  ;;  %v10008_v26 = vld [vmem:[%s19937_s1 + $0x1d8] sm:$0xff]  ;;  %v12055_v27 = vpack.c.bf16 %v10040_v23, %v10039_v22  ;;  %v10042_v30 = vld [vmem:[%s19937_s1 + $0x2e8] sm:$0xff] }
  0xc5   : > { %12044 = vmatprep.subr.bf16.mxu1 %v12043_v1  ;;  %11299 = vmatprep.mubr.f32.mxu1 %v1718_v20  ;;  %v12003_v28 = vpack.c.bf16 %v10008_v26, %v10007_v25  ;;  %v10009_v31 = vld [vmem:[%s19937_s1 + $0x1e0] sm:$0xff]  ;;  %v10010_v32 = vld [vmem:[%s19937_s1 + $0x1e8] sm:$0xff]  ;;  %v12059_v33 = vpack.c.bf16 %v10042_v30, %v10041_v29  ;;  %v10043_v35 = vld [vmem:[%s19937_s1 + $0x2f0] sm:$0xff] }
  0xc6   : > { %11995 = vmatpush1.bf16.msra.mxu0 %v11994_v2  ;;  %1957 = vmatprep.mubr.f32.mxu0 %v1590_v24  ;;  %v12006_v34 = vpack.c.bf16 %v10010_v32, %v10009_v31  ;;  %v10044_v36 = vld [vmem:[%s19937_s1 + $0x2f8] sm:$0xff]  ;;  %v10011_v37 = vld [vmem:[%s19937_s1 + $0x1f0] sm:$0xff]  ;;  %v13537_v40 = vld [vmem:[%s13472_s10 + $0x20] sm:$0xff] }
  0xc7   : > { %11996 = vmatprep.subr.bf16.mxu0 %v19942_v48  ;;  %v10012_v38 = vld [vmem:[%s19937_s1 + $0x1f8] sm:$0xff]  ;;  %v12063_v39 = vpack.c.bf16 %v10044_v36, %v10043_v35  ;;  %v13540_v41 = vld [vmem:[%s13472_s10 + $0x28] sm:$0x3]  ;;  %v13543_v43 = vld [vmem:[%s13472_s10 + $0x30] sm:$0xff]  ;;  %v1719_v47 = vrot.slane %v13537_v40, 2 }
  0xc8   : > { %12046 = vmatpush3.bf16.msra.mxu1 %v12043_v1  ;;  %v12009_v42 = vpack.c.bf16 %v10012_v38, %v10011_v37  ;;  %v13546_v44 = vld [vmem:[%s13472_s10 + $0x38] sm:$0x3]  ;;  %v10013_v45 = vld [vmem:[%s19937_s1 + $0x200] sm:$0xff]  ;;  %v10014_v46 = vld [vmem:[%s19937_s1 + $0x208] sm:$0xff]  ;;  %v1720_v49 = vrot.slane %v13540_v41, 2  ;;  %v1722_v52 = vrot.slane %v13543_v43, 2 }
  0xc9   : > { %12048 = vmatprep.subr.bf16.mxu1 %v12047_v7  ;;  %v1410_v50 = vld [vmem:[%s19937_s1] sm:$0xff]  ;;  %v1411_v51 = vld [vmem:[%s19937_s1 + $0x8] sm:$0xff]  ;;  %v1723_v53 = vrot.slane %v13546_v44, 2  ;;  %v12012_v56 = vpack.c.bf16 %v10014_v46, %v10013_v45  ;;  %v13572_v57 = vld [vmem:[%s13472_s10 + $0x50] sm:$0xff] }
  0xca   : > { %11998 = vmatpush1.bf16.msra.mxu0 %v11997_v9  ;;  %v13566_v54 = vld [vmem:[%s13472_s10 + $0x40] sm:$0xff]  ;;  %v13569_v55 = vld [vmem:[%s13472_s10 + $0x48] sm:$0x3]  ;;  %v13575_v58 = vld [vmem:[%s13472_s10 + $0x58] sm:$0x3]  ;;  %v1721_v61 = vsel %vm1281_vm0, %v1719_v47, %v1720_v49  ;;  %v12068_v62 = vpack.c.bf16 %v1411_v51, %v1410_v50  ;;  %v1728_v4 = vrot.slane %v13572_v57, 2 }
  0xcb   : > { %11999 = vmatprep.subr.bf16.mxu0 %v19942_v48  ;;  %v10015_v59 = vld [vmem:[%s19937_s1 + $0x210] sm:$0xff]  ;;  %v10016_v60 = vld [vmem:[%s19937_s1 + $0x218] sm:$0xff]  ;;  %v1725_v63 = vrot.slane %v13566_v54, 2  ;;  %v1726_v0 = vrot.slane %v13569_v55, 2  ;;  %v1724_v2 = vsel %vm1281_vm0, %v1722_v52, %v1723_v53  ;;  %v1729_v5 = vrot.slane %v13575_v58, 2  ;;  %v13598_v6 = vld [vmem:[%s13472_s10 + $0x60] sm:$0xff] }
  0xcc   : > { %12050 = vmatpush3.bf16.msra.mxu1 %v12047_v7  ;;  %v1412_v1 = vld [vmem:[%s19937_s1 + $0x10] sm:$0xff]  ;;  %v1413_v3 = vld [vmem:[%s19937_s1 + $0x18] sm:$0xff]  ;;  %v13601_v7 = vld [vmem:[%s13472_s10 + $0x68] sm:$0x3]  ;;  %v12015_v9 = vpack.c.bf16 %v10016_v60, %v10015_v59  ;;  %v1731_v17 = vrot.slane %v13598_v6, 2 }
  0xcd   : > { %12052 = vmatprep.subr.bf16.mxu1 %v12051_v19  ;;  %v13604_v10 = vld [vmem:[%s13472_s10 + $0x70] sm:$0xff]  ;;  %v13607_v11 = vld [vmem:[%s13472_s10 + $0x78] sm:$0x3]  ;;  %v10017_v12 = vld [vmem:[%s19937_s1 + $0x220] sm:$0xff]  ;;  %v1727_v15 = vsel %vm1281_vm0, %v1725_v63, %v1726_v0  ;;  %v12071_v16 = vpack.c.bf16 %v1413_v3, %v1412_v1  ;;  %v1732_v18 = vrot.slane %v13601_v7, 2  ;;  %v1730_v20 = vsel %vm1281_vm0, %v1728_v4, %v1729_v5 }
  0xce   : > { %12001 = vmatpush1.bf16.msra.mxu0 %v12000_v21  ;;  %v10018_v13 = vld [vmem:[%s19937_s1 + $0x228] sm:$0xff]  ;;  %v1734_v22 = vrot.slane %v13604_v10, 2  ;;  %v1735_v23 = vrot.slane %v13607_v11, 2  ;;  %v13630_v24 = vld [vmem:[%s13472_s10 + $0x80] sm:$0xff]  ;;  %v10019_v29 = vld [vmem:[%s19937_s1 + $0x230] sm:$0xff] }
  0xcf   : > { %12002 = vmatprep.subr.bf16.mxu0 %v19942_v48  ;;  %v1415_v21 = vld [vmem:[%s19937_s1 + $0x28] sm:$0xff]  ;;  %v12018_v26 = vpack.c.bf16 %v10018_v13, %v10017_v12  ;;  %v10020_v30 = vld [vmem:[%s19937_s1 + $0x238] sm:$0xff]  ;;  %v1733_v31 = vsel %vm1281_vm0, %v1731_v17, %v1732_v18  ;;  %v1416_v35 = vld [vmem:[%s19937_s1 + $0x30] sm:$0xff] }
  0xd0   : > { %12054 = vmatpush3.bf16.msra.mxu1 %v12051_v19  ;;  %v1414_v19 = vld [vmem:[%s19937_s1 + $0x20] sm:$0xff]  ;;  %v13633_v25 = vld [vmem:[%s13472_s10 + $0x88] sm:$0x3]  ;;  %v1736_v36 = vsel %vm1281_vm0, %v1734_v22, %v1735_v23  ;;  %v1417_v37 = vld [vmem:[%s19937_s1 + $0x38] sm:$0xff]  ;;  %v12021_v46 = vpack.c.bf16 %v10020_v30, %v10019_v29 }
  0xd1   : > { %12056 = vmatprep.subr.bf16.mxu1 %v12055_v27  ;;  %v12074_v32 = vpack.c.bf16 %v1415_v21, %v1414_v19  ;;  %v13665_v45 = vld [vmem:[%s13472_s10 + $0xc8] sm:$0x3]  ;;  %v13668_v47 = vld [vmem:[%s13472_s10 + $0xd0] sm:$0xff]  ;;  %v13671_v49 = vld [vmem:[%s13472_s10 + $0xd8] sm:$0x3]  ;;  %v12077_v53 = vpack.c.bf16 %v1417_v37, %v1416_v35 }
  0xd2   : > { %12004 = vmatpush1.bf16.msra.mxu0 %v12003_v28  ;;  %v13639_v28 = vld [vmem:[%s13472_s10 + $0xb8] sm:$0x3]  ;;  %v10021_v50 = vld [vmem:[%s19937_s1 + $0x240] sm:$0xff]  ;;  %v10022_v51 = vld [vmem:[%s19937_s1 + $0x248] sm:$0xff]  ;;  %v1744_v59 = vrot.slane %v13665_v45, 2  ;;  %v1746_v63 = vrot.slane %v13668_v47, 2 }
  0xd3   : > { %12005 = vmatprep.subr.bf16.mxu0 %v19942_v48  ;;  %v1418_v60 = vld [vmem:[%s19937_s1 + $0x40] sm:$0xff]  ;;  %v1747_v0 = vrot.slane %v13671_v49, 2  ;;  %v12024_v3 = vpack.c.bf16 %v10022_v51, %v10021_v50  ;;  %v13700_v4 = vld [vmem:[%s13472_s10 + $0xf0] sm:$0xff]  ;;  %v13703_v5 = vld [vmem:[%s13472_s10 + $0xf8] sm:$0x3] }
  0xd4   : > { %12058 = vmatpush3.bf16.msra.mxu1 %v12055_v27  ;;  %v13636_v27 = vld [vmem:[%s13472_s10 + $0xb0] sm:$0xff]  ;;  %v13694_v1 = vld [vmem:[%s13472_s10 + $0xe0] sm:$0xff]  ;;  %v10024_v12 = vld [vmem:[%s19937_s1 + $0x258] sm:$0xff]  ;;  %v1752_v21 = vrot.slane %v13700_v4, 2  ;;  %v1753_v22 = vrot.slane %v13703_v5, 2 }
  0xd5   : > { %12060 = vmatprep.subr.bf16.mxu1 %v12059_v33  ;;  %v1740_v38 = vrot.slane %v13636_v27, 2  ;;  %v1420_v18 = vld [vmem:[%s19937_s1 + $0x50] sm:$0xff]  ;;  %v1748_v19 = vsel %vm1281_vm0, %v1746_v63, %v1747_v0  ;;  %v13726_v23 = vld [vmem:[%s13472_s10 + $0x100] sm:$0xff] }
  0xd6   : > { %12007 = vmatpush1.bf16.msra.mxu0 %v12006_v34  ;;  %v1738_v34 = vrot.slane %v13633_v25, 2  ;;  %v13732_v30 = vld [vmem:[%s13472_s10 + $0x110] sm:$0xff] }
  0xd7   : > { %12008 = vmatprep.subr.bf16.mxu0 %v19942_v48  ;;  %v1758_v50 = vrot.slane %v13732_v30, 2 }
  0xd8   : > { %12062 = vmatpush3.bf16.msra.mxu1 %v12059_v33  ;;  %v1737_v33 = vrot.slane %v13630_v24, 2 }
  0xd9   : > { %12064 = vmatprep.subr.bf16.mxu1 %v12063_v39 }
  0xda   : > { %12010 = vmatpush1.bf16.msra.mxu0 %v12009_v42  ;;  %v13662_v42 = vld [vmem:[%s13472_s10 + $0xc0] sm:$0xff]  ;;  %v1739_v52 = vsel %vm1281_vm0, %v1737_v33, %v1738_v34  ;;  %v10026_v33 = vld [vmem:[%s19937_s1 + $0x268] sm:$0xff] }
  0xdb   : > { %12011 = vmatprep.subr.bf16.mxu0 %v19942_v48 }
  0xdc   : > { %12066 = vmatpush3.bf16.msra.mxu1 %v12063_v39  ;;  %v1741_v39 = vrot.slane %v13639_v28, 2 }
  0xdd   : > { %12067 = vmatprep.subr.bf16.mxu1 %v19942_v48 }
  0xde   : > { %12013 = vmatpush1.bf16.msra.mxu0 %v12012_v56  ;;  %v1743_v56 = vrot.slane %v13662_v42, 2 }
  0xdf   : > { %11300 = vmatmul.mubr.f32.vlgmr.msra.gmra.mrb[0].mxu1 %v1721_v61  ;;  %12014 = vmatprep.subr.bf16.mxu0 %v19942_v48  ;;  %v1742_v61 = vsel %vm1281_vm0, %v1740_v38, %v1741_v39  ;;  %v1422_v38 = vld [vmem:[%s19937_s1 + $0x60] sm:$0xff]  ;;  %v1754_v39 = vsel %vm1281_vm0, %v1752_v21, %v1753_v22  ;;  %v13799_v21 = vld [vmem:[%s13472_s10 + $0x168] sm:$0x3] }
  0xe0   : > { %12069 = vmatpush1.bf16.msra.mxu1 %v12068_v62  ;;  %11302 = vmatprep.mubr.f32.mxu1 %v1724_v2  ;;  %v1419_v62 = vld [vmem:[%s19937_s1 + $0x48] sm:$0xff]  ;;  %v1745_v13 = vsel %vm1281_vm0, %v1743_v56, %v1744_v59  ;;  %v13764_v59 = vld [vmem:[%s13472_s10 + $0x150] sm:$0xff] }
  0xe1   : > { %12070 = vmatprep.subr.bf16.mxu1 %v19942_v48  ;;  %v13697_v2 = vld [vmem:[%s13472_s10 + $0xe8] sm:$0x3] }
  0xe2   : > { %12016 = vmatpush1.bf16.msra.mxu0 %v12015_v9  ;;  %v10023_v9 = vld [vmem:[%s19937_s1 + $0x250] sm:$0xff]  ;;  %v1750_v17 = vrot.slane %v13697_v2, 2 }
  0xe3   : > { %11303 = vmatmul.mubr.f32.gmra.mrb[2].mxu1 %v1727_v15  ;;  %12017 = vmatprep.subr.bf16.mxu0 %v19942_v48  ;;  %v12080_v15 = vpack.c.bf16 %v1419_v62, %v1418_v60  ;;  %v12027_v29 = vpack.c.bf16 %v10024_v12, %v10023_v9  ;;  %v13767_v60 = vld [vmem:[%s13472_s10 + $0x158] sm:$0x3]  ;;  %v1424_v12 = vld [vmem:[%s19937_s1 + $0x70] sm:$0xff] }
  0xe4   : > { %12072 = vmatpush1.bf16.msra.mxu1 %v12071_v16  ;;  %11305 = vmatprep.mubr.f32.mxu1 %v1730_v20  ;;  %v1749_v16 = vrot.slane %v13694_v1, 2  ;;  %v1421_v20 = vld [vmem:[%s19937_s1 + $0x58] sm:$0xff] }
  0xe5   : > { %12073 = vmatprep.subr.bf16.mxu1 %v19942_v48  ;;  %v12083_v35 = vpack.c.bf16 %v1421_v20, %v1420_v18  ;;  %v10028_v62 = vld [vmem:[%s19937_s1 + $0x278] sm:$0xff]  ;;  %v1764_v18 = vrot.slane %v13764_v59, 2  ;;  %v13796_v20 = vld [vmem:[%s13472_s10 + $0x160] sm:$0xff] }
  0xe6   : > { %12019 = vmatpush1.bf16.msra.mxu0 %v12018_v26  ;;  %v13729_v26 = vld [vmem:[%s13472_s10 + $0x108] sm:$0x3]  ;;  %v1751_v34 = vsel %vm1281_vm0, %v1749_v16, %v1750_v17  ;;  %v1425_v17 = vld [vmem:[%s19937_s1 + $0x78] sm:$0xff] }
  0xe7   : > { %11306 = vmatmul.mubr.f32.gmra.mrb[4].mxu1 %v1733_v31  ;;  %12020 = vmatprep.subr.bf16.mxu0 %v19942_v48  ;;  %v13735_v31 = vld [vmem:[%s13472_s10 + $0x118] sm:$0x3]  ;;  %v1756_v37 = vrot.slane %v13729_v26, 2 }
  0xe8   : > { %12075 = vmatpush1.bf16.msra.mxu1 %v12074_v32  ;;  %11308 = vmatprep.mubr.f32.mxu1 %v1736_v36  ;;  %v10025_v32 = vld [vmem:[%s19937_s1 + $0x260] sm:$0xff]  ;;  %v1755_v36 = vrot.slane %v13726_v23, 2  ;;  %v1759_v51 = vrot.slane %v13735_v31, 2 }
  0xe9   : > { %12076 = vmatprep.subr.bf16.mxu1 %v19942_v48  ;;  %v12030_v56 = vpack.c.bf16 %v10026_v33, %v10025_v32  ;;  %v13805_v32 = vld [vmem:[%s13472_s10 + $0x178] sm:$0x3]  ;;  %v19940_v33 = vrot.slane %v13537_v40, 1 }
  0xea   : > { %12022 = vmatpush1.bf16.msra.mxu0 %v12021_v46  ;;  %v1423_v46 = vld [vmem:[%s19937_s1 + $0x68] sm:$0xff]  ;;  %v1757_v63 = vsel %vm1281_vm0, %v1755_v36, %v1756_v37  ;;  %v1760_v16 = vsel %vm1281_vm0, %v1758_v50, %v1759_v51  ;;  %v12089_v37 = vpack.c.bf16 %v1425_v17, %v1424_v12  ;;  %v1445_v50 = vld [vmem:[%s19937_s1 + $0x118] sm:$0xff] }
  0xeb   : > { %11309 = vmatmul.mubr.f32.gmra.mrb[6].mxu1 %v1739_v52  ;;  %12023 = vmatprep.subr.bf16.mxu0 %v19942_v48  ;;  %v13758_v52 = vld [vmem:[%s13472_s10 + $0x120] sm:$0xff]  ;;  %v12086_v0 = vpack.c.bf16 %v1423_v46, %v1422_v38  ;;  %v1767_v38 = vrot.slane %v13796_v20, 2 }
  0xec   : > { %12078 = vmatpush1.bf16.msra.mxu1 %v12077_v53  ;;  %11311 = vmatprep.mubr.f32.mxu1 %v1742_v61  ;;  %v13761_v53 = vld [vmem:[%s13472_s10 + $0x128] sm:$0x3]  ;;  %v10027_v61 = vld [vmem:[%s19937_s1 + $0x270] sm:$0xff]  ;;  %v1426_v46 = vld [vmem:[%s19937_s1 + $0x80] sm:$0xff] }
  0xed   : > { %12079 = vmatprep.subr.bf16.mxu1 %v19942_v48  ;;  %v1762_v9 = vrot.slane %v13761_v53, 2  ;;  %v12033_v22 = vpack.c.bf16 %v10028_v62, %v10027_v61  ;;  %v1771_v62 = vrot.slane %v13805_v32, 2 }
  0xee   : > { %12025 = vmatpush1.bf16.msra.mxu0 %v12024_v3  ;;  %v1761_v3 = vrot.slane %v13758_v52, 2 }
  0xef   : > { %11312 = vmatmul.mubr.f32.gmra.mrb[8].mxu1 %v1745_v13  ;;  %12026 = vmatprep.subr.bf16.mxu0 %v19942_v48  ;;  %v1442_v13 = vld [vmem:[%s19937_s1 + $0x100] sm:$0xff] }
  0xf0   : > { %12081 = vmatpush1.bf16.msra.mxu1 %v12080_v15  ;;  %11314 = vmatprep.mubr.f32.mxu1 %v1748_v19  ;;  %v1443_v15 = vld [vmem:[%s19937_s1 + $0x108] sm:$0xff]  ;;  %v1765_v19 = vrot.slane %v13767_v60, 2  ;;  %v1763_v36 = vsel %vm1281_vm0, %v1761_v3, %v1762_v9  ;;  %v13836_v3 = vld [vmem:[%s13472_s10 + $0x190] sm:$0xff]  ;;  %v13839_v9 = vld [vmem:[%s13472_s10 + $0x198] sm:$0x3] }
  0xf1   : > { %12082 = vmatprep.subr.bf16.mxu1 %v19942_v48 }
  0xf2   : > { %12028 = vmatpush1.bf16.msra.mxu0 %v12027_v29  ;;  %v13802_v29 = vld [vmem:[%s13472_s10 + $0x170] sm:$0xff]  ;;  %v1766_v51 = vsel %vm1281_vm0, %v1764_v18, %v1765_v19 }
  0xf3   : > { %11315 = vmatmul.mubr.f32.gmra.mrb[10].mxu1 %v1751_v34  ;;  %12029 = vmatprep.subr.bf16.mxu0 %v19942_v48  ;;  %v1592_v34 = vrot.slane %v13540_v41, 1  ;;  %v1444_v41 = vld [vmem:[%s19937_s1 + $0x110] sm:$0xff]  ;;  %v1770_v61 = vrot.slane %v13802_v29, 2 }
  0xf4   : > { %12084 = vmatpush1.bf16.msra.mxu1 %v12083_v35  ;;  %11317 = vmatprep.mubr.f32.mxu1 %v1754_v39  ;;  %v12115_v35 = vpack.c.bf16 %v1443_v15, %v1442_v13  ;;  %v1768_v39 = vrot.slane %v13799_v21, 2  ;;  %v19944_v13 = vrot.slane %v13543_v43, 1  ;;  %v1595_v15 = vrot.slane %v13546_v44, 1  ;;  %v1446_v44 = vld [vmem:[%s19937_s1 + $0x120] sm:$0xff] }
  0xf5   : > { %12085 = vmatprep.subr.bf16.mxu1 %v19942_v48  ;;  %v1593_v12 = vsel %vm1152_vm1, %v19940_v33, %v1592_v34  ;;  %v1428_v34 = vld [vmem:[%s19937_s1 + $0x90] sm:$0xff]  ;;  %v1598_v33 = vrot.slane %v13569_v55, 1 }
  0xf6   : > { %12031 = vmatpush1.bf16.msra.mxu0 %v12030_v56  ;;  %v1427_v56 = vld [vmem:[%s19937_s1 + $0x88] sm:$0xff]  ;;  %v1769_v17 = vsel %vm1281_vm0, %v1767_v38, %v1768_v39  ;;  %v1429_v38 = vld [vmem:[%s19937_s1 + $0x98] sm:$0xff]  ;;  %v1776_v39 = vrot.slane %v13836_v3, 2  ;;  %v1448_v55 = vld [vmem:[%s19937_s1 + $0x130] sm:$0xff] }
  0xf7   : > { %11318 = vmatmul.mubr.f32.gmra.mrb[12].mxu1 %v1757_v63  ;;  %12032 = vmatprep.subr.bf16.mxu0 %v19942_v48  ;;  %v13830_v63 = vld [vmem:[%s13472_s10 + $0x180] sm:$0xff]  ;;  %v12092_v18 = vpack.c.bf16 %v1427_v56, %v1426_v46  ;;  %v1777_v46 = vrot.slane %v13839_v9, 2  ;;  %v13876_v56 = vld [vmem:[%s13472_s10 + $0x1b8] sm:$0x3] }
  0xf8   : > { %12087 = vmatpush1.bf16.msra.mxu1 %v12086_v0  ;;  %11320 = vmatprep.mubr.f32.mxu1 %v1760_v16  ;;  %v13833_v0 = vld [vmem:[%s13472_s10 + $0x188] sm:$0x3]  ;;  %v12119_v16 = vpack.c.bf16 %v1445_v50, %v1444_v41  ;;  %v1773_v19 = vrot.slane %v13830_v63, 2  ;;  %v13867_v41 = vld [vmem:[%s13472_s10 + $0x1a0] sm:$0xff]  ;;  %20008 = vst [vmem:[#allocation10_spill] sm:$0xff] %v13876_v56 }
  0xf9   : > { %12088 = vmatprep.subr.bf16.mxu1 %v19942_v48  ;;  %20005 = vst [vmem:[#allocation7_spill] sm:$0xff] %v13867_v41  ;;  %v13870_v50 = vld [vmem:[%s13472_s10 + $0x1a8] sm:$0x3] }
  0xfa   : > { %12034 = vmatpush1.bf16.msra.mxu0 %v12033_v22  ;;  %v1774_v22 = vrot.slane %v13833_v0, 2  ;;  %20006 = vst [vmem:[#allocation8_spill] sm:$0xff] %v13870_v50 }
  0xfb   : > { %11321 = vmatmul.mubr.f32.gmra.mrb[14].mxu1 %v1763_v36  ;;  %12116 = vmatprep.subr.bf16.mxu0 %v12115_v35  ;;  %v1447_v36 = vld [vmem:[%s19937_s1 + $0x128] sm:$0xff] }
  0xfc   : > { %12090 = vmatpush1.bf16.msra.mxu1 %v12089_v37  ;;  %11323 = vmatprep.mubr.f32.mxu1 %v1766_v51  ;;  %v1772_v37 = vsel %vm1281_vm0, %v1770_v61, %v1771_v62  ;;  %v13873_v51 = vld [vmem:[%s13472_s10 + $0x1b0] sm:$0xff]  ;;  %v1596_v61 = vsel %vm1152_vm1, %v19944_v13, %v1595_v15  ;;  %v12123_v14 = vpack.c.bf16 %v1447_v36, %v1446_v44  ;;  %v1430_v15 = vld [vmem:[%s19937_s1 + $0xa0] sm:$0xff]  ;;  %v1783_v36 = vrot.slane %v13876_v56, 2  ;;  %v13913_v62 = vld [vmem:[%s13472_s10 + $0x1f8] sm:$0x3] }
  0xfd   : > { %1958 = vmatmul.mubr.f32.vlgmr.msra.gmra.mrb[0].mxu0 %v13475_v8  ;;  %12091 = vmatprep.subr.bf16.mxu1 %v19942_v48  ;;  %20007 = vst [vmem:[#allocation9_spill] sm:$0xff] %v13873_v51  ;;  %v12095_v48 = vpack.c.bf16 %v1429_v38, %v1428_v34  ;;  %v1431_v34 = vld [vmem:[%s19937_s1 + $0xa8] sm:$0xff]  ;;  %v1782_v44 = vrot.slane %v13873_v51, 2  ;;  %v13910_v13 = vld [vmem:[%s13472_s10 + $0x1f0] sm:$0xff]  ;;  %20013 = vst [vmem:[#allocation14_spill] sm:$0xff] %v13913_v62 }
  0xfe   : > { %1962 = vmatprep.mubr.f32.mxu0 %v1593_v12  ;;  %12118 = vmatpush3.bf16.msra.mxu0 %v12115_v35  ;;  %v1775_v12 = vsel %vm1281_vm0, %v1773_v19, %v1774_v22  ;;  %v1779_v35 = vrot.slane %v13867_v41, 2  ;;  %v20009_v19 = vmov 0.0|0.0   ;;  %v1778_v22 = vsel %vm1281_vm0, %v1776_v39, %v1777_v46  ;;  %v13907_v38 = vld [vmem:[%s13472_s10 + $0x1c8] sm:$0x3]  ;;  %20012 = vst [vmem:[#allocation13_spill] sm:$0xff] %v13910_v13  ;;  %v1432_v51 = vld [vmem:[%s19937_s1 + $0xb0] sm:$0xff] }
  0xff   : > { %11324 = vmatmul.mubr.f32.gmra.mrb[16].mxu1 %v1769_v17  ;;  %12120 = vmatprep.subr.bf16.mxu0 %v12119_v16  ;;  %v1780_v17 = vrot.slane %v13870_v50, 2  ;;  %20011 = vst [vmem:[#allocation12_spill] sm:$0xff] %v13907_v38  ;;  %v20014_v39 = vrot.slane %v13566_v54, 1  ;;  %v1601_v50 = vrot.slane %v13575_v58, 1  ;;  %v1433_v56 = vld [vmem:[%s19937_s1 + $0xb8] sm:$0xff]  ;;  %v1450_v58 = vld [vmem:[%s19937_s1 + $0x140] sm:$0xff] }
 0x100   : > { %12093 = vmatpush1.bf16.msra.mxu1 %v12092_v18  ;;  %11326 = vmatprep.mubr.f32.mxu1 %v1772_v37  ;;  %v1449_v18 = vld [vmem:[%s19937_s1 + $0x138] sm:$0xff]  ;;  %v13904_v37 = vld [vmem:[%s13472_s10 + $0x1c0] sm:$0xff] }
 0x101   : > { %1963 = vmatmul.mubr.f32.gmra.mrb[2].mxu0 %v13537_v40  ;;  %12094 = vmatprep.subr.bf16.mxu1 %v20009_v19  ;;  %20010 = vst [vmem:[#allocation11_spill] sm:$0xff] %v13904_v37  ;;  %v1599_v46 = vsel %vm1152_vm1, %v20014_v39, %v1598_v33  ;;  %v1785_v33 = vrot.slane %v13904_v37, 2  ;;  %v1786_v39 = vrot.slane %v13907_v38, 2  ;;  %v1604_v38 = vrot.slane %v13601_v7, 1  ;;  %v13952_v37 = vld [vmem:[%s13472_s10 + $0x218] sm:$0x3] }
 0x102   : > { %1967 = vmatprep.mubr.f32.mxu0 %v1596_v61  ;;  %12122 = vmatpush3.bf16.msra.mxu0 %v12119_v16  ;;  %v12127_v61 = vpack.c.bf16 %v1449_v18, %v1448_v55  ;;  %v1781_v16 = vsel %vm1281_vm0, %v1779_v35, %v1780_v17  ;;  %v1784_v35 = vsel %vm1281_vm0, %v1782_v44, %v1783_v36  ;;  %v1788_v17 = vrot.slane %v13910_v13, 2  ;;  %v13941_v55 = vld [vmem:[%s13472_s10 + $0x200] sm:$0xff]  ;;  %v13944_v18 = vld [vmem:[%s13472_s10 + $0x208] sm:$0x3]  ;;  %v1457_v41 = vld [vmem:[%s19937_s1 + $0x178] sm:$0xff] }
 0x103   : > { %11327 = vmatmul.mubr.f32.gmra.mrb[18].mxu1 %v1775_v12  ;;  %12124 = vmatprep.subr.bf16.mxu0 %v12123_v14  ;;  %v12098_v12 = vpack.c.bf16 %v1431_v34, %v1430_v15  ;;  %v1789_v15 = vrot.slane %v13913_v62, 2  ;;  %20015 = vst [vmem:[#allocation15_spill] sm:$0xff] %v13941_v55  ;;  %20016 = vst [vmem:[#allocation16_spill] sm:$0xff] %v13944_v18  ;;  %v12101_v44 = vpack.c.bf16 %v1433_v56, %v1432_v51  ;;  %v1434_v13 = vld [vmem:[%s19937_s1 + $0xc0] sm:$0xff] }
 0x104   : > { %12096 = vmatpush1.bf16.msra.mxu1 %v12095_v48  ;;  %11329 = vmatprep.mubr.f32.mxu1 %v1778_v22  ;;  %v1451_v48 = vld [vmem:[%s19937_s1 + $0x148] sm:$0xff]  ;;  %v13947_v22 = vld [vmem:[%s13472_s10 + $0x210] sm:$0xff]  ;;  %20018 = vst [vmem:[#allocation18_spill] sm:$0xff] %v13952_v37  ;;  %v20019_v36 = vrot.slane %v13572_v57, 1  ;;  %v1791_v51 = vrot.slane %v13941_v55, 2 }
 0x105   : > { %1968 = vmatmul.mubr.f32.gmra.mrb[4].mxu0 %v13543_v43  ;;  %12097 = vmatprep.subr.bf16.mxu1 %v20009_v19  ;;  %20017 = vst [vmem:[#allocation17_spill] sm:$0xff] %v13947_v22  ;;  %v12131_v7 = vpack.c.bf16 %v1451_v48, %v1450_v58  ;;  %v1794_v56 = vrot.slane %v13947_v22, 2  ;;  %v1453_v58 = vld [vmem:[%s19937_s1 + $0x158] sm:$0xff]  ;;  %v13984_v48 = vld [vmem:[%s13472_s10 + $0x230] sm:$0xff]  ;;  %v20024_v22 = vrot.slane %v13598_v6, 1 }
 0x106   : > { %1972 = vmatprep.mubr.f32.mxu0 %v1599_v46  ;;  %12126 = vmatpush3.bf16.msra.mxu0 %v12123_v14  ;;  %v1602_v62 = vsel %vm1152_vm1, %v20019_v36, %v1601_v50  ;;  %v1435_v46 = vld [vmem:[%s19937_s1 + $0xc8] sm:$0xff]  ;;  %v1787_v14 = vsel %vm1281_vm0, %v1785_v33, %v1786_v39  ;;  %v1792_v50 = vrot.slane %v13944_v18, 2  ;;  %v1452_v36 = vld [vmem:[%s19937_s1 + $0x150] sm:$0xff]  ;;  %v1795_v33 = vrot.slane %v13952_v37, 2  ;;  %20022 = vst [vmem:[#allocation21_spill] sm:$0xff] %v13984_v48 }
 0x107   : > { %11330 = vmatmul.mubr.f32.gmra.mrb[20].mxu1 %v1781_v16  ;;  %12128 = vmatprep.subr.bf16.mxu0 %v12127_v61  ;;  %v13968_v16 = vld [vmem:[%s13472_s10 + $0x220] sm:$0xff]  ;;  %v13981_v39 = vld [vmem:[%s13472_s10 + $0x228] sm:$0x3]  ;;  %v12104_v34 = vpack.c.bf16 %v1435_v46, %v1434_v13  ;;  %v1605_v18 = vsel %vm1152_vm1, %v20024_v22, %v1604_v38  ;;  %v1607_v37 = vrot.slane %v13607_v11, 1  ;;  %v12135_v13 = vpack.c.bf16 %v1453_v58, %v1452_v36 }
 0x108   : > { %12099 = vmatpush1.bf16.msra.mxu1 %v12098_v12  ;;  %11332 = vmatprep.mubr.f32.mxu1 %v1784_v35  ;;  %20020 = vst [vmem:[#allocation19_spill] sm:$0xff] %v13968_v16  ;;  %v1790_v12 = vsel %vm1281_vm0, %v1788_v17, %v1789_v15  ;;  %20021 = vst [vmem:[#allocation20_spill] sm:$0xff] %v13981_v39  ;;  %v13987_v35 = vld [vmem:[%s13472_s10 + $0x238] sm:$0x3]  ;;  %v1797_v55 = vrot.slane %v13968_v16, 2  ;;  %v1436_v17 = vld [vmem:[%s19937_s1 + $0xd0] sm:$0xff] }
 0x109   : > { %1973 = vmatmul.mubr.f32.gmra.mrb[6].mxu0 %v13566_v54  ;;  %12100 = vmatprep.subr.bf16.mxu1 %v20009_v19  ;;  %20023 = vst [vmem:[#allocation22_spill] sm:$0xff] %v13987_v35  ;;  %v1798_v38 = vrot.slane %v13981_v39, 2  ;;  %v1800_v22 = vrot.slane %v13984_v48, 2  ;;  %v1801_v46 = vrot.slane %v13987_v35, 2  ;;  %v1454_v11 = vld [vmem:[%s19937_s1 + $0x160] sm:$0xff]  ;;  %v1609_v36 = vrot.slane %v13630_v24, 1 }
 0x10a   : > { %1977 = vmatprep.mubr.f32.mxu0 %v1602_v62  ;;  %12130 = vmatpush3.bf16.msra.mxu0 %v12127_v61  ;;  %v1793_v62 = vsel %vm1281_vm0, %v1791_v51, %v1792_v50  ;;  %v1437_v61 = vld [vmem:[%s19937_s1 + $0xd8] sm:$0xff]  ;;  %v14015_v51 = vld [vmem:[%s13472_s10 + $0x240] sm:$0xff]  ;;  %v14018_v50 = vld [vmem:[%s13472_s10 + $0x248] sm:$0x3]  ;;  %v1610_v58 = vrot.slane %v13633_v25, 1  ;;  %v20029_v48 = vrot.slane %v13604_v10, 1 }
 0x10b   : > { %11333 = vmatmul.mubr.f32.gmra.mrb[22].mxu1 %v1787_v14  ;;  %12132 = vmatprep.subr.bf16.mxu0 %v12131_v7  ;;  %v1796_v14 = vsel %vm1281_vm0, %v1794_v56, %v1795_v33  ;;  %20025 = vst [vmem:[#allocation23_spill] sm:$0xff] %v14015_v51  ;;  %20026 = vst [vmem:[#allocation24_spill] sm:$0xff] %v14018_v50  ;;  %v14026_v15 = vld [vmem:[%s13472_s10 + $0x258] sm:$0x3]  ;;  %v12107_v35 = vpack.c.bf16 %v1437_v61, %v1436_v17  ;;  %v1439_v25 = vld [vmem:[%s19937_s1 + $0xe8] sm:$0xff] }
 0x10c   : > { %12102 = vmatpush1.bf16.msra.mxu1 %v12101_v44  ;;  %11335 = vmatprep.mubr.f32.mxu1 %v1790_v12  ;;  %v1455_v44 = vld [vmem:[%s19937_s1 + $0x168] sm:$0xff]  ;;  %v14023_v12 = vld [vmem:[%s13472_s10 + $0x250] sm:$0xff]  ;;  %20028 = vst [vmem:[#allocation26_spill] sm:$0xff] %v14026_v15  ;;  %v1608_v56 = vsel %vm1152_vm1, %v20029_v48, %v1607_v37  ;;  %v14038_v33 = vld [vmem:[%s13472_s10 + $0x260] sm:$0xff]  ;;  %v1799_v17 = vsel %vm1281_vm0, %v1797_v55, %v1798_v38  ;;  %v1803_v48 = vrot.slane %v14015_v51, 2 }
 0x10d   : > { %1978 = vmatmul.mubr.f32.gmra.mrb[8].mxu0 %v13572_v57  ;;  %12103 = vmatprep.subr.bf16.mxu1 %v20009_v19  ;;  %20027 = vst [vmem:[#allocation25_spill] sm:$0xff] %v14023_v12  ;;  %v14041_v39 = vld [vmem:[%s13472_s10] sm:$0xff]  ;;  %v1802_v37 = vsel %vm1281_vm0, %v1800_v22, %v1801_v46  ;;  %v1025_v61 = vld [vmem:[%s13472_s10 + $0x8] sm:$0x3]  ;;  %v1456_v16 = vld [vmem:[%s19937_s1 + $0x170] sm:$0xff]  ;;  %v1806_v55 = vrot.slane %v14023_v12, 2 }
 0x10e   : > { %1982 = vmatprep.mubr.f32.mxu0 %v1605_v18  ;;  %12134 = vmatpush3.bf16.msra.mxu0 %v12131_v7  ;;  %v1438_v18 = vld [vmem:[%s19937_s1 + $0xe0] sm:$0xff]  ;;  %v12139_v7 = vpack.c.bf16 %v1455_v44, %v1454_v11  ;;  %v14059_v38 = vld [vmem:[%s13472_s10 + $0x268] sm:$0x3]  ;;  %v1282_v22 = vrot.slane %v14041_v39, 2  ;;  %v1283_v46 = vrot.slane %v1025_v61, 2  ;;  %v1611_v11 = vsel %vm1152_vm1, %v1609_v36, %v1610_v58 }
 0x10f   : > { %11336 = vmatmul.mubr.f32.gmra.mrb[24].mxu1 %v1793_v62  ;;  %12136 = vmatprep.subr.bf16.mxu0 %v12135_v13  ;;  %v1804_v62 = vrot.slane %v14018_v50, 2  ;;  %v1612_v44 = vrot.slane %v13636_v27, 1  ;;  %v12143_v50 = vpack.c.bf16 %v1457_v41, %v1456_v16  ;;  %v12110_v51 = vpack.c.bf16 %v1439_v25, %v1438_v18  ;;  %v1440_v41 = vld [vmem:[%s19937_s1 + $0xf0] sm:$0xff]  ;;  %v1441_v16 = vld [vmem:[%s19937_s1 + $0xf8] sm:$0xff] }
 0x110   : > { %12105 = vmatpush1.bf16.msra.mxu1 %v12104_v34  ;;  %11338 = vmatprep.mubr.f32.mxu1 %v1796_v14  ;;  %v1807_v34 = vrot.slane %v14026_v15, 2  ;;  %v1613_v14 = vrot.slane %v13639_v28, 1  ;;  %v14066_v12 = vsel %vm1281_vm0, %v1282_v22, %v1283_v46  ;;  %v1154_v36 = vrot.slane %v1025_v61, 1  ;;  %v14082_v58 = vld [vmem:[%s13472_s10 + $0x18] sm:$0x3] }
 0x111   : > { %1983 = vmatmul.mubr.f32.gmra.mrb[10].mxu0 %v13598_v6  ;;  %12106 = vmatprep.subr.bf16.mxu1 %v20009_v19  ;;  %v1805_v15 = vsel %vm1281_vm0, %v1803_v48, %v1804_v62  ;;  %v1615_v25 = vrot.slane %v13662_v42, 1  ;;  %v12113_v48 = vpack.c.bf16 %v1441_v16, %v1440_v41  ;;  %v14101_v62 = vld [vmem:[%s13472_s10 + $0x28] sm:$0x3]  ;;  %v1618_v61 = vrot.slane %v13668_v47, 1  ;;  %v10141_v41 = vld [vmem:[%s19937_s1 + $0x400] sm:$0xff] }
 0x112   : > { %1987 = vmatprep.mubr.f32.mxu0 %v1608_v56  ;;  %12138 = vmatpush3.bf16.msra.mxu0 %v12135_v13  ;;  %v1809_v56 = vrot.slane %v14038_v33, 2  ;;  %v1810_v13 = vrot.slane %v14059_v38, 2  ;;  %v1808_v28 = vsel %vm1281_vm0, %v1806_v55, %v1807_v34  ;;  %v1614_v18 = vsel %vm1152_vm1, %v1612_v44, %v1613_v14  ;;  %v14121_v14 = vld [vmem:[%s13472_s10 + $0x38] sm:$0x3]  ;;  %v10142_v16 = vld [vmem:[%s19937_s1 + $0x408] sm:$0xff] }
 0x113   : > { %11339 = vmatmul.mubr.f32.gmra.mrb[26].mxu1 %v1799_v17  ;;  %12140 = vmatprep.subr.bf16.mxu0 %v12139_v7  ;;  %v1616_v17 = vrot.slane %v13665_v45, 1  ;;  %v10110_v45 = vld [vmem:[%s19937_s1 + $0x308] sm:$0xff]  ;;  %v1619_v55 = vrot.slane %v13671_v49, 1  ;;  %v20030_v22 = vrot.slane %v13475_v8, 1  ;;  %v1160_v46 = vrot.slane %v14101_v62, 1  ;;  %v10112_v49 = vld [vmem:[%s19937_s1 + $0x318] sm:$0xff] }
 0x114   : > { %12108 = vmatpush1.bf16.msra.mxu1 %v12107_v35  ;;  %11341 = vmatprep.mubr.f32.mxu1 %v1802_v37  ;;  %v1153_v35 = vrot.slane %v14041_v39, 1  ;;  %v1811_v37 = vsel %vm1281_vm0, %v1809_v56, %v1810_v13  ;;  %v1621_v13 = vrot.slane %v13694_v1, 1 }
 0x115   : > { %1988 = vmatmul.mubr.f32.gmra.mrb[12].mxu0 %v13604_v10  ;;  %12109 = vmatprep.subr.bf16.mxu1 %v20009_v19  ;;  %v1620_v56 = vsel %vm1152_vm1, %v1618_v61, %v1619_v55 }
 0x116   : > { %1992 = vmatprep.mubr.f32.mxu0 %v1611_v11  ;;  %12142 = vmatpush3.bf16.msra.mxu0 %v12139_v7  ;;  %v10109_v7 = vld [vmem:[%s19937_s1 + $0x300] sm:$0xff]  ;;  %v10111_v11 = vld [vmem:[%s19937_s1 + $0x310] sm:$0xff] }
 0x117   : > { %11342 = vmatmul.mubr.f32.gmra.mrb[28].mxu1 %v1805_v15  ;;  %12144 = vmatprep.subr.bf16.mxu0 %v12143_v50  ;;  %v1155_v15 = vsel %vm1152_vm1, %v1153_v35, %v1154_v36  ;;  %v12148_v34 = vpack.c.bf16 %v10110_v45, %v10109_v7  ;;  %v20031_v35 = vrot.slane %v13537_v40, 1  ;;  %v1624_v7 = vrot.slane %v13700_v4, 1 }
 0x118   : > { %12111 = vmatpush1.bf16.msra.mxu1 %v12110_v51  ;;  %11344 = vmatprep.mubr.f32.mxu1 %v1808_v28  ;;  %v1157_v51 = vrot.slane %v14082_v58, 1  ;;  %v1622_v28 = vrot.slane %v13697_v2, 1  ;;  %v1163_v2 = vrot.slane %v14121_v14, 1  ;;  %v1625_v45 = vrot.slane %v13703_v5, 1  ;;  %v10116_v5 = vld [vmem:[%s19937_s1 + $0x338] sm:$0xff] }
 0x119   : > { %1993 = vmatmul.mubr.f32.gmra.mrb[14].mxu0 %v13630_v24  ;;  %12112 = vmatprep.subr.bf16.mxu1 %v20009_v19  ;;  %v1617_v24 = vsel %vm1152_vm1, %v1615_v25, %v1616_v17  ;;  %v1161_v36 = vsel %vm1152_vm1, %v20031_v35, %v1160_v46  ;;  %v10114_v17 = vld [vmem:[%s19937_s1 + $0x328] sm:$0xff]  ;;  %v1627_v46 = vrot.slane %v13726_v23, 1  ;;  %v1630_v35 = vrot.slane %v13732_v30, 1 }
 0x11a   : > { %1997 = vmatprep.mubr.f32.mxu0 %v1614_v18  ;;  %12146 = vmatpush3.bf16.msra.mxu0 %v12143_v50  ;;  %v1158_v50 = vsel %vm1152_vm1, %v20030_v22, %v1157_v51  ;;  %v10113_v18 = vld [vmem:[%s19937_s1 + $0x320] sm:$0xff]  ;;  %v14171_v22 = vld [vmem:[%s13472_s10 + $0x58] sm:$0x3] }
 0x11b   : > { %11345 = vmatmul.mubr.f32.gmra.mrb[30].mxu1 %v1811_v37  ;;  %v14148_v37 = vld [vmem:[%s13472_s10 + $0x48] sm:$0x3]  ;;  %v12154_v51 = vpack.c.bf16 %v10114_v17, %v10113_v18  ;;  %v20034_v18 = vrot.slane %v13572_v57, 1 }
 0x11c   : > { %12114 = vmatpush1.bf16.msra.mxu1 %v12113_v48  ;;  %2407 = vmatprep.mubr.f32.mxu1 %v1155_v15  ;;  %v14150_v48 = vpack.c.bf16 %v10142_v16, %v10141_v41  ;;  %v1623_v15 = vsel %vm1152_vm1, %v1621_v13, %v1622_v28  ;;  %v1169_v41 = vrot.slane %v14171_v22, 1  ;;  %v14193_v16 = vld [vmem:[%s13472_s10 + $0x68] sm:$0x3] }
 0x11d   : > { %1998 = vmatmul.mubr.f32.gmra.mrb[16].mxu0 %v13636_v27  ;;  %12147 = vmatprep.subr.bf16.mxu1 %v20009_v19 }
 0x11e   : > { %2002 = vmatprep.mubr.f32.mxu0 %v1617_v24  ;;  %v20032_v24 = vrot.slane %v13543_v43, 1  ;;  %12196 = vmatprep.subr.bf16.mxu0 %v14150_v48  ;;  %v1170_v17 = vsel %vm1152_vm1, %v20034_v18, %v1169_v41  ;;  %v1637_v41 = vrot.slane %v13767_v60, 1  ;;  %v10124_v60 = vld [vmem:[%s19937_s1 + $0x378] sm:$0xff] }
 0x11f   : > { %2408 = vmatmul.mubr.f32.vlgmr.msra.gmra.mrb[32].mxu1 %v14041_v39  ;;  %v12151_v39 = vpack.c.bf16 %v10112_v49, %v10111_v11  ;;  %v1628_v11 = vrot.slane %v13729_v26, 1  ;;  %v10118_v26 = vld [vmem:[%s19937_s1 + $0x348] sm:$0xff]  ;;  %v14258_v18 = vld [vmem:[%s13472_s10 + $0xb8] sm:$0x3] }
 0x120   : > { %12149 = vmatpush1.bf16.msra.mxu1 %v12148_v34  ;;  %2412 = vmatprep.mubr.f32.mxu1 %v1158_v50  ;;  %v1164_v55 = vsel %vm1152_vm1, %v20032_v24, %v1163_v2  ;;  %v1166_v34 = vrot.slane %v14148_v37, 1  ;;  %v1626_v50 = vsel %vm1152_vm1, %v1624_v7, %v1625_v45  ;;  %v14214_v45 = vld [vmem:[%s13472_s10 + $0x78] sm:$0x3]  ;;  %v1633_v24 = vrot.slane %v13758_v52, 1 }
 0x121   : > { %2003 = vmatmul.mubr.f32.gmra.mrb[18].mxu0 %v13662_v42  ;;  %12150 = vmatprep.subr.bf16.mxu1 %v20009_v19 }
 0x122   : > { %2007 = vmatprep.mubr.f32.mxu0 %v1620_v56  ;;  %v20033_v56 = vrot.slane %v13566_v54, 1 }
 0x123   : > { %2413 = vmatmul.mubr.f32.gmra.mrb[34].mxu1 %v13475_v8  ;;  %v10115_v8 = vld [vmem:[%s19937_s1 + $0x330] sm:$0xff] }
 0x124   : > { %2417 = vmatprep.mubr.f32.mxu1 %v1161_v36  ;;  %12152 = vmatpush1.bf16.msra.mxu1 %v12151_v39  ;;  %v12157_v49 = vpack.c.bf16 %v10116_v5, %v10115_v8  ;;  %v1167_v28 = vsel %vm1152_vm1, %v20033_v56, %v1166_v34  ;;  %v1629_v39 = vsel %vm1152_vm1, %v1627_v46, %v1628_v11  ;;  %v1631_v36 = vrot.slane %v13735_v31, 1  ;;  %v10120_v31 = vld [vmem:[%s19937_s1 + $0x358] sm:$0xff]  ;;  %v14235_v11 = vld [vmem:[%s13472_s10 + $0xa0] sm:$0xff] }
 0x125   : > { %2008 = vmatmul.mubr.f32.gmra.mrb[20].mxu0 %v13668_v47  ;;  %12153 = vmatprep.subr.bf16.mxu1 %v20009_v19  ;;  %v20035_v8 = vrot.slane %v13598_v6, 1 }
 0x126   : > { %2012 = vmatprep.mubr.f32.mxu0 %v1623_v15  ;;  %v1172_v15 = vrot.slane %v14193_v16, 1 }
 0x127   : > { %2418 = vmatmul.mubr.f32.gmra.mrb[36].mxu1 %v13537_v40  ;;  %v10117_v40 = vld [vmem:[%s19937_s1 + $0x340] sm:$0xff] }
 0x128   : > { %2422 = vmatprep.mubr.f32.mxu1 %v1164_v55  ;;  %12155 = vmatpush1.bf16.msra.mxu1 %v12154_v51  ;;  %v12160_v2 = vpack.c.bf16 %v10118_v26, %v10117_v40  ;;  %v1632_v51 = vsel %vm1152_vm1, %v1630_v35, %v1631_v36  ;;  %v1634_v55 = vrot.slane %v13761_v53, 1  ;;  %v1173_v5 = vsel %vm1152_vm1, %v20035_v8, %v1172_v15  ;;  %v10122_v53 = vld [vmem:[%s19937_s1 + $0x368] sm:$0xff] }
 0x129   : > { %2013 = vmatmul.mubr.f32.gmra.mrb[22].mxu0 %v13694_v1  ;;  %12156 = vmatprep.subr.bf16.mxu1 %v20009_v19  ;;  %v20036_v26 = vrot.slane %v13604_v10, 1  ;;  %v1177_v36 = vrot.slane %v14235_v11, 1  ;;  %v1639_v15 = vrot.slane %v13796_v20, 1  ;;  %v1643_v8 = vrot.slane %v13805_v32, 1  ;;  %v10128_v32 = vld [vmem:[%s19937_s1 + $0x398] sm:$0xff] }
 0x12a   : > { %2017 = vmatprep.mubr.f32.mxu0 %v1626_v50  ;;  %v1175_v50 = vrot.slane %v14214_v45, 1  ;;  %v1635_v56 = vsel %vm1152_vm1, %v1633_v24, %v1634_v55  ;;  %v1181_v24 = vrot.slane %v14258_v18, 1  ;;  %v10126_v55 = vld [vmem:[%s19937_s1 + $0x388] sm:$0xff] }
 0x12b   : > { %2423 = vmatmul.mubr.f32.gmra.mrb[38].mxu1 %v13543_v43  ;;  %v10119_v43 = vld [vmem:[%s19937_s1 + $0x350] sm:$0xff] }
 0x12c   : > { %2427 = vmatprep.mubr.f32.mxu1 %v1167_v28  ;;  %12158 = vmatpush1.bf16.msra.mxu1 %v12157_v49  ;;  %v12163_v34 = vpack.c.bf16 %v10120_v31, %v10119_v43  ;;  %v14238_v49 = vld [vmem:[%s13472_s10 + $0xa8] sm:$0x3]  ;;  %v1636_v28 = vrot.slane %v13764_v59, 1  ;;  %v1640_v43 = vrot.slane %v13799_v21, 1 }
 0x12d   : > { %2018 = vmatmul.mubr.f32.gmra.mrb[24].mxu0 %v13700_v4  ;;  %12159 = vmatprep.subr.bf16.mxu1 %v20009_v19  ;;  %v14277_v21 = vld [vmem:[%s13472_s10 + $0xc8] sm:$0x3] }
 0x12e   : > { %2022 = vmatprep.mubr.f32.mxu0 %v1629_v39  ;;  %v1176_v39 = vsel %vm1152_vm1, %v20036_v26, %v1175_v50  ;;  %v1182_v50 = vsel %vm1152_vm1, %v1612_v44, %v1181_v24  ;;  %v20037_v24 = vld [vmem:[#allocation7_spill] sm:$0xff] }
 0x12f   : > { %2428 = vmatmul.mubr.f32.gmra.mrb[40].mxu1 %v13566_v54  ;;  %v10121_v54 = vld [vmem:[%s19937_s1 + $0x360] sm:$0xff] }
 0x130   : > { %2432 = vmatprep.mubr.f32.mxu1 %v1170_v17  ;;  %12161 = vmatpush1.bf16.msra.mxu1 %v12160_v2  ;;  %v12166_v40 = vpack.c.bf16 %v10122_v53, %v10121_v54  ;;  %v1178_v2 = vrot.slane %v14238_v49, 1  ;;  %v1638_v17 = vsel %vm1152_vm1, %v1636_v28, %v1637_v41  ;;  %v1184_v54 = vrot.slane %v14277_v21, 1  ;;  %v14298_v53 = vld [vmem:[%s13472_s10 + $0xd8] sm:$0x3] }
 0x131   : > { %2023 = vmatmul.mubr.f32.gmra.mrb[26].mxu0 %v13726_v23  ;;  %12162 = vmatprep.subr.bf16.mxu1 %v20009_v19  ;;  %v1646_v41 = vrot.slane %v13833_v0, 1  ;;  %v10130_v0 = vld [vmem:[%s19937_s1 + $0x3a8] sm:$0xff]  ;;  %v14409_v23 = vld [vmem:[%s13472_s10 + $0xf0] sm:$0xff] }
 0x132   : > { %2027 = vmatprep.mubr.f32.mxu0 %v1632_v51  ;;  %v1179_v51 = vsel %vm1152_vm1, %v1177_v36, %v1178_v2  ;;  %v1185_v26 = vsel %vm1152_vm1, %v1615_v25, %v1184_v54  ;;  %v10129_v36 = vld [vmem:[%s19937_s1 + $0x3a0] sm:$0xff]  ;;  %v14319_v2 = vld [vmem:[%s13472_s10 + $0xe8] sm:$0x3] }
 0x133   : > { %2433 = vmatmul.mubr.f32.gmra.mrb[42].mxu1 %v13572_v57  ;;  %v10123_v57 = vld [vmem:[%s19937_s1 + $0x370] sm:$0xff]  ;;  %v10134_v54 = vld [vmem:[%s19937_s1 + $0x3c8] sm:$0xff] }
 0x134   : > { %2437 = vmatprep.mubr.f32.mxu1 %v1173_v5  ;;  %12164 = vmatpush1.bf16.msra.mxu1 %v12163_v34  ;;  %v12169_v31 = vpack.c.bf16 %v10124_v60, %v10123_v57  ;;  %v1642_v34 = vrot.slane %v13802_v29, 1  ;;  %v1648_v57 = vrot.slane %v13836_v3, 1  ;;  %v1649_v60 = vrot.slane %v13839_v9, 1  ;;  %v10132_v9 = vld [vmem:[%s19937_s1 + $0x3b8] sm:$0xff] }
 0x135   : > { %2028 = vmatmul.mubr.f32.gmra.mrb[28].mxu0 %v13732_v30  ;;  %12165 = vmatprep.subr.bf16.mxu1 %v20009_v19  ;;  %v10253_v30 = vld [vmem:[%s19937_s1 + $0x580] sm:$0xff] }
 0x136   : > { %2032 = vmatprep.mubr.f32.mxu0 %v1635_v56  ;;  %v1644_v44 = vsel %vm1152_vm1, %v1642_v34, %v1643_v8  ;;  %v1645_v56 = vrot.slane %v13830_v63, 1 }
 0x137   : > { %2438 = vmatmul.mubr.f32.gmra.mrb[44].mxu1 %v13598_v6  ;;  %v10125_v6 = vld [vmem:[%s19937_s1 + $0x380] sm:$0xff] }
 0x138   : > { %2442 = vmatprep.mubr.f32.mxu1 %v1176_v39  ;;  %12167 = vmatpush1.bf16.msra.mxu1 %v12166_v40  ;;  %v12172_v5 = vpack.c.bf16 %v10126_v55, %v10125_v6  ;;  %v1187_v39 = vrot.slane %v14298_v53, 1  ;;  %v1647_v25 = vsel %vm1152_vm1, %v1645_v56, %v1646_v41  ;;  %v1651_v6 = vrot.slane %v20037_v24, 1  ;;  %v20038_v55 = vld [vmem:[#allocation8_spill] sm:$0xff]  ;;  %v20040_v41 = vld [vmem:[#allocation10_spill] sm:$0xff] }
 0x139   : > { %2033 = vmatmul.mubr.f32.gmra.mrb[30].mxu0 %v13758_v52  ;;  %12168 = vmatprep.subr.bf16.mxu1 %v20009_v19  ;;  %v1641_v52 = vsel %vm1152_vm1, %v1639_v15, %v1640_v43 }
 0x13a   : > { %2037 = vmatprep.mubr.f32.mxu0 %v1638_v17  ;;  %v12178_v17 = vpack.c.bf16 %v10130_v0, %v10129_v36  ;;  %v1188_v43 = vsel %vm1152_vm1, %v1618_v61, %v1187_v39  ;;  %v1650_v61 = vsel %vm1152_vm1, %v1648_v57, %v1649_v60  ;;  %v10136_v0 = vld [vmem:[%s19937_s1 + $0x3d8] sm:$0xff] }
 0x13b   : > { %2443 = vmatmul.mubr.f32.gmra.mrb[46].mxu1 %v13604_v10  ;;  %v10127_v10 = vld [vmem:[%s19937_s1 + $0x390] sm:$0xff] }
 0x13c   : > { %2447 = vmatprep.mubr.f32.mxu1 %v1179_v51  ;;  %12170 = vmatpush1.bf16.msra.mxu1 %v12169_v31  ;;  %v12175_v40 = vpack.c.bf16 %v10128_v32, %v10127_v10  ;;  %v1190_v31 = vrot.slane %v14319_v2, 1  ;;  %v14340_v51 = vld [vmem:[%s13472_s10 + $0xf8] sm:$0x3]  ;;  %v14361_v10 = vld [vmem:[%s13472_s10 + $0x108] sm:$0x3]  ;;  %v20039_v32 = vld [vmem:[#allocation9_spill] sm:$0xff] }
 0x13d   : > { %2038 = vmatmul.mubr.f32.gmra.mrb[32].mxu0 %v13764_v59  ;;  %12171 = vmatprep.subr.bf16.mxu1 %v20009_v19  ;;  %v1196_v36 = vrot.slane %v14361_v10, 1 }
 0x13e   : > { %2042 = vmatprep.mubr.f32.mxu0 %v1641_v52  ;;  %v1652_v52 = vrot.slane %v20038_v55, 1  ;;  %v14403_v55 = vld [vmem:[%s13472_s10 + $0x140] sm:$0xff] }
 0x13f   : > { %2448 = vmatmul.mubr.f32.gmra.mrb[48].mxu1 %v14235_v11 }
 0x140   : > { %2452 = vmatprep.mubr.f32.mxu1 %v1182_v50  ;;  %12173 = vmatpush1.bf16.msra.mxu1 %v12172_v5  ;;  %v1191_v5 = vsel %vm1152_vm1, %v1621_v13, %v1190_v31  ;;  %v1193_v50 = vrot.slane %v14340_v51, 1  ;;  %v1653_v13 = vsel %vm1152_vm1, %v1651_v6, %v1652_v52  ;;  %v14406_v52 = vld [vmem:[%s13472_s10 + $0x148] sm:$0x3] }
 0x141   : > { %2043 = vmatmul.mubr.f32.gmra.mrb[34].mxu0 %v13796_v20  ;;  %12174 = vmatprep.subr.bf16.mxu1 %v20009_v19 }
 0x142   : > { %2047 = vmatprep.mubr.f32.mxu0 %v1644_v44  ;;  %v1654_v44 = vrot.slane %v20039_v32, 1  ;;  %v1194_v39 = vsel %vm1152_vm1, %v1624_v7, %v1193_v50  ;;  %v20041_v7 = vld [vmem:[#allocation11_spill] sm:$0xff]  ;;  %v20044_v50 = vld [vmem:[#allocation14_spill] sm:$0xff] }
 0x143   : > { %2453 = vmatmul.mubr.f32.gmra.mrb[50].mxu1 %v13636_v27  ;;  %v10131_v27 = vld [vmem:[%s19937_s1 + $0x3b0] sm:$0xff]  ;;  %v1657_v60 = vrot.slane %v20041_v7, 1 }
 0x144   : > { %2457 = vmatprep.mubr.f32.mxu1 %v1185_v26  ;;  %12176 = vmatpush1.bf16.msra.mxu1 %v12175_v40  ;;  %v12181_v8 = vpack.c.bf16 %v10132_v9, %v10131_v27  ;;  %v1655_v40 = vrot.slane %v20040_v41, 1  ;;  %v1197_v27 = vsel %vm1152_vm1, %v1627_v46, %v1196_v36  ;;  %v10137_v9 = vld [vmem:[%s19937_s1 + $0x3e0] sm:$0xff]  ;;  %v1201_v41 = vrot.slane %v14403_v55, 1  ;;  %v14429_v36 = vld [vmem:[%s13472_s10 + $0x158] sm:$0x3] }
 0x145   : > { %2048 = vmatmul.mubr.f32.gmra.mrb[36].mxu0 %v13802_v29  ;;  %12177 = vmatprep.subr.bf16.mxu1 %v20009_v19 }
 0x146   : > { %2052 = vmatprep.mubr.f32.mxu0 %v1647_v25  ;;  %v14382_v25 = vld [vmem:[%s13472_s10 + $0x118] sm:$0x3]  ;;  %v1656_v4 = vsel %vm1152_vm1, %v1654_v44, %v1655_v40  ;;  %v1202_v40 = vrot.slane %v14406_v52, 1 }
 0x147   : > { %2458 = vmatmul.mubr.f32.gmra.mrb[52].mxu1 %v13662_v42  ;;  %v10133_v42 = vld [vmem:[%s19937_s1 + $0x3c0] sm:$0xff] }
 0x148   : > { %2462 = vmatprep.mubr.f32.mxu1 %v1188_v43  ;;  %12179 = vmatpush1.bf16.msra.mxu1 %v12178_v17  ;;  %v12184_v26 = vpack.c.bf16 %v10134_v54, %v10133_v42  ;;  %v20042_v17 = vld [vmem:[#allocation12_spill] sm:$0xff]  ;;  %v1661_v42 = vrot.slane %v20044_v50, 1  ;;  %v20047_v50 = vld [vmem:[#allocation17_spill] sm:$0xff] }
 0x149   : > { %2053 = vmatmul.mubr.f32.gmra.mrb[38].mxu0 %v13830_v63  ;;  %12180 = vmatprep.subr.bf16.mxu1 %v20009_v19  ;;  %v1658_v43 = vrot.slane %v20042_v17, 1  ;;  %v20046_v17 = vld [vmem:[#allocation16_spill] sm:$0xff] }
 0x14a   : > { %2057 = vmatprep.mubr.f32.mxu0 %v1650_v61  ;;  %v10138_v61 = vld [vmem:[%s19937_s1 + $0x3e8] sm:$0xff] }
 0x14b   : > { %2463 = vmatmul.mubr.f32.gmra.mrb[54].mxu1 %v13668_v47  ;;  %v10135_v47 = vld [vmem:[%s19937_s1 + $0x3d0] sm:$0xff]  ;;  %v1659_v46 = vsel %vm1152_vm1, %v1657_v60, %v1658_v43  ;;  %v12190_v54 = vpack.c.bf16 %v10138_v61, %v10137_v9  ;;  %v1664_v43 = vrot.slane %v20046_v17, 1  ;;  %v14453_v61 = vld [vmem:[%s13472_s10 + $0x168] sm:$0x3] }
 0x14c   : > { %2467 = vmatprep.mubr.f32.mxu1 %v1191_v5  ;;  %12182 = vmatpush1.bf16.msra.mxu1 %v12181_v8  ;;  %v12187_v31 = vpack.c.bf16 %v10136_v0, %v10135_v47  ;;  %v20043_v8 = vld [vmem:[#allocation13_spill] sm:$0xff]  ;;  %v14438_v47 = vld [vmem:[%s13472_s10 + $0x100] sm:$0xff] }
 0x14d   : > { %2058 = vmatmul.mubr.f32.gmra.mrb[40].mxu0 %v13836_v3  ;;  %12183 = vmatprep.subr.bf16.mxu1 %v20009_v19  ;;  %v1660_v5 = vrot.slane %v20043_v8, 1 }
 0x14e   : > { %2062 = vmatprep.mubr.f32.mxu0 %v1653_v13 }
 0x14f   : > { %2468 = vmatmul.mubr.f32.gmra.mrb[56].mxu1 %v13694_v1  ;;  %v1199_v1 = vrot.slane %v14382_v25, 1  ;;  %v1662_v0 = vsel %vm1152_vm1, %v1660_v5, %v1661_v42  ;;  %v1666_v42 = vrot.slane %v20047_v50, 1 }
 0x150   : > { %2472 = vmatprep.mubr.f32.mxu1 %v1194_v39  ;;  %12185 = vmatpush1.bf16.msra.mxu1 %v12184_v26  ;;  %v10139_v26 = vld [vmem:[%s19937_s1 + $0x3f0] sm:$0xff]  ;;  %v10140_v39 = vld [vmem:[%s19937_s1 + $0x3f8] sm:$0xff] }
 0x151   : > { %2063 = vmatmul.mubr.f32.gmra.mrb[42].mxu0 %v20037_v24  ;;  %12186 = vmatprep.subr.bf16.mxu1 %v20009_v19  ;;  %v1200_v13 = vsel %vm1152_vm1, %v1630_v35, %v1199_v1  ;;  %v10254_v35 = vld [vmem:[%s19937_s1 + $0x588] sm:$0xff]  ;;  %v1205_v1 = vrot.slane %v14429_v36, 1 }
 0x152   : > { %2067 = vmatprep.mubr.f32.mxu0 %v1656_v4  ;;  %v20045_v4 = vld [vmem:[#allocation15_spill] sm:$0xff]  ;;  %v14450_v9 = vpack.c.bf16 %v10254_v35, %v10253_v30 }
 0x153   : > { %2473 = vmatmul.mubr.f32.gmra.mrb[58].mxu1 %v14409_v23  ;;  %v1663_v60 = vrot.slane %v20045_v4, 1  ;;  %v20049_v30 = vld [vmem:[#allocation19_spill] sm:$0xff] }
 0x154   : > { %2477 = vmatprep.mubr.f32.mxu1 %v1197_v27  ;;  %12188 = vmatpush1.bf16.msra.mxu1 %v12187_v31  ;;  %v12193_v31 = vpack.c.bf16 %v10140_v39, %v10139_v26  ;;  %v1203_v27 = vsel %vm1152_vm1, %v1201_v41, %v1202_v40  ;;  %v1206_v41 = vsel %vm1152_vm1, %v1636_v28, %v1205_v1  ;;  %v1208_v40 = vrot.slane %v14453_v61, 1  ;;  %v14471_v26 = vld [vmem:[%s13472_s10 + $0x178] sm:$0x3]  ;;  %v20051_v1 = vld [vmem:[#allocation21_spill] sm:$0xff] }
 0x155   : > { %2068 = vmatmul.mubr.f32.gmra.mrb[44].mxu0 %v20039_v32  ;;  %12189 = vmatprep.subr.bf16.mxu1 %v20009_v19  ;;  %v1669_v35 = vrot.slane %v20049_v30, 1  ;;  %v1211_v17 = vrot.slane %v14471_v26, 1 }
 0x156   : > { %2072 = vmatprep.mubr.f32.mxu0 %v1659_v46  ;;  %v14456_v46 = vld [vmem:[%s13472_s10 + $0x110] sm:$0xff]  ;;  %v1209_v28 = vsel %vm1152_vm1, %v1639_v15, %v1208_v40  ;;  %v14503_v40 = vld [vmem:[%s13472_s10 + $0x160] sm:$0xff] }
 0x157   : > { %2478 = vmatmul.mubr.f32.gmra.mrb[60].mxu1 %v14438_v47  ;;  %v1212_v20 = vsel %vm1152_vm1, %v1642_v34, %v1211_v17  ;;  %v14515_v17 = vld [vmem:[%s13472_s10 + $0x1a8] sm:$0x3] }
 0x158   : > { %2482 = vmatprep.mubr.f32.mxu1 %v1200_v13  ;;  %12191 = vmatpush1.bf16.msra.mxu1 %v12190_v54  ;;  %v20048_v54 = vld [vmem:[#allocation18_spill] sm:$0xff] }
 0x159   : > { %2073 = vmatmul.mubr.f32.gmra.mrb[46].mxu0 %v20041_v7  ;;  %12192 = vmatprep.subr.bf16.mxu1 %v20009_v19  ;;  %v1665_v7 = vsel %vm1152_vm1, %v1663_v60, %v1664_v43  ;;  %v1667_v13 = vrot.slane %v20048_v54, 1  ;;  %v14485_v43 = vld [vmem:[%s13472_s10 + $0x188] sm:$0x3]  ;;  %v20052_v54 = vld [vmem:[#allocation22_spill] sm:$0xff] }
 0x15a   : > { %2077 = vmatprep.mubr.f32.mxu0 %v1662_v0  ;;  %v20050_v0 = vld [vmem:[#allocation20_spill] sm:$0xff]  ;;  %v1214_v15 = vrot.slane %v14485_v43, 1 }
 0x15b   : > { %2483 = vmatmul.mubr.f32.gmra.mrb[62].mxu1 %v14456_v46  ;;  %v1668_v39 = vsel %vm1152_vm1, %v1666_v42, %v1667_v13  ;;  %v1670_v59 = vrot.slane %v20050_v0, 1  ;;  %v1673_v13 = vrot.slane %v20052_v54, 1  ;;  %v20055_v54 = vld [vmem:[#allocation25_spill] sm:$0xff] }
 0x15c   : > { %2487 = vmatprep.mubr.f32.mxu1 %v1203_v27  ;;  %12194 = vmatpush1.bf16.msra.mxu1 %v12193_v31  ;;  %v14488_v31 = vld [vmem:[%s13472_s10 + $0x150] sm:$0xff]  ;;  %v1215_v29 = vsel %vm1152_vm1, %v1645_v56, %v1214_v15  ;;  %v14530_v15 = vld [vmem:[%s13472_s10 + $0x1b8] sm:$0x3] }
 0x15d   : > { %2078 = vmatmul.mubr.f32.gmra.mrb[48].mxu0 %v20043_v8  ;;  %12276 = vmatprep.subr.bf16.mxu1 %v14450_v9  ;;  %v1671_v27 = vsel %vm1152_vm1, %v1669_v35, %v1670_v59  ;;  %v20053_v35 = vld [vmem:[#allocation23_spill] sm:$0xff]  ;;  %v20054_v59 = vld [vmem:[#allocation24_spill] sm:$0xff] }
 0x15e   : > { %2082 = vmatprep.mubr.f32.mxu0 %v1665_v7  ;;  %v1672_v7 = vrot.slane %v20051_v1, 1  ;;  %v1675_v0 = vrot.slane %v20053_v35, 1 }
 0x15f   : > { %2488 = vmatmul.mubr.f32.gmra.mrb[64].mxu1 %v14403_v55 }
 0x160   : > { %2492 = vmatprep.mubr.f32.mxu1 %v1206_v41  ;;  %v14500_v41 = vld [vmem:[%s13472_s10 + $0x198] sm:$0x3] }
 0x161   : > { %2083 = vmatmul.mubr.f32.gmra.mrb[50].mxu0 %v20045_v4  ;;  %v1217_v34 = vrot.slane %v14500_v41, 1 }
 0x162   : > { %2087 = vmatprep.mubr.f32.mxu0 %v1668_v39  ;;  %v1674_v39 = vsel %vm1152_vm1, %v1672_v7, %v1673_v13  ;;  %v1678_v13 = vrot.slane %v20055_v54, 1 }
 0x163   : > { %2493 = vmatmul.mubr.f32.gmra.mrb[66].mxu1 %v14488_v31  ;;  %v1218_v56 = vsel %vm1152_vm1, %v1648_v57, %v1217_v34  ;;  %v1223_v57 = vrot.slane %v14530_v15, 1 }
 0x164   : > { %2497 = vmatprep.mubr.f32.mxu1 %v1209_v28  ;;  %v1676_v28 = vrot.slane %v20054_v59, 1 }
 0x165   : > { %2088 = vmatmul.mubr.f32.gmra.mrb[52].mxu0 %v20047_v50 }
 0x166   : > { %2092 = vmatprep.mubr.f32.mxu0 %v1671_v27  ;;  %v14518_v27 = vld [vmem:[%s13472_s10 + $0x170] sm:$0xff]  ;;  %v1677_v7 = vsel %vm1152_vm1, %v1675_v0, %v1676_v28  ;;  %v1681_v0 = vrot.slane %v14038_v33, 1  ;;  %v1682_v28 = vrot.slane %v14059_v38, 1 }
 0x167   : > { %2498 = vmatmul.mubr.f32.gmra.mrb[68].mxu1 %v14503_v40 }
 0x168   : > { %2502 = vmatprep.mubr.f32.mxu1 %v1212_v20  ;;  %v20056_v20 = vld [vmem:[#allocation26_spill] sm:$0xff]  ;;  %v1683_v38 = vsel %vm1152_vm1, %v1681_v0, %v1682_v28  ;;  %v1292_v28 = vrot.slane %v14121_v14, 2  ;;  %v10145_v14 = vld [vmem:[%s19937_s1 + $0x420] sm:$0xff] }
 0x169   : > { %2093 = vmatmul.mubr.f32.gmra.mrb[54].mxu0 %v20049_v30  ;;  %v1679_v59 = vrot.slane %v20056_v20, 1  ;;  %v1220_v30 = vrot.slane %v14515_v17, 1 }
 0x16a   : > { %2097 = vmatprep.mubr.f32.mxu0 %v1674_v39 }
 0x16b   : > { %2503 = vmatmul.mubr.f32.gmra.mrb[70].mxu1 %v14518_v27  ;;  %v1680_v39 = vsel %vm1152_vm1, %v1678_v13, %v1679_v59  ;;  %v1221_v3 = vsel %vm1152_vm1, %v1651_v6, %v1220_v30  ;;  %v1224_v6 = vsel %vm1152_vm1, %v1654_v44, %v1223_v57  ;;  %v12755_v13 = vld [vmem:[%s13472_s10 + $0x10] sm:$0xff]  ;;  %v14561_v59 = vld [vmem:[%s13472_s10 + $0x1f8] sm:$0x3]  ;;  %v1289_v44 = vrot.slane %v14101_v62, 2 }
 0x16c   : > { %2507 = vmatprep.mubr.f32.mxu1 %v1215_v29  ;;  %v14548_v29 = vld [vmem:[%s13472_s10 + $0x190] sm:$0xff]  ;;  %v1285_v20 = vrot.slane %v12755_v13, 2 }
 0x16d   : > { %2098 = vmatmul.mubr.f32.gmra.mrb[56].mxu0 %v20051_v1  ;;  %v14542_v1 = vld [vmem:[%s13472_s10 + $0x1e0] sm:$0xff]  ;;  %v14583_v57 = vld [vmem:[%s13472_s10 + $0x1b0] sm:$0xff] }
 0x16e   : > { %2102 = vmatprep.mubr.f32.mxu0 %v1677_v7  ;;  %v1286_v7 = vrot.slane %v14082_v58, 2  ;;  %v10143_v58 = vld [vmem:[%s19937_s1 + $0x410] sm:$0xff] }
 0x16f   : > { %2508 = vmatmul.mubr.f32.gmra.mrb[72].mxu1 %v13830_v63  ;;  %v14545_v63 = vld [vmem:[%s13472_s10 + $0x1e8] sm:$0x3] }
 0x170   : > { %2512 = vmatprep.mubr.f32.mxu1 %v1218_v56  ;;  %v1226_v34 = vrot.slane %v14545_v63, 1  ;;  %v10144_v56 = vld [vmem:[%s19937_s1 + $0x418] sm:$0xff]  ;;  %v1287_v62 = vsel %vm1281_vm0, %v1285_v20, %v1286_v7  ;;  %v12760_v20 = vld [vmem:[%s13472_s10 + $0x50] sm:$0xff] }
 0x171   : > { %2103 = vmatmul.mubr.f32.gmra.mrb[58].mxu0 %v20053_v35  ;;  %v1225_v35 = vrot.slane %v14542_v1, 1 }
 0x172   : > { %2107 = vmatprep.mubr.f32.mxu0 %v1680_v39  ;;  %v12757_v39 = vld [vmem:[%s13472_s10 + $0x30] sm:$0xff] }
 0x173   : > { %2513 = vmatmul.mubr.f32.gmra.mrb[74].mxu1 %v14548_v29  ;;  %v1227_v30 = vsel %vm1152_vm1, %v1225_v35, %v1226_v34  ;;  %v1291_v0 = vrot.slane %v12757_v39, 2  ;;  %v12199_v35 = vpack.c.bf16 %v10144_v56, %v10143_v58  ;;  %v10146_v34 = vld [vmem:[%s19937_s1 + $0x428] sm:$0xff]  ;;  %v12761_v58 = vld [vmem:[%s13472_s10 + $0x60] sm:$0xff]  ;;  %v1301_v56 = vrot.slane %v14193_v16, 2  ;;  %v12762_v39 = vld [vmem:[%s13472_s10 + $0x70] sm:$0xff] }
 0x174   : > { %2517 = vmatprep.mubr.f32.mxu1 %v1221_v3  ;;  %v14580_v3 = vld [vmem:[%s13472_s10 + $0x208] sm:$0x3] }
 0x175   : > { %2108 = vmatmul.mubr.f32.gmra.mrb[60].mxu0 %v20055_v54  ;;  %v12756_v54 = vld [vmem:[%s13472_s10 + $0x20] sm:$0xff]  ;;  %v1232_v13 = vrot.slane %v14580_v3, 1 }
 0x176   : > { %2112 = vmatprep.mubr.f32.mxu0 %v1683_v38  ;;  %v1288_v32 = vrot.slane %v12756_v54, 2  ;;  %v12759_v38 = vld [vmem:[%s13472_s10 + $0x40] sm:$0xff]  ;;  %v1297_v54 = vrot.slane %v12760_v20, 2  ;;  %v1310_v20 = vrot.slane %v14258_v18, 2 }
 0x177   : > { %2518 = vmatmul.mubr.f32.gmra.mrb[76].mxu1 %v20037_v24  ;;  %v1229_v24 = vrot.slane %v14561_v59, 1 }
 0x178   : > { %2522 = vmatprep.mubr.f32.mxu1 %v1224_v6  ;;  %v1294_v6 = vrot.slane %v12759_v38, 2  ;;  %v14627_v38 = vld [vmem:[%s13472_s10 + $0x228] sm:$0x3] }
 0x179   : > { %2113 = vmatmul.mubr.f32.gmra.mrb[62].mxu0 %v14038_v33  ;;  %v1290_v33 = vsel %vm1281_vm0, %v1288_v32, %v1289_v44  ;;  %v1230_v7 = vsel %vm1152_vm1, %v1660_v5, %v1229_v24  ;;  %v1298_v32 = vrot.slane %v14171_v22, 2  ;;  %v14603_v44 = vld [vmem:[%s13472_s10 + $0x218] sm:$0x3]  ;;  %v1300_v5 = vrot.slane %v12761_v58, 2  ;;  %v10147_v22 = vld [vmem:[%s19937_s1 + $0x430] sm:$0xff] }
 0x17a   : > { %11379 = vmatprep.mubr.f32.mxu0 %v14066_v12  ;;  %v1295_v12 = vrot.slane %v14148_v37, 2  ;;  %v1293_v37 = vsel %vm1281_vm0, %v1291_v0, %v1292_v28  ;;  %v1233_v24 = vsel %vm1152_vm1, %v1663_v60, %v1232_v13  ;;  %v1303_v0 = vrot.slane %v12762_v39, 2  ;;  %v12764_v13 = vld [vmem:[%s13472_s10 + $0xb0] sm:$0xff] }
 0x17b   : > { %2523 = vmatmul.mubr.f32.gmra.mrb[78].mxu1 %v14583_v57  ;;  %v1299_v16 = vsel %vm1281_vm0, %v1297_v54, %v1298_v32  ;;  %v1304_v28 = vrot.slane %v14214_v45, 2  ;;  %v1302_v4 = vsel %vm1281_vm0, %v1300_v5, %v1301_v56  ;;  %v1306_v60 = vrot.slane %v14235_v11, 2  ;;  %v14651_v54 = vld [vmem:[%s13472_s10 + $0x230] sm:$0xff]  ;;  %v14654_v32 = vld [vmem:[%s13472_s10 + $0x238] sm:$0x3] }
 0x17c   : > { %2527 = vmatprep.mubr.f32.mxu1 %v1227_v30  ;;  %v1296_v8 = vsel %vm1281_vm0, %v1294_v6, %v1295_v12  ;;  %v12203_v30 = vpack.c.bf16 %v10146_v34, %v10145_v14  ;;  %v14630_v6 = vld [vmem:[%s13472_s10 + $0x1f0] sm:$0xff]  ;;  %v1307_v12 = vrot.slane %v14238_v49, 2  ;;  %v10150_v14 = vld [vmem:[%s19937_s1 + $0x448] sm:$0xff]  ;;  %v1238_v34 = vrot.slane %v14627_v38, 1 }
 0x17d   : > { %11380 = vmatmul.mubr.f32.vlgmr.msra.gmra.mrb[64].mxu0 %v1287_v62  ;;  %v1235_v62 = vrot.slane %v14603_v44, 1  ;;  %v1313_v5 = vrot.slane %v14277_v21, 2  ;;  %v10151_v56 = vld [vmem:[%s19937_s1 + $0x450] sm:$0xff]  ;;  %v1241_v21 = vrot.slane %v14654_v32, 1  ;;  %v1316_v39 = vrot.slane %v14298_v53, 2  ;;  %v10153_v53 = vld [vmem:[%s19937_s1 + $0x460] sm:$0xff] }
 0x17e   : > { %11382 = vmatprep.mubr.f32.mxu0 %v1290_v33  ;;  %12198 = vmatpush3.bf16.msra.mxu0 %v14150_v48  ;;  %v10148_v48 = vld [vmem:[%s19937_s1 + $0x438] sm:$0xff]  ;;  %v14624_v33 = vld [vmem:[%s13472_s10 + $0x220] sm:$0xff]  ;;  %v1308_v50 = vsel %vm1281_vm0, %v1306_v60, %v1307_v12 }
 0x17f   : > { %2528 = vmatmul.mubr.f32.gmra.mrb[80].mxu1 %v14542_v1  ;;  %12200 = vmatprep.subr.bf16.mxu0 %v12199_v35  ;;  %v12207_v45 = vpack.c.bf16 %v10148_v48, %v10147_v22  ;;  %v1236_v11 = vsel %vm1152_vm1, %v1666_v42, %v1235_v62  ;;  %v1237_v49 = vrot.slane %v14624_v33, 1  ;;  %v12766_v42 = vld [vmem:[%s13472_s10 + $0xc0] sm:$0xff]  ;;  %v1240_v48 = vrot.slane %v14651_v54, 1  ;;  %v12767_v62 = vld [vmem:[%s13472_s10 + $0xd0] sm:$0xff] }
 0x180   : > { %2532 = vmatprep.mubr.f32.mxu1 %v1230_v7  ;;  %v1305_v7 = vsel %vm1281_vm0, %v1303_v0, %v1304_v28  ;;  %v1312_v58 = vrot.slane %v12766_v42, 2  ;;  %v14676_v0 = vld [vmem:[%s13472_s10 + $0x240] sm:$0xff]  ;;  %v14679_v28 = vld [vmem:[%s13472_s10 + $0x248] sm:$0x3] }
 0x181   : > { %11383 = vmatmul.mubr.f32.gmra.mrb[66].mxu0 %v1293_v37  ;;  %v1309_v37 = vrot.slane %v12764_v13, 2  ;;  %v1239_v22 = vsel %vm1152_vm1, %v1237_v49, %v1238_v34  ;;  %v12769_v12 = vld [vmem:[%s13472_s10 + $0xe0] sm:$0xff]  ;;  %v1242_v49 = vsel %vm1152_vm1, %v1240_v48, %v1241_v21  ;;  %v1243_v34 = vrot.slane %v14676_v0, 1 }
 0x182   : > { %11385 = vmatprep.mubr.f32.mxu0 %v1296_v8  ;;  %12202 = vmatpush3.bf16.msra.mxu0 %v12199_v35  ;;  %v10149_v35 = vld [vmem:[%s19937_s1 + $0x440] sm:$0xff]  ;;  %v1314_v60 = vsel %vm1281_vm0, %v1312_v58, %v1313_v5  ;;  %v1321_v13 = vrot.slane %v14409_v23, 2  ;;  %v1324_v58 = vrot.slane %v14438_v47, 2  ;;  %v1325_v5 = vrot.slane %v14361_v10, 2  ;;  %v10156_v23 = vld [vmem:[%s19937_s1 + $0x478] sm:$0xff] }
 0x183   : > { %2533 = vmatmul.mubr.f32.gmra.mrb[82].mxu1 %v14630_v6  ;;  %12204 = vmatprep.subr.bf16.mxu0 %v12203_v30  ;;  %v14657_v8 = vld [vmem:[%s13472_s10 + $0x200] sm:$0xff]  ;;  %v12211_v18 = vpack.c.bf16 %v10150_v14, %v10149_v35  ;;  %v1318_v35 = vrot.slane %v12769_v12, 2  ;;  %v1319_v14 = vrot.slane %v14319_v2, 2  ;;  %v1328_v48 = vrot.slane %v14382_v25, 2 }
 0x184   : > { %2537 = vmatprep.mubr.f32.mxu1 %v1233_v24  ;;  %v1311_v24 = vsel %vm1281_vm0, %v1309_v37, %v1310_v20  ;;  %v1322_v37 = vrot.slane %v14340_v51, 2  ;;  %v14701_v20 = vld [vmem:[%s13472_s10 + $0x250] sm:$0xff]  ;;  %v14723_v21 = vld [vmem:[%s13472_s10 + $0x20] sm:$0xff] }
 0x185   : > { %11386 = vmatmul.mubr.f32.gmra.mrb[68].mxu0 %v1299_v16  ;;  %v1315_v16 = vrot.slane %v12767_v62, 2  ;;  %v1320_v42 = vsel %vm1281_vm0, %v1318_v35, %v1319_v14  ;;  %v10155_v51 = vld [vmem:[%s19937_s1 + $0x470] sm:$0xff]  ;;  %v1326_v62 = vsel %vm1281_vm0, %v1324_v58, %v1325_v5  ;;  %v1333_v14 = vrot.slane %v14488_v31, 2 }
 0x186   : > { %11388 = vmatprep.mubr.f32.mxu0 %v1302_v4  ;;  %12206 = vmatpush3.bf16.msra.mxu0 %v12203_v30  ;;  %v10152_v30 = vld [vmem:[%s19937_s1 + $0x458] sm:$0xff]  ;;  %v14682_v4 = vld [vmem:[%s13472_s10 + $0x210] sm:$0xff]  ;;  %v1323_v10 = vsel %vm1281_vm0, %v1321_v13, %v1322_v37  ;;  %v1339_v13 = vrot.slane %v14518_v27, 2  ;;  %v12770_v27 = vld [vmem:[%s13472_s10 + $0x180] sm:$0xff] }
 0x187   : > { %2538 = vmatmul.mubr.f32.gmra.mrb[84].mxu1 %v14657_v8  ;;  %12208 = vmatprep.subr.bf16.mxu0 %v12207_v45  ;;  %v1317_v2 = vsel %vm1281_vm0, %v1315_v16, %v1316_v39  ;;  %v1330_v16 = vrot.slane %v14403_v55, 2  ;;  %v1331_v39 = vrot.slane %v14406_v52, 2  ;;  %v1334_v55 = vrot.slane %v14429_v36, 2  ;;  %v14742_v52 = vld [vmem:[%s13472_s10 + $0x38] sm:$0x3]  ;;  %v10255_v37 = vld [vmem:[%s19937_s1 + $0x590] sm:$0xff] }
 0x188   : > { %2542 = vmatprep.mubr.f32.mxu1 %v1236_v11  ;;  %v12215_v11 = vpack.c.bf16 %v10152_v30, %v10151_v56  ;;  %v1246_v30 = vrot.slane %v14701_v20, 1  ;;  %v1342_v5 = vrot.slane %v12770_v27, 2 }
 0x189   : > { %11389 = vmatmul.mubr.f32.gmra.mrb[70].mxu0 %v1305_v7  ;;  %v1244_v7 = vrot.slane %v14679_v28, 1 }
 0x18a   : > { %11391 = vmatprep.mubr.f32.mxu0 %v1308_v50  ;;  %12210 = vmatpush3.bf16.msra.mxu0 %v12207_v45  ;;  %v10154_v45 = vld [vmem:[%s19937_s1 + $0x468] sm:$0xff]  ;;  %v14704_v50 = vld [vmem:[%s13472_s10 + $0x258] sm:$0x3] }
 0x18b   : > { %2543 = vmatmul.mubr.f32.gmra.mrb[86].mxu1 %v14682_v4  ;;  %12212 = vmatprep.subr.bf16.mxu0 %v12211_v18  ;;  %v12219_v56 = vpack.c.bf16 %v10154_v45, %v10153_v53  ;;  %v1247_v47 = vrot.slane %v14704_v50, 1  ;;  %v1332_v53 = vsel %vm1281_vm0, %v1330_v16, %v1331_v39  ;;  %v1336_v45 = vrot.slane %v14503_v40, 2  ;;  %v12771_v39 = vld [vmem:[%s13472_s10 + $0x1a0] sm:$0xff] }
 0x18c   : > { %2547 = vmatprep.mubr.f32.mxu1 %v1239_v22  ;;  %v1327_v22 = vrot.slane %v14456_v46, 2  ;;  %v2923_v46 = vrot.slane %v14723_v21, 1  ;;  %v1340_v40 = vrot.slane %v14471_v26, 2  ;;  %v1343_v26 = vrot.slane %v14485_v43, 2 }
 0x18d   : > { %11392 = vmatmul.mubr.f32.gmra.mrb[72].mxu0 %v1311_v24  ;;  %v14726_v24 = vld [vmem:[%s13472_s10 + $0x28] sm:$0x3]  ;;  %v1248_v25 = vsel %vm1152_vm1, %v1246_v30, %v1247_v47  ;;  %v1346_v43 = vrot.slane %v14500_v41, 2 }
 0x18e   : > { %11394 = vmatprep.mubr.f32.mxu0 %v1314_v60  ;;  %12214 = vmatpush3.bf16.msra.mxu0 %v12211_v18  ;;  %v1245_v18 = vsel %vm1152_vm1, %v1243_v34, %v1244_v7  ;;  %v12223_v60 = vpack.c.bf16 %v10156_v23, %v10155_v51  ;;  %v2924_v12 = vrot.slane %v14726_v24, 1  ;;  %v1329_v35 = vsel %vm1281_vm0, %v1327_v22, %v1328_v48  ;;  %v14752_v7 = vld [vmem:[%s13472_s10 + $0x40] sm:$0xff]  ;;  %v14781_v22 = vld [vmem:[%s13472_s10 + $0x58] sm:$0x3] }
 0x18f   : > { %2548 = vmatmul.mubr.f32.gmra.mrb[88].mxu1 %v14624_v33  ;;  %12216 = vmatprep.subr.bf16.mxu0 %v12215_v11  ;;  %v2927_v34 = vrot.slane %v14742_v52, 1  ;;  %v2929_v51 = vrot.slane %v14752_v7, 1  ;;  %v1341_v47 = vsel %vm1281_vm0, %v1339_v13, %v1340_v40  ;;  %v10257_v48 = vld [vmem:[%s19937_s1 + $0x5a0] sm:$0xff]  ;;  %v1344_v16 = vsel %vm1281_vm0, %v1342_v5, %v1343_v26 }
 0x190   : > { %2552 = vmatprep.mubr.f32.mxu1 %v1242_v49  ;;  %v1337_v49 = vrot.slane %v14453_v61, 2  ;;  %v2925_v36 = vsel %vm1152_vm1, %v2923_v46, %v2924_v12  ;;  %v14758_v61 = vld [vmem:[%s13472_s10 + $0x48] sm:$0x3]  ;;  %v2933_v46 = vrot.slane %v14781_v22, 1  ;;  %v14798_v12 = vld [vmem:[%s13472_s10 + $0x60] sm:$0xff]  ;;  %v1360_v5 = vrot.slane %v14657_v8, 2 }
 0x191   : > { %11395 = vmatmul.mubr.f32.gmra.mrb[74].mxu0 %v1317_v2  ;;  %v1335_v2 = vsel %vm1281_vm0, %v1333_v14, %v1334_v55  ;;  %v2930_v23 = vrot.slane %v14758_v61, 1  ;;  %v14804_v55 = vld [vmem:[%s13472_s10 + $0x68] sm:$0x3] }
 0x192   : > { %11397 = vmatprep.mubr.f32.mxu0 %v1320_v42  ;;  %12218 = vmatpush3.bf16.msra.mxu0 %v12215_v11  ;;  %v14739_v11 = vld [vmem:[%s13472_s10 + $0x30] sm:$0xff]  ;;  %v10256_v42 = vld [vmem:[%s19937_s1 + $0x598] sm:$0xff]  ;;  %v1338_v58 = vsel %vm1281_vm0, %v1336_v45, %v1337_v49 }
 0x193   : > { %2553 = vmatmul.mubr.f32.gmra.mrb[90].mxu1 %v14651_v54  ;;  %12220 = vmatprep.subr.bf16.mxu0 %v12219_v56  ;;  %v2926_v31 = vrot.slane %v14739_v11, 1  ;;  %v12279_v30 = vpack.c.bf16 %v10256_v42, %v10255_v37  ;;  %v2931_v41 = vsel %vm1152_vm1, %v2929_v51, %v2930_v23  ;;  %v10260_v45 = vld [vmem:[%s19937_s1 + $0x5b8] sm:$0xff]  ;;  %v10261_v42 = vld [vmem:[%s19937_s1 + $0x5c0] sm:$0xff]  ;;  %v14845_v23 = vld [vmem:[%s13472_s10 + $0x88] sm:$0x3] }
 0x194   : > { %2557 = vmatprep.mubr.f32.mxu1 %v1245_v18  ;;  %v14775_v18 = vld [vmem:[%s13472_s10 + $0x50] sm:$0xff]  ;;  %v14826_v37 = vld [vmem:[%s13472_s10 + $0x78] sm:$0x3]  ;;  %v14842_v51 = vld [vmem:[%s13472_s10 + $0x80] sm:$0xff] }
 0x195   : > { %11398 = vmatmul.mubr.f32.gmra.mrb[76].mxu0 %v1323_v10  ;;  %v1345_v10 = vrot.slane %v14548_v29, 2  ;;  %v1348_v29 = vrot.slane %v12771_v39, 2 }
 0x196   : > { %11400 = vmatprep.mubr.f32.mxu0 %v1326_v62  ;;  %12222 = vmatpush3.bf16.msra.mxu0 %v12219_v56  ;;  %v2928_v56 = vsel %vm1152_vm1, %v2926_v31, %v2927_v34  ;;  %v10258_v62 = vld [vmem:[%s19937_s1 + $0x5a8] sm:$0xff]  ;;  %v2935_v31 = vrot.slane %v14798_v12, 1  ;;  %v2936_v34 = vrot.slane %v14804_v55, 1 }
 0x197   : > { %2558 = vmatmul.mubr.f32.gmra.mrb[92].mxu1 %v14676_v0  ;;  %12224 = vmatprep.subr.bf16.mxu0 %v12223_v60  ;;  %v1347_v14 = vsel %vm1281_vm0, %v1345_v10, %v1346_v43  ;;  %v10263_v10 = vld [vmem:[%s19937_s1 + $0x5d0] sm:$0xff]  ;;  %v10264_v43 = vld [vmem:[%s19937_s1 + $0x5d8] sm:$0xff] }
 0x198   : > { %2562 = vmatprep.mubr.f32.mxu1 %v1248_v25  ;;  %v2932_v25 = vrot.slane %v14775_v18, 1 }
 0x199   : > { %11401 = vmatmul.mubr.f32.gmra.mrb[78].mxu0 %v1329_v35  ;;  %v12283_v35 = vpack.c.bf16 %v10258_v62, %v10257_v48  ;;  %v1366_v62 = vrot.slane %v14624_v33, 2  ;;  %v1369_v33 = vrot.slane %v14651_v54, 2  ;;  %v1373_v54 = vrot.slane %v14679_v28, 2 }
 0x19a   : > { %11403 = vmatprep.mubr.f32.mxu0 %v1332_v53  ;;  %12226 = vmatpush3.bf16.msra.mxu0 %v12223_v60  ;;  %v1349_v60 = vrot.slane %v14515_v17, 2  ;;  %v1351_v17 = vrot.slane %v14583_v57, 2  ;;  %v10259_v53 = vld [vmem:[%s19937_s1 + $0x5b0] sm:$0xff]  ;;  %v1355_v57 = vrot.slane %v14545_v63, 2  ;;  %v1358_v63 = vrot.slane %v14561_v59, 2 }
 0x19b   : > { %2563 = vmatmul.mubr.f32.gmra.mrb[94].mxu1 %v14701_v20  ;;  %12227 = vmatprep.subr.bf16.mxu0 %v20009_v19  ;;  %v12287_v13 = vpack.c.bf16 %v10260_v45, %v10259_v53  ;;  %v2937_v59 = vsel %vm1152_vm1, %v2935_v31, %v2936_v34  ;;  %v1376_v28 = vrot.slane %v14704_v50, 2  ;;  %v10268_v31 = vld [vmem:[%s19937_s1 + $0x5f8] sm:$0xff]  ;;  %v3052_v50 = vrot.slane %v14726_v24, 2 }
 0x19c   : > { %3292 = vmatprep.mubr.f32.mxu1 %v2925_v36  ;;  %v1350_v49 = vsel %vm1281_vm0, %v1348_v29, %v1349_v60  ;;  %v1354_v36 = vrot.slane %v14542_v1, 2  ;;  %v1357_v1 = vrot.slane %v14630_v6, 2  ;;  %v1361_v6 = vrot.slane %v14580_v3, 2  ;;  %v14864_v29 = vld [vmem:[%s13472_s10 + $0x90] sm:$0xff] }
 0x19d   : > { %11404 = vmatmul.mubr.f32.gmra.mrb[80].mxu0 %v1335_v2  ;;  %v14820_v2 = vld [vmem:[%s13472_s10 + $0x70] sm:$0xff]  ;;  %v1363_v3 = vrot.slane %v14682_v4, 2  ;;  %v2942_v4 = vrot.slane %v14845_v23, 1  ;;  %v12295_v60 = vpack.c.bf16 %v10264_v43, %v10263_v10  ;;  %v2944_v53 = vrot.slane %v14864_v29, 1 }
 0x19e   : > { %11406 = vmatprep.mubr.f32.mxu0 %v1338_v58  ;;  %v10262_v58 = vld [vmem:[%s19937_s1 + $0x5c8] sm:$0xff]  ;;  %v1356_v27 = vsel %vm1281_vm0, %v1354_v36, %v1355_v57  ;;  %v2938_v26 = vrot.slane %v14820_v2, 1  ;;  %v1359_v8 = vsel %vm1281_vm0, %v1357_v1, %v1358_v63  ;;  %v1362_v48 = vsel %vm1281_vm0, %v1360_v5, %v1361_v6  ;;  %v14917_v6 = vld [vmem:[%s13472_s10 + $0xd0] sm:$0xff] }
 0x19f   : > { %3293 = vmatmul.mubr.f32.vlgmr.msra.gmra.mrb[96].mxu1 %v14723_v21  ;;  %v3054_v24 = vrot.slane %v14739_v11, 2 }
 0x1a0   : > { %12278 = vmatpush3.bf16.msra.mxu1 %v14450_v9  ;;  %3297 = vmatprep.mubr.f32.mxu1 %v2928_v56  ;;  %v1352_v9 = vrot.slane %v14530_v15, 2  ;;  %v2934_v15 = vsel %vm1152_vm1, %v2932_v25, %v2933_v46  ;;  %v2939_v56 = vrot.slane %v14826_v37, 1  ;;  %v14870_v25 = vld [vmem:[%s13472_s10 + $0x98] sm:$0x3]  ;;  %v10265_v46 = vld [vmem:[%s19937_s1 + $0x5e0] sm:$0xff] }
 0x1a1   : > { %11407 = vmatmul.mubr.f32.gmra.mrb[82].mxu0 %v1341_v47  ;;  %12280 = vmatprep.subr.bf16.mxu1 %v12279_v30  ;;  %v1364_v47 = vrot.slane %v14603_v44, 2  ;;  %v2941_v44 = vrot.slane %v14842_v51, 1  ;;  %v2945_v45 = vrot.slane %v14870_v25, 1 }
 0x1a2   : > { %11409 = vmatprep.mubr.f32.mxu0 %v1344_v16  ;;  %v1353_v40 = vsel %vm1281_vm0, %v1351_v17, %v1352_v9  ;;  %v1367_v16 = vrot.slane %v14627_v38, 2  ;;  %v2940_v39 = vsel %vm1152_vm1, %v2938_v26, %v2939_v56  ;;  %v1370_v38 = vrot.slane %v14654_v32, 2 }
 0x1a3   : > { %3298 = vmatmul.mubr.f32.gmra.mrb[98].mxu1 %v14739_v11  ;;  %v1372_v17 = vrot.slane %v14676_v0, 2  ;;  %v2943_v32 = vsel %vm1152_vm1, %v2941_v44, %v2942_v4  ;;  %v1375_v9 = vrot.slane %v14701_v20, 2  ;;  %v10267_v20 = vld [vmem:[%s19937_s1 + $0x5f0] sm:$0xff]  ;;  %v2946_v1 = vsel %vm1152_vm1, %v2944_v53, %v2945_v45  ;;  %v14948_v44 = vld [vmem:[%s13472_s10 + $0xe8] sm:$0x3]  ;;  %v10225_v45 = vld [vmem:[%s19937_s1 + $0x4a0] sm:$0xff] }
 0x1a4   : > { %3302 = vmatprep.mubr.f32.mxu1 %v2931_v41  ;;  %12282 = vmatpush3.bf16.msra.mxu1 %v12279_v30  ;;  %v12291_v30 = vpack.c.bf16 %v10262_v58, %v10261_v42  ;;  %v1365_v41 = vsel %vm1281_vm0, %v1363_v3, %v1364_v47  ;;  %v1371_v0 = vsel %vm1281_vm0, %v1369_v33, %v1370_v38  ;;  %v3057_v11 = vrot.slane %v14752_v7, 2 }
 0x1a5   : > { %11410 = vmatmul.mubr.f32.gmra.mrb[84].mxu0 %v1347_v14  ;;  %12284 = vmatprep.subr.bf16.mxu1 %v12283_v35  ;;  %v1368_v14 = vsel %vm1281_vm0, %v1366_v62, %v1367_v16  ;;  %v12303_v58 = vpack.c.bf16 %v10268_v31, %v10267_v20  ;;  %v19981_v47 = vrot.slane %v14917_v6, 1  ;;  %v3061_v62 = vrot.slane %v14781_v22, 2  ;;  %v14945_v16 = vld [vmem:[%s13472_s10 + $0xe0] sm:$0xff] }
 0x1a6   : > { %11412 = vmatprep.mubr.f32.mxu0 %v1350_v49  ;;  %v14887_v49 = vld [vmem:[%s13472_s10 + $0xc0] sm:$0xff]  ;;  %v3063_v22 = vrot.slane %v14798_v12, 2  ;;  %v19980_v38 = vrot.slane %v14945_v16, 1 }
 0x1a7   : > { %3303 = vmatmul.mubr.f32.gmra.mrb[100].mxu1 %v14752_v7  ;;  %v19982_v63 = vrot.slane %v14887_v49, 1 }
 0x1a8   : > { %3307 = vmatprep.mubr.f32.mxu1 %v2934_v15  ;;  %12286 = vmatpush3.bf16.msra.mxu1 %v12283_v35  ;;  %v10266_v35 = vld [vmem:[%s19937_s1 + $0x5e8] sm:$0xff] }
 0x1a9   : > { %11413 = vmatmul.mubr.f32.gmra.mrb[86].mxu0 %v1353_v40  ;;  %12288 = vmatprep.subr.bf16.mxu1 %v12287_v13  ;;  %v12299_v36 = vpack.c.bf16 %v10266_v35, %v10265_v46  ;;  %v14894_v15 = vld [vmem:[%s13472_s10 + $0xc8] sm:$0x3]  ;;  %v3051_v40 = vrot.slane %v14723_v21, 2  ;;  %v1377_v21 = vsel %vm1281_vm0, %v1375_v9, %v1376_v28  ;;  %v2954_v46 = vrot.slane %v14948_v44, 1 }
 0x1aa   : > { %11415 = vmatprep.mubr.f32.mxu0 %v1356_v27  ;;  %v2948_v42 = vrot.slane %v14894_v15, 1  ;;  %v3055_v27 = vrot.slane %v14742_v52, 2  ;;  %v10221_v52 = vld [vmem:[%s19937_s1 + $0x480] sm:$0xff] }
 0x1ab   : > { %3308 = vmatmul.mubr.f32.gmra.mrb[102].mxu1 %v14775_v18  ;;  %v3053_v56 = vsel %vm1281_vm0, %v3051_v40, %v3052_v50  ;;  %v15003_v50 = vld [vmem:[%s13472_s10 + $0x100] sm:$0xff] }
 0x1ac   : > { %3312 = vmatprep.mubr.f32.mxu1 %v2937_v59  ;;  %12290 = vmatpush3.bf16.msra.mxu1 %v12287_v13  ;;  %v1374_v13 = vsel %vm1281_vm0, %v1372_v17, %v1373_v54  ;;  %v14920_v59 = vld [vmem:[%s13472_s10 + $0xd8] sm:$0x3]  ;;  %v2949_v3 = vsel %vm1152_vm1, %v19982_v63, %v2948_v42  ;;  %v3056_v7 = vsel %vm1281_vm0, %v3054_v24, %v3055_v27  ;;  %v3067_v17 = vrot.slane %v14826_v37, 2  ;;  %v14974_v54 = vld [vmem:[%s13472_s10 + $0xf0] sm:$0xff] }
 0x1ad   : > { %11416 = vmatmul.mubr.f32.gmra.mrb[88].mxu0 %v1359_v8  ;;  %12292 = vmatprep.subr.bf16.mxu1 %v12291_v30  ;;  %v3058_v8 = vrot.slane %v14758_v61, 2  ;;  %v2951_v10 = vrot.slane %v14920_v59, 1  ;;  %v3060_v61 = vrot.slane %v14775_v18, 2  ;;  %v10224_v18 = vld [vmem:[%s19937_s1 + $0x498] sm:$0xff]  ;;  %v3069_v37 = vrot.slane %v14842_v51, 2  ;;  %20057 = vst [vmem:[#allocation7_spill] sm:$0xff] %v15003_v50 }
 0x1ae   : > { %11418 = vmatprep.mubr.f32.mxu0 %v1362_v48  ;;  %v19979_v28 = vrot.slane %v14974_v54, 1  ;;  %v10227_v27 = vld [vmem:[%s19937_s1 + $0x4b0] sm:$0xff] }
 0x1af   : > { %3313 = vmatmul.mubr.f32.gmra.mrb[104].mxu1 %v14798_v12  ;;  %v2952_v33 = vsel %vm1152_vm1, %v19981_v47, %v2951_v10  ;;  %v3062_v12 = vsel %vm1281_vm0, %v3060_v61, %v3061_v62  ;;  %v15032_v10 = vld [vmem:[%s13472_s10 + $0x110] sm:$0xff]  ;;  %v10229_v62 = vld [vmem:[%s19937_s1 + $0x4c0] sm:$0xff] }
 0x1b0   : > { %3317 = vmatprep.mubr.f32.mxu1 %v2940_v39  ;;  %12294 = vmatpush3.bf16.msra.mxu1 %v12291_v30  ;;  %v10222_v30 = vld [vmem:[%s19937_s1 + $0x488] sm:$0xff]  ;;  %v3059_v39 = vsel %vm1281_vm0, %v3057_v11, %v3058_v8  ;;  %20058 = vst [vmem:[#allocation8_spill] sm:$0xff] %v15032_v10 }
 0x1b1   : > { %11419 = vmatmul.mubr.f32.gmra.mrb[90].mxu0 %v1365_v41  ;;  %12296 = vmatprep.subr.bf16.mxu1 %v12295_v60  ;;  %v12228_v48 = vpack.c.bf16 %v10222_v30, %v10221_v52  ;;  %v3064_v41 = vrot.slane %v14804_v55, 2 }
 0x1b2   : > { %v14889_v57 = vpop.f32.mrb[0].mxu1  ;;  %11421 = vmatprep.mubr.f32.mxu0 %v1368_v14  ;;  %v3066_v14 = vrot.slane %v14820_v2, 2 }
 0x1b3   : > { %v14902_v34 = vpop.f32.mrb[1].mxu1  ;;  %3318 = vmatmul.mubr.f32.gmra.mrb[106].mxu1 %v14820_v2  ;;  %v3065_v53 = vsel %vm1281_vm0, %v3063_v22, %v3064_v41  ;;  %v10226_v2 = vld [vmem:[%s19937_s1 + $0x4a8] sm:$0xff]  ;;  %v19976_v22 = vrot.slane %v15032_v10, 1 }
 0x1b4   : > { %3322 = vmatprep.mubr.f32.mxu1 %v2943_v32  ;;  %12298 = vmatpush3.bf16.msra.mxu1 %v12295_v60  ;;  %v10223_v60 = vld [vmem:[%s19937_s1 + $0x490] sm:$0xff]  ;;  %v14977_v32 = vld [vmem:[%s13472_s10 + $0xf8] sm:$0x3]  ;;  %v12234_v40 = vpack.c.bf16 %v10226_v2, %v10225_v45 }
 0x1b5   : > { %11422 = vmatmul.mubr.f32.gmra.mrb[92].mxu0 %v1371_v0  ;;  %12300 = vmatprep.subr.bf16.mxu1 %v12299_v36  ;;  %v12231_v55 = vpack.c.bf16 %v10224_v18, %v10223_v60  ;;  %v2955_v0 = vsel %vm1152_vm1, %v19980_v38, %v2954_v46  ;;  %v2957_v20 = vrot.slane %v14977_v32, 1  ;;  %v3082_v60 = vrot.slane %v14948_v44, 2  ;;  %v10231_v2 = vld [vmem:[%s19937_s1 + $0x4d0] sm:$0xff] }
 0x1b6   : > { %v14912_v5 = vpop.f32.mrb[2].mxu1  ;;  %11424 = vmatprep.mubr.f32.mxu0 %v1374_v13  ;;  %v3068_v13 = vsel %vm1281_vm0, %v3066_v14, %v3067_v17  ;;  %v3085_v44 = vrot.slane %v14977_v32, 2  ;;  %v15061_v14 = vld [vmem:[%s13472_s10 + $0x120] sm:$0xff]  ;;  %v10074_v17 = vld [vmem:[%s13472_s10 + $0x128] sm:$0x3]  ;;  %v10232_v32 = vld [vmem:[%s19937_s1 + $0x4d8] sm:$0xff] }
 0x1b7   : > { %v14922_v26 = vpop.f32.mrb[3].mxu1  ;;  %3323 = vmatmul.mubr.f32.gmra.mrb[108].mxu1 %v14842_v51  ;;  %v3072_v51 = vrot.slane %v14864_v29, 2  ;;  %v2958_v24 = vsel %vm1152_vm1, %v19979_v28, %v2957_v20  ;;  %v2965_v20 = vrot.slane %v15061_v14, 1  ;;  %v15248_v28 = vld [vmem:[%s13472_s10 + $0x208] sm:$0x3] }
 0x1b8   : > { %3327 = vmatprep.mubr.f32.mxu1 %v2946_v1  ;;  %12302 = vmatpush3.bf16.msra.mxu1 %v12299_v36  ;;  %v3070_v36 = vrot.slane %v14845_v23, 2  ;;  %v3073_v23 = vrot.slane %v14870_v25, 2  ;;  %v15006_v1 = vld [vmem:[%s13472_s10 + $0x108] sm:$0x3]  ;;  %v3075_v25 = vrot.slane %v14887_v49, 2 }
 0x1b9   : > { %11425 = vmatmul.mubr.f32.gmra.mrb[94].mxu0 %v1377_v21  ;;  %12304 = vmatprep.subr.bf16.mxu1 %v12303_v58  ;;  %v3076_v21 = vrot.slane %v14894_v15, 2  ;;  %v2960_v52 = vrot.slane %v15006_v1, 1  ;;  %v3079_v15 = vrot.slane %v14920_v59, 2  ;;  %v10230_v59 = vld [vmem:[%s19937_s1 + $0x4c8] sm:$0xff] }
 0x1ba   : > { %v14939_v43 = vpop.f32.mrb[4].mxu1  ;;  %11459 = vmatprep.mubr.f32.mxu0 %v3053_v56  ;;  %v19977_v56 = vrot.slane %v15003_v50, 1  ;;  %v3074_v11 = vsel %vm1281_vm0, %v3072_v51, %v3073_v23  ;;  %v12243_v23 = vpack.c.bf16 %v10232_v32, %v10231_v2 }
 0x1bb   : > { %v14950_v4 = vpop.f32.mrb[5].mxu1  ;;  %3328 = vmatmul.mubr.f32.gmra.mrb[110].mxu1 %v14864_v29  ;;  %v10228_v29 = vld [vmem:[%s19937_s1 + $0x4b8] sm:$0xff]  ;;  %v3077_v61 = vsel %vm1281_vm0, %v3075_v25, %v3076_v21 }
 0x1bc   : > { %3332 = vmatprep.mubr.f32.mxu1 %v2949_v3  ;;  %12306 = vmatpush3.bf16.msra.mxu1 %v12303_v58  ;;  %v3071_v58 = vsel %vm1281_vm0, %v3069_v37, %v3070_v36  ;;  %v12237_v8 = vpack.c.bf16 %v10228_v29, %v10227_v27  ;;  %v3078_v3 = vrot.slane %v14917_v6, 2  ;;  %v2961_v18 = vsel %vm1152_vm1, %v19977_v56, %v2960_v52  ;;  %v15087_v27 = vld [vmem:[%s13472_s10 + $0x130] sm:$0xff]  ;;  %v10076_v29 = vld [vmem:[%s13472_s10 + $0x138] sm:$0x3]  ;;  %v10234_v52 = vld [vmem:[%s19937_s1 + $0x4e8] sm:$0xff] }
 0x1bd   : > { %11460 = vmatmul.mubr.f32.vlgmr.msra.gmra.mrb[96].mxu0 %v3056_v7  ;;  %12307 = vmatprep.subr.bf16.mxu1 %v20009_v19  ;;  %v15035_v7 = vld [vmem:[%s13472_s10 + $0x118] sm:$0x3]  ;;  %v3087_v37 = vrot.slane %v15003_v50, 2  ;;  %v3088_v36 = vrot.slane %v15006_v1, 2  ;;  %v3090_v1 = vrot.slane %v15032_v10, 2 }
 0x1be   : > { %v14968_v35 = vpop.f32.mrb[6].mxu1  ;;  %12229 = vmatpush1.bf16.msra.mxu0 %v12228_v48  ;;  %11462 = vmatprep.mubr.f32.mxu0 %v3059_v39  ;;  %v3081_v39 = vrot.slane %v14945_v16, 2  ;;  %v2963_v41 = vrot.slane %v15035_v7, 1  ;;  %v3080_v46 = vsel %vm1281_vm0, %v3078_v3, %v3079_v15  ;;  %v15103_v15 = vld [vmem:[%s13472_s10 + $0x160] sm:$0xff] }
 0x1bf   : > { %v14979_v9 = vpop.f32.mrb[7].mxu1  ;;  %3333 = vmatmul.mubr.f32.gmra.mrb[112].mxu1 %v14887_v49  ;;  %12230 = vmatprep.subr.bf16.mxu0 %v20009_v19  ;;  %v3089_v21 = vsel %vm1281_vm0, %v3087_v37, %v3088_v36  ;;  %20059 = vst [vmem:[#allocation9_spill] sm:$0xff] %v15103_v15  ;;  %v3099_v2 = vrot.slane %v15103_v15, 2  ;;  %v15128_v37 = vld [vmem:[%s13472_s10 + $0x170] sm:$0xff]  ;;  %v15131_v36 = vld [vmem:[%s13472_s10 + $0x178] sm:$0x3] }
 0x1c0   : > { %3337 = vmatprep.mubr.f32.mxu1 %v2952_v33  ;;  %v3083_v45 = vsel %vm1281_vm0, %v3081_v39, %v3082_v60  ;;  %v2968_v39 = vrot.slane %v15087_v27, 1  ;;  %v2969_v60 = vrot.slane %v10076_v29, 1  ;;  %20062 = vst [vmem:[#allocation12_spill] sm:$0xff] %v15128_v37 }
 0x1c1   : > { %11463 = vmatmul.mubr.f32.gmra.mrb[98].mxu0 %v3062_v12  ;;  %v12240_v12 = vpack.c.bf16 %v10230_v59, %v10229_v62 }
 0x1c2   : > { %v14997_v31 = vpop.f32.mrb[8].mxu1  ;;  %12232 = vmatpush1.bf16.msra.mxu0 %v12231_v55  ;;  %11465 = vmatprep.mubr.f32.mxu0 %v3065_v53  ;;  %v3084_v55 = vrot.slane %v14974_v54, 2 }
 0x1c3   : > { %v15008_v42 = vpop.f32.mrb[9].mxu1  ;;  %3338 = vmatmul.mubr.f32.gmra.mrb[114].mxu1 %v14917_v6  ;;  %12233 = vmatprep.subr.bf16.mxu0 %v20009_v19 }
 0x1c4   : > { %3342 = vmatprep.mubr.f32.mxu1 %v2955_v0  ;;  %v2964_v0 = vsel %vm1152_vm1, %v19976_v22, %v2963_v41  ;;  %v3086_v51 = vsel %vm1281_vm0, %v3084_v55, %v3085_v44  ;;  %v10235_v55 = vld [vmem:[%s19937_s1 + $0x4f0] sm:$0xff]  ;;  %v10236_v44 = vld [vmem:[%s19937_s1 + $0x4f8] sm:$0xff] }
 0x1c5   : > { %11466 = vmatmul.mubr.f32.gmra.mrb[100].mxu0 %v3068_v13  ;;  %v2966_v13 = vrot.slane %v10074_v17, 1 }
 0x1c6   : > { %v15026_v30 = vpop.f32.mrb[10].mxu1  ;;  %12235 = vmatpush1.bf16.msra.mxu0 %v12234_v40  ;;  %11468 = vmatprep.mubr.f32.mxu0 %v3071_v58  ;;  %v3091_v58 = vrot.slane %v15035_v7, 2  ;;  %v10078_v7 = vld [vmem:[%s13472_s10 + $0x168] sm:$0x3] }
 0x1c7   : > { %v15037_v48 = vpop.f32.mrb[11].mxu1  ;;  %3343 = vmatmul.mubr.f32.gmra.mrb[116].mxu1 %v14945_v16  ;;  %12236 = vmatprep.subr.bf16.mxu0 %v20009_v19  ;;  %v2967_v59 = vsel %vm1152_vm1, %v2965_v20, %v2966_v13  ;;  %v3100_v32 = vrot.slane %v10078_v7, 2  ;;  %v15134_v20 = vld [vmem:[%s13472_s10 + $0x180] sm:$0xff]  ;;  %v15137_v13 = vld [vmem:[%s13472_s10 + $0x188] sm:$0x3] }
 0x1c8   : > { %3347 = vmatprep.mubr.f32.mxu1 %v2958_v24  ;;  %v10233_v24 = vld [vmem:[%s19937_s1 + $0x4e0] sm:$0xff]  ;;  %v3092_v41 = vsel %vm1281_vm0, %v3090_v1, %v3091_v58  ;;  %20063 = vst [vmem:[#allocation13_spill] sm:$0xff] %v15134_v20  ;;  %v2970_v1 = vsel %vm1152_vm1, %v2968_v39, %v2969_v60  ;;  %v19975_v58 = vrot.slane %v15103_v15, 1  ;;  %v3106_v39 = vrot.slane %v15137_v13, 2  ;;  %v15163_v60 = vld [vmem:[%s13472_s10 + $0x190] sm:$0xff] }
 0x1c9   : > { %11469 = vmatmul.mubr.f32.gmra.mrb[102].mxu0 %v3074_v11  ;;  %v3093_v11 = vrot.slane %v15061_v14, 2  ;;  %20066 = vst [vmem:[#allocation16_spill] sm:$0xff] %v15163_v60  ;;  %v2978_v22 = vrot.slane %v15137_v13, 1  ;;  %v10242_v13 = vld [vmem:[%s19937_s1 + $0x528] sm:$0xff] }
 0x1ca   : > { %v15055_v33 = vpop.f32.mrb[12].mxu1  ;;  %12238 = vmatpush1.bf16.msra.mxu0 %v12237_v8  ;;  %11471 = vmatprep.mubr.f32.mxu0 %v3077_v61  ;;  %v3094_v8 = vrot.slane %v10074_v17, 2 }
 0x1cb   : > { %v15064_v53 = vpop.f32.mrb[13].mxu1  ;;  %3348 = vmatmul.mubr.f32.gmra.mrb[118].mxu1 %v14974_v54  ;;  %12239 = vmatprep.subr.bf16.mxu0 %v20009_v19 }
 0x1cc   : > { %3352 = vmatprep.mubr.f32.mxu1 %v2961_v18 }
 0x1cd   : > { %11472 = vmatmul.mubr.f32.gmra.mrb[104].mxu0 %v3080_v46  ;;  %v12246_v46 = vpack.c.bf16 %v10234_v52, %v10233_v24  ;;  %v12249_v52 = vpack.c.bf16 %v10236_v44, %v10235_v55 }
 0x1ce   : > { %v15081_v40 = vpop.f32.mrb[14].mxu1  ;;  %12241 = vmatpush1.bf16.msra.mxu0 %v12240_v12  ;;  %11474 = vmatprep.mubr.f32.mxu0 %v3083_v45  ;;  %v3097_v12 = vrot.slane %v10076_v29, 2  ;;  %v3095_v45 = vsel %vm1281_vm0, %v3093_v11, %v3094_v8  ;;  %v2972_v29 = vrot.slane %v10078_v7, 1  ;;  %v3103_v11 = vrot.slane %v15131_v36, 2  ;;  %v10237_v8 = vld [vmem:[%s19937_s1 + $0x500] sm:$0xff] }
 0x1cf   : > { %v15090_v25 = vpop.f32.mrb[15].mxu1  ;;  %3353 = vmatmul.mubr.f32.gmra.mrb[120].mxu1 %v15003_v50  ;;  %12242 = vmatprep.subr.bf16.mxu0 %v20009_v19 }
 0x1d0   : > { %v1959_v3 = vpop.f32.mrb[0].mxu0  ;;  %3357 = vmatprep.mubr.f32.mxu1 %v2964_v0  ;;  %v2973_v44 = vsel %vm1152_vm1, %v19975_v58, %v2972_v29  ;;  %v10239_v29 = vld [vmem:[%s19937_s1 + $0x510] sm:$0xff] }
 0x1d1   : > { %v15107_v61 = vadd.f32 %v14902_v34, %v1959_v3  ;;  %11475 = vmatmul.mubr.f32.gmra.mrb[106].mxu0 %v3086_v51  ;;  %v1961_v62 = vpop.f32.mrb[1].mxu0  ;;  %v3096_v34 = vrot.slane %v15087_v27, 2  ;;  %v10238_v3 = vld [vmem:[%s19937_s1 + $0x508] sm:$0xff] }
 0x1d2   : > { %v15111_v18 = vpop.f32.mrb[16].mxu1  ;;  %12244 = vmatpush1.bf16.msra.mxu0 %v12243_v23  ;;  %11477 = vmatprep.mubr.f32.mxu0 %v3089_v21  ;;  %v3101_v62 = vsel %vm1281_vm0, %v3099_v2, %v3100_v32  ;;  %v2975_v2 = vrot.slane %v15131_v36, 1  ;;  %v10240_v36 = vld [vmem:[%s19937_s1 + $0x518] sm:$0xff] }
 0x1d3   : > { %20060 = vst [vmem:[#allocation10_spill] sm:$0xff] %v15111_v18  ;;  %v15121_v17 = vpop.f32.mrb[17].mxu1  ;;  %3358 = vmatmul.mubr.f32.gmra.mrb[122].mxu1 %v15032_v10  ;;  %12245 = vmatprep.subr.bf16.mxu0 %v20009_v19  ;;  %v3098_v24 = vsel %vm1281_vm0, %v3096_v34, %v3097_v12  ;;  %v15169_v34 = vld [vmem:[%s13472_s10 + $0x1a0] sm:$0xff]  ;;  %v15172_v12 = vld [vmem:[%s13472_s10 + $0x1a8] sm:$0x3] }
 0x1d4   : > { %20061 = vst [vmem:[#allocation11_spill] sm:$0xff] %v15121_v17  ;;  %v1964_v0 = vpop.f32.mrb[2].mxu0  ;;  %3362 = vmatprep.mubr.f32.mxu1 %v2967_v59  ;;  %v3105_v59 = vrot.slane %v15134_v20, 2  ;;  %20067 = vst [vmem:[#allocation17_spill] sm:$0xff] %v15169_v34 }
 0x1d5   : > { %v15140_v51 = vadd.f32 %v14889_v57, %v1964_v0  ;;  %11478 = vmatmul.mubr.f32.gmra.mrb[108].mxu0 %v3092_v41  ;;  %v1966_v23 = vpop.f32.mrb[3].mxu0  ;;  %v3102_v57 = vrot.slane %v15128_v37, 2  ;;  %v15166_v41 = vld [vmem:[%s13472_s10 + $0x198] sm:$0x3] }
 0x1d6   : > { %v15144_v21 = vpop.f32.mrb[18].mxu1  ;;  %12247 = vmatpush1.bf16.msra.mxu0 %v12246_v46  ;;  %11480 = vmatprep.mubr.f32.mxu0 %v3095_v45  ;;  %v19978_v45 = vrot.slane %v15128_v37, 1  ;;  %v3108_v23 = vrot.slane %v15163_v60, 2  ;;  %v2981_v63 = vrot.slane %v15166_v41, 1 }
 0x1d7   : > { %20064 = vst [vmem:[#allocation14_spill] sm:$0xff] %v15144_v21  ;;  %v15155_v7 = vpop.f32.mrb[19].mxu1  ;;  %3363 = vmatmul.mubr.f32.gmra.mrb[124].mxu1 %v15061_v14  ;;  %12248 = vmatprep.subr.bf16.mxu0 %v20009_v19  ;;  %v3104_v0 = vsel %vm1281_vm0, %v3102_v57, %v3103_v11  ;;  %v3111_v57 = vrot.slane %v15169_v34, 2  ;;  %v3112_v11 = vrot.slane %v15172_v12, 2 }
 0x1d8   : > { %20065 = vst [vmem:[#allocation15_spill] sm:$0xff] %v15155_v7  ;;  %v1969_v46 = vpop.f32.mrb[4].mxu0  ;;  %3367 = vmatprep.mubr.f32.mxu1 %v2970_v1  ;;  %v3109_v1 = vrot.slane %v15166_v41, 2  ;;  %v10244_v41 = vld [vmem:[%s19937_s1 + $0x538] sm:$0xff] }
 0x1d9   : > { %v15175_v14 = vadd.f32 %v14922_v26, %v1969_v46  ;;  %11481 = vmatmul.mubr.f32.gmra.mrb[110].mxu0 %v3098_v24  ;;  %v1971_v55 = vpop.f32.mrb[5].mxu0  ;;  %v12252_v26 = vpack.c.bf16 %v10238_v3, %v10237_v8  ;;  %v15201_v8 = vld [vmem:[%s13472_s10 + $0x1b0] sm:$0xff]  ;;  %v15204_v3 = vld [vmem:[%s13472_s10 + $0x1b8] sm:$0x3]  ;;  %v15207_v46 = vld [vmem:[%s13472_s10 + $0x1c0] sm:$0xff] }
 0x1da   : > { %v15182_v32 = vpop.f32.mrb[20].mxu1  ;;  %12250 = vmatpush1.bf16.msra.mxu0 %v12249_v52  ;;  %11483 = vmatprep.mubr.f32.mxu0 %v3101_v62  ;;  %v3107_v52 = vsel %vm1281_vm0, %v3105_v59, %v3106_v39  ;;  %20070 = vst [vmem:[#allocation20_spill] sm:$0xff] %v15201_v8  ;;  %v15210_v55 = vld [vmem:[%s13472_s10 + $0x1c8] sm:$0x3]  ;;  %v2976_v59 = vsel %vm1152_vm1, %v19978_v45, %v2975_v2  ;;  %v19983_v39 = vrot.slane %v15134_v20, 1  ;;  %v10241_v2 = vld [vmem:[%s19937_s1 + $0x520] sm:$0xff] }
 0x1db   : > { %20068 = vst [vmem:[#allocation18_spill] sm:$0xff] %v15182_v32  ;;  %v15193_v24 = vpop.f32.mrb[21].mxu1  ;;  %3368 = vmatmul.mubr.f32.gmra.mrb[126].mxu1 %v15087_v27  ;;  %12251 = vmatprep.subr.bf16.mxu0 %v20009_v19  ;;  %v15245_v45 = vld [vmem:[%s13472_s10 + $0x200] sm:$0xff]  ;;  %v2984_v32 = vrot.slane %v15172_v12, 1  ;;  %v10246_v12 = vld [vmem:[%s19937_s1 + $0x548] sm:$0xff]  ;;  %v20081_v7 = vrot.slane %v15201_v8, 1 }
 0x1dc   : > { %20069 = vst [vmem:[#allocation19_spill] sm:$0xff] %v15193_v24  ;;  %v1974_v62 = vpop.f32.mrb[6].mxu0  ;;  %3372 = vmatprep.mubr.f32.mxu1 %v2973_v44  ;;  %v3110_v44 = vsel %vm1281_vm0, %v3108_v23, %v3109_v1  ;;  %v3117_v23 = vrot.slane %v15207_v46, 2  ;;  %v3118_v1 = vrot.slane %v15210_v55, 2  ;;  %v2987_v24 = vrot.slane %v15204_v3, 1 }
 0x1dd   : > { %v15213_v27 = vadd.f32 %v14912_v5, %v1974_v62  ;;  %11484 = vmatmul.mubr.f32.gmra.mrb[112].mxu0 %v3104_v0  ;;  %v1976_v58 = vpop.f32.mrb[7].mxu0  ;;  %v12255_v5 = vpack.c.bf16 %v10240_v36, %v10239_v29  ;;  %v3115_v0 = vrot.slane %v15204_v3, 2  ;;  %v15239_v29 = vld [vmem:[%s13472_s10 + $0x1d0] sm:$0xff]  ;;  %v15242_v36 = vld [vmem:[%s13472_s10 + $0x1d8] sm:$0x3] }
 0x1de   : > { %v15220_v56 = vpop.f32.mrb[22].mxu1  ;;  %12253 = vmatpush1.bf16.msra.mxu0 %v12252_v26  ;;  %11486 = vmatprep.mubr.f32.mxu0 %v3107_v52  ;;  %v3114_v58 = vrot.slane %v15201_v8, 2  ;;  %v3113_v26 = vsel %vm1281_vm0, %v3111_v57, %v3112_v11  ;;  %v2979_v57 = vsel %vm1152_vm1, %v19983_v39, %v2978_v22  ;;  %v10243_v22 = vld [vmem:[%s19937_s1 + $0x530] sm:$0xff]  ;;  %v15283_v39 = vld [vmem:[%s13472_s10 + $0x220] sm:$0xff]  ;;  %v15286_v11 = vld [vmem:[%s13472_s10 + $0x228] sm:$0x3]  ;;  %v2988_v18 = vsel %vm1152_vm1, %v20081_v7, %v2987_v24 }
 0x1df   : > { %20071 = vst [vmem:[#allocation21_spill] sm:$0xff] %v15220_v56  ;;  %v15231_v62 = vpop.f32.mrb[23].mxu1  ;;  %3373 = vmatmul.mubr.f32.gmra.mrb[128].mxu1 %v15103_v15  ;;  %12254 = vmatprep.subr.bf16.mxu0 %v20009_v19  ;;  %v15335_v15 = vld [vmem:[%s13472_s10 + $0x250] sm:$0xff] }
 0x1e0   : > { %20072 = vst [vmem:[#allocation22_spill] sm:$0xff] %v15231_v62  ;;  %v1979_v52 = vpop.f32.mrb[8].mxu0  ;;  %3377 = vmatprep.mubr.f32.mxu1 %v2976_v59  ;;  %v3116_v59 = vsel %vm1281_vm0, %v3114_v58, %v3115_v0  ;;  %v3123_v58 = vrot.slane %v15245_v45, 2  ;;  %v3124_v0 = vrot.slane %v15248_v28, 2  ;;  %v15324_v62 = vld [vmem:[%s13472_s10 + $0x248] sm:$0x3] }
 0x1e1   : > { %v15251_v38 = vadd.f32 %v14950_v4, %v1979_v52  ;;  %11487 = vmatmul.mubr.f32.gmra.mrb[114].mxu0 %v3110_v44  ;;  %v1981_v47 = vpop.f32.mrb[9].mxu0  ;;  %v12258_v4 = vpack.c.bf16 %v10242_v13, %v10241_v2  ;;  %v3121_v44 = vrot.slane %v15242_v36, 2  ;;  %v15277_v2 = vld [vmem:[%s13472_s10 + $0x210] sm:$0xff]  ;;  %v15280_v13 = vld [vmem:[%s13472_s10 + $0x218] sm:$0x3] }
 0x1e2   : > { %v15258_v56 = vpop.f32.mrb[24].mxu1  ;;  %12256 = vmatpush1.bf16.msra.mxu0 %v12255_v5  ;;  %11489 = vmatprep.mubr.f32.mxu0 %v3113_v26  ;;  %v3120_v47 = vrot.slane %v15239_v29, 2  ;;  %v3119_v5 = vsel %vm1281_vm0, %v3117_v23, %v3118_v1  ;;  %v20075_v23 = vrot.slane %v15163_v60, 1  ;;  %v10247_v3 = vld [vmem:[%s19937_s1 + $0x550] sm:$0xff] }
 0x1e3   : > { %20073 = vst [vmem:[#allocation23_spill] sm:$0xff] %v15258_v56  ;;  %v15269_v52 = vpop.f32.mrb[25].mxu1  ;;  %3378 = vmatmul.mubr.f32.gmra.mrb[130].mxu1 %v15128_v37  ;;  %12257 = vmatprep.subr.bf16.mxu0 %v20009_v19  ;;  %v15386_v24 = vld [vmem:[%s13472_s10 + $0x270] sm:$0xff] }
 0x1e4   : > { %20074 = vst [vmem:[#allocation24_spill] sm:$0xff] %v15269_v52  ;;  %v1984_v26 = vpop.f32.mrb[10].mxu0  ;;  %3382 = vmatprep.mubr.f32.mxu1 %v2979_v57  ;;  %v2982_v1 = vsel %vm1152_vm1, %v20075_v23, %v2981_v63  ;;  %v3122_v57 = vsel %vm1281_vm0, %v3120_v47, %v3121_v44  ;;  %v10245_v63 = vld [vmem:[%s19937_s1 + $0x540] sm:$0xff]  ;;  %v3129_v47 = vrot.slane %v15283_v39, 2  ;;  %v3130_v44 = vrot.slane %v15286_v11, 2 }
 0x1e5   : > { %v15289_v56 = vadd.f32 %v14939_v43, %v1984_v26  ;;  %11490 = vmatmul.mubr.f32.gmra.mrb[116].mxu0 %v3116_v59  ;;  %v1986_v52 = vpop.f32.mrb[11].mxu0  ;;  %v12261_v43 = vpack.c.bf16 %v10244_v41, %v10243_v22  ;;  %v3126_v59 = vrot.slane %v15277_v2, 2  ;;  %v15315_v22 = vld [vmem:[%s13472_s10 + $0x230] sm:$0xff]  ;;  %v15318_v41 = vld [vmem:[%s13472_s10 + $0x238] sm:$0x3]  ;;  %v15321_v23 = vld [vmem:[%s13472_s10 + $0x240] sm:$0xff] }
 0x1e6   : > { %v15296_v37 = vpop.f32.mrb[26].mxu1  ;;  %12259 = vmatpush1.bf16.msra.mxu0 %v12258_v4  ;;  %11492 = vmatprep.mubr.f32.mxu0 %v3119_v5  ;;  %v3127_v52 = vrot.slane %v15280_v13, 2  ;;  %v3125_v4 = vsel %vm1281_vm0, %v3123_v58, %v3124_v0  ;;  %v20078_v0 = vrot.slane %v15169_v34, 1 }
 0x1e7   : > { %20076 = vst [vmem:[#allocation25_spill] sm:$0xff] %v15296_v37  ;;  %v15307_v26 = vpop.f32.mrb[27].mxu1  ;;  %3383 = vmatmul.mubr.f32.gmra.mrb[132].mxu1 %v15134_v20  ;;  %12260 = vmatprep.subr.bf16.mxu0 %v20009_v19  ;;  %v2989_v20 = vrot.slane %v15207_v46, 1 }
 0x1e8   : > { %20077 = vst [vmem:[#allocation26_spill] sm:$0xff] %v15307_v26  ;;  %v1989_v5 = vpop.f32.mrb[12].mxu0  ;;  %3387 = vmatprep.mubr.f32.mxu1 %v2982_v1  ;;  %v2985_v26 = vsel %vm1152_vm1, %v20078_v0, %v2984_v32  ;;  %v15338_v1 = vld [vmem:[%s13472_s10 + $0x258] sm:$0x3]  ;;  %v3133_v32 = vrot.slane %v15318_v41, 2 }
 0x1e9   : > { %v15327_v37 = vadd.f32 %v14979_v9, %v1989_v5  ;;  %11493 = vmatmul.mubr.f32.gmra.mrb[118].mxu0 %v3122_v57  ;;  %v1991_v58 = vpop.f32.mrb[13].mxu0  ;;  %v3128_v9 = vsel %vm1281_vm0, %v3126_v59, %v3127_v52  ;;  %v12264_v57 = vpack.c.bf16 %v10246_v12, %v10245_v63  ;;  %v3132_v5 = vrot.slane %v15315_v22, 2  ;;  %v15359_v63 = vld [vmem:[%s13472_s10 + $0x260] sm:$0xff]  ;;  %v15362_v12 = vld [vmem:[%s13472_s10 + $0x268] sm:$0x3] }
 0x1ea   : > { %v15340_v21 = vpop.f32.mrb[28].mxu1  ;;  %12262 = vmatpush1.bf16.msra.mxu0 %v12261_v43  ;;  %11495 = vmatprep.mubr.f32.mxu0 %v3125_v4  ;;  %v10248_v58 = vld [vmem:[%s19937_s1 + $0x558] sm:$0xff]  ;;  %v3131_v43 = vsel %vm1281_vm0, %v3129_v47, %v3130_v44  ;;  %v3135_v59 = vrot.slane %v15321_v23, 2  ;;  %v3136_v52 = vrot.slane %v15324_v62, 2  ;;  %v3142_v7 = vrot.slane %v15362_v12, 2 }
 0x1eb   : > { %20079 = vst [vmem:[#allocation27_spill] sm:$0xff] %v15340_v21  ;;  %v15351_v0 = vpop.f32.mrb[29].mxu1  ;;  %3388 = vmatmul.mubr.f32.gmra.mrb[134].mxu1 %v15163_v60  ;;  %12263 = vmatprep.subr.bf16.mxu0 %v20009_v19  ;;  %v2990_v21 = vrot.slane %v15210_v55, 1  ;;  %v3139_v60 = vrot.slane %v15338_v1, 2  ;;  %v3134_v55 = vsel %vm1281_vm0, %v3132_v5, %v3133_v32  ;;  %v12267_v10 = vpack.c.bf16 %v10248_v58, %v10247_v3  ;;  %v15394_v5 = vld [vmem:[%s13472_s10 + $0x278] sm:$0x3] }
 0x1ec   : > { %20080 = vst [vmem:[#allocation28_spill] sm:$0xff] %v15351_v0  ;;  %v1994_v4 = vpop.f32.mrb[14].mxu0  ;;  %3392 = vmatprep.mubr.f32.mxu1 %v2985_v26  ;;  %v3138_v0 = vrot.slane %v15335_v15, 2  ;;  %v15397_v32 = vld [vmem:[%s13472_s10 + $0xa0] sm:$0xff]  ;;  %v15400_v3 = vld [vmem:[%s13472_s10 + $0xa8] sm:$0x3] }
 0x1ed   : > { %v15369_v47 = vadd.f32 %v14968_v35, %v1994_v4  ;;  %11496 = vmatmul.mubr.f32.gmra.mrb[120].mxu0 %v3128_v9  ;;  %v1996_v44 = vpop.f32.mrb[15].mxu0  ;;  %v10249_v35 = vld [vmem:[%s19937_s1 + $0x560] sm:$0xff]  ;;  %v10250_v9 = vld [vmem:[%s19937_s1 + $0x568] sm:$0xff]  ;;  %v3141_v4 = vrot.slane %v15359_v63, 2  ;;  %20084 = vst [vmem:[#allocation31_spill] sm:$0xff] %v15400_v3 }
 0x1ee   : > { %v15374_v26 = vpop.f32.mrb[30].mxu1  ;;  %12265 = vmatpush1.bf16.msra.mxu0 %v12264_v57  ;;  %11498 = vmatprep.mubr.f32.mxu0 %v3131_v43  ;;  %v3137_v57 = vsel %vm1281_vm0, %v3135_v59, %v3136_v52  ;;  %v2991_v43 = vsel %vm1152_vm1, %v2989_v20, %v2990_v21  ;;  %v12270_v17 = vpack.c.bf16 %v10250_v9, %v10249_v35  ;;  %v2992_v59 = vrot.slane %v15239_v29, 1  ;;  %v10366_v9 = vld [vmem:[%s19937_s1 + $0x708] sm:$0xff] }
 0x1ef   : > { %20082 = vst [vmem:[#allocation29_spill] sm:$0xff] %v15374_v26  ;;  %v15388_v44 = vpop.f32.mrb[31].mxu1  ;;  %3393 = vmatmul.mubr.f32.gmra.mrb[136].mxu1 %v15169_v34  ;;  %12266 = vmatprep.subr.bf16.mxu0 %v20009_v19  ;;  %v3140_v26 = vsel %vm1281_vm0, %v3138_v0, %v3139_v60  ;;  %v2993_v52 = vrot.slane %v15242_v36, 1  ;;  %v3145_v20 = vrot.slane %v15394_v5, 2  ;;  %v3840_v21 = vrot.slane %v15397_v32, 1  ;;  %v10251_v36 = vld [vmem:[%s19937_s1 + $0x570] sm:$0xff] }
 0x1f0   : > { %20083 = vst [vmem:[#allocation30_spill] sm:$0xff] %v15388_v44  ;;  %v1999_v58 = vpop.f32.mrb[16].mxu0  ;;  %3397 = vmatprep.mubr.f32.mxu1 %v2988_v18  ;;  %v3144_v18 = vrot.slane %v15386_v24, 2  ;;  %v10252_v0 = vld [vmem:[%s19937_s1 + $0x578] sm:$0xff] }
 0x1f1   : > { %v15405_v44 = vadd.f32 %v15008_v42, %v1999_v58  ;;  %11499 = vmatmul.mubr.f32.gmra.mrb[122].mxu0 %v3134_v55  ;;  %v2001_v34 = vpop.f32.mrb[17].mxu0  ;;  %v3841_v42 = vrot.slane %v15400_v3, 1  ;;  %v15426_v55 = vld [vmem:[%s13472_s10 + $0xb0] sm:$0xff]  ;;  %v2995_v58 = vrot.slane %v15245_v45, 1 }
 0x1f2   : > { %v2409_v50 = vpop.f32.mrb[32].mxu1  ;;  %12268 = vmatpush1.bf16.msra.mxu0 %v12267_v10  ;;  %11501 = vmatprep.mubr.f32.mxu0 %v3137_v57  ;;  %v3143_v10 = vsel %vm1281_vm0, %v3141_v4, %v3142_v7  ;;  %v2994_v57 = vsel %vm1152_vm1, %v2992_v59, %v2993_v52  ;;  %v3843_v59 = vrot.slane %v15426_v55, 1 }
 0x1f3   : > { %v15414_v60 = vadd.f32 %v2409_v50, %v15107_v61  ;;  %v2411_v34 = vpop.f32.mrb[33].mxu1  ;;  %3398 = vmatmul.mubr.f32.gmra.mrb[138].mxu1 %v15201_v8  ;;  %12269 = vmatprep.subr.bf16.mxu0 %v20009_v19  ;;  %v15429_v50 = vld [vmem:[%s13472_s10 + $0xb8] sm:$0x3]  ;;  %v10365_v61 = vld [vmem:[%s19937_s1 + $0x700] sm:$0xff]  ;;  %v12273_v8 = vpack.c.bf16 %v10252_v0, %v10251_v36  ;;  %v3842_v3 = vsel %vm1152_vm1, %v3840_v21, %v3841_v42  ;;  %v2998_v42 = vrot.slane %v15277_v2, 1 }
 0x1f4   : > { %v2004_v35 = vpop.f32.mrb[18].mxu0  ;;  %3402 = vmatprep.mubr.f32.mxu1 %v2991_v43  ;;  %v2996_v43 = vrot.slane %v15248_v28, 1  ;;  %v3844_v28 = vrot.slane %v15429_v50, 1  ;;  %v12355_v52 = vpack.c.bf16 %v10366_v9, %v10365_v61  ;;  %v2999_v36 = vrot.slane %v15280_v13, 1 }
 0x1f5   : > { %20085 = vst [vmem:[#allocation32_spill] sm:$0xff] %v15414_v60  ;;  %v15438_v4 = vadd.f32 %v14997_v31, %v2004_v35  ;;  %11502 = vmatmul.mubr.f32.gmra.mrb[124].mxu0 %v3140_v26  ;;  %v2006_v7 = vpop.f32.mrb[19].mxu0  ;;  %v3146_v60 = vsel %vm1281_vm0, %v3144_v18, %v3145_v20  ;;  %v10367_v18 = vld [vmem:[%s19937_s1 + $0x710] sm:$0xff] }
 0x1f6   : > { %v2414_v34 = vpop.f32.mrb[34].mxu1  ;;  %12271 = vmatpush1.bf16.msra.mxu0 %v12270_v17  ;;  %11504 = vmatprep.mubr.f32.mxu0 %v3143_v10  ;;  %v15453_v10 = vld [vmem:[%s13472_s10 + $0xc8] sm:$0x3]  ;;  %v2997_v21 = vsel %vm1152_vm1, %v2995_v58, %v2996_v43  ;;  %v3001_v58 = vrot.slane %v15283_v39, 1  ;;  %v3002_v43 = vrot.slane %v15286_v11, 1 }
 0x1f7   : > { %v15446_v31 = vadd.f32 %v2414_v34, %v15140_v51  ;;  %v2416_v26 = vpop.f32.mrb[35].mxu1  ;;  %3403 = vmatmul.mubr.f32.gmra.mrb[140].mxu1 %v15207_v46  ;;  %12272 = vmatprep.subr.bf16.mxu0 %v20009_v19  ;;  %v10368_v51 = vld [vmem:[%s19937_s1 + $0x718] sm:$0xff]  ;;  %v15498_v11 = vld [vmem:[%s13472_s10 + $0xe8] sm:$0x3] }
 0x1f8   : > { %v2009_v17 = vpop.f32.mrb[20].mxu0  ;;  %3407 = vmatprep.mubr.f32.mxu1 %v2994_v57  ;;  %v12359_v9 = vpack.c.bf16 %v10368_v51, %v10367_v18  ;;  %v15474_v57 = vld [vmem:[%s13472_s10 + $0xd8] sm:$0x3] }
 0x1f9   : > { %v15462_v46 = vadd.f32 %v15037_v48, %v2009_v17  ;;  %11505 = vmatmul.mubr.f32.gmra.mrb[126].mxu0 %v3146_v60  ;;  %v2011_v20 = vpop.f32.mrb[21].mxu0  ;;  %v3845_v48 = vsel %vm1152_vm1, %v3843_v59, %v3844_v28  ;;  %v3847_v60 = vrot.slane %v15453_v10, 1  ;;  %v3850_v17 = vrot.slane %v15474_v57, 1 }
 0x1fa   : > { %v2419_v0 = vpop.f32.mrb[36].mxu1  ;;  %12274 = vmatpush1.bf16.msra.mxu0 %v12273_v8  ;;  %4209 = vmatprep.mubr.f32.mxu0 %v3842_v3  ;;  %v10369_v8 = vld [vmem:[%s19937_s1 + $0x720] sm:$0xff]  ;;  %v3000_v3 = vsel %vm1152_vm1, %v2998_v42, %v2999_v36  ;;  %v3004_v42 = vrot.slane %v15315_v22, 1  ;;  %v3005_v36 = vrot.slane %v15318_v41, 1  ;;  %v15522_v41 = vld [vmem:[%s13472_s10 + $0xf8] sm:$0x3] }
 0x1fb   : > { %v15468_v35 = vadd.f32 %v2419_v0, %v15175_v14  ;;  %v2421_v61 = vpop.f32.mrb[37].mxu1  ;;  %3408 = vmatmul.mubr.f32.gmra.mrb[142].mxu1 %v15239_v29  ;;  %12356 = vmatprep.subr.bf16.mxu0 %v12355_v52  ;;  %v10370_v14 = vld [vmem:[%s19937_s1 + $0x728] sm:$0xff] }
 0x1fc   : > { %v2014_v7 = vpop.f32.mrb[22].mxu0  ;;  %3412 = vmatprep.mubr.f32.mxu1 %v2997_v21  ;;  %v12363_v18 = vpack.c.bf16 %v10370_v14, %v10369_v8  ;;  %v3003_v21 = vsel %vm1152_vm1, %v3001_v58, %v3002_v43  ;;  %v3007_v58 = vrot.slane %v15321_v23, 1  ;;  %v3008_v43 = vrot.slane %v15324_v62, 1  ;;  %v15546_v62 = vld [vmem:[%s13472_s10 + $0x108] sm:$0x3] }
 0x1fd   : > { %v15483_v29 = vadd.f32 %v15026_v30, %v2014_v7  ;;  %4210 = vmatmul.mubr.f32.vlgmr.msra.gmra.mrb[128].mxu0 %v15397_v32  ;;  %v2016_v13 = vpop.f32.mrb[23].mxu0  ;;  %v20086_v30 = vrot.slane %v14887_v49, 1  ;;  %v3853_v7 = vrot.slane %v15498_v11, 1 }
 0x1fe   : > { %v2424_v34 = vpop.f32.mrb[38].mxu1  ;;  %4214 = vmatprep.mubr.f32.mxu0 %v3845_v48  ;;  %12358 = vmatpush3.bf16.msra.mxu0 %v12355_v52 }
 0x1ff   : > { %v15490_v26 = vadd.f32 %v2424_v34, %v15213_v27  ;;  %v2426_v59 = vpop.f32.mrb[39].mxu1  ;;  %3413 = vmatmul.mubr.f32.gmra.mrb[144].mxu1 %v15245_v45  ;;  %v3848_v28 = vsel %vm1152_vm1, %v20086_v30, %v3847_v60  ;;  %12360 = vmatprep.subr.bf16.mxu0 %v12359_v9  ;;  %v10371_v27 = vld [vmem:[%s19937_s1 + $0x730] sm:$0xff]  ;;  %v10372_v45 = vld [vmem:[%s19937_s1 + $0x738] sm:$0xff] }
 0x200   : > { %v2019_v51 = vpop.f32.mrb[24].mxu0  ;;  %3417 = vmatprep.mubr.f32.mxu1 %v3000_v3  ;;  %v12367_v8 = vpack.c.bf16 %v10372_v45, %v10371_v27  ;;  %v3006_v3 = vsel %vm1152_vm1, %v3004_v42, %v3005_v36  ;;  %v3009_v45 = vsel %vm1152_vm1, %v3007_v58, %v3008_v43 }
 0x201   : > { %v15507_v52 = vadd.f32 %v15064_v53, %v2019_v51  ;;  %4215 = vmatmul.mubr.f32.gmra.mrb[130].mxu0 %v15426_v55  ;;  %v2021_v20 = vpop.f32.mrb[25].mxu0  ;;  %v20087_v53 = vrot.slane %v14917_v6, 1 }
 0x202   : > { %v2429_v0 = vpop.f32.mrb[40].mxu1  ;;  %4219 = vmatprep.mubr.f32.mxu0 %v3848_v28  ;;  %12362 = vmatpush3.bf16.msra.mxu0 %v12359_v9  ;;  %v3856_v28 = vrot.slane %v15522_v41, 1  ;;  %v3010_v20 = vrot.slane %v15335_v15, 1 }
 0x203   : > { %v15514_v61 = vadd.f32 %v2429_v0, %v15251_v38  ;;  %v2431_v48 = vpop.f32.mrb[41].mxu1  ;;  %3418 = vmatmul.mubr.f32.gmra.mrb[146].mxu1 %v15277_v2  ;;  %v3851_v60 = vsel %vm1152_vm1, %v20087_v53, %v3850_v17  ;;  %12364 = vmatprep.subr.bf16.mxu0 %v12363_v18  ;;  %v10373_v38 = vld [vmem:[%s19937_s1 + $0x740] sm:$0xff]  ;;  %v10374_v2 = vld [vmem:[%s19937_s1 + $0x748] sm:$0xff]  ;;  %v15570_v53 = vld [vmem:[%s13472_s10 + $0x118] sm:$0x3] }
 0x204   : > { %v2024_v14 = vpop.f32.mrb[26].mxu0  ;;  %3422 = vmatprep.mubr.f32.mxu1 %v3003_v21  ;;  %v12371_v17 = vpack.c.bf16 %v10374_v2, %v10373_v38  ;;  %v3011_v21 = vrot.slane %v15338_v1, 1  ;;  %v3859_v48 = vrot.slane %v15546_v62, 1  ;;  %v3013_v38 = vrot.slane %v15359_v63, 1 }
 0x205   : > { %v15531_v9 = vadd.f32 %v15055_v33, %v2024_v14  ;;  %4220 = vmatmul.mubr.f32.gmra.mrb[132].mxu0 %v14887_v49  ;;  %v2026_v13 = vpop.f32.mrb[27].mxu0  ;;  %v20088_v33 = vrot.slane %v14945_v16, 1  ;;  %v3014_v2 = vrot.slane %v15362_v12, 1 }
 0x206   : > { %v2434_v34 = vpop.f32.mrb[42].mxu1  ;;  %4224 = vmatprep.mubr.f32.mxu0 %v3851_v60  ;;  %12366 = vmatpush3.bf16.msra.mxu0 %v12363_v18  ;;  %v3012_v14 = vsel %vm1152_vm1, %v3010_v20, %v3011_v21  ;;  %v20093_v20 = vld [vmem:[#allocation8_spill] sm:$0xff] }
 0x207   : > { %v15538_v59 = vadd.f32 %v2434_v34, %v15289_v56  ;;  %v2436_v30 = vpop.f32.mrb[43].mxu1  ;;  %3423 = vmatmul.mubr.f32.gmra.mrb[148].mxu1 %v15283_v39  ;;  %v3854_v49 = vsel %vm1152_vm1, %v20088_v33, %v3853_v7  ;;  %12368 = vmatprep.subr.bf16.mxu0 %v12367_v8  ;;  %v10375_v56 = vld [vmem:[%s19937_s1 + $0x750] sm:$0xff]  ;;  %v10376_v39 = vld [vmem:[%s19937_s1 + $0x758] sm:$0xff]  ;;  %v20094_v21 = vrot.slane %v20093_v20, 1 }
 0x208   : > { %v2029_v51 = vpop.f32.mrb[28].mxu0  ;;  %3427 = vmatprep.mubr.f32.mxu1 %v3006_v3  ;;  %v12375_v60 = vpack.c.bf16 %v10376_v39, %v10375_v56  ;;  %v3862_v3 = vrot.slane %v15570_v53, 1  ;;  %v15594_v30 = vld [vmem:[%s13472_s10 + $0x140] sm:$0xff]  ;;  %v3015_v56 = vsel %vm1152_vm1, %v3013_v38, %v3014_v2  ;;  %v3016_v39 = vrot.slane %v15386_v24, 1 }
 0x209   : > { %v15555_v18 = vadd.f32 %v15090_v25, %v2029_v51  ;;  %4225 = vmatmul.mubr.f32.gmra.mrb[134].mxu0 %v14917_v6  ;;  %v2031_v27 = vpop.f32.mrb[29].mxu0  ;;  %v20089_v25 = vrot.slane %v14974_v54, 1 }
 0x20a   : > { %v2439_v42 = vpop.f32.mrb[44].mxu1  ;;  %4229 = vmatprep.mubr.f32.mxu0 %v3854_v49  ;;  %12370 = vmatpush3.bf16.msra.mxu0 %v12367_v8  ;;  %v15597_v49 = vld [vmem:[%s13472_s10 + $0x148] sm:$0x3]  ;;  %v3017_v27 = vrot.slane %v15394_v5, 1 }
 0x20b   : > { %v15562_v36 = vadd.f32 %v2439_v42, %v15327_v37  ;;  %v2441_v0 = vpop.f32.mrb[45].mxu1  ;;  %3428 = vmatmul.mubr.f32.gmra.mrb[150].mxu1 %v15315_v22  ;;  %v3857_v6 = vsel %vm1152_vm1, %v20089_v25, %v3856_v28  ;;  %12372 = vmatprep.subr.bf16.mxu0 %v12371_v17  ;;  %v10377_v37 = vld [vmem:[%s19937_s1 + $0x760] sm:$0xff]  ;;  %v10378_v22 = vld [vmem:[%s19937_s1 + $0x768] sm:$0xff]  ;;  %v3863_v42 = vsel %vm1152_vm1, %v20094_v21, %v3862_v3  ;;  %v3864_v25 = vrot.slane %v15594_v30, 1 }
 0x20c   : > { %v2034_v1 = vpop.f32.mrb[30].mxu0  ;;  %3432 = vmatprep.mubr.f32.mxu1 %v3009_v45  ;;  %v12379_v33 = vpack.c.bf16 %v10378_v22, %v10377_v37  ;;  %v20092_v28 = vld [vmem:[#allocation11_spill] sm:$0xff]  ;;  %v15625_v37 = vld [vmem:[%s13472_s10 + $0x158] sm:$0x3] }
 0x20d   : > { %v15579_v7 = vadd.f32 %v15081_v40, %v2034_v1  ;;  %4230 = vmatmul.mubr.f32.gmra.mrb[136].mxu0 %v14945_v16  ;;  %v2036_v8 = vpop.f32.mrb[31].mxu0  ;;  %v20090_v16 = vld [vmem:[#allocation7_spill] sm:$0xff]  ;;  %v15622_v1 = vld [vmem:[%s13472_s10 + $0x150] sm:$0xff]  ;;  %v20095_v22 = vld [vmem:[#allocation10_spill] sm:$0xff] }
 0x20e   : > { %v2444_v13 = vpop.f32.mrb[46].mxu1  ;;  %4234 = vmatprep.mubr.f32.mxu0 %v3857_v6  ;;  %12374 = vmatpush3.bf16.msra.mxu0 %v12371_v17  ;;  %v20091_v43 = vrot.slane %v20090_v16, 1  ;;  %v3865_v6 = vrot.slane %v15597_v49, 1  ;;  %v3968_v8 = vrot.slane %v15397_v32, 2  ;;  %v3972_v32 = vrot.slane %v15429_v50, 2  ;;  %v10334_v50 = vld [vmem:[%s19937_s1 + $0x608] sm:$0xff] }
 0x20f   : > { %v15587_v58 = vadd.f32 %v2444_v13, %v15369_v47  ;;  %v2446_v40 = vpop.f32.mrb[47].mxu1  ;;  %3433 = vmatmul.mubr.f32.gmra.mrb[152].mxu1 %v15321_v23  ;;  %12376 = vmatprep.subr.bf16.mxu0 %v12375_v60  ;;  %v10379_v47 = vld [vmem:[%s19937_s1 + $0x770] sm:$0xff]  ;;  %v10380_v23 = vld [vmem:[%s19937_s1 + $0x778] sm:$0xff] }
 0x210   : > { %v3860_v34 = vsel %vm1152_vm1, %v20091_v43, %v3859_v48  ;;  %v2039_v12 = vpop.f32.mrb[32].mxu0  ;;  %3437 = vmatprep.mubr.f32.mxu1 %v3012_v14  ;;  %v12383_v48 = vpack.c.bf16 %v10380_v23, %v10379_v47  ;;  %v20096_v14 = vld [vmem:[#allocation31_spill] sm:$0xff]  ;;  %v3866_v40 = vsel %vm1152_vm1, %v3864_v25, %v3865_v6  ;;  %v3868_v43 = vrot.slane %v15625_v37, 1  ;;  %v12773_v25 = vld [vmem:[%s13472_s10 + $0xd0] sm:$0xff] }
 0x211   : > { %v15606_v17 = vadd.f32 %v20092_v28, %v2039_v12  ;;  %4235 = vmatmul.mubr.f32.gmra.mrb[138].mxu0 %v14974_v54  ;;  %v2041_v51 = vpop.f32.mrb[33].mxu0  ;;  %v3969_v38 = vrot.slane %v20096_v14, 2  ;;  %v15644_v12 = vld [vmem:[%s13472_s10 + $0x168] sm:$0x3]  ;;  %v10333_v28 = vld [vmem:[%s19937_s1 + $0x600] sm:$0xff]  ;;  %v3977_v6 = vrot.slane %v12773_v25, 2 }
 0x212   : > { %v2449_v45 = vpop.f32.mrb[48].mxu1  ;;  %4239 = vmatprep.mubr.f32.mxu0 %v3860_v34  ;;  %12378 = vmatpush3.bf16.msra.mxu0 %v12375_v60  ;;  %v12772_v51 = vld [vmem:[%s13472_s10 + $0xc0] sm:$0xff]  ;;  %v3871_v21 = vrot.slane %v15644_v12, 1  ;;  %v20102_v25 = vld [vmem:[#allocation12_spill] sm:$0xff] }
 0x213   : > { %v15616_v0 = vadd.f32 %v2449_v45, %v15405_v44  ;;  %v2451_v54 = vpop.f32.mrb[49].mxu1  ;;  %3438 = vmatmul.mubr.f32.gmra.mrb[154].mxu1 %v15335_v15  ;;  %12380 = vmatprep.subr.bf16.mxu0 %v12379_v33  ;;  %v3018_v15 = vsel %vm1152_vm1, %v3016_v39, %v3017_v27  ;;  %v3970_v23 = vsel %vm1281_vm0, %v3968_v8, %v3969_v38  ;;  %v10336_v8 = vld [vmem:[%s19937_s1 + $0x618] sm:$0xff]  ;;  %v3981_v38 = vrot.slane %v15498_v11, 2 }
 0x214   : > { %v2044_v5 = vpop.f32.mrb[34].mxu0  ;;  %3442 = vmatprep.mubr.f32.mxu1 %v3015_v56  ;;  %v3975_v56 = vrot.slane %v15453_v10, 2  ;;  %v12308_v54 = vpack.c.bf16 %v10334_v50, %v10333_v28  ;;  %v15696_v28 = vld [vmem:[%s13472_s10 + $0x188] sm:$0x3]  ;;  %v20101_v50 = vld [vmem:[#allocation19_spill] sm:$0xff] }
 0x215   : > { %v15628_v60 = vadd.f32 %v20095_v22, %v2044_v5  ;;  %4240 = vmatmul.mubr.f32.gmra.mrb[140].mxu0 %v20090_v16  ;;  %v2046_v44 = vpop.f32.mrb[35].mxu0  ;;  %v3867_v16 = vrot.slane %v15622_v1, 1  ;;  %v20098_v5 = vld [vmem:[#allocation14_spill] sm:$0xff] }
 0x216   : > { %v2454_v2 = vpop.f32.mrb[50].mxu1  ;;  %4244 = vmatprep.mubr.f32.mxu0 %v3863_v42  ;;  %12382 = vmatpush3.bf16.msra.mxu0 %v12379_v33  ;;  %v3971_v33 = vrot.slane %v15426_v55, 2  ;;  %v3974_v55 = vrot.slane %v12772_v51, 2 }
 0x217   : > { %v15635_v13 = vadd.f32 %v2454_v2, %v15438_v4  ;;  %v2456_v3 = vpop.f32.mrb[51].mxu1  ;;  %3443 = vmatmul.mubr.f32.gmra.mrb[156].mxu1 %v15359_v63  ;;  %12384 = vmatprep.subr.bf16.mxu0 %v12383_v48  ;;  %v20097_v4 = vld [vmem:[#allocation15_spill] sm:$0xff] }
 0x218   : > { %v2049_v34 = vpop.f32.mrb[36].mxu0  ;;  %3447 = vmatprep.mubr.f32.mxu1 %v3018_v15  ;;  %v3973_v10 = vsel %vm1281_vm0, %v3971_v33, %v3972_v32  ;;  %v3976_v44 = vsel %vm1281_vm0, %v3974_v55, %v3975_v56  ;;  %v10335_v15 = vld [vmem:[%s19937_s1 + $0x610] sm:$0xff] }
 0x219   : > { %v15647_v47 = vadd.f32 %v20097_v4, %v2049_v34  ;;  %4245 = vmatmul.mubr.f32.gmra.mrb[142].mxu0 %v20093_v20  ;;  %v2051_v63 = vpop.f32.mrb[37].mxu0  ;;  %v3869_v20 = vsel %vm1152_vm1, %v3867_v16, %v3868_v43  ;;  %v20099_v16 = vld [vmem:[#allocation9_spill] sm:$0xff]  ;;  %v12311_v4 = vpack.c.bf16 %v10336_v8, %v10335_v15 }
 0x21a   : > { %v2459_v39 = vpop.f32.mrb[52].mxu1  ;;  %4249 = vmatprep.mubr.f32.mxu0 %v3866_v40  ;;  %12386 = vmatpush3.bf16.msra.mxu0 %v12383_v48  ;;  %v15670_v48 = vld [vmem:[%s13472_s10 + $0x178] sm:$0x3]  ;;  %v20100_v43 = vrot.slane %v20099_v16, 1  ;;  %v12775_v63 = vld [vmem:[%s13472_s10 + $0xf0] sm:$0xff] }
 0x21b   : > { %v15660_v27 = vadd.f32 %v2459_v39, %v15462_v46  ;;  %v2461_v45 = vpop.f32.mrb[53].mxu1  ;;  %3448 = vmatmul.mubr.f32.gmra.mrb[158].mxu1 %v15386_v24  ;;  %12387 = vmatprep.subr.bf16.mxu0 %v20009_v19  ;;  %v3978_v46 = vrot.slane %v15474_v57, 2  ;;  %v12774_v57 = vld [vmem:[%s13472_s10 + $0xe0] sm:$0xff]  ;;  %v3874_v34 = vrot.slane %v15670_v48, 1  ;;  %v12777_v15 = vld [vmem:[%s13472_s10 + $0x110] sm:$0xff] }
 0x21c   : > { %v2054_v42 = vpop.f32.mrb[38].mxu0  ;;  %11539 = vmatprep.mubr.f32.mxu1 %v3970_v23  ;;  %v3980_v14 = vrot.slane %v12774_v57, 2  ;;  %v3872_v32 = vsel %vm1152_vm1, %v20100_v43, %v3871_v21  ;;  %v3983_v23 = vrot.slane %v12775_v63, 2  ;;  %v10337_v39 = vld [vmem:[%s19937_s1 + $0x620] sm:$0xff]  ;;  %v3987_v21 = vrot.slane %v15546_v62, 2  ;;  %v10339_v43 = vld [vmem:[%s19937_s1 + $0x630] sm:$0xff] }
 0x21d   : > { %v15673_v24 = vadd.f32 %v20098_v5, %v2054_v42  ;;  %4250 = vmatmul.mubr.f32.gmra.mrb[144].mxu0 %v15594_v30  ;;  %v2056_v22 = vpop.f32.mrb[39].mxu0  ;;  %v3979_v11 = vsel %vm1281_vm0, %v3977_v6, %v3978_v46  ;;  %v12776_v45 = vld [vmem:[%s13472_s10 + $0x100] sm:$0xff]  ;;  %v20103_v6 = vrot.slane %v20102_v25, 1  ;;  %v3877_v5 = vrot.slane %v15696_v28, 1 }
 0x21e   : > { %v2464_v2 = vpop.f32.mrb[54].mxu1  ;;  %4254 = vmatprep.mubr.f32.mxu0 %v3869_v20  ;;  %v3982_v56 = vsel %vm1281_vm0, %v3980_v14, %v3981_v38  ;;  %v3986_v20 = vrot.slane %v12776_v45, 2  ;;  %v3989_v8 = vrot.slane %v12777_v15, 2  ;;  %v3990_v57 = vrot.slane %v15570_v53, 2  ;;  %v20104_v14 = vld [vmem:[#allocation18_spill] sm:$0xff]  ;;  %v12778_v45 = vld [vmem:[%s13472_s10 + $0x170] sm:$0xff] }
 0x21f   : > { %v15686_v3 = vadd.f32 %v2464_v2, %v15483_v29  ;;  %v2466_v40 = vpop.f32.mrb[55].mxu1  ;;  %11540 = vmatmul.mubr.f32.vlgmr.msra.gmra.mrb[160].mxu1 %v3973_v10  ;;  %v3984_v29 = vrot.slane %v15522_v41, 2  ;;  %v10338_v41 = vld [vmem:[%s19937_s1 + $0x628] sm:$0xff]  ;;  %v3875_v46 = vsel %vm1152_vm1, %v20103_v6, %v3874_v34  ;;  %v10340_v53 = vld [vmem:[%s19937_s1 + $0x638] sm:$0xff]  ;;  %v3993_v34 = vrot.slane %v15597_v49, 2 }
 0x220   : > { %12309 = vmatpush1.bf16.msra.mxu1 %v12308_v54  ;;  %v2059_v33 = vpop.f32.mrb[40].mxu0  ;;  %11542 = vmatprep.mubr.f32.mxu1 %v3976_v44  ;;  %v12314_v62 = vpack.c.bf16 %v10338_v41, %v10337_v39  ;;  %v3988_v40 = vsel %vm1281_vm0, %v3986_v20, %v3987_v21  ;;  %v3991_v49 = vsel %vm1281_vm0, %v3989_v8, %v3990_v57  ;;  %v20107_v39 = vld [vmem:[#allocation22_spill] sm:$0xff]  ;;  %v3999_v25 = vrot.slane %v15644_v12, 2 }
 0x221   : > { %v15699_v51 = vadd.f32 %v20101_v50, %v2059_v33  ;;  %4255 = vmatmul.mubr.f32.gmra.mrb[146].mxu0 %v15622_v1  ;;  %12310 = vmatprep.subr.bf16.mxu1 %v20009_v19  ;;  %v2061_v55 = vpop.f32.mrb[41].mxu0  ;;  %v3985_v44 = vsel %vm1281_vm0, %v3983_v23, %v3984_v29  ;;  %v12317_v50 = vpack.c.bf16 %v10340_v53, %v10339_v43  ;;  %v12780_v53 = vld [vmem:[%s13472_s10 + $0x180] sm:$0xff] }
 0x222   : > { %v2469_v42 = vpop.f32.mrb[56].mxu1  ;;  %4259 = vmatprep.mubr.f32.mxu0 %v3872_v32  ;;  %v3992_v32 = vrot.slane %v15594_v30, 2  ;;  %v3995_v55 = vrot.slane %v15622_v1, 2  ;;  %v10342_v1 = vld [vmem:[%s19937_s1 + $0x648] sm:$0xff] }
 0x223   : > { %v15713_v10 = vadd.f32 %v2469_v42, %v15507_v52  ;;  %v2471_v54 = vpop.f32.mrb[57].mxu1  ;;  %11543 = vmatmul.mubr.f32.gmra.mrb[162].mxu1 %v3979_v11  ;;  %v15723_v52 = vld [vmem:[%s13472_s10 + $0x198] sm:$0x3]  ;;  %v10341_v42 = vld [vmem:[%s19937_s1 + $0x640] sm:$0xff] }
 0x224   : > { %12312 = vmatpush1.bf16.msra.mxu1 %v12311_v4  ;;  %v2064_v22 = vpop.f32.mrb[42].mxu0  ;;  %11545 = vmatprep.mubr.f32.mxu1 %v3982_v56  ;;  %v20105_v4 = vld [vmem:[#allocation13_spill] sm:$0xff]  ;;  %v3880_v29 = vrot.slane %v15723_v52, 1  ;;  %v15750_v56 = vld [vmem:[%s13472_s10 + $0x1a8] sm:$0x3]  ;;  %v3994_v21 = vsel %vm1281_vm0, %v3992_v32, %v3993_v34  ;;  %v12320_v12 = vpack.c.bf16 %v10342_v1, %v10341_v42 }
 0x225   : > { %v15726_v38 = vadd.f32 %v20104_v14, %v2064_v22  ;;  %4260 = vmatmul.mubr.f32.gmra.mrb[148].mxu0 %v20099_v16  ;;  %12313 = vmatprep.subr.bf16.mxu1 %v20009_v19  ;;  %v2066_v2 = vpop.f32.mrb[43].mxu0  ;;  %v20106_v63 = vrot.slane %v20105_v4, 1  ;;  %v20109_v22 = vld [vmem:[#allocation16_spill] sm:$0xff]  ;;  %v3883_v15 = vrot.slane %v15750_v56, 1  ;;  %v4001_v14 = vrot.slane %v12778_v45, 2 }
 0x226   : > { %v2474_v33 = vpop.f32.mrb[58].mxu1  ;;  %4264 = vmatprep.mubr.f32.mxu0 %v3875_v46  ;;  %v4002_v2 = vrot.slane %v15670_v48, 2  ;;  %v10344_v48 = vld [vmem:[%s19937_s1 + $0x658] sm:$0xff]  ;;  %v4005_v4 = vrot.slane %v15696_v28, 2  ;;  %v15805_v42 = vld [vmem:[%s13472_s10 + $0x1e8] sm:$0x3] }
 0x227   : > { %v15740_v16 = vadd.f32 %v2474_v33, %v15531_v9  ;;  %v2476_v11 = vpop.f32.mrb[59].mxu1  ;;  %11546 = vmatmul.mubr.f32.gmra.mrb[164].mxu1 %v3985_v44  ;;  %v3878_v23 = vsel %vm1152_vm1, %v20106_v63, %v3877_v5  ;;  %v3996_v9 = vrot.slane %v15625_v37, 2  ;;  %v12779_v37 = vld [vmem:[%s13472_s10 + $0x160] sm:$0xff]  ;;  %v20110_v44 = vrot.slane %v20109_v22, 1  ;;  %v10343_v33 = vld [vmem:[%s19937_s1 + $0x650] sm:$0xff]  ;;  %v20115_v1 = vld [vmem:[#allocation24_spill] sm:$0xff] }
 0x228   : > { %12315 = vmatpush1.bf16.msra.mxu1 %v12314_v62  ;;  %v2069_v30 = vpop.f32.mrb[44].mxu0  ;;  %11548 = vmatprep.mubr.f32.mxu1 %v3988_v40  ;;  %v3998_v54 = vrot.slane %v12779_v37, 2  ;;  %v15776_v40 = vld [vmem:[%s13472_s10 + $0x1b8] sm:$0x3]  ;;  %v4004_v11 = vrot.slane %v12780_v53, 2  ;;  %v4003_v28 = vsel %vm1281_vm0, %v4001_v14, %v4002_v2 }
 0x229   : > { %v15753_v41 = vadd.f32 %v20107_v39, %v2069_v30  ;;  %4265 = vmatmul.mubr.f32.gmra.mrb[150].mxu0 %v12778_v45  ;;  %12316 = vmatprep.subr.bf16.mxu1 %v20009_v19  ;;  %v2071_v20 = vpop.f32.mrb[45].mxu0  ;;  %v3881_v62 = vsel %vm1152_vm1, %v20110_v44, %v3880_v29  ;;  %v3997_v57 = vsel %vm1281_vm0, %v3995_v55, %v3996_v9  ;;  %v20113_v30 = vld [vmem:[#allocation17_spill] sm:$0xff]  ;;  %v3886_v55 = vrot.slane %v15776_v40, 1 }
 0x22a   : > { %v2479_v6 = vpop.f32.mrb[60].mxu1  ;;  %4269 = vmatprep.mubr.f32.mxu0 %v3878_v23  ;;  %v4000_v34 = vsel %vm1281_vm0, %v3998_v54, %v3999_v25  ;;  %v12323_v39 = vpack.c.bf16 %v10344_v48, %v10343_v33  ;;  %v12781_v45 = vld [vmem:[%s13472_s10 + $0x190] sm:$0xff]  ;;  %v4006_v25 = vsel %vm1281_vm0, %v4004_v11, %v4005_v4  ;;  %v4011_v44 = vrot.slane %v15750_v56, 2  ;;  %v10348_v11 = vld [vmem:[%s19937_s1 + $0x678] sm:$0xff]  ;;  %v20119_v4 = vld [vmem:[#allocation23_spill] sm:$0xff] }
 0x22b   : > { %v15767_v46 = vadd.f32 %v2479_v6, %v15555_v18  ;;  %v2481_v5 = vpop.f32.mrb[61].mxu1  ;;  %11549 = vmatmul.mubr.f32.gmra.mrb[166].mxu1 %v3991_v49  ;;  %v20111_v18 = vld [vmem:[#allocation21_spill] sm:$0xff]  ;;  %v20114_v49 = vrot.slane %v20113_v30, 1  ;;  %v4007_v20 = vrot.slane %v12781_v45, 2  ;;  %v10345_v6 = vld [vmem:[%s19937_s1 + $0x660] sm:$0xff]  ;;  %v4014_v33 = vrot.slane %v15776_v40, 2 }
 0x22c   : > { %12318 = vmatpush1.bf16.msra.mxu1 %v12317_v50  ;;  %v2074_v8 = vpop.f32.mrb[46].mxu0  ;;  %11551 = vmatprep.mubr.f32.mxu1 %v3994_v21  ;;  %v15802_v21 = vld [vmem:[%s13472_s10 + $0x1e0] sm:$0xff]  ;;  %v10347_v48 = vld [vmem:[%s19937_s1 + $0x670] sm:$0xff]  ;;  %v4017_v40 = vrot.slane %v15805_v42, 2 }
 0x22d   : > { %20108 = vst [vmem:[#allocation7_spill] sm:$0xff] %v15767_v46  ;;  %v15779_v43 = vadd.f32 %v20111_v18, %v2074_v8  ;;  %4270 = vmatmul.mubr.f32.gmra.mrb[152].mxu0 %v12780_v53  ;;  %12319 = vmatprep.subr.bf16.mxu1 %v20009_v19  ;;  %v2076_v32 = vpop.f32.mrb[47].mxu0  ;;  %v3884_v50 = vsel %vm1152_vm1, %v20114_v49, %v3883_v15  ;;  %v12782_v5 = vld [vmem:[%s13472_s10 + $0x1a0] sm:$0xff]  ;;  %v3888_v2 = vrot.slane %v15802_v21, 1  ;;  %v3889_v18 = vrot.slane %v15805_v42, 1 }
 0x22e   : > { %v2484_v63 = vpop.f32.mrb[62].mxu1  ;;  %4274 = vmatprep.mubr.f32.mxu0 %v3881_v62  ;;  %v4010_v22 = vrot.slane %v12782_v5, 2  ;;  %v4016_v49 = vrot.slane %v15802_v21, 2 }
 0x22f   : > { %v15792_v23 = vadd.f32 %v2484_v63, %v15579_v7  ;;  %v2486_v29 = vpop.f32.mrb[63].mxu1  ;;  %11552 = vmatmul.mubr.f32.gmra.mrb[168].mxu1 %v3997_v57  ;;  %v4008_v7 = vrot.slane %v15723_v52, 2  ;;  %v10346_v52 = vld [vmem:[%s19937_s1 + $0x668] sm:$0xff] }
 0x230   : > { %12321 = vmatpush1.bf16.msra.mxu1 %v12320_v12  ;;  %v2079_v9 = vpop.f32.mrb[48].mxu0  ;;  %11554 = vmatprep.mubr.f32.mxu1 %v4000_v34  ;;  %v20117_v57 = vld [vmem:[#allocation20_spill] sm:$0xff]  ;;  %v12326_v32 = vpack.c.bf16 %v10346_v52, %v10345_v6  ;;  %v4012_v30 = vsel %vm1281_vm0, %v4010_v22, %v4011_v44  ;;  %v12329_v6 = vpack.c.bf16 %v10348_v11, %v10347_v48  ;;  %v20121_v44 = vld [vmem:[#allocation26_spill] sm:$0xff] }
 0x231   : > { %20112 = vst [vmem:[#allocation11_spill] sm:$0xff] %v15792_v23  ;;  %v15808_v37 = vadd.f32 %v20115_v1, %v2079_v9  ;;  %4275 = vmatmul.mubr.f32.gmra.mrb[154].mxu0 %v12781_v45  ;;  %12322 = vmatprep.subr.bf16.mxu1 %v20009_v19  ;;  %v2081_v54 = vpop.f32.mrb[49].mxu0  ;;  %v20118_v12 = vrot.slane %v20117_v57, 1  ;;  %v4009_v56 = vsel %vm1281_vm0, %v4007_v20, %v4008_v7  ;;  %v10350_v22 = vld [vmem:[%s19937_s1 + $0x688] sm:$0xff] }
 0x232   : > { %v2489_v62 = vpop.f32.mrb[64].mxu1  ;;  %4279 = vmatprep.mubr.f32.mxu0 %v3884_v50  ;;  %v15845_v50 = vld [vmem:[%s13472_s10 + $0x1f0] sm:$0xff]  ;;  %v3890_v7 = vsel %vm1152_vm1, %v3888_v2, %v3889_v18  ;;  %v4018_v57 = vsel %vm1281_vm0, %v4016_v49, %v4017_v40  ;;  %v15875_v18 = vld [vmem:[%s13472_s10 + $0x218] sm:$0x3] }
 0x233   : > { %v15821_v15 = vadd.f32 %v2489_v62, %v15606_v17  ;;  %v2491_v8 = vpop.f32.mrb[65].mxu1  ;;  %11555 = vmatmul.mubr.f32.gmra.mrb[170].mxu1 %v4003_v28  ;;  %v3887_v14 = vsel %vm1152_vm1, %v20118_v12, %v3886_v55  ;;  %v12783_v17 = vld [vmem:[%s13472_s10 + $0x1b0] sm:$0xff]  ;;  %v10192_v55 = vld [vmem:[%s13472_s10 + $0x1f8] sm:$0x3]  ;;  %v15849_v28 = vld [vmem:[%s13472_s10 + $0x200] sm:$0xff]  ;;  %v3891_v1 = vrot.slane %v15845_v50, 1 }
 0x234   : > { %12324 = vmatpush1.bf16.msra.mxu1 %v12323_v39  ;;  %v2084_v53 = vpop.f32.mrb[50].mxu0  ;;  %11557 = vmatprep.mubr.f32.mxu1 %v4006_v25  ;;  %v4013_v34 = vrot.slane %v12783_v17, 2  ;;  %v10194_v39 = vld [vmem:[%s13472_s10 + $0x208] sm:$0x3]  ;;  %v3892_v54 = vrot.slane %v10192_v55, 1  ;;  %v4019_v52 = vrot.slane %v15845_v50, 2 }
 0x235   : > { %20116 = vst [vmem:[#allocation8_spill] sm:$0xff] %v15821_v15  ;;  %v15838_v63 = vadd.f32 %v20119_v4, %v2084_v53  ;;  %4280 = vmatmul.mubr.f32.gmra.mrb[156].mxu0 %v12782_v5  ;;  %12325 = vmatprep.subr.bf16.mxu1 %v20009_v19  ;;  %v2086_v29 = vpop.f32.mrb[51].mxu0  ;;  %v10349_v5 = vld [vmem:[%s19937_s1 + $0x680] sm:$0xff]  ;;  %v4022_v12 = vrot.slane %v15849_v28, 2  ;;  %v15872_v2 = vld [vmem:[%s13472_s10 + $0x210] sm:$0xff]  ;;  %v3894_v48 = vrot.slane %v15849_v28, 1 }
 0x236   : > { %v2494_v9 = vpop.f32.mrb[66].mxu1  ;;  %4284 = vmatprep.mubr.f32.mxu0 %v3887_v14  ;;  %v4015_v25 = vsel %vm1281_vm0, %v4013_v34, %v4014_v33  ;;  %v4023_v14 = vrot.slane %v10194_v39, 2  ;;  %v3893_v33 = vsel %vm1152_vm1, %v3891_v1, %v3892_v54  ;;  %v3895_v11 = vrot.slane %v10194_v39, 1  ;;  %v10351_v40 = vld [vmem:[%s19937_s1 + $0x690] sm:$0xff] }
 0x237   : > { %v15853_v45 = vadd.f32 %v2494_v9, %v15628_v60  ;;  %v2496_v20 = vpop.f32.mrb[67].mxu1  ;;  %11558 = vmatmul.mubr.f32.gmra.mrb[172].mxu1 %v4009_v56  ;;  %v4020_v60 = vrot.slane %v10192_v55, 2  ;;  %v15878_v56 = vld [vmem:[%s13472_s10 + $0x220] sm:$0xff]  ;;  %v4025_v49 = vrot.slane %v15872_v2, 2  ;;  %v10352_v55 = vld [vmem:[%s19937_s1 + $0x698] sm:$0xff]  ;;  %v20123_v9 = vld [vmem:[#allocation25_spill] sm:$0xff] }
 0x238   : > { %12327 = vmatpush1.bf16.msra.mxu1 %v12326_v32  ;;  %v2089_v42 = vpop.f32.mrb[52].mxu0  ;;  %11560 = vmatprep.mubr.f32.mxu1 %v4012_v30  ;;  %v15881_v32 = vld [vmem:[%s13472_s10 + $0x228] sm:$0x3]  ;;  %v12332_v30 = vpack.c.bf16 %v10350_v22, %v10349_v5  ;;  %v4028_v1 = vrot.slane %v15878_v56, 2  ;;  %v3896_v22 = vsel %vm1152_vm1, %v3894_v48, %v3895_v11 }
 0x239   : > { %20120 = vst [vmem:[#allocation10_spill] sm:$0xff] %v15853_v45  ;;  %v15866_v62 = vadd.f32 %v20121_v44, %v2089_v42  ;;  %4285 = vmatmul.mubr.f32.gmra.mrb[158].mxu0 %v12783_v17  ;;  %12328 = vmatprep.subr.bf16.mxu1 %v20009_v19  ;;  %v2091_v8 = vpop.f32.mrb[53].mxu0  ;;  %v4021_v29 = vsel %vm1281_vm0, %v4019_v52, %v4020_v60  ;;  %v4029_v54 = vrot.slane %v15881_v32, 2  ;;  %v15906_v42 = vld [vmem:[%s13472_s10 + $0x230] sm:$0xff]  ;;  %v15912_v52 = vld [vmem:[%s13472_s10 + $0x240] sm:$0xff]  ;;  %v3897_v44 = vrot.slane %v15872_v2, 1 }
 0x23a   : > { %v2499_v53 = vpop.f32.mrb[68].mxu1  ;;  %4289 = vmatprep.mubr.f32.mxu0 %v3890_v7  ;;  %v4024_v7 = vsel %vm1281_vm0, %v4022_v12, %v4023_v14  ;;  %v15915_v60 = vld [vmem:[%s13472_s10 + $0x248] sm:$0x3]  ;;  %v3898_v8 = vrot.slane %v15875_v18, 1  ;;  %v12335_v14 = vpack.c.bf16 %v10352_v55, %v10351_v40  ;;  %v15947_v55 = vld [vmem:[%s13472_s10 + $0x280] sm:$0xff] }
 0x23b   : > { %v15884_v17 = vadd.f32 %v2499_v53, %v15647_v47  ;;  %v2501_v34 = vpop.f32.mrb[69].mxu1  ;;  %11561 = vmatmul.mubr.f32.gmra.mrb[174].mxu1 %v4015_v25  ;;  %v4026_v47 = vrot.slane %v15875_v18, 2  ;;  %v15909_v25 = vld [vmem:[%s13472_s10 + $0x238] sm:$0x3]  ;;  %v10354_v18 = vld [vmem:[%s19937_s1 + $0x6a8] sm:$0xff] }
 0x23c   : > { %12330 = vmatpush1.bf16.msra.mxu1 %v12329_v6  ;;  %v2094_v4 = vpop.f32.mrb[54].mxu0  ;;  %11563 = vmatprep.mubr.f32.mxu1 %v4018_v57  ;;  %v4032_v53 = vrot.slane %v15909_v25, 2  ;;  %v10353_v34 = vld [vmem:[%s19937_s1 + $0x6a0] sm:$0xff] }
 0x23d   : > { %20122 = vst [vmem:[#allocation31_spill] sm:$0xff] %v15884_v17  ;;  %v15898_v39 = vadd.f32 %v20123_v9, %v2094_v4  ;;  %4290 = vmatmul.mubr.f32.gmra.mrb[160].mxu0 %v15802_v21  ;;  %12331 = vmatprep.subr.bf16.mxu1 %v20009_v19  ;;  %v2096_v20 = vpop.f32.mrb[55].mxu0  ;;  %v4027_v12 = vsel %vm1281_vm0, %v4025_v49, %v4026_v47  ;;  %v15941_v49 = vld [vmem:[%s13472_s10 + $0x250] sm:$0xff]  ;;  %v15944_v47 = vld [vmem:[%s13472_s10 + $0x258] sm:$0x3] }
 0x23e   : > { %v2504_v6 = vpop.f32.mrb[70].mxu1  ;;  %4294 = vmatprep.mubr.f32.mxu0 %v3893_v33  ;;  %v20125_v33 = vld [vmem:[#allocation28_spill] sm:$0xff]  ;;  %v4030_v4 = vsel %vm1281_vm0, %v4028_v1, %v4029_v54  ;;  %v3900_v1 = vrot.slane %v15878_v56, 1  ;;  %v3901_v54 = vrot.slane %v15881_v32, 1  ;;  %v10356_v32 = vld [vmem:[%s19937_s1 + $0x6b8] sm:$0xff]  ;;  %v3909_v15 = vrot.slane %v15941_v49, 1 }
 0x23f   : > { %v15918_v21 = vadd.f32 %v2504_v6, %v15673_v24  ;;  %v2506_v5 = vpop.f32.mrb[71].mxu1  ;;  %11564 = vmatmul.mubr.f32.gmra.mrb[176].mxu1 %v4021_v29  ;;  %v4031_v24 = vrot.slane %v15906_v42, 2  ;;  %v4034_v29 = vrot.slane %v15912_v52, 2  ;;  %v15950_v9 = vld [vmem:[%s13472_s10 + $0x288] sm:$0x3]  ;;  %v3910_v45 = vrot.slane %v15944_v47, 1 }
 0x240   : > { %12333 = vmatpush1.bf16.msra.mxu1 %v12332_v30  ;;  %v2099_v57 = vpop.f32.mrb[56].mxu0  ;;  %11566 = vmatprep.mubr.f32.mxu1 %v4024_v7  ;;  %v4035_v30 = vrot.slane %v15915_v60, 2  ;;  %v3899_v7 = vsel %vm1152_vm1, %v3897_v44, %v3898_v8  ;;  %v10355_v44 = vld [vmem:[%s19937_s1 + $0x6b0] sm:$0xff]  ;;  %v20127_v8 = vld [vmem:[#allocation27_spill] sm:$0xff]  ;;  %v16032_v17 = vld [vmem:[%s13472_s10 + $0x2d8] sm:$0x3] }
 0x241   : > { %20124 = vst [vmem:[#allocation15_spill] sm:$0xff] %v15918_v21  ;;  %v15933_v48 = vadd.f32 %v20125_v33, %v2099_v57  ;;  %4295 = vmatmul.mubr.f32.gmra.mrb[162].mxu0 %v15845_v50  ;;  %12334 = vmatprep.subr.bf16.mxu1 %v20009_v19  ;;  %v2101_v11 = vpop.f32.mrb[57].mxu0  ;;  %v4033_v5 = vsel %vm1281_vm0, %v4031_v24, %v4032_v53  ;;  %v4038_v57 = vrot.slane %v15944_v47, 2  ;;  %v4040_v53 = vrot.slane %v15947_v55, 2  ;;  %v15979_v33 = vld [vmem:[%s13472_s10 + $0x298] sm:$0x3] }
 0x242   : > { %v2509_v40 = vpop.f32.mrb[72].mxu1  ;;  %4299 = vmatprep.mubr.f32.mxu0 %v3896_v22  ;;  %v12338_v22 = vpack.c.bf16 %v10354_v18, %v10353_v34  ;;  %v4036_v24 = vsel %vm1281_vm0, %v4034_v29, %v4035_v30  ;;  %v4041_v34 = vrot.slane %v15950_v9, 2  ;;  %v15976_v18 = vld [vmem:[%s13472_s10 + $0x290] sm:$0xff]  ;;  %v3902_v29 = vsel %vm1152_vm1, %v3900_v1, %v3901_v54  ;;  %v10357_v1 = vld [vmem:[%s19937_s1 + $0x6c0] sm:$0xff]  ;;  %v20129_v54 = vld [vmem:[#allocation30_spill] sm:$0xff] }
 0x243   : > { %v15953_v50 = vadd.f32 %v2509_v40, %v15699_v51  ;;  %v2511_v20 = vpop.f32.mrb[73].mxu1  ;;  %11567 = vmatmul.mubr.f32.gmra.mrb[178].mxu1 %v4027_v12  ;;  %v4037_v51 = vrot.slane %v15941_v49, 2  ;;  %v15985_v40 = vld [vmem:[%s13472_s10 + $0x2a8] sm:$0x3]  ;;  %v3903_v30 = vrot.slane %v15906_v42, 1  ;;  %v3913_v46 = vrot.slane %v15950_v9, 1 }
 0x244   : > { %12336 = vmatpush1.bf16.msra.mxu1 %v12335_v14  ;;  %v2104_v6 = vpop.f32.mrb[58].mxu0  ;;  %11569 = vmatprep.mubr.f32.mxu1 %v4030_v4  ;;  %v15982_v4 = vld [vmem:[%s13472_s10 + $0x2a0] sm:$0xff]  ;;  %v10363_v9 = vld [vmem:[%s19937_s1 + $0x6f0] sm:$0xff] }
 0x245   : > { %20126 = vst [vmem:[#allocation14_spill] sm:$0xff] %v15953_v50  ;;  %v15968_v12 = vadd.f32 %v20127_v8, %v2104_v6  ;;  %4300 = vmatmul.mubr.f32.gmra.mrb[164].mxu0 %v15849_v28  ;;  %12337 = vmatprep.subr.bf16.mxu1 %v20009_v19  ;;  %v2106_v14 = vpop.f32.mrb[59].mxu0  ;;  %v3904_v6 = vrot.slane %v15909_v25, 1  ;;  %v10358_v25 = vld [vmem:[%s19937_s1 + $0x6c8] sm:$0xff]  ;;  %v3907_v50 = vrot.slane %v15915_v60, 1  ;;  %v10359_v60 = vld [vmem:[%s19937_s1 + $0x6d0] sm:$0xff] }
 0x246   : > { %v2514_v11 = vpop.f32.mrb[74].mxu1  ;;  %4304 = vmatprep.mubr.f32.mxu0 %v3899_v7  ;;  %v4039_v7 = vsel %vm1281_vm0, %v4037_v51, %v4038_v57  ;;  %v12341_v14 = vpack.c.bf16 %v10356_v32, %v10355_v44  ;;  %v4042_v57 = vsel %vm1281_vm0, %v4040_v53, %v4041_v34  ;;  %v4046_v44 = vrot.slane %v15982_v4, 2 }
 0x247   : > { %v15988_v28 = vadd.f32 %v2514_v11, %v15726_v38  ;;  %v2516_v20 = vpop.f32.mrb[75].mxu1  ;;  %11570 = vmatmul.mubr.f32.gmra.mrb[180].mxu1 %v4033_v5  ;;  %v4043_v38 = vrot.slane %v15976_v18, 2  ;;  %v4044_v5 = vrot.slane %v15979_v33, 2  ;;  %v4047_v32 = vrot.slane %v15985_v40, 2  ;;  %v16014_v11 = vld [vmem:[%s13472_s10 + $0x2b8] sm:$0x3] }
 0x248   : > { %12339 = vmatpush1.bf16.msra.mxu1 %v12338_v22  ;;  %v2109_v8 = vpop.f32.mrb[60].mxu0  ;;  %11572 = vmatprep.mubr.f32.mxu1 %v4036_v24  ;;  %v16011_v24 = vld [vmem:[%s13472_s10 + $0x2b0] sm:$0xff]  ;;  %v3905_v53 = vsel %vm1152_vm1, %v3903_v30, %v3904_v6  ;;  %v3906_v34 = vrot.slane %v15912_v52, 1  ;;  %v4050_v30 = vrot.slane %v16014_v11, 2  ;;  %v10360_v6 = vld [vmem:[%s19937_s1 + $0x6d8] sm:$0xff] }
 0x249   : > { %20128 = vst [vmem:[#allocation9_spill] sm:$0xff] %v15988_v28  ;;  %v16003_v22 = vadd.f32 %v20129_v54, %v2109_v8  ;;  %4305 = vmatmul.mubr.f32.gmra.mrb[166].mxu0 %v15872_v2  ;;  %12340 = vmatprep.subr.bf16.mxu1 %v20009_v19  ;;  %v2111_v51 = vpop.f32.mrb[61].mxu0  ;;  %v16017_v8 = vld [vmem:[%s13472_s10 + $0x2c0] sm:$0xff]  ;;  %v16020_v2 = vld [vmem:[%s13472_s10 + $0x2c8] sm:$0x3]  ;;  %v16029_v28 = vld [vmem:[%s13472_s10 + $0x2d0] sm:$0xff] }
 0x24a   : > { %v2519_v20 = vpop.f32.mrb[76].mxu1  ;;  %4309 = vmatprep.mubr.f32.mxu0 %v3902_v29 }
 0x24b   : > { %v16023_v54 = vadd.f32 %v2519_v20, %v15753_v41  ;;  %v2521_v51 = vpop.f32.mrb[77].mxu1  ;;  %11573 = vmatmul.mubr.f32.gmra.mrb[182].mxu1 %v4039_v7  ;;  %v4045_v41 = vsel %vm1281_vm0, %v4043_v38, %v4044_v5  ;;  %v12344_v20 = vpack.c.bf16 %v10358_v25, %v10357_v1  ;;  %v4049_v7 = vrot.slane %v16011_v24, 2 }
 0x24c   : > { %12342 = vmatpush1.bf16.msra.mxu1 %v12341_v14  ;;  %v2114_v29 = vpop.f32.mrb[62].mxu0  ;;  %11575 = vmatprep.mubr.f32.mxu1 %v4042_v57  ;;  %v20131_v14 = vld [vmem:[#allocation29_spill] sm:$0xff]  ;;  %v4048_v5 = vsel %vm1281_vm0, %v4046_v44, %v4047_v32  ;;  %v4052_v1 = vrot.slane %v16017_v8, 2  ;;  %v4053_v25 = vrot.slane %v16020_v2, 2  ;;  %v16052_v57 = vld [vmem:[%s13472_s10 + $0x2e0] sm:$0xff]  ;;  %v3908_v44 = vsel %vm1152_vm1, %v3906_v34, %v3907_v50 }
 0x24d   : > { %20130 = vst [vmem:[#allocation19_spill] sm:$0xff] %v16023_v54  ;;  %v16044_v51 = vadd.f32 %v20131_v14, %v2114_v29  ;;  %4310 = vmatmul.mubr.f32.gmra.mrb[168].mxu0 %v15878_v56  ;;  %12343 = vmatprep.subr.bf16.mxu1 %v20009_v19  ;;  %v2116_v38 = vpop.f32.mrb[63].mxu0  ;;  %v16055_v54 = vld [vmem:[%s13472_s10 + $0x2e8] sm:$0x3]  ;;  %v4055_v29 = vrot.slane %v16029_v28, 2  ;;  %v4056_v14 = vrot.slane %v16032_v17, 2  ;;  %v12347_v50 = vpack.c.bf16 %v10360_v6, %v10359_v60 }
 0x24e   : > { %v2524_v21 = vpop.f32.mrb[78].mxu1  ;;  %4314 = vmatprep.mubr.f32.mxu0 %v3905_v53  ;;  %v10361_v32 = vld [vmem:[%s19937_s1 + $0x6e0] sm:$0xff]  ;;  %v10362_v53 = vld [vmem:[%s19937_s1 + $0x6e8] sm:$0xff]  ;;  %v4058_v34 = vrot.slane %v16052_v57, 2  ;;  %v4054_v47 = vsel %vm1281_vm0, %v4052_v1, %v4053_v25  ;;  %v3911_v1 = vsel %vm1152_vm1, %v3909_v15, %v3910_v45  ;;  %v3912_v25 = vrot.slane %v15947_v55, 1 }
 0x24f   : > { %20132 = vst [vmem:[#allocation12_spill] sm:$0xff] %v16044_v51  ;;  %v16060_v56 = vadd.f32 %v2524_v21, %v15779_v43  ;;  %v2526_v38 = vpop.f32.mrb[79].mxu1  ;;  %11576 = vmatmul.mubr.f32.gmra.mrb[184].mxu1 %v4045_v41  ;;  %v4051_v21 = vsel %vm1281_vm0, %v4049_v7, %v4050_v30  ;;  %v4059_v41 = vrot.slane %v16055_v54, 2  ;;  %v16087_v7 = vld [vmem:[%s13472_s10 + $0xb0] sm:$0xff]  ;;  %v16090_v30 = vld [vmem:[%s13472_s10 + $0xb8] sm:$0x3] }
 0x250   : > { %12345 = vmatpush1.bf16.msra.mxu1 %v12344_v20  ;;  %v11381_v43 = vpop.f32.mrb[64].mxu0  ;;  %11578 = vmatprep.mubr.f32.mxu1 %v4048_v5  ;;  %v16075_v38 = vld [vmem:[%s13472_s10 + $0x2f0] sm:$0xff]  ;;  %v16084_v20 = vld [vmem:[%s13472_s10 + $0x2f8] sm:$0x3]  ;;  %v20135_v6 = vld [vmem:[#allocation32_spill] sm:$0xff] }
 0x251   : > { %20133 = vst [vmem:[#allocation18_spill] sm:$0xff] %v16060_v56  ;;  %v16078_v56 = vadd.f32 %v11381_v43, %v15446_v31  ;;  %v2634_v51 = vpop.f32.mrb[65].mxu0  ;;  %4315 = vmatmul.mubr.f32.gmra.mrb[170].mxu0 %v15906_v42  ;;  %12346 = vmatprep.subr.bf16.mxu1 %v20009_v19  ;;  %v4057_v31 = vsel %vm1281_vm0, %v4055_v29, %v4056_v14  ;;  %v4062_v29 = vrot.slane %v16084_v20, 2  ;;  %v4758_v14 = vrot.slane %v16090_v30, 1 }
 0x252   : > { %v2529_v60 = vpop.f32.mrb[80].mxu1  ;;  %v16093_v5 = vadd.f32 %v2634_v51, %v20135_v6  ;;  %4319 = vmatprep.mubr.f32.mxu0 %v3908_v44  ;;  %v12350_v43 = vpack.c.bf16 %v10362_v53, %v10361_v32  ;;  %v4061_v51 = vrot.slane %v16075_v38, 2  ;;  %v4060_v45 = vsel %vm1281_vm0, %v4058_v34, %v4059_v41  ;;  %v10364_v44 = vld [vmem:[%s19937_s1 + $0x6f8] sm:$0xff]  ;;  %v16119_v32 = vld [vmem:[%s13472_s10 + $0xc0] sm:$0xff] }
 0x253   : > { %20134 = vst [vmem:[#allocation13_spill] sm:$0xff] %v16078_v56  ;;  %v16097_v42 = vadd.f32 %v2529_v60, %v15808_v37  ;;  %v2531_v56 = vpop.f32.mrb[81].mxu1  ;;  %11579 = vmatmul.mubr.f32.gmra.mrb[186].mxu1 %v4051_v21  ;;  %v4757_v37 = vrot.slane %v16087_v7, 1  ;;  %v16131_v21 = vld [vmem:[%s13472_s10 + $0xc8] sm:$0x3]  ;;  %v3914_v41 = vsel %vm1152_vm1, %v3912_v25, %v3913_v46  ;;  %v4760_v25 = vrot.slane %v16119_v32, 1 }
 0x254   : > { %12348 = vmatpush1.bf16.msra.mxu1 %v12347_v50  ;;  %v11384_v23 = vpop.f32.mrb[66].mxu0  ;;  %11581 = vmatprep.mubr.f32.mxu1 %v4054_v47  ;;  %v3916_v47 = vrot.slane %v15979_v33, 1  ;;  %v4063_v6 = vsel %vm1281_vm0, %v4061_v51, %v4062_v29  ;;  %v4761_v33 = vrot.slane %v16131_v21, 1 }
 0x255   : > { %v16107_v56 = vadd.f32 %v11384_v23, %v15490_v26  ;;  %v2644_v15 = vpop.f32.mrb[67].mxu0  ;;  %4320 = vmatmul.mubr.f32.gmra.mrb[172].mxu0 %v15912_v52  ;;  %12349 = vmatprep.subr.bf16.mxu1 %v20009_v19  ;;  %v10477_v23 = vld [vmem:[%s19937_s1 + $0x880] sm:$0xff]  ;;  %v10478_v52 = vld [vmem:[%s19937_s1 + $0x888] sm:$0xff] }
 0x256   : > { %v2534_v53 = vpop.f32.mrb[82].mxu1  ;;  %v16122_v26 = vadd.f32 %v2644_v15, %v15468_v35  ;;  %4324 = vmatprep.mubr.f32.mxu0 %v3911_v1  ;;  %v3915_v35 = vrot.slane %v15976_v18, 1  ;;  %v12353_v1 = vpack.c.bf16 %v10364_v44, %v10363_v9  ;;  %v4759_v15 = vsel %vm1152_vm1, %v4757_v37, %v4758_v14 }
 0x257   : > { %v16134_v50 = vadd.f32 %v2534_v53, %v15838_v63  ;;  %v2536_v34 = vpop.f32.mrb[83].mxu1  ;;  %11582 = vmatmul.mubr.f32.gmra.mrb[188].mxu1 %v4057_v31  ;;  %v12435_v46 = vpack.c.bf16 %v10478_v52, %v10477_v23  ;;  %v3919_v44 = vrot.slane %v15985_v40, 1 }
 0x258   : > { %12351 = vmatpush1.bf16.msra.mxu1 %v12350_v43  ;;  %v11387_v60 = vpop.f32.mrb[68].mxu0  ;;  %11584 = vmatprep.mubr.f32.mxu1 %v4060_v45  ;;  %v16149_v43 = vld [vmem:[%s13472_s10 + $0xd0] sm:$0xff]  ;;  %v16152_v45 = vld [vmem:[%s13472_s10 + $0xd8] sm:$0x3]  ;;  %v3917_v9 = vsel %vm1152_vm1, %v3915_v35, %v3916_v47  ;;  %v16177_v35 = vld [vmem:[%s13472_s10 + $0xe0] sm:$0xff] }
 0x259   : > { %v16142_v63 = vadd.f32 %v11387_v60, %v15538_v59  ;;  %v2654_v31 = vpop.f32.mrb[69].mxu0  ;;  %4325 = vmatmul.mubr.f32.gmra.mrb[174].mxu0 %v15941_v49  ;;  %12352 = vmatprep.subr.bf16.mxu1 %v20009_v19  ;;  %v10479_v59 = vld [vmem:[%s19937_s1 + $0x890] sm:$0xff]  ;;  %v10480_v49 = vld [vmem:[%s19937_s1 + $0x898] sm:$0xff]  ;;  %v4763_v23 = vrot.slane %v16149_v43, 1  ;;  %v4764_v52 = vrot.slane %v16152_v45, 1 }
 0x25a   : > { %v2539_v51 = vpop.f32.mrb[84].mxu1  ;;  %v16155_v29 = vadd.f32 %v2654_v31, %v15514_v61  ;;  %4329 = vmatprep.mubr.f32.mxu0 %v3914_v41  ;;  %v3918_v61 = vrot.slane %v15982_v4, 1  ;;  %v4762_v41 = vsel %vm1152_vm1, %v4760_v25, %v4761_v33  ;;  %v12439_v40 = vpack.c.bf16 %v10480_v49, %v10479_v59 }
 0x25b   : > { %v16164_v37 = vadd.f32 %v2539_v51, %v15866_v62  ;;  %v2541_v14 = vpop.f32.mrb[85].mxu1  ;;  %11585 = vmatmul.mubr.f32.gmra.mrb[190].mxu1 %v4063_v6  ;;  %v16183_v6 = vld [vmem:[%s13472_s10 + $0xe8] sm:$0x3]  ;;  %v3921_v31 = vrot.slane %v16011_v24, 1  ;;  %v3922_v25 = vrot.slane %v16014_v11, 1  ;;  %v4765_v51 = vsel %vm1152_vm1, %v4763_v23, %v4764_v52 }
 0x25c   : > { %12354 = vmatpush1.bf16.msra.mxu1 %v12353_v1  ;;  %v11390_v53 = vpop.f32.mrb[70].mxu0  ;;  %5126 = vmatprep.mubr.f32.mxu1 %v4759_v15  ;;  %v4766_v49 = vrot.slane %v16177_v35, 1  ;;  %v4767_v14 = vrot.slane %v16183_v6, 1 }
 0x25d   : > { %v16172_v62 = vadd.f32 %v11390_v53, %v15587_v58  ;;  %v2664_v34 = vpop.f32.mrb[71].mxu0  ;;  %4330 = vmatmul.mubr.f32.gmra.mrb[176].mxu0 %v15947_v55  ;;  %12436 = vmatprep.subr.bf16.mxu1 %v12435_v46  ;;  %v10481_v58 = vld [vmem:[%s19937_s1 + $0x8a0] sm:$0xff]  ;;  %v10482_v55 = vld [vmem:[%s19937_s1 + $0x8a8] sm:$0xff]  ;;  %v3923_v52 = vsel %vm1152_vm1, %v3921_v31, %v3922_v25 }
 0x25e   : > { %v2544_v47 = vpop.f32.mrb[86].mxu1  ;;  %v16180_v60 = vadd.f32 %v2664_v34, %v15562_v36  ;;  %4334 = vmatprep.mubr.f32.mxu0 %v3917_v9  ;;  %v3920_v36 = vsel %vm1152_vm1, %v3918_v61, %v3919_v44  ;;  %v16206_v9 = vld [vmem:[%s13472_s10 + $0xf0] sm:$0xff]  ;;  %v16209_v61 = vld [vmem:[%s13472_s10 + $0xf8] sm:$0x3]  ;;  %v12443_v11 = vpack.c.bf16 %v10482_v55, %v10481_v58  ;;  %v3925_v34 = vrot.slane %v16020_v2, 1 }
 0x25f   : > { %v16192_v1 = vadd.f32 %v2544_v47, %v15898_v39  ;;  %v2546_v15 = vpop.f32.mrb[87].mxu1  ;;  %5127 = vmatmul.mubr.f32.vlgmr.msra.gmra.mrb[192].mxu1 %v16087_v7  ;;  %v4769_v47 = vrot.slane %v16206_v9, 1  ;;  %v4770_v58 = vrot.slane %v16209_v61, 1 }
 0x260   : > { %12438 = vmatpush3.bf16.msra.mxu1 %v12435_v46  ;;  %v11393_v33 = vpop.f32.mrb[72].mxu0  ;;  %5131 = vmatprep.mubr.f32.mxu1 %v4762_v41  ;;  %v4768_v15 = vsel %vm1152_vm1, %v4766_v49, %v4767_v14  ;;  %v3928_v49 = vrot.slane %v16032_v17, 1 }
 0x261   : > { %v16200_v59 = vadd.f32 %v11393_v33, %v15635_v13  ;;  %v2674_v39 = vpop.f32.mrb[73].mxu0  ;;  %4335 = vmatmul.mubr.f32.gmra.mrb[178].mxu0 %v15976_v18  ;;  %12440 = vmatprep.subr.bf16.mxu1 %v12439_v40  ;;  %v10483_v13 = vld [vmem:[%s19937_s1 + $0x8b0] sm:$0xff]  ;;  %v10484_v18 = vld [vmem:[%s19937_s1 + $0x8b8] sm:$0xff]  ;;  %v16241_v33 = vld [vmem:[%s13472_s10 + $0x108] sm:$0x3] }
 0x262   : > { %v2549_v46 = vpop.f32.mrb[88].mxu1  ;;  %v16212_v44 = vadd.f32 %v2674_v39, %v15616_v0  ;;  %4339 = vmatprep.mubr.f32.mxu0 %v3920_v36  ;;  %v3924_v0 = vrot.slane %v16017_v8, 1  ;;  %v16235_v36 = vld [vmem:[%s13472_s10 + $0x100] sm:$0xff]  ;;  %v12447_v2 = vpack.c.bf16 %v10484_v18, %v10483_v13  ;;  %v3927_v39 = vrot.slane %v16029_v28, 1 }
 0x263   : > { %v16221_v53 = vadd.f32 %v2549_v46, %v15933_v48  ;;  %v2551_v23 = vpop.f32.mrb[89].mxu1  ;;  %5132 = vmatmul.mubr.f32.gmra.mrb[194].mxu1 %v16119_v32  ;;  %v4771_v46 = vsel %vm1152_vm1, %v4769_v47, %v4770_v58  ;;  %v4772_v18 = vrot.slane %v16235_v36, 1 }
 0x264   : > { %v11396_v41 = vpop.f32.mrb[74].mxu0  ;;  %5136 = vmatprep.mubr.f32.mxu1 %v4765_v51  ;;  %12442 = vmatpush3.bf16.msra.mxu1 %v12439_v40  ;;  %v4773_v23 = vrot.slane %v16241_v33, 1  ;;  %v3929_v58 = vsel %vm1152_vm1, %v3927_v39, %v3928_v49  ;;  %v16293_v39 = vld [vmem:[%s13472_s10 + $0x120] sm:$0xff] }
 0x265   : > { %v16230_v48 = vadd.f32 %v11396_v41, %v15686_v3  ;;  %v2684_v55 = vpop.f32.mrb[75].mxu0  ;;  %4340 = vmatmul.mubr.f32.gmra.mrb[180].mxu0 %v15982_v4  ;;  %12444 = vmatprep.subr.bf16.mxu1 %v12443_v11  ;;  %v10485_v3 = vld [vmem:[%s19937_s1 + $0x8c0] sm:$0xff]  ;;  %v10486_v4 = vld [vmem:[%s19937_s1 + $0x8c8] sm:$0xff] }
 0x266   : > { %v2554_v31 = vpop.f32.mrb[90].mxu1  ;;  %v16238_v25 = vadd.f32 %v2684_v55, %v15660_v27  ;;  %4344 = vmatprep.mubr.f32.mxu0 %v3923_v52  ;;  %v3926_v27 = vsel %vm1152_vm1, %v3924_v0, %v3925_v34  ;;  %v16264_v52 = vld [vmem:[%s13472_s10 + $0x110] sm:$0xff]  ;;  %v16267_v0 = vld [vmem:[%s13472_s10 + $0x118] sm:$0x3]  ;;  %v12451_v17 = vpack.c.bf16 %v10486_v4, %v10485_v3  ;;  %v3931_v55 = vrot.slane %v16055_v54, 1  ;;  %v20136_v4 = vld [vmem:[#allocation11_spill] sm:$0xff] }
 0x267   : > { %v16250_v40 = vadd.f32 %v2554_v31, %v15968_v12  ;;  %v2556_v51 = vpop.f32.mrb[91].mxu1  ;;  %5137 = vmatmul.mubr.f32.gmra.mrb[196].mxu1 %v16149_v43  ;;  %v4775_v31 = vrot.slane %v16264_v52, 1  ;;  %v4776_v3 = vrot.slane %v16267_v0, 1 }
 0x268   : > { %v11399_v14 = vpop.f32.mrb[76].mxu0  ;;  %5141 = vmatprep.mubr.f32.mxu1 %v4768_v15  ;;  %12446 = vmatpush3.bf16.msra.mxu1 %v12443_v11 }
 0x269   : > { %v16258_v13 = vadd.f32 %v11399_v14, %v15740_v16  ;;  %v2694_v12 = vpop.f32.mrb[77].mxu0  ;;  %4345 = vmatmul.mubr.f32.gmra.mrb[182].mxu0 %v16011_v24  ;;  %12448 = vmatprep.subr.bf16.mxu1 %v12447_v2  ;;  %v10487_v16 = vld [vmem:[%s19937_s1 + $0x8d0] sm:$0xff]  ;;  %v10488_v24 = vld [vmem:[%s19937_s1 + $0x8d8] sm:$0xff]  ;;  %v20138_v14 = vld [vmem:[#allocation7_spill] sm:$0xff] }
 0x26a   : > { %v2559_v34 = vpop.f32.mrb[92].mxu1  ;;  %v16270_v41 = vadd.f32 %v2694_v12, %v15713_v10  ;;  %4349 = vmatprep.mubr.f32.mxu0 %v3926_v27  ;;  %v3930_v10 = vrot.slane %v16052_v57, 1  ;;  %v4774_v27 = vsel %vm1152_vm1, %v4772_v18, %v4773_v23  ;;  %v12455_v54 = vpack.c.bf16 %v10488_v24, %v10487_v16  ;;  %v16299_v12 = vld [vmem:[%s13472_s10 + $0x128] sm:$0x3] }
 0x26b   : > { %v16279_v11 = vadd.f32 %v2559_v34, %v16003_v22  ;;  %v2561_v47 = vpop.f32.mrb[93].mxu1  ;;  %5142 = vmatmul.mubr.f32.gmra.mrb[198].mxu1 %v16177_v35  ;;  %v20139_v18 = vld [vmem:[#allocation12_spill] sm:$0xff]  ;;  %v3933_v24 = vrot.slane %v16075_v38, 1 }
 0x26c   : > { %v11402_v15 = vpop.f32.mrb[78].mxu0  ;;  %5146 = vmatprep.mubr.f32.mxu1 %v4771_v46  ;;  %12450 = vmatpush3.bf16.msra.mxu1 %v12447_v2  ;;  %v10489_v2 = vld [vmem:[%s19937_s1 + $0x8e0] sm:$0xff]  ;;  %v3932_v16 = vsel %vm1152_vm1, %v3930_v10, %v3931_v55  ;;  %v3934_v47 = vrot.slane %v16084_v20, 1  ;;  %v16322_v10 = vld [vmem:[%s13472_s10 + $0x150] sm:$0xff]  ;;  %v16325_v55 = vld [vmem:[%s13472_s10 + $0x158] sm:$0x3] }
 0x26d   : > { %v16288_v22 = vadd.f32 %v11402_v15, %v20136_v4  ;;  %v2704_v51 = vpop.f32.mrb[79].mxu0  ;;  %4350 = vmatmul.mubr.f32.gmra.mrb[184].mxu0 %v16017_v8  ;;  %12452 = vmatprep.subr.bf16.mxu1 %v12451_v17  ;;  %v10490_v8 = vld [vmem:[%s19937_s1 + $0x8e8] sm:$0xff]  ;;  %v4777_v15 = vsel %vm1152_vm1, %v4775_v31, %v4776_v3  ;;  %v20140_v4 = vld [vmem:[#allocation10_spill] sm:$0xff] }
 0x26e   : > { %v2564_v49 = vpop.f32.mrb[94].mxu1  ;;  %v16296_v46 = vadd.f32 %v2704_v51, %v20138_v14  ;;  %4354 = vmatprep.mubr.f32.mxu0 %v3929_v58  ;;  %v4778_v14 = vrot.slane %v16293_v39, 1  ;;  %v12459_v20 = vpack.c.bf16 %v10490_v8, %v10489_v2  ;;  %v10492_v31 = vld [vmem:[%s19937_s1 + $0x8f8] sm:$0xff]  ;;  %v4885_v2 = vrot.slane %v16087_v7, 2 }
 0x26f   : > { %20137 = vst [vmem:[#allocation22_spill] sm:$0xff] %v16288_v22  ;;  %v16308_v23 = vadd.f32 %v2564_v49, %v20139_v18  ;;  %v2566_v34 = vpop.f32.mrb[95].mxu1  ;;  %5147 = vmatmul.mubr.f32.gmra.mrb[200].mxu1 %v16206_v9  ;;  %v4779_v18 = vrot.slane %v16299_v12, 1  ;;  %v4886_v8 = vrot.slane %v16090_v30, 2  ;;  %v4888_v30 = vrot.slane %v16119_v32, 2  ;;  %v16357_v22 = vld [vmem:[%s13472_s10 + $0x160] sm:$0xff] }
 0x270   : > { %v11405_v58 = vpop.f32.mrb[80].mxu0  ;;  %5151 = vmatprep.mubr.f32.mxu1 %v4774_v27  ;;  %12454 = vmatpush3.bf16.msra.mxu1 %v12451_v17  ;;  %v20142_v27 = vld [vmem:[#allocation8_spill] sm:$0xff]  ;;  %v10445_v32 = vld [vmem:[%s19937_s1 + $0x780] sm:$0xff] }
 0x271   : > { %v16316_v51 = vadd.f32 %v11405_v58, %v20140_v4  ;;  %v2714_v49 = vpop.f32.mrb[81].mxu0  ;;  %4355 = vmatmul.mubr.f32.gmra.mrb[186].mxu0 %v16029_v28  ;;  %12456 = vmatprep.subr.bf16.mxu1 %v12455_v54  ;;  %v10491_v28 = vld [vmem:[%s19937_s1 + $0x8f0] sm:$0xff]  ;;  %v3935_v58 = vsel %vm1152_vm1, %v3933_v24, %v3934_v47  ;;  %v4889_v4 = vrot.slane %v16131_v21, 2  ;;  %v4780_v7 = vsel %vm1152_vm1, %v4778_v14, %v4779_v18  ;;  %v20145_v24 = vld [vmem:[#allocation31_spill] sm:$0xff]  ;;  %v10446_v14 = vld [vmem:[%s19937_s1 + $0x788] sm:$0xff] }
 0x272   : > { %v16328_v34 = vadd.f32 %v2714_v49, %v20142_v27  ;;  %v16330_v17 = vpop.f32.mrb[96].mxu1  ;;  %4359 = vmatprep.mubr.f32.mxu0 %v3932_v16  ;;  %v4781_v49 = vrot.slane %v16322_v10, 1  ;;  %v4782_v27 = vrot.slane %v16325_v55, 1  ;;  %v12463_v21 = vpack.c.bf16 %v10492_v31, %v10491_v28 }
 0x273   : > { %20141 = vst [vmem:[#allocation16_spill] sm:$0xff] %v16316_v51  ;;  %v3296_v3 = vpop.f32.mrb[97].mxu1  ;;  %5152 = vmatmul.mubr.f32.gmra.mrb[202].mxu1 %v16235_v36  ;;  %v4891_v18 = vrot.slane %v16149_v43, 2  ;;  %v16381_v43 = vld [vmem:[%s13472_s10 + $0x170] sm:$0xff] }
 0x274   : > { %20143 = vst [vmem:[#allocation21_spill] sm:$0xff] %v16328_v34  ;;  %v11408_v16 = vpop.f32.mrb[82].mxu0  ;;  %5156 = vmatprep.mubr.f32.mxu1 %v4777_v15  ;;  %12458 = vmatpush3.bf16.msra.mxu1 %v12455_v54  ;;  %v20144_v3 = vld [vmem:[#allocation15_spill] sm:$0xff]  ;;  %v16360_v54 = vld [vmem:[%s13472_s10 + $0x168] sm:$0x3]  ;;  %v4783_v31 = vsel %vm1152_vm1, %v4781_v49, %v4782_v27  ;;  %v12388_v27 = vpack.c.bf16 %v10446_v14, %v10445_v32  ;;  %v4898_v32 = vrot.slane %v16209_v61, 2 }
 0x275   : > { %v16346_v51 = vadd.f32 %v11408_v16, %v20144_v3  ;;  %v2724_v34 = vpop.f32.mrb[83].mxu0  ;;  %4360 = vmatmul.mubr.f32.gmra.mrb[188].mxu0 %v16052_v57  ;;  %12460 = vmatprep.subr.bf16.mxu1 %v12459_v20  ;;  %v4887_v57 = vsel %vm1281_vm0, %v4885_v2, %v4886_v8  ;;  %v4890_v3 = vsel %vm1281_vm0, %v4888_v30, %v4889_v4  ;;  %v4895_v4 = vrot.slane %v16183_v6, 2  ;;  %v10449_v61 = vld [vmem:[%s19937_s1 + $0x7a0] sm:$0xff] }
 0x276   : > { %v16352_v47 = vadd.f32 %v2724_v34, %v20145_v24  ;;  %v16354_v15 = vpop.f32.mrb[98].mxu1  ;;  %4364 = vmatprep.mubr.f32.mxu0 %v3935_v58  ;;  %v4892_v34 = vrot.slane %v16152_v45, 2  ;;  %v20146_v58 = vld [vmem:[#allocation9_spill] sm:$0xff]  ;;  %v4784_v24 = vrot.slane %v16357_v22, 1  ;;  %v16384_v45 = vld [vmem:[%s13472_s10 + $0x178] sm:$0x3] }
 0x277   : > { %v3301_v16 = vpop.f32.mrb[99].mxu1  ;;  %5157 = vmatmul.mubr.f32.gmra.mrb[204].mxu1 %v16264_v52  ;;  %v4787_v6 = vrot.slane %v16381_v43, 1  ;;  %v4788_v14 = vrot.slane %v16384_v45, 1 }
 0x278   : > { %v11411_v28 = vpop.f32.mrb[84].mxu0  ;;  %5161 = vmatprep.mubr.f32.mxu1 %v4780_v7  ;;  %12462 = vmatpush3.bf16.msra.mxu1 %v12459_v20  ;;  %v4785_v16 = vrot.slane %v16360_v54, 1  ;;  %v20148_v7 = vld [vmem:[#allocation14_spill] sm:$0xff] }
 0x279   : > { %v16374_v2 = vadd.f32 %v11411_v28, %v20146_v58  ;;  %v2734_v8 = vpop.f32.mrb[85].mxu0  ;;  %4365 = vmatmul.mubr.f32.gmra.mrb[190].mxu0 %v16075_v38  ;;  %12464 = vmatprep.subr.bf16.mxu1 %v12463_v21  ;;  %v4894_v38 = vrot.slane %v16177_v35, 2  ;;  %v4893_v28 = vsel %vm1281_vm0, %v4891_v18, %v4892_v34  ;;  %v10447_v58 = vld [vmem:[%s19937_s1 + $0x790] sm:$0xff]  ;;  %v20149_v18 = vld [vmem:[#allocation18_spill] sm:$0xff] }
 0x27a   : > { %v16387_v49 = vadd.f32 %v2734_v8, %v20148_v7  ;;  %v16389_v20 = vpop.f32.mrb[100].mxu1  ;;  %11619 = vmatprep.mubr.f32.mxu0 %v4887_v57  ;;  %v10448_v8 = vld [vmem:[%s19937_s1 + $0x798] sm:$0xff]  ;;  %v4897_v57 = vrot.slane %v16206_v9, 2  ;;  %v4900_v9 = vrot.slane %v16235_v36, 2  ;;  %v10450_v36 = vld [vmem:[%s19937_s1 + $0x7a8] sm:$0xff] }
 0x27b   : > { %20147 = vst [vmem:[#allocation17_spill] sm:$0xff] %v16374_v2  ;;  %v3306_v30 = vpop.f32.mrb[101].mxu1  ;;  %5162 = vmatmul.mubr.f32.gmra.mrb[206].mxu1 %v16293_v39 }
 0x27c   : > { %v11414_v35 = vpop.f32.mrb[86].mxu0  ;;  %5166 = vmatprep.mubr.f32.mxu1 %v4783_v31  ;;  %12466 = vmatpush3.bf16.msra.mxu1 %v12463_v21  ;;  %v4786_v30 = vsel %vm1152_vm1, %v4784_v24, %v4785_v16  ;;  %v20151_v31 = vld [vmem:[#allocation19_spill] sm:$0xff]  ;;  %v4901_v24 = vrot.slane %v16241_v33, 2  ;;  %v4904_v33 = vrot.slane %v16267_v0, 2 }
 0x27d   : > { %v16406_v34 = vadd.f32 %v11414_v35, %v20149_v18  ;;  %v2744_v7 = vpop.f32.mrb[87].mxu0  ;;  %11620 = vmatmul.mubr.f32.vlgmr.msra.gmra.mrb[192].mxu0 %v4890_v3  ;;  %12467 = vmatprep.subr.bf16.mxu1 %v20009_v19  ;;  %v4896_v35 = vsel %vm1281_vm0, %v4894_v38, %v4895_v4  ;;  %v12391_v3 = vpack.c.bf16 %v10448_v8, %v10447_v58  ;;  %v16425_v16 = vld [vmem:[%s13472_s10 + $0x180] sm:$0xff]  ;;  %v16428_v18 = vld [vmem:[%s13472_s10 + $0x188] sm:$0x3]  ;;  %v4903_v38 = vrot.slane %v16264_v52, 2 }
 0x27e   : > { %v16415_v2 = vadd.f32 %v2744_v7, %v20151_v31  ;;  %v16417_v21 = vpop.f32.mrb[102].mxu1  ;;  %12389 = vmatpush1.bf16.msra.mxu0 %v12388_v27  ;;  %11622 = vmatprep.mubr.f32.mxu0 %v4893_v28  ;;  %v4899_v27 = vsel %vm1281_vm0, %v4897_v57, %v4898_v32  ;;  %v4789_v28 = vsel %vm1152_vm1, %v4787_v6, %v4788_v14  ;;  %v16445_v57 = vld [vmem:[%s13472_s10 + $0x198] sm:$0x3]  ;;  %v4906_v32 = vrot.slane %v16293_v39, 2 }
 0x27f   : > { %20150 = vst [vmem:[#allocation24_spill] sm:$0xff] %v16406_v34  ;;  %v3311_v7 = vpop.f32.mrb[103].mxu1  ;;  %5167 = vmatmul.mubr.f32.gmra.mrb[208].mxu1 %v16322_v10  ;;  %12390 = vmatprep.subr.bf16.mxu0 %v20009_v19  ;;  %v12394_v31 = vpack.c.bf16 %v10450_v36, %v10449_v61  ;;  %v4791_v34 = vrot.slane %v16428_v18, 1  ;;  %v4907_v6 = vrot.slane %v16299_v12, 2  ;;  %v10452_v61 = vld [vmem:[%s19937_s1 + $0x7b8] sm:$0xff]  ;;  %v4910_v39 = vrot.slane %v16325_v55, 2 }
 0x280   : > { %20152 = vst [vmem:[#allocation20_spill] sm:$0xff] %v16415_v2  ;;  %v11417_v4 = vpop.f32.mrb[88].mxu0  ;;  %5171 = vmatprep.mubr.f32.mxu1 %v4786_v30  ;;  %v4790_v7 = vrot.slane %v16425_v16, 1  ;;  %v16442_v2 = vld [vmem:[%s13472_s10 + $0x190] sm:$0xff]  ;;  %v4905_v30 = vsel %vm1281_vm0, %v4903_v38, %v4904_v33  ;;  %v4912_v38 = vrot.slane %v16357_v22, 2 }
 0x281   : > { %v16437_v58 = vadd.f32 %v11417_v4, %v16134_v50  ;;  %v2754_v8 = vpop.f32.mrb[89].mxu0  ;;  %11623 = vmatmul.mubr.f32.gmra.mrb[194].mxu0 %v4896_v35  ;;  %v4902_v50 = vsel %vm1281_vm0, %v4900_v9, %v4901_v24  ;;  %v4909_v9 = vrot.slane %v16322_v10, 2  ;;  %v4793_v35 = vrot.slane %v16442_v2, 1  ;;  %v10453_v10 = vld [vmem:[%s19937_s1 + $0x7c0] sm:$0xff] }
 0x282   : > { %v16448_v52 = vadd.f32 %v2754_v8, %v16097_v42  ;;  %v16450_v0 = vpop.f32.mrb[104].mxu1  ;;  %12392 = vmatpush1.bf16.msra.mxu0 %v12391_v3  ;;  %11625 = vmatprep.mubr.f32.mxu0 %v4899_v27  ;;  %v10451_v42 = vld [vmem:[%s19937_s1 + $0x7b0] sm:$0xff]  ;;  %v4794_v3 = vrot.slane %v16445_v57, 1  ;;  %v4792_v27 = vsel %vm1152_vm1, %v4790_v7, %v4791_v34  ;;  %v16487_v34 = vld [vmem:[%s13472_s10 + $0x1a0] sm:$0xff]  ;;  %v16490_v8 = vld [vmem:[%s13472_s10 + $0x1a8] sm:$0x3] }
 0x283   : > { %v3316_v14 = vpop.f32.mrb[105].mxu1  ;;  %5172 = vmatmul.mubr.f32.gmra.mrb[210].mxu1 %v16357_v22  ;;  %12393 = vmatprep.subr.bf16.mxu0 %v20009_v19  ;;  %v12397_v4 = vpack.c.bf16 %v10452_v61, %v10451_v42  ;;  %v10454_v22 = vld [vmem:[%s19937_s1 + $0x7c8] sm:$0xff]  ;;  %v4915_v7 = vrot.slane %v16381_v43, 2  ;;  %v4796_v42 = vrot.slane %v16487_v34, 1  ;;  %v4797_v61 = vrot.slane %v16490_v8, 1 }
 0x284   : > { %v11420_v12 = vpop.f32.mrb[90].mxu0  ;;  %5176 = vmatprep.mubr.f32.mxu1 %v4789_v28  ;;  %v4913_v28 = vrot.slane %v16360_v54, 2  ;;  %v4916_v54 = vrot.slane %v16384_v45, 2 }
 0x285   : > { %v16469_v24 = vadd.f32 %v11420_v12, %v16192_v1  ;;  %v2764_v36 = vpop.f32.mrb[91].mxu0  ;;  %11626 = vmatmul.mubr.f32.gmra.mrb[196].mxu0 %v4902_v50  ;;  %v4908_v1 = vsel %vm1281_vm0, %v4906_v32, %v4907_v6  ;;  %v4795_v32 = vsel %vm1152_vm1, %v4793_v35, %v4794_v3  ;;  %v16504_v12 = vld [vmem:[%s13472_s10 + $0x1b0] sm:$0xff]  ;;  %v4919_v35 = vrot.slane %v16428_v18, 2 }
 0x286   : > { %v16477_v55 = vadd.f32 %v2764_v36, %v16164_v37  ;;  %v16479_v33 = vpop.f32.mrb[106].mxu1  ;;  %12395 = vmatpush1.bf16.msra.mxu0 %v12394_v31  ;;  %11628 = vmatprep.mubr.f32.mxu0 %v4905_v30  ;;  %v4911_v31 = vsel %vm1281_vm0, %v4909_v9, %v4910_v39  ;;  %v12400_v30 = vpack.c.bf16 %v10454_v22, %v10453_v10  ;;  %v16507_v9 = vld [vmem:[%s13472_s10 + $0x1b8] sm:$0x3]  ;;  %v4918_v39 = vrot.slane %v16425_v16, 2 }
 0x287   : > { %v3321_v37 = vpop.f32.mrb[107].mxu1  ;;  %5177 = vmatmul.mubr.f32.gmra.mrb[212].mxu1 %v16381_v43  ;;  %12396 = vmatprep.subr.bf16.mxu0 %v20009_v19  ;;  %v4917_v36 = vsel %vm1281_vm0, %v4915_v7, %v4916_v54  ;;  %v4922_v10 = vrot.slane %v16445_v57, 2  ;;  %v4798_v22 = vsel %vm1152_vm1, %v4796_v42, %v4797_v61  ;;  %v10457_v57 = vld [vmem:[%s19937_s1 + $0x7e0] sm:$0xff]  ;;  %v10300_v42 = vld [vmem:[%s13472_s10 + $0x1c8] sm:$0x3]  ;;  %v4927_v61 = vrot.slane %v16504_v12, 2 }
 0x288   : > { %v11423_v50 = vpop.f32.mrb[92].mxu0  ;;  %5181 = vmatprep.mubr.f32.mxu1 %v4792_v27  ;;  %v10456_v27 = vld [vmem:[%s19937_s1 + $0x7d8] sm:$0xff]  ;;  %v4924_v37 = vrot.slane %v16487_v34, 2 }
 0x289   : > { %v16499_v6 = vadd.f32 %v11423_v50, %v16250_v40  ;;  %v2774_v14 = vpop.f32.mrb[93].mxu0  ;;  %11629 = vmatmul.mubr.f32.gmra.mrb[198].mxu0 %v4908_v1  ;;  %v4914_v40 = vsel %vm1281_vm0, %v4912_v38, %v4913_v28  ;;  %v4921_v38 = vrot.slane %v16442_v2, 2  ;;  %v4800_v1 = vrot.slane %v16507_v9, 1 }
 0x28a   : > { %v16510_v43 = vadd.f32 %v2774_v14, %v16221_v53  ;;  %v16512_v45 = vpop.f32.mrb[108].mxu1  ;;  %12398 = vmatpush1.bf16.msra.mxu0 %v12397_v4  ;;  %11631 = vmatprep.mubr.f32.mxu0 %v4911_v31  ;;  %v10455_v53 = vld [vmem:[%s19937_s1 + $0x7d0] sm:$0xff]  ;;  %v4925_v50 = vrot.slane %v16490_v8, 2  ;;  %v16549_v14 = vld [vmem:[%s13472_s10 + $0x1c0] sm:$0xff] }
 0x28b   : > { %v3326_v3 = vpop.f32.mrb[109].mxu1  ;;  %5182 = vmatmul.mubr.f32.gmra.mrb[214].mxu1 %v16425_v16  ;;  %12399 = vmatprep.subr.bf16.mxu0 %v20009_v19  ;;  %v4799_v16 = vrot.slane %v16504_v12, 1  ;;  %v12403_v54 = vpack.c.bf16 %v10456_v27, %v10455_v53  ;;  %v4802_v27 = vrot.slane %v16549_v14, 1 }
 0x28c   : > { %v11426_v18 = vpop.f32.mrb[94].mxu0  ;;  %5186 = vmatprep.mubr.f32.mxu1 %v4795_v32  ;;  %v10458_v32 = vld [vmem:[%s19937_s1 + $0x7e8] sm:$0xff]  ;;  %v10302_v3 = vld [vmem:[%s13472_s10 + $0x1f8] sm:$0x3] }
 0x28d   : > { %v16531_v4 = vadd.f32 %v11426_v18, %v16308_v23  ;;  %v2784_v28 = vpop.f32.mrb[95].mxu0  ;;  %11632 = vmatmul.mubr.f32.gmra.mrb[200].mxu0 %v4914_v40  ;;  %v4920_v23 = vsel %vm1281_vm0, %v4918_v39, %v4919_v35  ;;  %v4928_v40 = vrot.slane %v16507_v9, 2  ;;  %v4801_v8 = vsel %vm1152_vm1, %v4799_v16, %v4800_v1  ;;  %v16559_v35 = vld [vmem:[%s13472_s10 + $0x1f0] sm:$0xff] }
 0x28e   : > { %v16539_v31 = vadd.f32 %v2784_v28, %v16279_v11  ;;  %v16541_v7 = vpop.f32.mrb[110].mxu1  ;;  %12401 = vmatpush1.bf16.msra.mxu0 %v12400_v30  ;;  %11634 = vmatprep.mubr.f32.mxu0 %v4917_v36  ;;  %v4923_v30 = vsel %vm1281_vm0, %v4921_v38, %v4922_v10  ;;  %v4803_v18 = vrot.slane %v10300_v42, 1  ;;  %v4926_v10 = vsel %vm1281_vm0, %v4924_v37, %v4925_v50  ;;  %v10460_v28 = vld [vmem:[%s19937_s1 + $0x7f8] sm:$0xff]  ;;  %v16583_v50 = vld [vmem:[%s13472_s10 + $0x200] sm:$0xff] }
 0x28f   : > { %v3331_v11 = vpop.f32.mrb[111].mxu1  ;;  %5187 = vmatmul.mubr.f32.gmra.mrb[216].mxu1 %v16442_v2  ;;  %12402 = vmatprep.subr.bf16.mxu0 %v20009_v19  ;;  %v12406_v2 = vpack.c.bf16 %v10458_v32, %v10457_v57  ;;  %v4930_v16 = vrot.slane %v16549_v14, 2  ;;  %v4931_v1 = vrot.slane %v10300_v42, 2  ;;  %v4929_v37 = vsel %vm1281_vm0, %v4927_v61, %v4928_v40  ;;  %v16586_v32 = vld [vmem:[%s13472_s10 + $0x208] sm:$0x3] }
 0x290   : > { %v11461_v39 = vpop.f32.mrb[96].mxu0  ;;  %5191 = vmatprep.mubr.f32.mxu1 %v4798_v22  ;;  %v20153_v22 = vld [vmem:[#allocation13_spill] sm:$0xff]  ;;  %v16596_v61 = vld [vmem:[%s13472_s10 + $0x218] sm:$0x3] }
 0x291   : > { %v3525_v36 = vadd.f32 %v11461_v39, %v16354_v15  ;;  %v3519_v53 = vpop.f32.mrb[97].mxu0  ;;  %11635 = vmatmul.mubr.f32.gmra.mrb[202].mxu0 %v4920_v23  ;;  %v10459_v15 = vld [vmem:[%s19937_s1 + $0x7f0] sm:$0xff]  ;;  %v4933_v23 = vrot.slane %v16559_v35, 2 }
 0x292   : > { %v16564_v38 = vpop.f32.mrb[112].mxu1  ;;  %v3520_v9 = vadd.f32 %v3519_v53, %v16330_v17  ;;  %12404 = vmatpush1.bf16.msra.mxu0 %v12403_v54  ;;  %11637 = vmatprep.mubr.f32.mxu0 %v4923_v30  ;;  %v4934_v54 = vrot.slane %v10302_v3, 2  ;;  %v4805_v30 = vrot.slane %v16559_v35, 1  ;;  %v16593_v39 = vld [vmem:[%s13472_s10 + $0x210] sm:$0xff]  ;;  %v4804_v53 = vsel %vm1152_vm1, %v4802_v27, %v4803_v18 }
 0x293   : > { %v16576_v17 = vadd.f32 %v3525_v36, %v20153_v22  ;;  %v3336_v57 = vpop.f32.mrb[113].mxu1  ;;  %5192 = vmatmul.mubr.f32.gmra.mrb[218].mxu1 %v16487_v34  ;;  %12405 = vmatprep.subr.bf16.mxu0 %v20009_v19  ;;  %v4806_v34 = vrot.slane %v10302_v3, 1  ;;  %v12409_v22 = vpack.c.bf16 %v10460_v28, %v10459_v15  ;;  %v4932_v3 = vsel %vm1281_vm0, %v4930_v16, %v4931_v1 }
 0x294   : > { %v16589_v42 = vadd.f32 %v3520_v9, %v16093_v5  ;;  %v11464_v11 = vpop.f32.mrb[98].mxu0  ;;  %5196 = vmatprep.mubr.f32.mxu1 %v4801_v8  ;;  %v4936_v9 = vrot.slane %v16583_v50, 2  ;;  %v4937_v57 = vrot.slane %v16586_v32, 2  ;;  %v4939_v16 = vrot.slane %v16593_v39, 2 }
 0x295   : > { %v3535_v40 = vadd.f32 %v11464_v11, %v16417_v21  ;;  %v3529_v36 = vpop.f32.mrb[99].mxu0  ;;  %11638 = vmatmul.mubr.f32.gmra.mrb[204].mxu0 %v4926_v10  ;;  %v16610_v21 = vld [vmem:[%s13472_s10 + $0x228] sm:$0x3]  ;;  %v4807_v15 = vsel %vm1152_vm1, %v4805_v30, %v4806_v34  ;;  %v4808_v28 = vrot.slane %v16583_v50, 1 }
 0x296   : > { %20154 = vst [vmem:[#allocation23_spill] sm:$0xff] %v16589_v42  ;;  %v16600_v5 = vpop.f32.mrb[114].mxu1  ;;  %v3530_v8 = vadd.f32 %v3529_v36, %v16389_v20  ;;  %12407 = vmatpush1.bf16.msra.mxu0 %v12406_v2  ;;  %11640 = vmatprep.mubr.f32.mxu0 %v4929_v37  ;;  %v16607_v42 = vld [vmem:[%s13472_s10 + $0x220] sm:$0xff]  ;;  %v4935_v20 = vsel %vm1281_vm0, %v4933_v23, %v4934_v54  ;;  %v10462_v10 = vld [vmem:[%s19937_s1 + $0x808] sm:$0xff]  ;;  %v16632_v37 = vld [vmem:[%s13472_s10 + $0x230] sm:$0xff] }
 0x297   : > { %v16613_v27 = vadd.f32 %v3535_v40, %v16107_v56  ;;  %v3341_v18 = vpop.f32.mrb[115].mxu1  ;;  %5197 = vmatmul.mubr.f32.gmra.mrb[220].mxu1 %v16504_v12  ;;  %12408 = vmatprep.subr.bf16.mxu0 %v20009_v19  ;;  %v10461_v2 = vld [vmem:[%s19937_s1 + $0x800] sm:$0xff]  ;;  %v4940_v56 = vrot.slane %v16596_v61, 2  ;;  %v16635_v23 = vld [vmem:[%s13472_s10 + $0x238] sm:$0x3]  ;;  %v4809_v40 = vrot.slane %v16586_v32, 1  ;;  %v4938_v34 = vsel %vm1281_vm0, %v4936_v9, %v4937_v57 }
 0x298   : > { %v16627_v1 = vadd.f32 %v3530_v8, %v16122_v26  ;;  %v11467_v12 = vpop.f32.mrb[100].mxu0  ;;  %5201 = vmatprep.mubr.f32.mxu1 %v4804_v53  ;;  %v4942_v36 = vrot.slane %v16607_v42, 2  ;;  %v4943_v26 = vrot.slane %v16610_v21, 2  ;;  %v12412_v8 = vpack.c.bf16 %v10462_v10, %v10461_v2  ;;  %v10464_v32 = vld [vmem:[%s19937_s1 + $0x818] sm:$0xff]  ;;  %v16660_v57 = vld [vmem:[%s13472_s10 + $0x240] sm:$0xff] }
 0x299   : > { %v3545_v54 = vadd.f32 %v11467_v12, %v16479_v33  ;;  %v3539_v11 = vpop.f32.mrb[101].mxu0  ;;  %11641 = vmatmul.mubr.f32.gmra.mrb[206].mxu0 %v4932_v3  ;;  %v10463_v33 = vld [vmem:[%s19937_s1 + $0x810] sm:$0xff]  ;;  %v4946_v9 = vrot.slane %v16635_v23, 2  ;;  %v4811_v10 = vrot.slane %v16593_v39, 1 }
 0x29a   : > { %v16641_v53 = vpop.f32.mrb[116].mxu1  ;;  %v3540_v30 = vadd.f32 %v3539_v11, %v16450_v0  ;;  %12410 = vmatpush1.bf16.msra.mxu0 %v12409_v22  ;;  %11643 = vmatprep.mubr.f32.mxu0 %v4935_v20  ;;  %v4941_v0 = vsel %vm1281_vm0, %v4939_v16, %v4940_v56  ;;  %v4945_v22 = vrot.slane %v16632_v37, 2  ;;  %v16663_v20 = vld [vmem:[%s13472_s10 + $0x248] sm:$0x3]  ;;  %v16671_v12 = vld [vmem:[%s13472_s10 + $0x250] sm:$0xff]  ;;  %v4810_v11 = vsel %vm1152_vm1, %v4808_v28, %v4809_v40 }
 0x29b   : > { %v16652_v3 = vadd.f32 %v3545_v54, %v16142_v63  ;;  %v3346_v18 = vpop.f32.mrb[117].mxu1  ;;  %5202 = vmatmul.mubr.f32.gmra.mrb[222].mxu1 %v16549_v14  ;;  %12411 = vmatprep.subr.bf16.mxu0 %v20009_v19  ;;  %v4812_v14 = vrot.slane %v16596_v61, 1  ;;  %v16674_v16 = vld [vmem:[%s13472_s10 + $0x258] sm:$0x3]  ;;  %v12415_v61 = vpack.c.bf16 %v10464_v32, %v10463_v33  ;;  %v10466_v28 = vld [vmem:[%s19937_s1 + $0x828] sm:$0xff] }
 0x29c   : > { %v16666_v2 = vadd.f32 %v3540_v30, %v16155_v29  ;;  %v11470_v63 = vpop.f32.mrb[102].mxu0  ;;  %5206 = vmatprep.mubr.f32.mxu1 %v4807_v15  ;;  %v4944_v18 = vsel %vm1281_vm0, %v4942_v36, %v4943_v26  ;;  %v4948_v30 = vrot.slane %v16660_v57, 2  ;;  %v4947_v36 = vsel %vm1281_vm0, %v4945_v22, %v4946_v9  ;;  %v16700_v33 = vld [vmem:[%s13472_s10 + $0x268] sm:$0x3] }
 0x29d   : > { %v3555_v56 = vadd.f32 %v11470_v63, %v16541_v7  ;;  %v3549_v54 = vpop.f32.mrb[103].mxu0  ;;  %11644 = vmatmul.mubr.f32.gmra.mrb[208].mxu0 %v4938_v34  ;;  %v10465_v7 = vld [vmem:[%s19937_s1 + $0x820] sm:$0xff]  ;;  %v4951_v26 = vrot.slane %v16671_v12, 2  ;;  %v4952_v34 = vrot.slane %v16674_v16, 2  ;;  %v16710_v63 = vld [vmem:[%s13472_s10 + $0x298] sm:$0x3] }
 0x29e   : > { %20155 = vst [vmem:[#allocation26_spill] sm:$0xff] %v16666_v2  ;;  %v3349_v29 = vpop.f32.mrb[118].mxu1  ;;  %v3550_v15 = vadd.f32 %v3549_v54, %v16512_v45  ;;  %12413 = vmatpush1.bf16.msra.mxu0 %v12412_v8  ;;  %11646 = vmatprep.mubr.f32.mxu0 %v4941_v0  ;;  %v4949_v2 = vrot.slane %v16663_v20, 2  ;;  %v16697_v8 = vld [vmem:[%s13472_s10 + $0x260] sm:$0xff]  ;;  %v4813_v0 = vsel %vm1152_vm1, %v4811_v10, %v4812_v14  ;;  %v4814_v54 = vrot.slane %v16607_v42, 1 }
 0x29f   : > { %v16689_v45 = vadd.f32 %v3555_v56, %v16172_v62  ;;  %v3351_v40 = vpop.f32.mrb[119].mxu1  ;;  %5207 = vmatmul.mubr.f32.gmra.mrb[224].mxu1 %v16559_v35  ;;  %12414 = vmatprep.subr.bf16.mxu0 %v20009_v19  ;;  %v16707_v35 = vld [vmem:[%s13472_s10 + $0x290] sm:$0xff]  ;;  %v12418_v56 = vpack.c.bf16 %v10466_v28, %v10465_v7  ;;  %v4954_v14 = vrot.slane %v16697_v8, 2  ;;  %v16737_v7 = vld [vmem:[%s13472_s10 + $0x2a8] sm:$0x3] }
 0x2a0   : > { %v16703_v32 = vadd.f32 %v3550_v15, %v16180_v60  ;;  %v11473_v62 = vpop.f32.mrb[104].mxu0  ;;  %5211 = vmatprep.mubr.f32.mxu1 %v4810_v11  ;;  %v4815_v40 = vrot.slane %v16610_v21, 1  ;;  %v4950_v10 = vsel %vm1281_vm0, %v4948_v30, %v4949_v2  ;;  %v10467_v11 = vld [vmem:[%s19937_s1 + $0x830] sm:$0xff]  ;;  %v10468_v21 = vld [vmem:[%s19937_s1 + $0x838] sm:$0xff]  ;;  %v4953_v2 = vsel %vm1281_vm0, %v4951_v26, %v4952_v34  ;;  %v16734_v30 = vld [vmem:[%s13472_s10 + $0x2a0] sm:$0xff] }
 0x2a1   : > { %20156 = vst [vmem:[#allocation25_spill] sm:$0xff] %v16689_v45  ;;  %v3565_v22 = vadd.f32 %v11473_v62, %v16600_v5  ;;  %v3559_v9 = vpop.f32.mrb[105].mxu0  ;;  %11647 = vmatmul.mubr.f32.gmra.mrb[210].mxu0 %v4944_v18  ;;  %v4955_v5 = vrot.slane %v16700_v33, 2  ;;  %v4957_v15 = vrot.slane %v16707_v35, 2  ;;  %v16745_v62 = vld [vmem:[%s13472_s10 + $0x2b0] sm:$0xff] }
 0x2a2   : > { %20157 = vst [vmem:[#allocation28_spill] sm:$0xff] %v16703_v32  ;;  %v3354_v45 = vpop.f32.mrb[120].mxu1  ;;  %v3560_v60 = vadd.f32 %v3559_v9, %v16564_v38  ;;  %12416 = vmatpush1.bf16.msra.mxu0 %v12415_v61  ;;  %11649 = vmatprep.mubr.f32.mxu0 %v4947_v36  ;;  %v4958_v61 = vrot.slane %v16710_v63, 2  ;;  %v4817_v36 = vrot.slane %v16632_v37, 1  ;;  %v16748_v26 = vld [vmem:[%s13472_s10 + $0x2b8] sm:$0x3]  ;;  %v4816_v9 = vsel %vm1152_vm1, %v4814_v54, %v4815_v40 }
 0x2a3   : > { %v16726_v38 = vadd.f32 %v3565_v22, %v16200_v59  ;;  %v3356_v18 = vpop.f32.mrb[121].mxu1  ;;  %5212 = vmatmul.mubr.f32.gmra.mrb[226].mxu1 %v16583_v50  ;;  %12417 = vmatprep.subr.bf16.mxu0 %v20009_v19  ;;  %v4818_v50 = vrot.slane %v16635_v23, 1  ;;  %v4960_v23 = vrot.slane %v16734_v30, 2  ;;  %v10470_v54 = vld [vmem:[%s19937_s1 + $0x848] sm:$0xff] }
 0x2a4   : > { %v16740_v28 = vadd.f32 %v3560_v60, %v16212_v44  ;;  %v11476_v59 = vpop.f32.mrb[106].mxu0  ;;  %5216 = vmatprep.mubr.f32.mxu1 %v4813_v0  ;;  %v12421_v18 = vpack.c.bf16 %v10468_v21, %v10467_v11  ;;  %v4956_v0 = vsel %vm1281_vm0, %v4954_v14, %v4955_v5  ;;  %v4961_v60 = vrot.slane %v16737_v7, 2  ;;  %v16770_v5 = vld [vmem:[%s13472_s10 + $0x2c0] sm:$0xff]  ;;  %v16773_v11 = vld [vmem:[%s13472_s10 + $0x2c8] sm:$0x3] }
 0x2a5   : > { %20158 = vst [vmem:[#allocation27_spill] sm:$0xff] %v16726_v38  ;;  %v3575_v34 = vadd.f32 %v11476_v59, %v3349_v29  ;;  %v3569_v22 = vpop.f32.mrb[107].mxu0  ;;  %11650 = vmatmul.mubr.f32.gmra.mrb[212].mxu0 %v4950_v10  ;;  %v10469_v29 = vld [vmem:[%s19937_s1 + $0x840] sm:$0xff]  ;;  %v4959_v40 = vsel %vm1281_vm0, %v4957_v15, %v4958_v61  ;;  %v4963_v10 = vrot.slane %v16745_v62, 2  ;;  %v4964_v14 = vrot.slane %v16748_v26, 2 }
 0x2a6   : > { %20159 = vst [vmem:[#allocation30_spill] sm:$0xff] %v16740_v28  ;;  %v3359_v38 = vpop.f32.mrb[122].mxu1  ;;  %v3570_v44 = vadd.f32 %v3569_v22, %v16641_v53  ;;  %12419 = vmatpush1.bf16.msra.mxu0 %v12418_v56  ;;  %11652 = vmatprep.mubr.f32.mxu0 %v4953_v2  ;;  %v4819_v2 = vsel %vm1152_vm1, %v4817_v36, %v4818_v50  ;;  %v16783_v59 = vld [vmem:[%s13472_s10 + $0x2d8] sm:$0x3]  ;;  %v4820_v22 = vrot.slane %v16660_v57, 1  ;;  %v4966_v50 = vrot.slane %v16770_v5, 2 }
 0x2a7   : > { %v16762_v53 = vadd.f32 %v3575_v34, %v16230_v48  ;;  %v3361_v56 = vpop.f32.mrb[123].mxu1  ;;  %5217 = vmatmul.mubr.f32.gmra.mrb[228].mxu1 %v16593_v39  ;;  %12420 = vmatprep.subr.bf16.mxu0 %v20009_v19  ;;  %v16780_v39 = vld [vmem:[%s13472_s10 + $0x2d0] sm:$0xff]  ;;  %v12424_v34 = vpack.c.bf16 %v10470_v54, %v10469_v29  ;;  %v4962_v36 = vsel %vm1281_vm0, %v4960_v23, %v4961_v60  ;;  %v4970_v23 = vrot.slane %v16783_v59, 2  ;;  %v16805_v60 = vld [vmem:[%s13472_s10 + $0x2e0] sm:$0xff]  ;;  %v16808_v29 = vld [vmem:[%s13472_s10 + $0x2e8] sm:$0x3] }
 0x2a8   : > { %v16776_v21 = vadd.f32 %v3570_v44, %v16238_v25  ;;  %v11479_v48 = vpop.f32.mrb[108].mxu0  ;;  %5221 = vmatprep.mubr.f32.mxu1 %v4816_v9  ;;  %v4821_v56 = vrot.slane %v16663_v20, 1  ;;  %v10471_v9 = vld [vmem:[%s19937_s1 + $0x850] sm:$0xff]  ;;  %v10472_v20 = vld [vmem:[%s19937_s1 + $0x858] sm:$0xff]  ;;  %v4965_v44 = vsel %vm1281_vm0, %v4963_v10, %v4964_v14 }
 0x2a9   : > { %20160 = vst [vmem:[#allocation29_spill] sm:$0xff] %v16762_v53  ;;  %v3585_v15 = vadd.f32 %v11479_v48, %v3359_v38  ;;  %v3579_v61 = vpop.f32.mrb[109].mxu0  ;;  %11653 = vmatmul.mubr.f32.gmra.mrb[214].mxu0 %v4956_v0  ;;  %v4967_v38 = vrot.slane %v16773_v11, 2  ;;  %v4969_v0 = vrot.slane %v16780_v39, 2  ;;  %v12427_v14 = vpack.c.bf16 %v10472_v20, %v10471_v9  ;;  %v16840_v9 = vld [vmem:[%s13472_s10 + $0x308] sm:$0x3] }
 0x2aa   : > { %20161 = vst [vmem:[#allocation32_spill] sm:$0xff] %v16776_v21  ;;  %v3364_v53 = vpop.f32.mrb[124].mxu1  ;;  %v3580_v25 = vadd.f32 %v3579_v61, %v3354_v45  ;;  %12422 = vmatpush1.bf16.msra.mxu0 %v12421_v18  ;;  %11655 = vmatprep.mubr.f32.mxu0 %v4959_v40  ;;  %v16814_v40 = vld [vmem:[%s13472_s10 + $0x2f0] sm:$0xff]  ;;  %v4822_v10 = vsel %vm1152_vm1, %v4820_v22, %v4821_v56  ;;  %v4824_v61 = vrot.slane %v16674_v16, 1  ;;  %v10473_v22 = vld [vmem:[%s19937_s1 + $0x860] sm:$0xff]  ;;  %v10474_v16 = vld [vmem:[%s19937_s1 + $0x868] sm:$0xff] }
 0x2ab   : > { %v16797_v45 = vadd.f32 %v3585_v15, %v16258_v13  ;;  %v3366_v18 = vpop.f32.mrb[125].mxu1  ;;  %5222 = vmatmul.mubr.f32.gmra.mrb[230].mxu1 %v16607_v42  ;;  %12423 = vmatprep.subr.bf16.mxu0 %v20009_v19  ;;  %v16817_v42 = vld [vmem:[%s13472_s10 + $0x2f8] sm:$0x3]  ;;  %v4823_v15 = vrot.slane %v16671_v12, 1 }
 0x2ac   : > { %v16811_v54 = vadd.f32 %v3580_v25, %v16270_v41  ;;  %v11482_v13 = vpop.f32.mrb[110].mxu0  ;;  %5226 = vmatprep.mubr.f32.mxu1 %v4819_v2  ;;  %v4968_v41 = vsel %vm1281_vm0, %v4966_v50, %v4967_v38  ;;  %v4972_v2 = vrot.slane %v16805_v60, 2  ;;  %v4973_v25 = vrot.slane %v16808_v29, 2  ;;  %v16837_v38 = vld [vmem:[%s13472_s10 + $0x300] sm:$0xff] }
 0x2ad   : > { %20162 = vst [vmem:[#allocation11_spill] sm:$0xff] %v16797_v45  ;;  %v3589_v48 = vpop.f32.mrb[111].mxu0  ;;  %11656 = vmatmul.mubr.f32.gmra.mrb[216].mxu0 %v4962_v36  ;;  %v4975_v36 = vrot.slane %v16814_v40, 2  ;;  %v4976_v50 = vrot.slane %v16817_v42, 2 }
 0x2ae   : > { %20163 = vst [vmem:[#allocation7_spill] sm:$0xff] %v16811_v54  ;;  %v3369_v18 = vpop.f32.mrb[126].mxu1  ;;  %v3590_v45 = vadd.f32 %v3589_v48, %v3364_v53  ;;  %12425 = vmatpush1.bf16.msra.mxu0 %v12424_v34  ;;  %11658 = vmatprep.mubr.f32.mxu0 %v4965_v44  ;;  %v4971_v34 = vsel %vm1281_vm0, %v4969_v0, %v4970_v23  ;;  %v20165_v48 = vld [vmem:[#allocation22_spill] sm:$0xff]  ;;  %v4827_v54 = vrot.slane %v16700_v33, 1 }
 0x2af   : > { %v3595_v53 = vadd.f32 %v11482_v13, %v3369_v18  ;;  %v3371_v56 = vpop.f32.mrb[127].mxu1  ;;  %5227 = vmatmul.mubr.f32.gmra.mrb[232].mxu1 %v16632_v37  ;;  %12426 = vmatprep.subr.bf16.mxu0 %v20009_v19  ;;  %v16846_v13 = vld [vmem:[%s13472_s10 + $0xc0] sm:$0xff]  ;;  %v16849_v37 = vld [vmem:[%s13472_s10 + $0xc8] sm:$0x3]  ;;  %v4825_v23 = vsel %vm1152_vm1, %v4823_v15, %v4824_v61  ;;  %v10475_v15 = vld [vmem:[%s19937_s1 + $0x870] sm:$0xff] }
 0x2b0   : > { %v16843_v20 = vadd.f32 %v3590_v45, %v16296_v46  ;;  %v11485_v44 = vpop.f32.mrb[112].mxu0  ;;  %5231 = vmatprep.mubr.f32.mxu1 %v4822_v10  ;;  %v4826_v56 = vrot.slane %v16697_v8, 1  ;;  %v4974_v46 = vsel %vm1281_vm0, %v4972_v2, %v4973_v25  ;;  %v12430_v45 = vpack.c.bf16 %v10474_v16, %v10473_v22  ;;  %v10476_v33 = vld [vmem:[%s19937_s1 + $0x878] sm:$0xff]  ;;  %v16872_v22 = vld [vmem:[%s13472_s10 + $0xd0] sm:$0xff] }
 0x2b1   : > { %v16852_v18 = vadd.f32 %v3595_v53, %v20165_v48  ;;  %v3599_v0 = vpop.f32.mrb[113].mxu0  ;;  %11659 = vmatmul.mubr.f32.gmra.mrb[218].mxu0 %v4968_v41  ;;  %v4978_v10 = vrot.slane %v16837_v38, 2  ;;  %v4979_v53 = vrot.slane %v16840_v9, 2  ;;  %v5674_v2 = vrot.slane %v16846_v13, 1  ;;  %v16875_v16 = vld [vmem:[%s13472_s10 + $0xd8] sm:$0x3] }
 0x2b2   : > { %20164 = vst [vmem:[#allocation12_spill] sm:$0xff] %v16843_v20  ;;  %v3374_v21 = vpop.f32.mrb[128].mxu1  ;;  %12428 = vmatpush1.bf16.msra.mxu0 %v12427_v14  ;;  %11661 = vmatprep.mubr.f32.mxu0 %v4971_v34  ;;  %v4977_v14 = vsel %vm1281_vm0, %v4975_v36, %v4976_v50  ;;  %v5675_v25 = vrot.slane %v16849_v37, 1  ;;  %v20167_v48 = vld [vmem:[#allocation21_spill] sm:$0xff]  ;;  %v12433_v28 = vpack.c.bf16 %v10476_v33, %v10475_v15  ;;  %v5677_v32 = vrot.slane %v16872_v22, 1 }
 0x2b3   : > { %20166 = vst [vmem:[#allocation10_spill] sm:$0xff] %v16852_v18  ;;  %v3600_v61 = vadd.f32 %v3599_v0, %v3374_v21  ;;  %v3376_v41 = vpop.f32.mrb[129].mxu1  ;;  %5232 = vmatmul.mubr.f32.gmra.mrb[234].mxu1 %v16660_v57  ;;  %12429 = vmatprep.subr.bf16.mxu0 %v20009_v19  ;;  %v10589_v21 = vld [vmem:[%s19937_s1 + $0xa00] sm:$0xff]  ;;  %v10590_v57 = vld [vmem:[%s19937_s1 + $0xa08] sm:$0xff]  ;;  %v4828_v0 = vsel %vm1152_vm1, %v4826_v56, %v4827_v54  ;;  %v4832_v15 = vrot.slane %v16734_v30, 1  ;;  %v4833_v33 = vrot.slane %v16737_v7, 1 }
 0x2b4   : > { %5236 = vmatprep.mubr.f32.mxu1 %v4825_v23  ;;  %v11488_v34 = vpop.f32.mrb[114].mxu0  ;;  %v4829_v41 = vrot.slane %v16707_v35, 1  ;;  %v4830_v23 = vrot.slane %v16710_v63, 1  ;;  %v4980_v18 = vsel %vm1281_vm0, %v4978_v10, %v4979_v53  ;;  %v5676_v54 = vsel %vm1152_vm1, %v5674_v2, %v5675_v25  ;;  %v16896_v63 = vld [vmem:[%s13472_s10 + $0xe0] sm:$0xff]  ;;  %v16901_v10 = vld [vmem:[%s13472_s10 + $0xe8] sm:$0x3] }
 0x2b5   : > { %v16884_v36 = vadd.f32 %v3600_v61, %v20167_v48  ;;  %11662 = vmatmul.mubr.f32.gmra.mrb[220].mxu0 %v4974_v46  ;;  %v3609_v50 = vpop.f32.mrb[115].mxu0  ;;  %v5678_v61 = vrot.slane %v16875_v16, 1  ;;  %v12515_v56 = vpack.c.bf16 %v10590_v57, %v10589_v21  ;;  %v10591_v53 = vld [vmem:[%s19937_s1 + $0xa10] sm:$0xff] }
 0x2b6   : > { %v3379_v20 = vpop.f32.mrb[130].mxu1  ;;  %12431 = vmatpush1.bf16.msra.mxu0 %v12430_v45  ;;  %11664 = vmatprep.mubr.f32.mxu0 %v4977_v14  ;;  %v20169_v14 = vld [vmem:[#allocation16_spill] sm:$0xff] }
 0x2b7   : > { %20168 = vst [vmem:[#allocation8_spill] sm:$0xff] %v16884_v36  ;;  %v3605_v46 = vadd.f32 %v11485_v44, %v3379_v20  ;;  %v3381_v48 = vpop.f32.mrb[131].mxu1  ;;  %5237 = vmatmul.mubr.f32.gmra.mrb[236].mxu1 %v16671_v12  ;;  %12432 = vmatprep.subr.bf16.mxu0 %v20009_v19  ;;  %v10592_v12 = vld [vmem:[%s19937_s1 + $0xa18] sm:$0xff]  ;;  %v4831_v20 = vsel %vm1152_vm1, %v4829_v41, %v4830_v23  ;;  %v5681_v41 = vrot.slane %v16901_v10, 1  ;;  %v16920_v23 = vld [vmem:[%s13472_s10 + $0xf0] sm:$0xff] }
 0x2b8   : > { %5241 = vmatprep.mubr.f32.mxu1 %v4828_v0  ;;  %v16898_v45 = vpop.f32.mrb[116].mxu0  ;;  %v5679_v21 = vsel %vm1152_vm1, %v5677_v32, %v5678_v61  ;;  %v16923_v48 = vld [vmem:[%s13472_s10 + $0xf8] sm:$0x3]  ;;  %v12519_v7 = vpack.c.bf16 %v10592_v12, %v10591_v53  ;;  %v10593_v32 = vld [vmem:[%s19937_s1 + $0xa20] sm:$0xff]  ;;  %v4836_v61 = vrot.slane %v16748_v26, 1 }
 0x2b9   : > { %11665 = vmatmul.mubr.f32.gmra.mrb[222].mxu0 %v4980_v18  ;;  %v3619_v44 = vpop.f32.mrb[117].mxu0  ;;  %v16913_v2 = vadd.f32 %v3605_v46, %v20169_v14  ;;  %v5680_v18 = vrot.slane %v16896_v63, 1  ;;  %v5684_v14 = vrot.slane %v16923_v48, 1  ;;  %v16947_v26 = vld [vmem:[%s13472_s10 + $0x100] sm:$0xff] }
 0x2ba   : > { %v3384_v25 = vpop.f32.mrb[132].mxu1  ;;  %12434 = vmatpush1.bf16.msra.mxu0 %v12433_v28  ;;  %6043 = vmatprep.mubr.f32.mxu0 %v5676_v54  ;;  %v4834_v28 = vsel %vm1152_vm1, %v4832_v15, %v4833_v33 }
 0x2bb   : > { %20170 = vst [vmem:[#allocation15_spill] sm:$0xff] %v16913_v2  ;;  %v3610_v57 = vadd.f32 %v3609_v50, %v3384_v25  ;;  %v3386_v0 = vpop.f32.mrb[133].mxu1  ;;  %5242 = vmatmul.mubr.f32.gmra.mrb[238].mxu1 %v16697_v8  ;;  %12516 = vmatprep.subr.bf16.mxu0 %v12515_v56  ;;  %v10594_v8 = vld [vmem:[%s19937_s1 + $0xa28] sm:$0xff]  ;;  %v4835_v50 = vrot.slane %v16745_v62, 1  ;;  %v5682_v15 = vsel %vm1152_vm1, %v5680_v18, %v5681_v41  ;;  %v4839_v18 = vrot.slane %v16773_v11, 1 }
 0x2bc   : > { %5246 = vmatprep.mubr.f32.mxu1 %v4831_v20  ;;  %v16925_v46 = vpop.f32.mrb[118].mxu0  ;;  %v5683_v20 = vrot.slane %v16920_v23, 1  ;;  %v12523_v33 = vpack.c.bf16 %v10594_v8, %v10593_v32  ;;  %v16977_v11 = vld [vmem:[%s13472_s10 + $0x118] sm:$0x3] }
 0x2bd   : > { %6044 = vmatmul.mubr.f32.vlgmr.msra.gmra.mrb[224].mxu0 %v16846_v13  ;;  %v16937_v54 = vpop.f32.mrb[119].mxu0  ;;  %v16940_v53 = vadd.f32 %v3610_v57, %v16352_v47  ;;  %v16950_v47 = vld [vmem:[%s13472_s10 + $0x108] sm:$0x3]  ;;  %v17033_v2 = vld [vmem:[%s13472_s10 + $0x138] sm:$0x3] }
 0x2be   : > { %v3389_v12 = vpop.f32.mrb[134].mxu1  ;;  %6048 = vmatprep.mubr.f32.mxu0 %v5679_v21  ;;  %12518 = vmatpush3.bf16.msra.mxu0 %v12515_v56  ;;  %v10595_v21 = vld [vmem:[%s19937_s1 + $0xa30] sm:$0xff]  ;;  %v4838_v56 = vrot.slane %v16770_v5, 1 }
 0x2bf   : > { %20171 = vst [vmem:[#allocation31_spill] sm:$0xff] %v16940_v53  ;;  %v3615_v25 = vadd.f32 %v11488_v34, %v3389_v12  ;;  %v3391_v0 = vpop.f32.mrb[135].mxu1  ;;  %5247 = vmatmul.mubr.f32.gmra.mrb[240].mxu1 %v16707_v35  ;;  %12520 = vmatprep.subr.bf16.mxu0 %v12519_v7  ;;  %v10596_v34 = vld [vmem:[%s19937_s1 + $0xa38] sm:$0xff]  ;;  %v4837_v35 = vsel %vm1152_vm1, %v4835_v50, %v4836_v61  ;;  %v5686_v50 = vrot.slane %v16947_v26, 1  ;;  %v5687_v61 = vrot.slane %v16950_v47, 1  ;;  %v16974_v53 = vld [vmem:[%s13472_s10 + $0x110] sm:$0xff] }
 0x2c0   : > { %5251 = vmatprep.mubr.f32.mxu1 %v4834_v28  ;;  %v16952_v57 = vpop.f32.mrb[120].mxu0  ;;  %v5685_v28 = vsel %vm1152_vm1, %v5683_v20, %v5684_v14  ;;  %v4841_v20 = vrot.slane %v16780_v39, 1  ;;  %v4842_v14 = vrot.slane %v16783_v59, 1 }
 0x2c1   : > { %6049 = vmatmul.mubr.f32.gmra.mrb[226].mxu0 %v16872_v22  ;;  %v16964_v41 = vpop.f32.mrb[121].mxu0  ;;  %v16967_v32 = vadd.f32 %v3615_v25, %v16346_v51  ;;  %v12527_v51 = vpack.c.bf16 %v10596_v34, %v10595_v21  ;;  %v5688_v59 = vsel %vm1152_vm1, %v5686_v50, %v5687_v61  ;;  %v4845_v50 = vrot.slane %v16808_v29, 1  ;;  %v17030_v29 = vld [vmem:[%s13472_s10 + $0x130] sm:$0xff] }
 0x2c2   : > { %v3394_v8 = vpop.f32.mrb[136].mxu1  ;;  %6053 = vmatprep.mubr.f32.mxu0 %v5682_v15  ;;  %12522 = vmatpush3.bf16.msra.mxu0 %v12519_v7  ;;  %v4840_v7 = vsel %vm1152_vm1, %v4838_v56, %v4839_v18  ;;  %v17002_v18 = vld [vmem:[%s13472_s10 + $0x120] sm:$0xff] }
 0x2c3   : > { %20172 = vst [vmem:[#allocation9_spill] sm:$0xff] %v16967_v32  ;;  %v3620_v12 = vadd.f32 %v3619_v44, %v3394_v8  ;;  %v3396_v0 = vpop.f32.mrb[137].mxu1  ;;  %5252 = vmatmul.mubr.f32.gmra.mrb[242].mxu1 %v16734_v30  ;;  %12524 = vmatprep.subr.bf16.mxu0 %v12523_v33  ;;  %v10597_v44 = vld [vmem:[%s19937_s1 + $0xa40] sm:$0xff]  ;;  %v10598_v30 = vld [vmem:[%s19937_s1 + $0xa48] sm:$0xff]  ;;  %v5690_v8 = vrot.slane %v16977_v11, 1 }
 0x2c4   : > { %5256 = vmatprep.mubr.f32.mxu1 %v4837_v35  ;;  %v16979_v25 = vpop.f32.mrb[122].mxu0  ;;  %v5689_v35 = vrot.slane %v16974_v53, 1  ;;  %v12531_v32 = vpack.c.bf16 %v10598_v30, %v10597_v44  ;;  %v20174_v44 = vld [vmem:[#allocation17_spill] sm:$0xff] }
 0x2c5   : > { %6054 = vmatmul.mubr.f32.gmra.mrb[228].mxu0 %v16896_v63  ;;  %v16991_v15 = vpop.f32.mrb[123].mxu0  ;;  %v16994_v21 = vadd.f32 %v3620_v12, %v16387_v49  ;;  %v17005_v49 = vld [vmem:[%s13472_s10 + $0x128] sm:$0x3]  ;;  %v4844_v12 = vrot.slane %v16805_v60, 1 }
 0x2c6   : > { %v3399_v34 = vpop.f32.mrb[138].mxu1  ;;  %6058 = vmatprep.mubr.f32.mxu0 %v5685_v28  ;;  %12526 = vmatpush3.bf16.msra.mxu0 %v12523_v33  ;;  %v10599_v33 = vld [vmem:[%s19937_s1 + $0xa50] sm:$0xff] }
 0x2c7   : > { %20173 = vst [vmem:[#allocation14_spill] sm:$0xff] %v16994_v21  ;;  %v3625_v0 = vadd.f32 %v16898_v45, %v3399_v34  ;;  %v3401_v56 = vpop.f32.mrb[139].mxu1  ;;  %5257 = vmatmul.mubr.f32.gmra.mrb[244].mxu1 %v16745_v62  ;;  %12528 = vmatprep.subr.bf16.mxu0 %v12527_v51  ;;  %v10600_v45 = vld [vmem:[%s19937_s1 + $0xa58] sm:$0xff]  ;;  %v4843_v62 = vsel %vm1152_vm1, %v4841_v20, %v4842_v14  ;;  %v5692_v20 = vrot.slane %v17002_v18, 1  ;;  %v5693_v14 = vrot.slane %v17005_v49, 1 }
 0x2c8   : > { %5261 = vmatprep.mubr.f32.mxu1 %v4840_v7  ;;  %v17007_v28 = vpop.f32.mrb[124].mxu0  ;;  %v5691_v34 = vsel %vm1152_vm1, %v5689_v35, %v5690_v8  ;;  %v4848_v35 = vrot.slane %v16817_v42, 1 }
 0x2c9   : > { %6059 = vmatmul.mubr.f32.gmra.mrb[230].mxu0 %v16920_v23  ;;  %v17019_v61 = vpop.f32.mrb[125].mxu0  ;;  %v17022_v30 = vadd.f32 %v3625_v0, %v20174_v44  ;;  %v12535_v0 = vpack.c.bf16 %v10600_v45, %v10599_v33  ;;  %v20176_v33 = vld [vmem:[#allocation20_spill] sm:$0xff]  ;;  %v5695_v44 = vrot.slane %v17030_v29, 1  ;;  %v5694_v42 = vsel %vm1152_vm1, %v5692_v20, %v5693_v14 }
 0x2ca   : > { %v3404_v7 = vpop.f32.mrb[140].mxu1  ;;  %6063 = vmatprep.mubr.f32.mxu0 %v5688_v59  ;;  %12530 = vmatpush3.bf16.msra.mxu0 %v12527_v51  ;;  %v4846_v51 = vsel %vm1152_vm1, %v4844_v12, %v4845_v50  ;;  %v17058_v50 = vld [vmem:[%s13472_s10 + $0x160] sm:$0xff]  ;;  %v4850_v20 = vrot.slane %v16837_v38, 1  ;;  %v4851_v14 = vrot.slane %v16840_v9, 1 }
 0x2cb   : > { %20175 = vst [vmem:[#allocation18_spill] sm:$0xff] %v17022_v30  ;;  %v3630_v56 = vadd.f32 %v16937_v54, %v3404_v7  ;;  %v3406_v21 = vpop.f32.mrb[141].mxu1  ;;  %5262 = vmatmul.mubr.f32.gmra.mrb[246].mxu1 %v16770_v5  ;;  %12532 = vmatprep.subr.bf16.mxu0 %v12531_v32  ;;  %v10601_v54 = vld [vmem:[%s19937_s1 + $0xa60] sm:$0xff]  ;;  %v10602_v5 = vld [vmem:[%s19937_s1 + $0xa68] sm:$0xff]  ;;  %v5696_v7 = vrot.slane %v17033_v2, 1 }
 0x2cc   : > { %5266 = vmatprep.mubr.f32.mxu1 %v4843_v62  ;;  %v17035_v59 = vpop.f32.mrb[126].mxu0  ;;  %v4847_v21 = vrot.slane %v16814_v40, 1  ;;  %v12539_v36 = vpack.c.bf16 %v10602_v5, %v10601_v54  ;;  %v20178_v5 = vld [vmem:[#allocation24_spill] sm:$0xff] }
 0x2cd   : > { %6064 = vmatmul.mubr.f32.gmra.mrb[232].mxu0 %v16947_v26  ;;  %v17047_v8 = vpop.f32.mrb[127].mxu0  ;;  %v17050_v45 = vadd.f32 %v3630_v56, %v20176_v33  ;;  %v17061_v56 = vld [vmem:[%s13472_s10 + $0x168] sm:$0x3] }
 0x2ce   : > { %v3409_v62 = vpop.f32.mrb[142].mxu1  ;;  %6068 = vmatprep.mubr.f32.mxu0 %v5691_v34  ;;  %12534 = vmatpush3.bf16.msra.mxu0 %v12531_v32  ;;  %v10603_v32 = vld [vmem:[%s19937_s1 + $0xa70] sm:$0xff] }
 0x2cf   : > { %20177 = vst [vmem:[#allocation19_spill] sm:$0xff] %v17050_v45  ;;  %v3635_v30 = vadd.f32 %v16925_v46, %v3409_v62  ;;  %v3411_v12 = vpop.f32.mrb[143].mxu1  ;;  %5267 = vmatmul.mubr.f32.gmra.mrb[248].mxu1 %v16780_v39  ;;  %12536 = vmatprep.subr.bf16.mxu0 %v12535_v0  ;;  %v10604_v46 = vld [vmem:[%s19937_s1 + $0xa78] sm:$0xff]  ;;  %v4849_v39 = vsel %vm1152_vm1, %v4847_v21, %v4848_v35  ;;  %v20004_v21 = vrot.slane %v17058_v50, 1  ;;  %v5699_v35 = vrot.slane %v17061_v56, 1 }
 0x2d0   : > { %5271 = vmatprep.mubr.f32.mxu1 %v4846_v51  ;;  %v17063_v34 = vpop.f32.mrb[128].mxu0  ;;  %v5697_v62 = vsel %vm1152_vm1, %v5695_v44, %v5696_v7  ;;  %v12543_v9 = vpack.c.bf16 %v10604_v46, %v10603_v32 }
 0x2d1   : > { %6069 = vmatmul.mubr.f32.gmra.mrb[234].mxu0 %v16974_v53  ;;  %v4213_v54 = vpop.f32.mrb[129].mxu0  ;;  %v17076_v51 = vadd.f32 %v3635_v30, %v20178_v5  ;;  %v17087_v30 = vld [vmem:[%s13472_s10 + $0x178] sm:$0x3]  ;;  %v10557_v5 = vld [vmem:[%s19937_s1 + $0x900] sm:$0xff] }
 0x2d2   : > { %v3414_v33 = vpop.f32.mrb[144].mxu1  ;;  %6073 = vmatprep.mubr.f32.mxu0 %v5694_v42  ;;  %12538 = vmatpush3.bf16.msra.mxu0 %v12535_v0  ;;  %v17084_v54 = vld [vmem:[%s13472_s10 + $0x170] sm:$0xff]  ;;  %v5802_v0 = vrot.slane %v16846_v13, 2  ;;  %v5700_v13 = vsel %vm1152_vm1, %v20004_v21, %v5699_v35 }
 0x2d3   : > { %v3640_v12 = vadd.f32 %v16964_v41, %v3414_v33  ;;  %v3416_v45 = vpop.f32.mrb[145].mxu1  ;;  %5272 = vmatmul.mubr.f32.gmra.mrb[250].mxu1 %v16805_v60  ;;  %12540 = vmatprep.subr.bf16.mxu0 %v12539_v36  ;;  %v4852_v41 = vsel %vm1152_vm1, %v4850_v20, %v4851_v14  ;;  %v5803_v60 = vrot.slane %v16849_v37, 2  ;;  %v20003_v37 = vrot.slane %v17084_v54, 1 }
 0x2d4   : > { %5276 = vmatprep.mubr.f32.mxu1 %v4849_v39  ;;  %v17089_v42 = vpop.f32.mrb[130].mxu0  ;;  %v5702_v39 = vrot.slane %v17087_v30, 1  ;;  %v5806_v20 = vrot.slane %v16875_v16, 2  ;;  %v5808_v16 = vrot.slane %v16896_v63, 2  ;;  %v5809_v33 = vrot.slane %v16901_v10, 2 }
 0x2d5   : > { %6074 = vmatmul.mubr.f32.gmra.mrb[236].mxu0 %v17002_v18  ;;  %v4218_v45 = vpop.f32.mrb[131].mxu0  ;;  %v17096_v44 = vadd.f32 %v3640_v12, %v16448_v52  ;;  %v5805_v52 = vrot.slane %v16872_v22, 2  ;;  %v10558_v22 = vld [vmem:[%s19937_s1 + $0x908] sm:$0xff] }
 0x2d6   : > { %v3419_v7 = vpop.f32.mrb[146].mxu1  ;;  %6078 = vmatprep.mubr.f32.mxu0 %v5697_v62  ;;  %12542 = vmatpush3.bf16.msra.mxu0 %v12539_v36  ;;  %v17108_v36 = vld [vmem:[%s13472_s10 + $0x180] sm:$0xff]  ;;  %v5703_v63 = vsel %vm1152_vm1, %v20003_v37, %v5702_v39  ;;  %v12468_v45 = vpack.c.bf16 %v10558_v22, %v10557_v5  ;;  %v5815_v39 = vrot.slane %v16950_v47, 2 }
 0x2d7   : > { %v3645_v32 = vadd.f32 %v16952_v57, %v3419_v7  ;;  %v3421_v46 = vpop.f32.mrb[147].mxu1  ;;  %5277 = vmatmul.mubr.f32.gmra.mrb[252].mxu1 %v16814_v40  ;;  %12544 = vmatprep.subr.bf16.mxu0 %v12543_v9  ;;  %v17111_v57 = vld [vmem:[%s13472_s10 + $0x188] sm:$0x3]  ;;  %v5804_v40 = vsel %vm1281_vm0, %v5802_v0, %v5803_v60  ;;  %v20002_v10 = vrot.slane %v17108_v36, 1  ;;  %v17140_v7 = vld [vmem:[%s13472_s10 + $0x190] sm:$0xff] }
 0x2d8   : > { %5281 = vmatprep.mubr.f32.mxu1 %v4852_v41  ;;  %v17113_v14 = vpop.f32.mrb[132].mxu0  ;;  %v5705_v60 = vrot.slane %v17111_v57, 1  ;;  %v5810_v46 = vsel %vm1281_vm0, %v5808_v16, %v5809_v33  ;;  %v5818_v33 = vrot.slane %v16977_v11, 2  ;;  %v10561_v11 = vld [vmem:[%s19937_s1 + $0x920] sm:$0xff] }
 0x2d9   : > { %6079 = vmatmul.mubr.f32.gmra.mrb[238].mxu0 %v17030_v29  ;;  %v4223_v62 = vpop.f32.mrb[133].mxu0  ;;  %v17126_v12 = vadd.f32 %v3645_v32, %v16437_v58  ;;  %v5812_v58 = vrot.slane %v16923_v48, 2  ;;  %v10559_v48 = vld [vmem:[%s19937_s1 + $0x910] sm:$0xff] }
 0x2da   : > { %v3424_v35 = vpop.f32.mrb[148].mxu1  ;;  %6083 = vmatprep.mubr.f32.mxu0 %v5700_v13  ;;  %12546 = vmatpush3.bf16.msra.mxu0 %v12543_v9  ;;  %v5807_v9 = vsel %vm1281_vm0, %v5805_v52, %v5806_v20  ;;  %v10560_v13 = vld [vmem:[%s19937_s1 + $0x918] sm:$0xff]  ;;  %v5706_v16 = vsel %vm1152_vm1, %v20002_v10, %v5705_v60  ;;  %v5820_v60 = vrot.slane %v17002_v18, 2 }
 0x2db   : > { %v3650_v41 = vadd.f32 %v16991_v15, %v3424_v35  ;;  %v3426_v0 = vpop.f32.mrb[149].mxu1  ;;  %5282 = vmatmul.mubr.f32.gmra.mrb[254].mxu1 %v16837_v38  ;;  %12547 = vmatprep.subr.bf16.mxu0 %v20009_v19  ;;  %v5811_v15 = vrot.slane %v16920_v23, 2  ;;  %v17143_v38 = vld [vmem:[%s13472_s10 + $0x198] sm:$0x3]  ;;  %v5814_v23 = vrot.slane %v16947_v26, 2  ;;  %v20000_v26 = vrot.slane %v17140_v7, 1 }
 0x2dc   : > { %11699 = vmatprep.mubr.f32.mxu1 %v5804_v40  ;;  %v17145_v32 = vpop.f32.mrb[134].mxu0  ;;  %v5708_v47 = vrot.slane %v17143_v38, 1  ;;  %v12471_v62 = vpack.c.bf16 %v10560_v13, %v10559_v48  ;;  %v5817_v35 = vrot.slane %v16974_v53, 2  ;;  %v10562_v53 = vld [vmem:[%s19937_s1 + $0x928] sm:$0xff] }
 0x2dd   : > { %6084 = vmatmul.mubr.f32.gmra.mrb[240].mxu0 %v17058_v50  ;;  %v4228_v52 = vpop.f32.mrb[135].mxu0  ;;  %v17158_v20 = vadd.f32 %v3650_v41, %v16477_v55  ;;  %v5813_v55 = vsel %vm1281_vm0, %v5811_v15, %v5812_v58  ;;  %v17173_v41 = vld [vmem:[%s13472_s10 + $0x1a8] sm:$0x3]  ;;  %v5821_v58 = vrot.slane %v17005_v49, 2 }
 0x2de   : > { %v3429_v40 = vpop.f32.mrb[150].mxu1  ;;  %6088 = vmatprep.mubr.f32.mxu0 %v5703_v63  ;;  %v5816_v63 = vsel %vm1281_vm0, %v5814_v23, %v5815_v39  ;;  %v5709_v13 = vsel %vm1152_vm1, %v20000_v26, %v5708_v47  ;;  %v5711_v49 = vrot.slane %v17173_v41, 1  ;;  %v5824_v23 = vrot.slane %v17033_v2, 2  ;;  %v10563_v2 = vld [vmem:[%s19937_s1 + $0x930] sm:$0xff] }
 0x2df   : > { %v3655_v5 = vadd.f32 %v16979_v25, %v3429_v40  ;;  %v3431_v22 = vpop.f32.mrb[151].mxu1  ;;  %11700 = vmatmul.mubr.f32.vlgmr.msra.gmra.mrb[0].mxu1 %v5807_v9  ;;  %v17170_v25 = vld [vmem:[%s13472_s10 + $0x1a0] sm:$0xff]  ;;  %v12474_v39 = vpack.c.bf16 %v10562_v53, %v10561_v11  ;;  %v5823_v52 = vrot.slane %v17030_v29, 2  ;;  %v17204_v40 = vld [vmem:[%s13472_s10 + $0x1b8] sm:$0x3]  ;;  %v5827_v47 = vrot.slane %v17061_v56, 2 }
 0x2e0   : > { %12469 = vmatpush1.bf16.msra.mxu1 %v12468_v45  ;;  %11702 = vmatprep.mubr.f32.mxu1 %v5810_v46  ;;  %v17175_v0 = vpop.f32.mrb[136].mxu0  ;;  %v19999_v18 = vrot.slane %v17170_v25, 1  ;;  %v5822_v22 = vsel %vm1281_vm0, %v5820_v60, %v5821_v58  ;;  %v10564_v29 = vld [vmem:[%s19937_s1 + $0x938] sm:$0xff]  ;;  %v5714_v56 = vrot.slane %v17204_v40, 1  ;;  %v5830_v60 = vrot.slane %v17087_v30, 2  ;;  %v10565_v30 = vld [vmem:[%s19937_s1 + $0x940] sm:$0xff] }
 0x2e1   : > { %6089 = vmatmul.mubr.f32.gmra.mrb[242].mxu0 %v17084_v54  ;;  %12470 = vmatprep.subr.bf16.mxu1 %v20009_v19  ;;  %v4233_v9 = vpop.f32.mrb[137].mxu0  ;;  %v17189_v45 = vadd.f32 %v3655_v5, %v16469_v24  ;;  %v5819_v24 = vsel %vm1281_vm0, %v5817_v35, %v5818_v33  ;;  %v12477_v58 = vpack.c.bf16 %v10564_v29, %v10563_v2 }
 0x2e2   : > { %v3434_v15 = vpop.f32.mrb[152].mxu1  ;;  %6093 = vmatprep.mubr.f32.mxu0 %v5706_v16  ;;  %v5826_v16 = vrot.slane %v17058_v50, 2  ;;  %v5712_v11 = vsel %vm1152_vm1, %v19999_v18, %v5711_v49  ;;  %v5829_v9 = vrot.slane %v17084_v54, 2  ;;  %v5832_v49 = vrot.slane %v17108_v36, 2 }
 0x2e3   : > { %v3660_v46 = vadd.f32 %v17019_v61, %v3434_v15  ;;  %v3436_v48 = vpop.f32.mrb[153].mxu1  ;;  %11703 = vmatmul.mubr.f32.gmra.mrb[2].mxu1 %v5813_v55  ;;  %v17201_v61 = vld [vmem:[%s13472_s10 + $0x1b0] sm:$0xff]  ;;  %v17235_v15 = vld [vmem:[%s13472_s10 + $0x1c8] sm:$0x3] }
 0x2e4   : > { %12472 = vmatpush1.bf16.msra.mxu1 %v12471_v62  ;;  %11705 = vmatprep.mubr.f32.mxu1 %v5816_v63  ;;  %v17206_v5 = vpop.f32.mrb[138].mxu0  ;;  %v19998_v53 = vrot.slane %v17201_v61, 1  ;;  %v5828_v48 = vsel %vm1281_vm0, %v5826_v16, %v5827_v47  ;;  %v5836_v47 = vrot.slane %v17143_v38, 2  ;;  %v10567_v38 = vld [vmem:[%s19937_s1 + $0x950] sm:$0xff] }
 0x2e5   : > { %6094 = vmatmul.mubr.f32.gmra.mrb[244].mxu0 %v17108_v36  ;;  %12473 = vmatprep.subr.bf16.mxu1 %v20009_v19  ;;  %v4238_v33 = vpop.f32.mrb[139].mxu0  ;;  %v17220_v55 = vadd.f32 %v3660_v46, %v16510_v43  ;;  %v5825_v43 = vsel %vm1281_vm0, %v5823_v52, %v5824_v23  ;;  %v5833_v23 = vrot.slane %v17111_v57, 2  ;;  %v5717_v57 = vrot.slane %v17235_v15, 1 }
 0x2e6   : > { %v3439_v62 = vpop.f32.mrb[154].mxu1  ;;  %6098 = vmatprep.mubr.f32.mxu0 %v5709_v13  ;;  %v10566_v13 = vld [vmem:[%s19937_s1 + $0x948] sm:$0xff]  ;;  %v5715_v29 = vsel %vm1152_vm1, %v19998_v53, %v5714_v56  ;;  %v10568_v56 = vld [vmem:[%s19937_s1 + $0x958] sm:$0xff] }
 0x2e7   : > { %v3665_v35 = vadd.f32 %v17007_v28, %v3439_v62  ;;  %v3441_v63 = vpop.f32.mrb[155].mxu1  ;;  %11706 = vmatmul.mubr.f32.gmra.mrb[4].mxu1 %v5819_v24  ;;  %v17232_v28 = vld [vmem:[%s13472_s10 + $0x1c0] sm:$0xff]  ;;  %v12480_v33 = vpack.c.bf16 %v10566_v13, %v10565_v30  ;;  %v5835_v62 = vrot.slane %v17140_v7, 2 }
 0x2e8   : > { %12475 = vmatpush1.bf16.msra.mxu1 %v12474_v39  ;;  %11708 = vmatprep.mubr.f32.mxu1 %v5822_v22  ;;  %v17237_v46 = vpop.f32.mrb[140].mxu0  ;;  %v5716_v16 = vrot.slane %v17232_v28, 1 }
 0x2e9   : > { %6099 = vmatmul.mubr.f32.gmra.mrb[246].mxu0 %v17140_v7  ;;  %12476 = vmatprep.subr.bf16.mxu1 %v20009_v19  ;;  %v4243_v24 = vpop.f32.mrb[141].mxu0  ;;  %v17251_v39 = vadd.f32 %v3665_v35, %v16499_v6  ;;  %v5831_v6 = vsel %vm1281_vm0, %v5829_v9, %v5830_v60  ;;  %v17266_v35 = vld [vmem:[%s13472_s10 + $0x1d8] sm:$0x3]  ;;  %v5838_v60 = vrot.slane %v17170_v25, 2 }
 0x2ea   : > { %v3444_v52 = vpop.f32.mrb[156].mxu1  ;;  %6103 = vmatprep.mubr.f32.mxu0 %v5712_v11  ;;  %v5834_v11 = vsel %vm1281_vm0, %v5832_v49, %v5833_v23  ;;  %v5718_v49 = vsel %vm1152_vm1, %v5716_v16, %v5717_v57  ;;  %v5720_v24 = vrot.slane %v17266_v35, 1  ;;  %v10570_v57 = vld [vmem:[%s19937_s1 + $0x968] sm:$0xff] }
 0x2eb   : > { %v3670_v22 = vadd.f32 %v17047_v8, %v3444_v52  ;;  %v3446_v2 = vpop.f32.mrb[157].mxu1  ;;  %11709 = vmatmul.mubr.f32.gmra.mrb[6].mxu1 %v5825_v43  ;;  %v17263_v8 = vld [vmem:[%s13472_s10 + $0x1d0] sm:$0xff]  ;;  %v5839_v43 = vrot.slane %v17173_v41, 2  ;;  %v5842_v41 = vrot.slane %v17204_v40, 2  ;;  %v12483_v52 = vpack.c.bf16 %v10568_v56, %v10567_v38  ;;  %v10569_v40 = vld [vmem:[%s19937_s1 + $0x960] sm:$0xff] }
 0x2ec   : > { %12478 = vmatpush1.bf16.msra.mxu1 %v12477_v58  ;;  %11711 = vmatprep.mubr.f32.mxu1 %v5828_v48  ;;  %v17268_v63 = vpop.f32.mrb[142].mxu0  ;;  %v5719_v23 = vrot.slane %v17263_v8, 1  ;;  %v17292_v2 = vld [vmem:[%s13472_s10 + $0x200] sm:$0xff]  ;;  %v5848_v38 = vrot.slane %v17266_v35, 2  ;;  %v5847_v56 = vrot.slane %v17263_v8, 2 }
 0x2ed   : > { %6104 = vmatmul.mubr.f32.gmra.mrb[248].mxu0 %v17170_v25  ;;  %12479 = vmatprep.subr.bf16.mxu1 %v20009_v19  ;;  %v4248_v58 = vpop.f32.mrb[143].mxu0  ;;  %v17282_v9 = vadd.f32 %v3670_v22, %v16539_v31  ;;  %v5837_v31 = vsel %vm1281_vm0, %v5835_v62, %v5836_v47  ;;  %v5841_v22 = vrot.slane %v17201_v61, 2  ;;  %v5840_v16 = vsel %vm1281_vm0, %v5838_v60, %v5839_v43 }
 0x2ee   : > { %v3449_v48 = vpop.f32.mrb[158].mxu1  ;;  %6108 = vmatprep.mubr.f32.mxu0 %v5715_v29  ;;  %v5844_v47 = vrot.slane %v17232_v28, 2  ;;  %v5721_v58 = vsel %vm1152_vm1, %v5719_v23, %v5720_v24  ;;  %v5850_v23 = vrot.slane %v17292_v2, 2 }
 0x2ef   : > { %20179 = vst [vmem:[#allocation13_spill] sm:$0xff] %v17282_v9  ;;  %v3675_v30 = vadd.f32 %v17035_v59, %v3449_v48  ;;  %v3451_v13 = vpop.f32.mrb[159].mxu1  ;;  %11712 = vmatmul.mubr.f32.gmra.mrb[8].mxu1 %v5831_v6  ;;  %v17295_v59 = vld [vmem:[%s13472_s10 + $0x208] sm:$0x3]  ;;  %v5845_v6 = vrot.slane %v17235_v15, 2  ;;  %v19997_v48 = vrot.slane %v17292_v2, 1  ;;  %v5843_v35 = vsel %vm1281_vm0, %v5841_v22, %v5842_v41 }
 0x2f0   : > { %12481 = vmatpush1.bf16.msra.mxu1 %v12480_v33  ;;  %11714 = vmatprep.mubr.f32.mxu1 %v5834_v11  ;;  %v17297_v29 = vpop.f32.mrb[144].mxu0  ;;  %v5723_v15 = vrot.slane %v17295_v59, 1  ;;  %v10572_v13 = vld [vmem:[%s19937_s1 + $0x978] sm:$0xff]  ;;  %v5851_v24 = vrot.slane %v17295_v59, 2  ;;  %v17335_v41 = vld [vmem:[%s13472_s10 + $0x210] sm:$0xff] }
 0x2f1   : > { %6109 = vmatmul.mubr.f32.gmra.mrb[250].mxu0 %v17201_v61  ;;  %12482 = vmatprep.subr.bf16.mxu1 %v20009_v19  ;;  %v4253_v33 = vpop.f32.mrb[145].mxu0  ;;  %v17311_v62 = vadd.f32 %v3675_v30, %v16531_v4  ;;  %v12486_v30 = vpack.c.bf16 %v10570_v57, %v10569_v40  ;;  %v5849_v40 = vsel %vm1281_vm0, %v5847_v56, %v5848_v38  ;;  %v17346_v57 = vld [vmem:[%s13472_s10 + $0x228] sm:$0x3] }
 0x2f2   : > { %v11541_v11 = vpop.f32.mrb[160].mxu1  ;;  %6113 = vmatprep.mubr.f32.mxu0 %v5718_v49  ;;  %v17363_v38 = vld [vmem:[%s19937_s1 + $0x988] sm:$0xff] }
 0x2f3   : > { %20180 = vst [vmem:[#allocation22_spill] sm:$0xff] %v17311_v62  ;;  %v4442_v60 = vadd.f32 %v11541_v11, %v17089_v42  ;;  %v4436_v43 = vpop.f32.mrb[161].mxu1  ;;  %11715 = vmatmul.mubr.f32.gmra.mrb[10].mxu1 %v5837_v31  ;;  %v10571_v42 = vld [vmem:[%s19937_s1 + $0x970] sm:$0xff]  ;;  %v10416_v31 = vld [vmem:[%s13472_s10 + $0x218] sm:$0x3]  ;;  %v17358_v11 = vld [vmem:[%s19937_s1 + $0x980] sm:$0xff] }
 0x2f4   : > { %v4437_v4 = vadd.f32 %v4436_v43, %v17063_v34  ;;  %12484 = vmatpush1.bf16.msra.mxu1 %v12483_v52  ;;  %11717 = vmatprep.mubr.f32.mxu1 %v5840_v16  ;;  %v17327_v49 = vpop.f32.mrb[146].mxu0  ;;  %v5846_v34 = vsel %vm1281_vm0, %v5844_v47, %v5845_v6  ;;  %v20182_v47 = vld [vmem:[#allocation23_spill] sm:$0xff]  ;;  %v5726_v56 = vrot.slane %v10416_v31, 1  ;;  %v12489_v43 = vpack.c.bf16 %v10572_v13, %v10571_v42  ;;  %v17379_v42 = vld [vmem:[%s13472_s10 + $0x238] sm:$0x3] }
 0x2f5   : > { %6114 = vmatmul.mubr.f32.gmra.mrb[252].mxu0 %v17232_v28  ;;  %12485 = vmatprep.subr.bf16.mxu1 %v20009_v19  ;;  %v4258_v52 = vpop.f32.mrb[147].mxu0  ;;  %v17339_v22 = vadd.f32 %v4442_v60, %v16576_v17  ;;  %v17343_v28 = vld [vmem:[%s13472_s10 + $0x220] sm:$0xff]  ;;  %v5724_v17 = vsel %vm1152_vm1, %v19997_v48, %v5723_v15  ;;  %v5854_v15 = vrot.slane %v10416_v31, 2  ;;  %v20187_v48 = vld [vmem:[#allocation26_spill] sm:$0xff] }
 0x2f6   : > { %v11544_v16 = vpop.f32.mrb[162].mxu1  ;;  %6118 = vmatprep.mubr.f32.mxu0 %v5721_v58  ;;  %v17349_v6 = vadd.f32 %v4437_v4, %v20182_v47  ;;  %v5853_v58 = vrot.slane %v17335_v41, 2  ;;  %v5856_v52 = vrot.slane %v17343_v28, 2 }
 0x2f7   : > { %20181 = vst [vmem:[#allocation21_spill] sm:$0xff] %v17339_v22  ;;  %v4452_v59 = vadd.f32 %v11544_v16, %v17145_v32  ;;  %v4446_v33 = vpop.f32.mrb[163].mxu1  ;;  %11718 = vmatmul.mubr.f32.gmra.mrb[12].mxu1 %v5843_v35  ;;  %v19996_v32 = vrot.slane %v17335_v41, 1  ;;  %v5852_v35 = vsel %vm1281_vm0, %v5850_v23, %v5851_v24  ;;  %v17387_v23 = vld [vmem:[%s13472_s10 + $0x240] sm:$0xff]  ;;  %v17390_v24 = vld [vmem:[%s13472_s10 + $0x248] sm:$0x3] }
 0x2f8   : > { %20183 = vst [vmem:[#allocation16_spill] sm:$0xff] %v17349_v6  ;;  %v4447_v60 = vadd.f32 %v4446_v33, %v17113_v14  ;;  %12487 = vmatpush1.bf16.msra.mxu1 %v12486_v30  ;;  %11720 = vmatprep.mubr.f32.mxu1 %v5846_v34  ;;  %v17368_v4 = vpop.f32.mrb[148].mxu0  ;;  %v5857_v14 = vrot.slane %v17346_v57, 2  ;;  %v17376_v30 = vld [vmem:[%s13472_s10 + $0x230] sm:$0xff] }
 0x2f9   : > { %6119 = vmatmul.mubr.f32.gmra.mrb[254].mxu0 %v17263_v8  ;;  %12488 = vmatprep.subr.bf16.mxu1 %v20009_v19  ;;  %v4263_v13 = vpop.f32.mrb[149].mxu0  ;;  %v17382_v34 = vadd.f32 %v4452_v59, %v16613_v27  ;;  %v12492_v8 = vpack.c.bf16 %v17363_v38, %v17358_v11  ;;  %v5727_v27 = vsel %vm1152_vm1, %v19996_v32, %v5726_v56  ;;  %v20001_v59 = vrot.slane %v17343_v28, 1  ;;  %v17402_v11 = vld [vmem:[%s13472_s10 + $0x250] sm:$0xff]  ;;  %v17405_v38 = vld [vmem:[%s13472_s10 + $0x258] sm:$0x3] }
 0x2fa   : > { %v11547_v31 = vpop.f32.mrb[164].mxu1  ;;  %6123 = vmatprep.mubr.f32.mxu0 %v5724_v17  ;;  %v17393_v16 = vadd.f32 %v4447_v60, %v16627_v1  ;;  %v5729_v17 = vrot.slane %v17346_v57, 1  ;;  %v5855_v1 = vsel %vm1281_vm0, %v5853_v58, %v5854_v15  ;;  %v5858_v57 = vsel %vm1281_vm0, %v5856_v52, %v5857_v14  ;;  %v10576_v60 = vld [vmem:[%s19937_s1 + $0x998] sm:$0xff]  ;;  %v17433_v32 = vld [vmem:[%s13472_s10 + $0x268] sm:$0x3] }
 0x2fb   : > { %20184 = vst [vmem:[#allocation17_spill] sm:$0xff] %v17382_v34  ;;  %v4462_v47 = vadd.f32 %v11547_v31, %v17206_v5  ;;  %v4456_v33 = vpop.f32.mrb[165].mxu1  ;;  %11721 = vmatmul.mubr.f32.gmra.mrb[14].mxu1 %v5849_v40  ;;  %v5859_v5 = vrot.slane %v17376_v30, 2  ;;  %v5860_v40 = vrot.slane %v17379_v42, 2  ;;  %v5863_v58 = vrot.slane %v17390_v24, 2 }
 0x2fc   : > { %20185 = vst [vmem:[#allocation20_spill] sm:$0xff] %v17393_v16  ;;  %v4457_v13 = vadd.f32 %v4456_v33, %v17175_v0  ;;  %12490 = vmatpush1.bf16.msra.mxu1 %v12489_v43  ;;  %11723 = vmatprep.mubr.f32.mxu1 %v5852_v35  ;;  %v17411_v56 = vpop.f32.mrb[150].mxu0  ;;  %v10575_v0 = vld [vmem:[%s19937_s1 + $0x990] sm:$0xff]  ;;  %v5862_v43 = vrot.slane %v17387_v23, 2  ;;  %v5865_v52 = vrot.slane %v17402_v11, 2  ;;  %v5866_v14 = vrot.slane %v17405_v38, 2 }
 0x2fd   : > { %6124 = vmatmul.mubr.f32.gmra.mrb[0].mxu0 %v17292_v2  ;;  %12491 = vmatprep.subr.bf16.mxu1 %v20009_v19  ;;  %v4268_v15 = vpop.f32.mrb[151].mxu0  ;;  %v17425_v35 = vadd.f32 %v4462_v47, %v16652_v3  ;;  %v17430_v33 = vld [vmem:[%s13472_s10 + $0x260] sm:$0xff]  ;;  %v5730_v3 = vsel %vm1152_vm1, %v20001_v59, %v5729_v17  ;;  %v5731_v47 = vrot.slane %v17376_v30, 1 }
 0x2fe   : > { %v11550_v31 = vpop.f32.mrb[166].mxu1  ;;  %6128 = vmatprep.mubr.f32.mxu0 %v5727_v27  ;;  %v17436_v53 = vadd.f32 %v4457_v13, %v20187_v48  ;;  %v5732_v27 = vrot.slane %v17379_v42, 1  ;;  %v5861_v48 = vsel %vm1281_vm0, %v5859_v5, %v5860_v40  ;;  %v12495_v13 = vpack.c.bf16 %v10576_v60, %v10575_v0  ;;  %v10577_v17 = vld [vmem:[%s19937_s1 + $0x9a0] sm:$0xff]  ;;  %v10578_v42 = vld [vmem:[%s19937_s1 + $0x9a8] sm:$0xff]  ;;  %v17460_v5 = vld [vmem:[%s13472_s10 + $0x270] sm:$0xff] }
 0x2ff   : > { %20186 = vst [vmem:[#allocation24_spill] sm:$0xff] %v17425_v35  ;;  %v4472_v18 = vadd.f32 %v11550_v31, %v17268_v63  ;;  %v4466_v26 = vpop.f32.mrb[167].mxu1  ;;  %11724 = vmatmul.mubr.f32.gmra.mrb[16].mxu1 %v5855_v1  ;;  %v5869_v1 = vrot.slane %v17433_v32, 2  ;;  %v17463_v40 = vld [vmem:[%s13472_s10 + $0x278] sm:$0x3]  ;;  %v5867_v31 = vsel %vm1281_vm0, %v5865_v52, %v5866_v14  ;;  %v17470_v59 = vld [vmem:[%s13472_s10 + $0x2a0] sm:$0xff] }
 0x300   : > { %20188 = vst [vmem:[#allocation23_spill] sm:$0xff] %v17436_v53  ;;  %v4467_v15 = vadd.f32 %v4466_v26, %v17237_v46  ;;  %12493 = vmatpush1.bf16.msra.mxu1 %v12492_v8  ;;  %11726 = vmatprep.mubr.f32.mxu1 %v5858_v57  ;;  %v17446_v63 = vpop.f32.mrb[152].mxu0  ;;  %v5864_v26 = vsel %vm1281_vm0, %v5862_v43, %v5863_v58  ;;  %v5868_v8 = vrot.slane %v17430_v33, 2  ;;  %v20189_v57 = vld [vmem:[#allocation25_spill] sm:$0xff]  ;;  %v17473_v43 = vld [vmem:[%s13472_s10 + $0x2a8] sm:$0x3] }
 0x301   : > { %6129 = vmatmul.mubr.f32.gmra.mrb[2].mxu0 %v17335_v41  ;;  %12494 = vmatprep.subr.bf16.mxu1 %v20009_v19  ;;  %v4273_v46 = vpop.f32.mrb[153].mxu0  ;;  %v17466_v0 = vadd.f32 %v4472_v18, %v20189_v57  ;;  %v20191_v58 = vld [vmem:[#allocation28_spill] sm:$0xff]  ;;  %v5733_v21 = vsel %vm1152_vm1, %v5731_v47, %v5732_v27  ;;  %v5734_v18 = vrot.slane %v17387_v23, 1  ;;  %v5735_v57 = vrot.slane %v17390_v24, 1  ;;  %v17486_v52 = vld [vmem:[%s13472_s10 + $0x2b8] sm:$0x3] }
 0x302   : > { %v11553_v60 = vpop.f32.mrb[168].mxu1  ;;  %6133 = vmatprep.mubr.f32.mxu0 %v5730_v3  ;;  %v17476_v46 = vadd.f32 %v4467_v15, %v20191_v58  ;;  %v17483_v3 = vld [vmem:[%s13472_s10 + $0x2b0] sm:$0xff]  ;;  %v12498_v15 = vpack.c.bf16 %v10578_v42, %v10577_v17  ;;  %v5872_v47 = vrot.slane %v17463_v40, 2  ;;  %v5870_v24 = vsel %vm1281_vm0, %v5868_v8, %v5869_v1  ;;  %v17503_v17 = vld [vmem:[%s13472_s10 + $0x2c0] sm:$0xff] }
 0x303   : > { %20190 = vst [vmem:[#allocation26_spill] sm:$0xff] %v17466_v0  ;;  %v4482_v10 = vadd.f32 %v11553_v60, %v17327_v49  ;;  %v4476_v37 = vpop.f32.mrb[169].mxu1  ;;  %11727 = vmatmul.mubr.f32.gmra.mrb[18].mxu1 %v5861_v48  ;;  %v5871_v49 = vrot.slane %v17460_v5, 2  ;;  %v5874_v48 = vrot.slane %v17470_v59, 2  ;;  %v20193_v42 = vld [vmem:[#allocation27_spill] sm:$0xff]  ;;  %v5877_v8 = vrot.slane %v17483_v3, 2 }
 0x304   : > { %20192 = vst [vmem:[#allocation25_spill] sm:$0xff] %v17476_v46  ;;  %v4477_v14 = vadd.f32 %v4476_v37, %v17297_v29  ;;  %12496 = vmatpush1.bf16.msra.mxu1 %v12495_v13  ;;  %11729 = vmatprep.mubr.f32.mxu1 %v5864_v26  ;;  %v4276_v58 = vpop.f32.mrb[154].mxu0  ;;  %v10579_v37 = vld [vmem:[%s19937_s1 + $0x9b0] sm:$0xff]  ;;  %v10580_v29 = vld [vmem:[%s19937_s1 + $0x9b8] sm:$0xff]  ;;  %v5875_v13 = vrot.slane %v17473_v43, 2  ;;  %v5878_v1 = vrot.slane %v17486_v52, 2  ;;  %v5736_v16 = vsel %vm1152_vm1, %v5734_v18, %v5735_v57 }
 0x305   : > { %6134 = vmatmul.mubr.f32.gmra.mrb[4].mxu0 %v17343_v28  ;;  %12497 = vmatprep.subr.bf16.mxu1 %v20009_v19  ;;  %v4278_v27 = vpop.f32.mrb[155].mxu0  ;;  %v17506_v26 = vadd.f32 %v4482_v10, %v20193_v42  ;;  %v20195_v46 = vld [vmem:[#allocation30_spill] sm:$0xff]  ;;  %v5737_v10 = vrot.slane %v17402_v11, 1  ;;  %v17534_v57 = vld [vmem:[%s13472_s10 + $0x2d0] sm:$0xff]  ;;  %v5746_v62 = vrot.slane %v17470_v59, 1 }
 0x306   : > { %v11556_v60 = vpop.f32.mrb[170].mxu1  ;;  %6138 = vmatprep.mubr.f32.mxu0 %v5733_v21  ;;  %v17511_v27 = vld [vmem:[%s13472_s10 + $0x2c8] sm:$0x3]  ;;  %v17514_v0 = vadd.f32 %v4477_v14, %v20195_v46  ;;  %v5738_v21 = vrot.slane %v17405_v38, 1  ;;  %v12501_v14 = vpack.c.bf16 %v10580_v29, %v10579_v37  ;;  %v5880_v38 = vrot.slane %v17503_v17, 2  ;;  %v17551_v29 = vld [vmem:[%s19937_s1 + $0x9d8] sm:$0xff] }
 0x307   : > { %20194 = vst [vmem:[#allocation28_spill] sm:$0xff] %v17506_v26  ;;  %v4492_v53 = vadd.f32 %v11556_v60, %v17411_v56  ;;  %v4486_v35 = vpop.f32.mrb[171].mxu1  ;;  %11730 = vmatmul.mubr.f32.gmra.mrb[20].mxu1 %v5867_v31  ;;  %v5873_v26 = vsel %vm1281_vm0, %v5871_v49, %v5872_v47  ;;  %v10581_v56 = vld [vmem:[%s19937_s1 + $0x9c0] sm:$0xff]  ;;  %v10582_v31 = vld [vmem:[%s19937_s1 + $0x9c8] sm:$0xff]  ;;  %v5881_v18 = vrot.slane %v17511_v27, 2  ;;  %v17542_v49 = vld [vmem:[%s19937_s1 + $0x9d0] sm:$0xff]  ;;  %v5879_v37 = vsel %vm1281_vm0, %v5877_v8, %v5878_v1 }
 0x308   : > { %20196 = vst [vmem:[#allocation27_spill] sm:$0xff] %v17514_v0  ;;  %v4487_v42 = vadd.f32 %v4486_v35, %v17368_v4  ;;  %12499 = vmatpush1.bf16.msra.mxu1 %v12498_v15  ;;  %11732 = vmatprep.mubr.f32.mxu1 %v5870_v24  ;;  %v4281_v46 = vpop.f32.mrb[156].mxu0  ;;  %v5876_v35 = vsel %vm1281_vm0, %v5874_v48, %v5875_v13  ;;  %v17537_v15 = vld [vmem:[%s13472_s10 + $0x2d8] sm:$0x3]  ;;  %v20197_v47 = vld [vmem:[#allocation29_spill] sm:$0xff]  ;;  %v17554_v48 = vld [vmem:[%s13472_s10 + $0x2e0] sm:$0xff] }
 0x309   : > { %6139 = vmatmul.mubr.f32.gmra.mrb[6].mxu0 %v17376_v30  ;;  %12500 = vmatprep.subr.bf16.mxu1 %v20009_v19  ;;  %v4283_v4 = vpop.f32.mrb[157].mxu0  ;;  %v17545_v30 = vadd.f32 %v4492_v53, %v20197_v47  ;;  %v17557_v13 = vld [vmem:[%s13472_s10 + $0x2e8] sm:$0x3]  ;;  %v5739_v53 = vsel %vm1152_vm1, %v5737_v10, %v5738_v21  ;;  %v5741_v8 = vrot.slane %v17433_v32, 1  ;;  %v17566_v1 = vld [vmem:[%s13472_s10 + $0x2f0] sm:$0xff]  ;;  %v5884_v10 = vrot.slane %v17537_v15, 2 }
 0x30a   : > { %v11559_v24 = vpop.f32.mrb[172].mxu1  ;;  %6143 = vmatprep.mubr.f32.mxu0 %v5736_v16  ;;  %v20199_v60 = vld [vmem:[#allocation32_spill] sm:$0xff]  ;;  %v5740_v16 = vrot.slane %v17430_v33, 1  ;;  %v17569_v47 = vld [vmem:[%s13472_s10 + $0x2f8] sm:$0x3]  ;;  %v5882_v21 = vsel %vm1281_vm0, %v5880_v38, %v5881_v18  ;;  %v20203_v18 = vld [vmem:[#allocation7_spill] sm:$0xff] }
 0x30b   : > { %20198 = vst [vmem:[#allocation30_spill] sm:$0xff] %v17545_v30  ;;  %v17560_v4 = vadd.f32 %v4487_v42, %v20199_v60  ;;  %v4502_v0 = vadd.f32 %v11559_v24, %v4276_v58  ;;  %v4496_v34 = vpop.f32.mrb[173].mxu1  ;;  %11733 = vmatmul.mubr.f32.gmra.mrb[22].mxu1 %v5873_v26  ;;  %v12504_v58 = vpack.c.bf16 %v10582_v31, %v10581_v56  ;;  %v5883_v26 = vrot.slane %v17534_v57, 2 }
 0x30c   : > { %v4497_v30 = vadd.f32 %v4496_v34, %v17446_v63  ;;  %12502 = vmatpush1.bf16.msra.mxu1 %v12501_v14  ;;  %v4286_v42 = vpop.f32.mrb[158].mxu0  ;;  %11735 = vmatprep.mubr.f32.mxu1 %v5876_v35  ;;  %v5886_v24 = vrot.slane %v17554_v48, 2  ;;  %v5887_v60 = vrot.slane %v17557_v13, 2  ;;  %v17580_v34 = vld [vmem:[%s13472_s10 + $0x300] sm:$0xff]  ;;  %v17583_v63 = vld [vmem:[%s13472_s10 + $0x308] sm:$0x3]  ;;  %v5742_v22 = vsel %vm1152_vm1, %v5740_v16, %v5741_v8 }
 0x30d   : > { %20200 = vst [vmem:[#allocation29_spill] sm:$0xff] %v17560_v4  ;;  %6144 = vmatmul.mubr.f32.gmra.mrb[8].mxu0 %v17387_v23  ;;  %12503 = vmatprep.subr.bf16.mxu1 %v20009_v19  ;;  %v4288_v32 = vpop.f32.mrb[159].mxu0  ;;  %v20201_v14 = vld [vmem:[#allocation11_spill] sm:$0xff]  ;;  %v12507_v23 = vpack.c.bf16 %v17551_v29, %v17542_v49  ;;  %v5889_v35 = vrot.slane %v17566_v1, 2  ;;  %v5890_v38 = vrot.slane %v17569_v47, 2  ;;  %v10586_v49 = vld [vmem:[%s19937_s1 + $0x9e8] sm:$0xff]  ;;  %v5885_v16 = vsel %vm1281_vm0, %v5883_v26, %v5884_v10 }
 0x30e   : > { %v17586_v56 = vadd.f32 %v4502_v0, %v20201_v14  ;;  %v11562_v31 = vpop.f32.mrb[174].mxu1  ;;  %6148 = vmatprep.mubr.f32.mxu0 %v5739_v53  ;;  %v17593_v32 = vadd.f32 %v4497_v30, %v20203_v18  ;;  %v10585_v0 = vld [vmem:[%s19937_s1 + $0x9e0] sm:$0xff]  ;;  %v5743_v29 = vrot.slane %v17460_v5, 1  ;;  %v5744_v30 = vrot.slane %v17463_v40, 1  ;;  %v17608_v14 = vld [vmem:[%s13472_s10 + $0x310] sm:$0xff] }
 0x30f   : > { %v4512_v4 = vadd.f32 %v11562_v31, %v4286_v42  ;;  %v4506_v6 = vpop.f32.mrb[175].mxu1  ;;  %11736 = vmatmul.mubr.f32.gmra.mrb[24].mxu1 %v5879_v37  ;;  %v5892_v8 = vrot.slane %v17580_v34, 2  ;;  %v5893_v42 = vrot.slane %v17583_v63, 2  ;;  %v5888_v18 = vsel %vm1281_vm0, %v5886_v24, %v5887_v60  ;;  %v17614_v40 = vld [vmem:[%s13472_s10 + $0x318] sm:$0x3] }
 0x310   : > { %20202 = vst [vmem:[#allocation32_spill] sm:$0xff] %v17586_v56  ;;  %20204 = vst [vmem:[#allocation11_spill] sm:$0xff] %v17593_v32  ;;  %v4507_v53 = vadd.f32 %v4506_v6, %v4281_v46  ;;  %12505 = vmatpush1.bf16.msra.mxu1 %v12504_v58  ;;  %11738 = vmatprep.mubr.f32.mxu1 %v5882_v21  ;;  %v4291_v37 = vpop.f32.mrb[160].mxu0  ;;  %v17617_v6 = vld [vmem:[%s13472_s10 + $0x140] sm:$0xff]  ;;  %v17620_v46 = vld [vmem:[%s13472_s10 + $0x148] sm:$0x3]  ;;  %v5891_v21 = vsel %vm1281_vm0, %v5889_v35, %v5890_v38 }
 0x311   : > { %6149 = vmatmul.mubr.f32.gmra.mrb[10].mxu0 %v17402_v11  ;;  %12506 = vmatprep.subr.bf16.mxu1 %v20009_v19  ;;  %v4293_v31 = vpop.f32.mrb[161].mxu0  ;;  %v20205_v58 = vld [vmem:[#allocation10_spill] sm:$0xff]  ;;  %v12510_v32 = vpack.c.bf16 %v10586_v49, %v10585_v0  ;;  %v20207_v11 = vld [vmem:[#allocation12_spill] sm:$0xff]  ;;  %v5745_v24 = vsel %vm1152_vm1, %v5743_v29, %v5744_v30  ;;  %v5895_v60 = vrot.slane %v17608_v14, 2  ;;  %v5896_v35 = vrot.slane %v17614_v40, 2 }
 0x312   : > { %v17623_v26 = vadd.f32 %v4512_v4, %v20205_v58  ;;  %v11565_v10 = vpop.f32.mrb[176].mxu1  ;;  %6153 = vmatprep.mubr.f32.mxu0 %v5742_v22  ;;  %v17627_v56 = vadd.f32 %v4507_v53, %v20207_v11  ;;  %v5747_v4 = vrot.slane %v17473_v43, 1  ;;  %v6591_v38 = vrot.slane %v17617_v6, 1  ;;  %v10587_v43 = vld [vmem:[%s19937_s1 + $0x9f0] sm:$0xff] }
 0x313   : > { %v4516_v31 = vpop.f32.mrb[177].mxu1  ;;  %11739 = vmatmul.mubr.f32.gmra.mrb[26].mxu1 %v5885_v16  ;;  %v6592_v0 = vrot.slane %v17620_v46, 1  ;;  %v5894_v30 = vsel %vm1281_vm0, %v5892_v8, %v5893_v42  ;;  %v17646_v53 = vld [vmem:[%s13472_s10 + $0x150] sm:$0xff]  ;;  %v10702_v16 = vld [vmem:[%s19937_s1 + $0xb88] sm:$0xff]  ;;  %v17655_v8 = vld [vmem:[%s13472_s10 + $0x158] sm:$0x3] }
 0x314   : > { %20206 = vst [vmem:[#allocation7_spill] sm:$0xff] %v17623_v26  ;;  %20208 = vst [vmem:[#allocation10_spill] sm:$0xff] %v17627_v56  ;;  %v4517_v58 = vadd.f32 %v4516_v31, %v4291_v37  ;;  %12508 = vmatpush1.bf16.msra.mxu1 %v12507_v23  ;;  %v4296_v22 = vpop.f32.mrb[162].mxu0  ;;  %11741 = vmatprep.mubr.f32.mxu1 %v5888_v18  ;;  %v10588_v23 = vld [vmem:[%s19937_s1 + $0x9f8] sm:$0xff]  ;;  %v20209_v42 = vld [vmem:[#allocation8_spill] sm:$0xff]  ;;  %v5897_v56 = vsel %vm1281_vm0, %v5895_v60, %v5896_v35 }
 0x315   : > { %v4522_v49 = vadd.f32 %v11565_v10, %v4296_v22  ;;  %6154 = vmatmul.mubr.f32.gmra.mrb[12].mxu0 %v17430_v33  ;;  %12509 = vmatprep.subr.bf16.mxu1 %v20009_v19  ;;  %v4298_v29 = vpop.f32.mrb[163].mxu0  ;;  %v10701_v33 = vld [vmem:[%s19937_s1 + $0xb80] sm:$0xff]  ;;  %v5749_v22 = vrot.slane %v17483_v3, 1  ;;  %v12513_v9 = vpack.c.bf16 %v10588_v23, %v10587_v43  ;;  %v10703_v60 = vld [vmem:[%s19937_s1 + $0xb90] sm:$0xff]  ;;  %v5753_v43 = vrot.slane %v17511_v27, 1 }
 0x316   : > { %v11568_v37 = vpop.f32.mrb[178].mxu1  ;;  %6158 = vmatprep.mubr.f32.mxu0 %v5745_v24  ;;  %v17658_v18 = vadd.f32 %v4517_v58, %v20209_v42  ;;  %v20210_v10 = vld [vmem:[#allocation15_spill] sm:$0xff]  ;;  %v5748_v24 = vsel %vm1152_vm1, %v5746_v62, %v5747_v4  ;;  %v5750_v29 = vrot.slane %v17486_v52, 1  ;;  %v6593_v58 = vsel %vm1152_vm1, %v6591_v38, %v6592_v0  ;;  %v20212_v27 = vld [vmem:[#allocation9_spill] sm:$0xff] }
 0x317   : > { %v17661_v11 = vadd.f32 %v4522_v49, %v20210_v10  ;;  %v4526_v31 = vpop.f32.mrb[179].mxu1  ;;  %11742 = vmatmul.mubr.f32.gmra.mrb[28].mxu1 %v5891_v21  ;;  %v12595_v62 = vpack.c.bf16 %v10702_v16, %v10701_v33  ;;  %v6594_v4 = vrot.slane %v17646_v53, 1  ;;  %v6595_v52 = vrot.slane %v17655_v8, 1 }
 0x318   : > { %12511 = vmatpush1.bf16.msra.mxu1 %v12510_v32  ;;  %v4301_v26 = vpop.f32.mrb[164].mxu0  ;;  %11744 = vmatprep.mubr.f32.mxu1 %v5894_v30  ;;  %v17673_v32 = vld [vmem:[%s13472_s10 + $0x168] sm:$0x3]  ;;  %v5751_v0 = vsel %vm1152_vm1, %v5749_v22, %v5750_v29  ;;  %v5752_v30 = vrot.slane %v17503_v17, 1  ;;  %v17693_v22 = vld [vmem:[%s13472_s10 + $0x178] sm:$0x3] }
 0x319   : > { %v4527_v42 = vadd.f32 %v4526_v31, %v4301_v26  ;;  %6159 = vmatmul.mubr.f32.gmra.mrb[14].mxu0 %v17460_v5  ;;  %12512 = vmatprep.subr.bf16.mxu1 %v20009_v19  ;;  %v4303_v21 = vpop.f32.mrb[165].mxu0  ;;  %v10704_v5 = vld [vmem:[%s19937_s1 + $0xb98] sm:$0xff]  ;;  %v20211_v26 = vld [vmem:[#allocation31_spill] sm:$0xff]  ;;  %v6596_v10 = vsel %vm1152_vm1, %v6594_v4, %v6595_v52  ;;  %v6598_v31 = vrot.slane %v17673_v32, 1 }
 0x31a   : > { %v11571_v49 = vpop.f32.mrb[180].mxu1  ;;  %6163 = vmatprep.mubr.f32.mxu0 %v5748_v24  ;;  %v5756_v21 = vrot.slane %v17537_v15, 1  ;;  %v10707_v15 = vld [vmem:[%s19937_s1 + $0xbb0] sm:$0xff] }
 0x31b   : > { %v17682_v35 = vadd.f32 %v4527_v42, %v20211_v26  ;;  %v4536_v38 = vpop.f32.mrb[181].mxu1  ;;  %11745 = vmatmul.mubr.f32.gmra.mrb[30].mxu1 %v5897_v56  ;;  %v12599_v56 = vpack.c.bf16 %v10704_v5, %v10703_v60  ;;  %v5755_v42 = vrot.slane %v17534_v57, 1  ;;  %v20213_v5 = vrot.slane %v17058_v50, 1  ;;  %v20214_v50 = vld [vmem:[#allocation14_spill] sm:$0xff] }
 0x31c   : > { %12514 = vmatpush1.bf16.msra.mxu1 %v12513_v9  ;;  %v4306_v23 = vpop.f32.mrb[166].mxu0  ;;  %6960 = vmatprep.mubr.f32.mxu1 %v6593_v58  ;;  %v10705_v9 = vld [vmem:[%s19937_s1 + $0xba0] sm:$0xff]  ;;  %v5754_v58 = vsel %vm1152_vm1, %v5752_v30, %v5753_v43  ;;  %v17716_v43 = vld [vmem:[%s13472_s10 + $0x188] sm:$0x3] }
 0x31d   : > { %v4532_v33 = vadd.f32 %v11568_v37, %v4306_v23  ;;  %6164 = vmatmul.mubr.f32.gmra.mrb[16].mxu0 %v17470_v59  ;;  %12596 = vmatprep.subr.bf16.mxu1 %v12595_v62  ;;  %v4308_v16 = vpop.f32.mrb[167].mxu0  ;;  %v10706_v59 = vld [vmem:[%s19937_s1 + $0xba8] sm:$0xff]  ;;  %v6599_v26 = vsel %vm1152_vm1, %v20213_v5, %v6598_v31 }
 0x31e   : > { %v17690_v24 = vpop.f32.mrb[182].mxu1  ;;  %6168 = vmatprep.mubr.f32.mxu0 %v5751_v0  ;;  %v6601_v0 = vrot.slane %v17693_v22, 1  ;;  %v12603_v23 = vpack.c.bf16 %v10706_v59, %v10705_v9  ;;  %v5758_v16 = vrot.slane %v17554_v48, 1 }
 0x31f   : > { %v17702_v37 = vadd.f32 %v4532_v33, %v20212_v27  ;;  %v4546_v29 = vpop.f32.mrb[183].mxu1  ;;  %6961 = vmatmul.mubr.f32.vlgmr.msra.gmra.mrb[32].mxu1 %v17617_v6  ;;  %v5757_v33 = vsel %vm1152_vm1, %v5755_v42, %v5756_v21  ;;  %v20215_v27 = vrot.slane %v17084_v54, 1  ;;  %v20216_v54 = vld [vmem:[#allocation18_spill] sm:$0xff] }
 0x320   : > { %12598 = vmatpush3.bf16.msra.mxu1 %v12595_v62  ;;  %v4311_v4 = vpop.f32.mrb[168].mxu0  ;;  %6965 = vmatprep.mubr.f32.mxu1 %v6596_v10  ;;  %v5759_v10 = vrot.slane %v17557_v13, 1  ;;  %v17741_v13 = vld [vmem:[%s13472_s10 + $0x198] sm:$0x3] }
 0x321   : > { %v4537_v52 = vadd.f32 %v4536_v38, %v4311_v4  ;;  %6169 = vmatmul.mubr.f32.gmra.mrb[18].mxu0 %v17483_v3  ;;  %v4313_v60 = vpop.f32.mrb[169].mxu0  ;;  %12600 = vmatprep.subr.bf16.mxu1 %v12599_v56  ;;  %v10708_v3 = vld [vmem:[%s19937_s1 + $0xbb8] sm:$0xff]  ;;  %v6604_v4 = vrot.slane %v17716_v43, 1 }
 0x322   : > { %v17713_v30 = vpop.f32.mrb[184].mxu1  ;;  %6173 = vmatprep.mubr.f32.mxu0 %v5754_v58  ;;  %v6602_v58 = vsel %vm1152_vm1, %v20215_v27, %v6601_v0  ;;  %v12607_v42 = vpack.c.bf16 %v10708_v3, %v10707_v15  ;;  %v17755_v60 = vld [vmem:[%s13472_s10 + $0x160] sm:$0xff]  ;;  %v5760_v5 = vsel %vm1152_vm1, %v5758_v16, %v5759_v10  ;;  %v5762_v0 = vrot.slane %v17569_v47, 1  ;;  %v17769_v47 = vld [vmem:[%s13472_s10 + $0x1a8] sm:$0x3]  ;;  %v17783_v27 = vld [vmem:[%s13472_s10 + $0x170] sm:$0xff] }
 0x323   : > { %v17725_v62 = vadd.f32 %v4537_v52, %v20214_v50  ;;  %v17727_v38 = vpop.f32.mrb[185].mxu1  ;;  %6966 = vmatmul.mubr.f32.gmra.mrb[34].mxu1 %v17646_v53 }
 0x324   : > { %v4316_v31 = vpop.f32.mrb[170].mxu0  ;;  %6970 = vmatprep.mubr.f32.mxu1 %v6599_v26  ;;  %12602 = vmatpush3.bf16.msra.mxu1 %v12599_v56  ;;  %v5761_v26 = vrot.slane %v17566_v1, 1 }
 0x325   : > { %v4542_v9 = vadd.f32 %v11571_v49, %v4316_v31  ;;  %6174 = vmatmul.mubr.f32.gmra.mrb[20].mxu0 %v17503_v17  ;;  %v4318_v59 = vpop.f32.mrb[171].mxu0  ;;  %12604 = vmatprep.subr.bf16.mxu1 %v12603_v23  ;;  %v10709_v49 = vld [vmem:[%s19937_s1 + $0xbc0] sm:$0xff]  ;;  %v10710_v17 = vld [vmem:[%s19937_s1 + $0xbc8] sm:$0xff] }
 0x326   : > { %v17738_v21 = vpop.f32.mrb[186].mxu1  ;;  %6178 = vmatprep.mubr.f32.mxu0 %v5757_v33  ;;  %v20217_v33 = vrot.slane %v17108_v36, 1  ;;  %v12611_v16 = vpack.c.bf16 %v10710_v17, %v10709_v49  ;;  %v20218_v36 = vld [vmem:[#allocation19_spill] sm:$0xff]  ;;  %v5765_v49 = vrot.slane %v17583_v63, 1 }
 0x327   : > { %v17750_v56 = vadd.f32 %v4542_v9, %v20216_v54  ;;  %v17752_v52 = vpop.f32.mrb[187].mxu1  ;;  %6971 = vmatmul.mubr.f32.gmra.mrb[36].mxu1 %v17755_v60  ;;  %v6607_v9 = vrot.slane %v17741_v13, 1 }
 0x328   : > { %v4321_v15 = vpop.f32.mrb[172].mxu0  ;;  %6975 = vmatprep.mubr.f32.mxu1 %v6602_v58  ;;  %12606 = vmatpush3.bf16.msra.mxu1 %v12603_v23  ;;  %v6605_v31 = vsel %vm1152_vm1, %v20217_v33, %v6604_v4  ;;  %v5763_v58 = vsel %vm1152_vm1, %v5761_v26, %v5762_v0  ;;  %v5764_v4 = vrot.slane %v17580_v34, 1  ;;  %v17796_v26 = vld [vmem:[%s13472_s10 + $0x1b8] sm:$0x3]  ;;  %v17812_v33 = vld [vmem:[%s13472_s10 + $0x180] sm:$0xff] }
 0x329   : > { %v4547_v3 = vadd.f32 %v4546_v29, %v4321_v15  ;;  %6179 = vmatmul.mubr.f32.gmra.mrb[22].mxu0 %v17534_v57  ;;  %v4323_v50 = vpop.f32.mrb[173].mxu0  ;;  %12608 = vmatprep.subr.bf16.mxu1 %v12607_v42  ;;  %v10711_v29 = vld [vmem:[%s19937_s1 + $0xbd0] sm:$0xff]  ;;  %v10712_v57 = vld [vmem:[%s19937_s1 + $0xbd8] sm:$0xff]  ;;  %v20219_v15 = vrot.slane %v17140_v7, 1 }
 0x32a   : > { %v17766_v10 = vpop.f32.mrb[188].mxu1  ;;  %6183 = vmatprep.mubr.f32.mxu0 %v5760_v5  ;;  %v6610_v50 = vrot.slane %v17769_v47, 1  ;;  %v12615_v0 = vpack.c.bf16 %v10712_v57, %v10711_v29  ;;  %v5768_v29 = vrot.slane %v17614_v40, 1 }
 0x32b   : > { %v17778_v23 = vadd.f32 %v4547_v3, %v20218_v36  ;;  %v17780_v59 = vpop.f32.mrb[189].mxu1  ;;  %6976 = vmatmul.mubr.f32.gmra.mrb[38].mxu1 %v17783_v27  ;;  %v6608_v3 = vsel %vm1152_vm1, %v20219_v15, %v6607_v9  ;;  %v5767_v9 = vrot.slane %v17608_v14, 1  ;;  %v6613_v36 = vrot.slane %v17796_v26, 1  ;;  %v17842_v15 = vld [vmem:[%s13472_s10 + $0x190] sm:$0xff] }
 0x32c   : > { %v4326_v17 = vpop.f32.mrb[174].mxu0  ;;  %6980 = vmatprep.mubr.f32.mxu1 %v6605_v31  ;;  %12610 = vmatpush3.bf16.msra.mxu1 %v12607_v42  ;;  %v5766_v31 = vsel %vm1152_vm1, %v5764_v4, %v5765_v49  ;;  %v17825_v49 = vld [vmem:[%s13472_s10 + $0x1e0] sm:$0xff] }
 0x32d   : > { %v4552_v54 = vadd.f32 %v17690_v24, %v4326_v17  ;;  %6184 = vmatmul.mubr.f32.gmra.mrb[24].mxu0 %v17554_v48  ;;  %v4328_v5 = vpop.f32.mrb[175].mxu0  ;;  %12612 = vmatprep.subr.bf16.mxu1 %v12611_v16  ;;  %v10713_v24 = vld [vmem:[%s19937_s1 + $0xbe0] sm:$0xff]  ;;  %v10714_v48 = vld [vmem:[%s19937_s1 + $0xbe8] sm:$0xff]  ;;  %v20220_v17 = vrot.slane %v17170_v25, 1 }
 0x32e   : > { %v17798_v63 = vpop.f32.mrb[190].mxu1  ;;  %6188 = vmatprep.mubr.f32.mxu0 %v5763_v58  ;;  %v17830_v5 = vld [vmem:[%s13472_s10 + $0x1e8] sm:$0x3] }
 0x32f   : > { %v17807_v7 = vadd.f32 %v4552_v54, %v17076_v51  ;;  %v17809_v42 = vpop.f32.mrb[191].mxu1  ;;  %6981 = vmatmul.mubr.f32.gmra.mrb[40].mxu1 %v17812_v33  ;;  %v6611_v4 = vsel %vm1152_vm1, %v20220_v17, %v6610_v50  ;;  %v12619_v54 = vpack.c.bf16 %v10714_v48, %v10713_v24  ;;  %v6719_v50 = vrot.slane %v17617_v6, 2  ;;  %v17869_v17 = vld [vmem:[%s13472_s10 + $0x1a0] sm:$0xff] }
 0x330   : > { %v4331_v57 = vpop.f32.mrb[176].mxu0  ;;  %6985 = vmatprep.mubr.f32.mxu1 %v6608_v3  ;;  %12614 = vmatpush3.bf16.msra.mxu1 %v12611_v16  ;;  %v5769_v3 = vsel %vm1152_vm1, %v5767_v9, %v5768_v29  ;;  %v6720_v24 = vrot.slane %v17620_v46, 2  ;;  %v6615_v9 = vrot.slane %v17825_v49, 1  ;;  %v6616_v6 = vrot.slane %v17830_v5, 1 }
 0x331   : > { %v4557_v51 = vadd.f32 %v17727_v38, %v4331_v57  ;;  %6189 = vmatmul.mubr.f32.gmra.mrb[26].mxu0 %v17566_v1  ;;  %v4333_v58 = vpop.f32.mrb[177].mxu0  ;;  %12616 = vmatprep.subr.bf16.mxu1 %v12615_v0  ;;  %v10715_v38 = vld [vmem:[%s19937_s1 + $0xbf0] sm:$0xff]  ;;  %v10716_v1 = vld [vmem:[%s19937_s1 + $0xbf8] sm:$0xff]  ;;  %v6722_v29 = vrot.slane %v17646_v53, 2  ;;  %v10669_v53 = vld [vmem:[%s19937_s1 + $0xa80] sm:$0xff] }
 0x332   : > { %v17827_v40 = vpop.f32.mrb[192].mxu1  ;;  %6193 = vmatprep.mubr.f32.mxu0 %v5766_v31  ;;  %v20221_v31 = vrot.slane %v17201_v61, 1  ;;  %v12623_v46 = vpack.c.bf16 %v10716_v1, %v10715_v38  ;;  %v6723_v58 = vrot.slane %v17655_v8, 2  ;;  %v10670_v8 = vld [vmem:[%s19937_s1 + $0xa88] sm:$0xff]  ;;  %v6725_v38 = vrot.slane %v17755_v60, 2 }
 0x333   : > { %v17839_v25 = vadd.f32 %v4557_v51, %v17096_v44  ;;  %v5130_v16 = vpop.f32.mrb[193].mxu1  ;;  %6986 = vmatmul.mubr.f32.gmra.mrb[42].mxu1 %v17842_v15  ;;  %v6729_v60 = vrot.slane %v17693_v22, 2 }
 0x334   : > { %v4336_v48 = vpop.f32.mrb[178].mxu0  ;;  %6990 = vmatprep.mubr.f32.mxu1 %v6611_v4  ;;  %v6614_v44 = vsel %vm1152_vm1, %v20221_v31, %v6613_v36  ;;  %12618 = vmatpush3.bf16.msra.mxu1 %v12615_v0  ;;  %v17860_v0 = vld [vmem:[%s13472_s10 + $0x1f0] sm:$0xff]  ;;  %v17863_v36 = vld [vmem:[%s13472_s10 + $0x1f8] sm:$0x3]  ;;  %v6721_v4 = vsel %vm1281_vm0, %v6719_v50, %v6720_v24  ;;  %v6617_v50 = vsel %vm1152_vm1, %v6615_v9, %v6616_v6  ;;  %v6731_v6 = vrot.slane %v17812_v33, 2 }
 0x335   : > { %v4562_v57 = vadd.f32 %v17713_v30, %v4336_v48  ;;  %6194 = vmatmul.mubr.f32.gmra.mrb[28].mxu0 %v17580_v34  ;;  %v4338_v51 = vpop.f32.mrb[179].mxu0  ;;  %12620 = vmatprep.subr.bf16.mxu1 %v12619_v54  ;;  %v6618_v24 = vrot.slane %v17860_v0, 1  ;;  %v6619_v48 = vrot.slane %v17863_v36, 1  ;;  %v12548_v31 = vpack.c.bf16 %v10670_v8, %v10669_v53  ;;  %v10671_v9 = vld [vmem:[%s19937_s1 + $0xa90] sm:$0xff] }
 0x336   : > { %v17857_v61 = vpop.f32.mrb[194].mxu1  ;;  %6198 = vmatprep.mubr.f32.mxu0 %v5769_v3  ;;  %v17898_v51 = vld [vmem:[%s13472_s10 + $0x1b0] sm:$0xff]  ;;  %v6735_v8 = vrot.slane %v17741_v13, 2 }
 0x337   : > { %v17866_v34 = vadd.f32 %v4562_v57, %v17126_v12  ;;  %v5135_v30 = vpop.f32.mrb[195].mxu1  ;;  %6991 = vmatmul.mubr.f32.gmra.mrb[44].mxu1 %v17869_v17  ;;  %v6726_v12 = vrot.slane %v17673_v32, 2 }
 0x338   : > { %v4341_v1 = vpop.f32.mrb[180].mxu0  ;;  %6995 = vmatprep.mubr.f32.mxu1 %v6614_v44  ;;  %12622 = vmatpush3.bf16.msra.mxu1 %v12619_v54  ;;  %v6724_v54 = vsel %vm1281_vm0, %v6722_v29, %v6723_v58  ;;  %v17892_v44 = vld [vmem:[%s13472_s10 + $0x208] sm:$0x3] }
 0x339   : > { %v4567_v16 = vadd.f32 %v17752_v52, %v4341_v1  ;;  %6199 = vmatmul.mubr.f32.gmra.mrb[30].mxu0 %v17608_v14  ;;  %v4343_v3 = vpop.f32.mrb[181].mxu0  ;;  %12624 = vmatprep.subr.bf16.mxu1 %v12623_v46  ;;  %v6728_v52 = vrot.slane %v17783_v27, 2  ;;  %v6727_v22 = vsel %vm1281_vm0, %v6725_v38, %v6726_v12  ;;  %v10672_v27 = vld [vmem:[%s19937_s1 + $0xa98] sm:$0xff]  ;;  %v6622_v53 = vrot.slane %v17892_v44, 1 }
 0x33a   : > { %v17887_v32 = vpop.f32.mrb[196].mxu1  ;;  %11779 = vmatprep.mubr.f32.mxu0 %v6721_v4  ;;  %v6620_v4 = vsel %vm1152_vm1, %v6618_v24, %v6619_v48  ;;  %v12551_v33 = vpack.c.bf16 %v10672_v27, %v10671_v9  ;;  %v6737_v3 = vrot.slane %v17869_v17, 2  ;;  %v10675_v27 = vld [vmem:[%s19937_s1 + $0xab0] sm:$0xff] }
 0x33b   : > { %v17895_v14 = vadd.f32 %v4567_v16, %v17158_v20  ;;  %v5140_v57 = vpop.f32.mrb[197].mxu1  ;;  %6996 = vmatmul.mubr.f32.gmra.mrb[46].mxu1 %v17898_v51  ;;  %v6732_v20 = vrot.slane %v17716_v43, 2  ;;  %v6730_v43 = vsel %vm1281_vm0, %v6728_v52, %v6729_v60  ;;  %v10673_v16 = vld [vmem:[%s19937_s1 + $0xaa0] sm:$0xff]  ;;  %v20222_v60 = vrot.slane %v17292_v2, 1 }
 0x33c   : > { %v4346_v29 = vpop.f32.mrb[182].mxu0  ;;  %7000 = vmatprep.mubr.f32.mxu1 %v6617_v50  ;;  %12626 = vmatpush3.bf16.msra.mxu1 %v12623_v46  ;;  %v6734_v46 = vrot.slane %v17842_v15, 2  ;;  %v10674_v15 = vld [vmem:[%s19937_s1 + $0xaa8] sm:$0xff]  ;;  %v6741_v52 = vrot.slane %v17796_v26, 2 }
 0x33d   : > { %v4572_v58 = vadd.f32 %v17738_v21, %v4346_v29  ;;  %11780 = vmatmul.mubr.f32.vlgmr.msra.gmra.mrb[32].mxu0 %v6724_v54  ;;  %v4348_v30 = vpop.f32.mrb[183].mxu0  ;;  %12627 = vmatprep.subr.bf16.mxu1 %v20009_v19  ;;  %v17920_v21 = vld [vmem:[%s13472_s10 + $0x218] sm:$0x3]  ;;  %v6733_v13 = vsel %vm1281_vm0, %v6731_v6, %v6732_v20  ;;  %v6623_v54 = vsel %vm1152_vm1, %v20222_v60, %v6622_v53  ;;  %v6743_v6 = vrot.slane %v17825_v49, 2 }
 0x33e   : > { %v17915_v38 = vpop.f32.mrb[198].mxu1  ;;  %12549 = vmatpush1.bf16.msra.mxu0 %v12548_v31  ;;  %11782 = vmatprep.mubr.f32.mxu0 %v6727_v22  ;;  %v6625_v31 = vrot.slane %v17920_v21, 1  ;;  %v12554_v17 = vpack.c.bf16 %v10674_v15, %v10673_v16  ;;  %v6740_v22 = vrot.slane %v17898_v51, 2  ;;  %v10676_v51 = vld [vmem:[%s19937_s1 + $0xab8] sm:$0xff]  ;;  %v20223_v30 = vrot.slane %v17335_v41, 1  ;;  %v10678_v16 = vld [vmem:[%s19937_s1 + $0xac8] sm:$0xff] }
 0x33f   : > { %v17923_v12 = vadd.f32 %v4572_v58, %v17189_v45  ;;  %v5145_v1 = vpop.f32.mrb[199].mxu1  ;;  %7001 = vmatmul.mubr.f32.gmra.mrb[48].mxu1 %v17825_v49  ;;  %12550 = vmatprep.subr.bf16.mxu0 %v20009_v19  ;;  %v6738_v45 = vrot.slane %v17769_v47, 2  ;;  %v6736_v47 = vsel %vm1281_vm0, %v6734_v46, %v6735_v8  ;;  %v6747_v8 = vrot.slane %v17863_v36, 2  ;;  %v17977_v46 = vld [vmem:[%s13472_s10 + $0x238] sm:$0x3] }
 0x340   : > { %v4351_v50 = vpop.f32.mrb[184].mxu0  ;;  %7005 = vmatprep.mubr.f32.mxu1 %v6620_v4  ;;  %v6626_v4 = vsel %vm1152_vm1, %v20223_v30, %v6625_v31  ;;  %v17999_v31 = vld [vmem:[%s13472_s10 + $0x240] sm:$0xff] }
 0x341   : > { %v4577_v24 = vadd.f32 %v17780_v59, %v4351_v50  ;;  %11783 = vmatmul.mubr.f32.gmra.mrb[34].mxu0 %v6730_v43  ;;  %v4353_v48 = vpop.f32.mrb[185].mxu0  ;;  %v17947_v59 = vld [vmem:[%s13472_s10 + $0x228] sm:$0x3]  ;;  %v6739_v26 = vsel %vm1281_vm0, %v6737_v3, %v6738_v45  ;;  %v12557_v43 = vpack.c.bf16 %v10676_v51, %v10675_v27  ;;  %v6633_v30 = vrot.slane %v17999_v31, 1 }
 0x342   : > { %v17942_v57 = vpop.f32.mrb[200].mxu1  ;;  %12552 = vmatpush1.bf16.msra.mxu0 %v12551_v33  ;;  %11785 = vmatprep.mubr.f32.mxu0 %v6733_v13  ;;  %v6628_v53 = vrot.slane %v17947_v59, 1  ;;  %v17974_v33 = vld [vmem:[%s13472_s10 + $0x230] sm:$0xff]  ;;  %v12790_v13 = vld [vmem:[%s13472_s10 + $0x200] sm:$0xff] }
 0x343   : > { %v17950_v9 = vadd.f32 %v4577_v24, %v17220_v55  ;;  %v5150_v2 = vpop.f32.mrb[201].mxu1  ;;  %7006 = vmatmul.mubr.f32.gmra.mrb[50].mxu1 %v17860_v0  ;;  %12553 = vmatprep.subr.bf16.mxu0 %v20009_v19  ;;  %v6744_v55 = vrot.slane %v17830_v5, 2  ;;  %v6742_v5 = vsel %vm1281_vm0, %v6740_v22, %v6741_v52  ;;  %v6749_v15 = vrot.slane %v12790_v13, 2  ;;  %v18002_v52 = vld [vmem:[%s13472_s10 + $0x248] sm:$0x3] }
 0x344   : > { %v4356_v20 = vpop.f32.mrb[186].mxu0  ;;  %7010 = vmatprep.mubr.f32.mxu1 %v6623_v54  ;;  %v20224_v24 = vrot.slane %v17343_v28, 1  ;;  %v6630_v60 = vrot.slane %v17974_v33, 1  ;;  %v6631_v54 = vrot.slane %v17977_v46, 1  ;;  %v20225_v2 = vld [vmem:[#allocation13_spill] sm:$0xff] }
 0x345   : > { %v4582_v29 = vadd.f32 %v17766_v10, %v4356_v20  ;;  %11786 = vmatmul.mubr.f32.gmra.mrb[36].mxu0 %v6736_v47  ;;  %v4358_v58 = vpop.f32.mrb[187].mxu0  ;;  %v6746_v10 = vrot.slane %v17860_v0, 2  ;;  %v6745_v36 = vsel %vm1281_vm0, %v6743_v6, %v6744_v55  ;;  %v10677_v0 = vld [vmem:[%s19937_s1 + $0xac0] sm:$0xff]  ;;  %v6753_v47 = vrot.slane %v17920_v21, 2  ;;  %v10679_v21 = vld [vmem:[%s19937_s1 + $0xad0] sm:$0xff]  ;;  %v10680_v6 = vld [vmem:[%s19937_s1 + $0xad8] sm:$0xff] }
 0x346   : > { %v17969_v49 = vpop.f32.mrb[202].mxu1  ;;  %12555 = vmatpush1.bf16.msra.mxu0 %v12554_v17  ;;  %11788 = vmatprep.mubr.f32.mxu0 %v6739_v26  ;;  %v6629_v48 = vsel %vm1152_vm1, %v20224_v24, %v6628_v53  ;;  %v12560_v28 = vpack.c.bf16 %v10678_v16, %v10677_v0  ;;  %v12791_v17 = vld [vmem:[%s13472_s10 + $0x210] sm:$0xff]  ;;  %v12792_v55 = vld [vmem:[%s13472_s10 + $0x220] sm:$0xff]  ;;  %v10524_v0 = vld [vmem:[%s13472_s10 + $0x258] sm:$0x3] }
 0x347   : > { %v17980_v41 = vadd.f32 %v4582_v29, %v17251_v39  ;;  %v5155_v1 = vpop.f32.mrb[203].mxu1  ;;  %7011 = vmatmul.mubr.f32.gmra.mrb[52].mxu1 %v12790_v13  ;;  %12556 = vmatprep.subr.bf16.mxu0 %v20009_v19  ;;  %v6750_v39 = vrot.slane %v17892_v44, 2  ;;  %v6752_v22 = vrot.slane %v12791_v17, 2  ;;  %v6755_v20 = vrot.slane %v12792_v55, 2  ;;  %v20226_v16 = vld [vmem:[#allocation22_spill] sm:$0xff] }
 0x348   : > { %v4361_v3 = vpop.f32.mrb[188].mxu0  ;;  %7015 = vmatprep.mubr.f32.mxu1 %v6626_v4  ;;  %v6756_v29 = vrot.slane %v17947_v59, 2  ;;  %v6634_v4 = vrot.slane %v18002_v52, 1  ;;  %v10681_v59 = vld [vmem:[%s19937_s1 + $0xae0] sm:$0xff]  ;;  %v12563_v13 = vpack.c.bf16 %v10680_v6, %v10679_v21  ;;  %v10684_v6 = vld [vmem:[%s19937_s1 + $0xaf8] sm:$0xff] }
 0x349   : > { %v4587_v45 = vadd.f32 %v17809_v42, %v4361_v3  ;;  %11789 = vmatmul.mubr.f32.gmra.mrb[38].mxu0 %v6742_v5  ;;  %v4363_v50 = vpop.f32.mrb[189].mxu0  ;;  %v6748_v42 = vsel %vm1281_vm0, %v6746_v10, %v6747_v8  ;;  %v6751_v51 = vsel %vm1281_vm0, %v6749_v15, %v6750_v39  ;;  %v6632_v5 = vsel %vm1152_vm1, %v6630_v60, %v6631_v54  ;;  %v18050_v60 = vld [vmem:[%s13472_s10 + $0x280] sm:$0xff]  ;;  %v10526_v54 = vld [vmem:[%s13472_s10 + $0x288] sm:$0x3] }
 0x34a   : > { %v18004_v44 = vpop.f32.mrb[204].mxu1  ;;  %12558 = vmatpush1.bf16.msra.mxu0 %v12557_v43  ;;  %11791 = vmatprep.mubr.f32.mxu0 %v6745_v36  ;;  %v6759_v43 = vrot.slane %v17977_v46, 2  ;;  %v6754_v1 = vsel %vm1281_vm0, %v6752_v22, %v6753_v47  ;;  %v10682_v36 = vld [vmem:[%s19937_s1 + $0xae8] sm:$0xff]  ;;  %v18038_v46 = vld [vmem:[%s13472_s10 + $0x250] sm:$0xff]  ;;  %v6757_v3 = vsel %vm1281_vm0, %v6755_v20, %v6756_v29  ;;  %v6762_v50 = vrot.slane %v18002_v52, 2 }
 0x34b   : > { %v18010_v26 = vadd.f32 %v4587_v45, %v20225_v2  ;;  %v5160_v27 = vpop.f32.mrb[205].mxu1  ;;  %7016 = vmatmul.mubr.f32.gmra.mrb[54].mxu1 %v12791_v17  ;;  %12559 = vmatprep.subr.bf16.mxu0 %v20009_v19  ;;  %v6761_v45 = vrot.slane %v17999_v31, 2  ;;  %v6636_v17 = vrot.slane %v18038_v46, 1  ;;  %v6637_v22 = vrot.slane %v10524_v0, 1 }
 0x34c   : > { %v4366_v58 = vpop.f32.mrb[190].mxu0  ;;  %7020 = vmatprep.mubr.f32.mxu1 %v6629_v48  ;;  %v6635_v48 = vsel %vm1152_vm1, %v6633_v30, %v6634_v4  ;;  %v6764_v21 = vrot.slane %v18038_v46, 2  ;;  %v6768_v30 = vrot.slane %v10526_v54, 2  ;;  %v18074_v4 = vld [vmem:[%s13472_s10 + $0x290] sm:$0xff] }
 0x34d   : > { %v4592_v53 = vadd.f32 %v17798_v63, %v4366_v58  ;;  %11792 = vmatmul.mubr.f32.gmra.mrb[40].mxu0 %v6748_v42  ;;  %v4368_v8 = vpop.f32.mrb[191].mxu0  ;;  %v6758_v63 = vrot.slane %v17974_v33, 2  ;;  %v6763_v29 = vsel %vm1281_vm0, %v6761_v45, %v6762_v50  ;;  %v6767_v58 = vrot.slane %v18050_v60, 2 }
 0x34e   : > { %v18030_v10 = vpop.f32.mrb[206].mxu1  ;;  %12561 = vmatpush1.bf16.msra.mxu0 %v12560_v28  ;;  %11794 = vmatprep.mubr.f32.mxu0 %v6751_v51  ;;  %v12566_v28 = vpack.c.bf16 %v10682_v36, %v10681_v59  ;;  %v6765_v51 = vrot.slane %v10524_v0, 2  ;;  %v20229_v8 = vld [vmem:[#allocation16_spill] sm:$0xff]  ;;  %v6639_v59 = vrot.slane %v18050_v60, 1  ;;  %v6638_v0 = vsel %vm1152_vm1, %v6636_v17, %v6637_v22 }
 0x34f   : > { %v18042_v15 = vadd.f32 %v4592_v53, %v20226_v16  ;;  %v5165_v39 = vpop.f32.mrb[207].mxu1  ;;  %7021 = vmatmul.mubr.f32.gmra.mrb[56].mxu1 %v12792_v55  ;;  %12562 = vmatprep.subr.bf16.mxu0 %v20009_v19  ;;  %v6760_v27 = vsel %vm1281_vm0, %v6758_v63, %v6759_v43  ;;  %v20227_v55 = vld [vmem:[#allocation21_spill] sm:$0xff]  ;;  %v18077_v53 = vld [vmem:[%s13472_s10 + $0x298] sm:$0x3]  ;;  %v6770_v50 = vrot.slane %v18074_v4, 2  ;;  %v10686_v17 = vld [vmem:[%s19937_s1 + $0xb08] sm:$0xff] }
 0x350   : > { %v11621_v24 = vpop.f32.mrb[192].mxu0  ;;  %7025 = vmatprep.mubr.f32.mxu1 %v6632_v5  ;;  %v6766_v45 = vsel %vm1281_vm0, %v6764_v21, %v6765_v51 }
 0x351   : > { %v5359_v47 = vadd.f32 %v11621_v24, %v17857_v61  ;;  %v5353_v42 = vpop.f32.mrb[193].mxu0  ;;  %11795 = vmatmul.mubr.f32.gmra.mrb[42].mxu0 %v6754_v1  ;;  %v10683_v61 = vld [vmem:[%s19937_s1 + $0xaf0] sm:$0xff]  ;;  %v18084_v1 = vld [vmem:[%s13472_s10 + $0x2a0] sm:$0xff]  ;;  %v6771_v24 = vrot.slane %v18077_v53, 2 }
 0x352   : > { %v18055_v2 = vpop.f32.mrb[208].mxu1  ;;  %v5354_v52 = vadd.f32 %v5353_v42, %v17827_v40  ;;  %12564 = vmatpush1.bf16.msra.mxu0 %v12563_v13  ;;  %11797 = vmatprep.mubr.f32.mxu0 %v6757_v3  ;;  %v18087_v13 = vld [vmem:[%s13472_s10 + $0x2a8] sm:$0x3]  ;;  %v12569_v16 = vpack.c.bf16 %v10684_v6, %v10683_v61  ;;  %v6773_v22 = vrot.slane %v18084_v1, 2  ;;  %v6642_v61 = vrot.slane %v18074_v4, 1  ;;  %v18123_v6 = vld [vmem:[%s13472_s10 + $0x2c0] sm:$0xff] }
 0x353   : > { %v18067_v40 = vadd.f32 %v5359_v47, %v20227_v55  ;;  %v5170_v20 = vpop.f32.mrb[209].mxu1  ;;  %7026 = vmatmul.mubr.f32.gmra.mrb[58].mxu1 %v17974_v33  ;;  %12565 = vmatprep.subr.bf16.mxu0 %v20009_v19  ;;  %v6640_v33 = vrot.slane %v10526_v54, 1  ;;  %v20231_v54 = vld [vmem:[#allocation17_spill] sm:$0xff]  ;;  %v18126_v55 = vld [vmem:[%s13472_s10 + $0x2c8] sm:$0x3] }
 0x354   : > { %v18080_v5 = vadd.f32 %v5354_v52, %v20229_v8  ;;  %v11624_v43 = vpop.f32.mrb[194].mxu0  ;;  %7030 = vmatprep.mubr.f32.mxu1 %v6635_v48  ;;  %v18098_v48 = vld [vmem:[%s13472_s10 + $0x2b0] sm:$0xff]  ;;  %v6774_v52 = vrot.slane %v18087_v13, 2 }
 0x355   : > { %20228 = vst [vmem:[#allocation12_spill] sm:$0xff] %v18067_v40  ;;  %v5369_v63 = vadd.f32 %v11624_v43, %v17915_v38  ;;  %v5363_v36 = vpop.f32.mrb[195].mxu0  ;;  %11798 = vmatmul.mubr.f32.gmra.mrb[44].mxu0 %v6760_v27  ;;  %v18101_v38 = vld [vmem:[%s13472_s10 + $0x2b8] sm:$0x3]  ;;  %v20233_v27 = vld [vmem:[#allocation20_spill] sm:$0xff]  ;;  %v6641_v21 = vsel %vm1152_vm1, %v6639_v59, %v6640_v33  ;;  %v6772_v33 = vsel %vm1281_vm0, %v6770_v50, %v6771_v24  ;;  %v18151_v50 = vld [vmem:[%s13472_s10 + $0x2d0] sm:$0xff] }
 0x356   : > { %20230 = vst [vmem:[#allocation8_spill] sm:$0xff] %v18080_v5  ;;  %v18091_v39 = vpop.f32.mrb[210].mxu1  ;;  %v5364_v3 = vadd.f32 %v5363_v36, %v17887_v32  ;;  %12567 = vmatpush1.bf16.msra.mxu0 %v12566_v28  ;;  %11800 = vmatprep.mubr.f32.mxu0 %v6763_v29  ;;  %v6769_v32 = vsel %vm1281_vm0, %v6767_v58, %v6768_v30  ;;  %v10685_v28 = vld [vmem:[%s19937_s1 + $0xb00] sm:$0xff]  ;;  %v6643_v58 = vrot.slane %v18077_v53, 1  ;;  %v6776_v30 = vrot.slane %v18098_v48, 2  ;;  %v10688_v53 = vld [vmem:[%s19937_s1 + $0xb18] sm:$0xff] }
 0x357   : > { %v18104_v47 = vadd.f32 %v5369_v63, %v20231_v54  ;;  %v5175_v42 = vpop.f32.mrb[211].mxu1  ;;  %7031 = vmatmul.mubr.f32.gmra.mrb[60].mxu1 %v17999_v31  ;;  %12568 = vmatprep.subr.bf16.mxu0 %v20009_v19  ;;  %v6777_v8 = vrot.slane %v18101_v38, 2  ;;  %v12572_v63 = vpack.c.bf16 %v10686_v17, %v10685_v28  ;;  %v20235_v36 = vld [vmem:[#allocation24_spill] sm:$0xff]  ;;  %v18154_v24 = vld [vmem:[%s13472_s10 + $0x2d8] sm:$0x3]  ;;  %v20237_v54 = vld [vmem:[#allocation23_spill] sm:$0xff] }
 0x358   : > { %v18118_v51 = vadd.f32 %v5364_v3, %v20233_v27  ;;  %v11627_v31 = vpop.f32.mrb[196].mxu0  ;;  %7035 = vmatprep.mubr.f32.mxu1 %v6638_v0  ;;  %v6645_v28 = vrot.slane %v18084_v1, 1  ;;  %v18162_v17 = vld [vmem:[%s13472_s10 + $0x2e0] sm:$0xff] }
 0x359   : > { %20232 = vst [vmem:[#allocation15_spill] sm:$0xff] %v18104_v47  ;;  %v5379_v20 = vadd.f32 %v11627_v31, %v17969_v49  ;;  %v5373_v29 = vpop.f32.mrb[197].mxu0  ;;  %11801 = vmatmul.mubr.f32.gmra.mrb[46].mxu0 %v6766_v45  ;;  %v10687_v49 = vld [vmem:[%s19937_s1 + $0xb10] sm:$0xff]  ;;  %v6780_v45 = vrot.slane %v18126_v55, 2  ;;  %v6644_v31 = vsel %vm1152_vm1, %v6642_v61, %v6643_v58  ;;  %v10690_v61 = vld [vmem:[%s19937_s1 + $0xb28] sm:$0xff]  ;;  %v20239_v58 = vld [vmem:[#allocation26_spill] sm:$0xff] }
 0x35a   : > { %20234 = vst [vmem:[#allocation31_spill] sm:$0xff] %v18118_v51  ;;  %v18132_v43 = vpop.f32.mrb[212].mxu1  ;;  %v5374_v59 = vadd.f32 %v5373_v29, %v17942_v57  ;;  %12570 = vmatpush1.bf16.msra.mxu0 %v12569_v16  ;;  %11803 = vmatprep.mubr.f32.mxu0 %v6769_v32  ;;  %v6775_v57 = vsel %vm1281_vm0, %v6773_v22, %v6774_v52  ;;  %v6779_v16 = vrot.slane %v18123_v6, 2  ;;  %v18165_v22 = vld [vmem:[%s13472_s10 + $0x2e8] sm:$0x3] }
 0x35b   : > { %v18143_v0 = vadd.f32 %v5379_v20, %v20235_v36  ;;  %v5180_v3 = vpop.f32.mrb[213].mxu1  ;;  %7036 = vmatmul.mubr.f32.gmra.mrb[62].mxu1 %v18038_v46  ;;  %12571 = vmatprep.subr.bf16.mxu0 %v20009_v19  ;;  %v6646_v46 = vrot.slane %v18087_v13, 1  ;;  %v6778_v20 = vsel %vm1281_vm0, %v6776_v30, %v6777_v8  ;;  %v12575_v13 = vpack.c.bf16 %v10688_v53, %v10687_v49  ;;  %v18188_v49 = vld [vmem:[%s13472_s10 + $0x2f0] sm:$0xff]  ;;  %v18191_v53 = vld [vmem:[%s13472_s10 + $0x2f8] sm:$0x3] }
 0x35c   : > { %v18157_v42 = vadd.f32 %v5374_v59, %v20237_v54  ;;  %v11630_v32 = vpop.f32.mrb[198].mxu0  ;;  %7040 = vmatprep.mubr.f32.mxu1 %v6641_v21  ;;  %v6782_v59 = vrot.slane %v18151_v50, 2  ;;  %v6783_v36 = vrot.slane %v18154_v24, 2  ;;  %v6781_v8 = vsel %vm1281_vm0, %v6779_v16, %v6780_v45  ;;  %v20241_v3 = vld [vmem:[#allocation25_spill] sm:$0xff] }
 0x35d   : > { %20236 = vst [vmem:[#allocation9_spill] sm:$0xff] %v18143_v0  ;;  %v5389_v52 = vadd.f32 %v11630_v32, %v18030_v10  ;;  %v5383_v27 = vpop.f32.mrb[199].mxu0  ;;  %11804 = vmatmul.mubr.f32.gmra.mrb[48].mxu0 %v6772_v33  ;;  %v10689_v10 = vld [vmem:[%s19937_s1 + $0xb20] sm:$0xff]  ;;  %v6785_v33 = vrot.slane %v18162_v17, 2  ;;  %v6647_v32 = vsel %vm1152_vm1, %v6645_v28, %v6646_v46  ;;  %v6788_v46 = vrot.slane %v18188_v49, 2 }
 0x35e   : > { %20238 = vst [vmem:[#allocation14_spill] sm:$0xff] %v18157_v42  ;;  %v5183_v29 = vpop.f32.mrb[214].mxu1  ;;  %v5384_v21 = vadd.f32 %v5383_v27, %v18004_v44  ;;  %12573 = vmatpush1.bf16.msra.mxu0 %v12572_v63  ;;  %11806 = vmatprep.mubr.f32.mxu0 %v6775_v57  ;;  %v6786_v63 = vrot.slane %v18165_v22, 2  ;;  %v12578_v27 = vpack.c.bf16 %v10690_v61, %v10689_v10  ;;  %v18225_v61 = vld [vmem:[%s13472_s10 + $0x330] sm:$0xff]  ;;  %v6661_v47 = vrot.slane %v18191_v53, 1 }
 0x35f   : > { %v18180_v44 = vadd.f32 %v5389_v52, %v20239_v58  ;;  %v5185_v30 = vpop.f32.mrb[215].mxu1  ;;  %7041 = vmatmul.mubr.f32.gmra.mrb[64].mxu1 %v18050_v60  ;;  %12574 = vmatprep.subr.bf16.mxu0 %v20009_v19  ;;  %v18198_v60 = vld [vmem:[%s13472_s10 + $0x320] sm:$0xff]  ;;  %v18201_v52 = vld [vmem:[%s13472_s10 + $0x328] sm:$0x3]  ;;  %v6648_v58 = vrot.slane %v18098_v48, 1  ;;  %v6784_v28 = vsel %vm1281_vm0, %v6782_v59, %v6783_v36 }
 0x360   : > { %v18194_v57 = vadd.f32 %v5384_v21, %v20241_v3  ;;  %v11633_v54 = vpop.f32.mrb[200].mxu0  ;;  %7045 = vmatprep.mubr.f32.mxu1 %v6644_v31  ;;  %v6649_v30 = vrot.slane %v18101_v38, 1  ;;  %v10691_v31 = vld [vmem:[%s19937_s1 + $0xb30] sm:$0xff]  ;;  %v10692_v38 = vld [vmem:[%s19937_s1 + $0xb38] sm:$0xff]  ;;  %v6787_v59 = vsel %vm1281_vm0, %v6785_v33, %v6786_v63  ;;  %v6791_v36 = vrot.slane %v18198_v60, 2  ;;  %v20245_v3 = vld [vmem:[#allocation27_spill] sm:$0xff] }
 0x361   : > { %20240 = vst [vmem:[#allocation18_spill] sm:$0xff] %v18180_v44  ;;  %v5399_v16 = vadd.f32 %v11633_v54, %v18091_v39  ;;  %v5393_v45 = vpop.f32.mrb[201].mxu0  ;;  %11807 = vmatmul.mubr.f32.gmra.mrb[50].mxu0 %v6778_v20  ;;  %v6789_v39 = vrot.slane %v18191_v53, 2  ;;  %v20243_v20 = vld [vmem:[#allocation28_spill] sm:$0xff]  ;;  %v6792_v10 = vrot.slane %v18201_v52, 2  ;;  %v10700_v53 = vld [vmem:[%s19937_s1 + $0xb78] sm:$0xff] }
 0x362   : > { %20242 = vst [vmem:[#allocation19_spill] sm:$0xff] %v18194_v57  ;;  %v5188_v44 = vpop.f32.mrb[216].mxu1  ;;  %v5394_v21 = vadd.f32 %v5393_v45, %v18055_v2  ;;  %12576 = vmatpush1.bf16.msra.mxu0 %v12575_v13  ;;  %11809 = vmatprep.mubr.f32.mxu0 %v6781_v8  ;;  %v18228_v8 = vld [vmem:[%s13472_s10 + $0x338] sm:$0x3]  ;;  %v6651_v45 = vrot.slane %v18123_v6, 1  ;;  %v12581_v57 = vpack.c.bf16 %v10692_v38, %v10691_v31  ;;  %v18261_v31 = vld [vmem:[%s13472_s10 + $0x350] sm:$0xff] }
 0x363   : > { %v18217_v2 = vadd.f32 %v5399_v16, %v20243_v20  ;;  %v5190_v13 = vpop.f32.mrb[217].mxu1  ;;  %7046 = vmatmul.mubr.f32.gmra.mrb[66].mxu1 %v18074_v4  ;;  %12577 = vmatprep.subr.bf16.mxu0 %v20009_v19  ;;  %v6652_v4 = vrot.slane %v18126_v55, 1  ;;  %v18236_v20 = vld [vmem:[%s13472_s10 + $0x340] sm:$0xff]  ;;  %v18239_v33 = vld [vmem:[%s13472_s10 + $0x348] sm:$0x3]  ;;  %v6794_v55 = vrot.slane %v18225_v61, 2 }
 0x364   : > { %v18231_v54 = vadd.f32 %v5394_v21, %v20245_v3  ;;  %v11636_v16 = vpop.f32.mrb[202].mxu0  ;;  %7050 = vmatprep.mubr.f32.mxu1 %v6647_v32  ;;  %v6790_v32 = vsel %vm1281_vm0, %v6788_v46, %v6789_v39  ;;  %v6795_v3 = vrot.slane %v18228_v8, 2  ;;  %v6797_v46 = vrot.slane %v18236_v20, 2  ;;  %v18264_v38 = vld [vmem:[%s13472_s10 + $0x358] sm:$0x3] }
 0x365   : > { %20244 = vst [vmem:[#allocation13_spill] sm:$0xff] %v18217_v2  ;;  %v5409_v63 = vadd.f32 %v11636_v16, %v5183_v29  ;;  %v5403_v13 = vpop.f32.mrb[203].mxu0  ;;  %11810 = vmatmul.mubr.f32.gmra.mrb[52].mxu0 %v6784_v28  ;;  %v6650_v2 = vsel %vm1152_vm1, %v6648_v58, %v6649_v30  ;;  %v10693_v29 = vld [vmem:[%s19937_s1 + $0xb40] sm:$0xff]  ;;  %v10694_v58 = vld [vmem:[%s19937_s1 + $0xb48] sm:$0xff]  ;;  %v6793_v28 = vsel %vm1281_vm0, %v6791_v36, %v6792_v10  ;;  %v6798_v39 = vrot.slane %v18239_v33, 2 }
 0x366   : > { %20246 = vst [vmem:[#allocation22_spill] sm:$0xff] %v18231_v54  ;;  %v5193_v42 = vpop.f32.mrb[218].mxu1  ;;  %v5404_v21 = vadd.f32 %v5403_v13, %v18132_v43  ;;  %12579 = vmatpush1.bf16.msra.mxu0 %v12578_v27  ;;  %11812 = vmatprep.mubr.f32.mxu0 %v6787_v59  ;;  %v20247_v43 = vld [vmem:[#allocation30_spill] sm:$0xff]  ;;  %v20249_v59 = vld [vmem:[#allocation29_spill] sm:$0xff]  ;;  %v6653_v13 = vsel %vm1152_vm1, %v6651_v45, %v6652_v4  ;;  %v6655_v54 = vrot.slane %v18154_v24, 1  ;;  %v6800_v45 = vrot.slane %v18261_v31, 2 }
 0x367   : > { %v18253_v30 = vadd.f32 %v5409_v63, %v20247_v43  ;;  %v5195_v27 = vpop.f32.mrb[219].mxu1  ;;  %7051 = vmatmul.mubr.f32.gmra.mrb[68].mxu1 %v18084_v1  ;;  %12580 = vmatprep.subr.bf16.mxu0 %v20009_v19  ;;  %v18271_v1 = vld [vmem:[%s13472_s10 + $0x360] sm:$0xff]  ;;  %v18274_v43 = vld [vmem:[%s13472_s10 + $0x368] sm:$0x3]  ;;  %v10695_v4 = vld [vmem:[%s19937_s1 + $0xb50] sm:$0xff] }
 0x368   : > { %v18267_v16 = vadd.f32 %v5404_v21, %v20249_v59  ;;  %v11639_v63 = vpop.f32.mrb[204].mxu0  ;;  %7055 = vmatprep.mubr.f32.mxu1 %v6650_v2  ;;  %v12584_v27 = vpack.c.bf16 %v10694_v58, %v10693_v29  ;;  %v6796_v2 = vsel %vm1281_vm0, %v6794_v55, %v6795_v3  ;;  %v10696_v24 = vld [vmem:[%s19937_s1 + $0xb58] sm:$0xff]  ;;  %v6799_v55 = vsel %vm1281_vm0, %v6797_v46, %v6798_v39  ;;  %v18296_v58 = vld [vmem:[%s13472_s10 + $0x370] sm:$0xff]  ;;  %v20253_v59 = vld [vmem:[#allocation11_spill] sm:$0xff] }
 0x369   : > { %20248 = vst [vmem:[#allocation21_spill] sm:$0xff] %v18253_v30  ;;  %v5419_v36 = vadd.f32 %v11639_v63, %v5193_v42  ;;  %v5413_v10 = vpop.f32.mrb[205].mxu0  ;;  %11813 = vmatmul.mubr.f32.gmra.mrb[54].mxu0 %v6790_v32  ;;  %v6654_v30 = vrot.slane %v18151_v50, 1  ;;  %v6801_v42 = vrot.slane %v18264_v38, 2  ;;  %v6803_v3 = vrot.slane %v18271_v1, 2 }
 0x36a   : > { %20250 = vst [vmem:[#allocation16_spill] sm:$0xff] %v18267_v16  ;;  %v5198_v0 = vpop.f32.mrb[220].mxu1  ;;  %v5414_v21 = vadd.f32 %v5413_v10, %v5188_v44  ;;  %12582 = vmatpush1.bf16.msra.mxu0 %v12581_v57  ;;  %11815 = vmatprep.mubr.f32.mxu0 %v6793_v28  ;;  %v20251_v44 = vld [vmem:[#allocation32_spill] sm:$0xff]  ;;  %v6804_v29 = vrot.slane %v18274_v43, 2  ;;  %v18299_v28 = vld [vmem:[%s13472_s10 + $0x378] sm:$0x3]  ;;  %v12587_v39 = vpack.c.bf16 %v10696_v24, %v10695_v4 }
 0x36b   : > { %v18288_v32 = vadd.f32 %v5419_v36, %v20251_v44  ;;  %v5200_v57 = vpop.f32.mrb[221].mxu1  ;;  %7056 = vmatmul.mubr.f32.gmra.mrb[70].mxu1 %v18098_v48  ;;  %12583 = vmatprep.subr.bf16.mxu0 %v20009_v19  ;;  %v18305_v10 = vld [vmem:[%s13472_s10 + $0x380] sm:$0xff]  ;;  %v18308_v48 = vld [vmem:[%s13472_s10 + $0x388] sm:$0x3]  ;;  %v6656_v46 = vsel %vm1152_vm1, %v6654_v30, %v6655_v54  ;;  %v18328_v4 = vld [vmem:[%s13472_s10 + $0x390] sm:$0xff] }
 0x36c   : > { %v18302_v63 = vadd.f32 %v5414_v21, %v20253_v59  ;;  %v11642_v36 = vpop.f32.mrb[206].mxu0  ;;  %7060 = vmatprep.mubr.f32.mxu1 %v6653_v13  ;;  %v6657_v57 = vrot.slane %v18162_v17, 1  ;;  %v6802_v13 = vsel %vm1281_vm0, %v6800_v45, %v6801_v42  ;;  %v6806_v21 = vrot.slane %v18296_v58, 2  ;;  %v10697_v54 = vld [vmem:[%s19937_s1 + $0xb60] sm:$0xff]  ;;  %v18331_v24 = vld [vmem:[%s13472_s10 + $0x398] sm:$0x3] }
 0x36d   : > { %20252 = vst [vmem:[#allocation17_spill] sm:$0xff] %v18288_v32  ;;  %v5423_v44 = vpop.f32.mrb[207].mxu0  ;;  %11816 = vmatmul.mubr.f32.gmra.mrb[56].mxu0 %v6796_v2  ;;  %v6658_v32 = vrot.slane %v18165_v22, 1  ;;  %v6807_v2 = vrot.slane %v18299_v28, 2  ;;  %v10698_v22 = vld [vmem:[%s19937_s1 + $0xb68] sm:$0xff]  ;;  %v6809_v45 = vrot.slane %v18305_v10, 2 }
 0x36e   : > { %20254 = vst [vmem:[#allocation20_spill] sm:$0xff] %v18302_v63  ;;  %v5203_v16 = vpop.f32.mrb[222].mxu1  ;;  %v5424_v51 = vadd.f32 %v5423_v44, %v5198_v0  ;;  %12585 = vmatpush1.bf16.msra.mxu0 %v12584_v27  ;;  %11818 = vmatprep.mubr.f32.mxu0 %v6799_v55  ;;  %v6805_v27 = vsel %vm1281_vm0, %v6803_v3, %v6804_v29  ;;  %v6810_v42 = vrot.slane %v18308_v48, 2  ;;  %v20255_v55 = vld [vmem:[#allocation10_spill] sm:$0xff]  ;;  %v6660_v63 = vrot.slane %v18188_v49, 1 }
 0x36f   : > { %v5429_v0 = vadd.f32 %v11642_v36, %v5203_v16  ;;  %v5205_v30 = vpop.f32.mrb[223].mxu1  ;;  %7061 = vmatmul.mubr.f32.gmra.mrb[72].mxu1 %v18123_v6  ;;  %12586 = vmatprep.subr.bf16.mxu0 %v20009_v19  ;;  %v18337_v16 = vld [vmem:[%s13472_s10 + $0x150] sm:$0xff]  ;;  %v18340_v6 = vld [vmem:[%s13472_s10 + $0x158] sm:$0x3]  ;;  %v20257_v36 = vld [vmem:[#allocation7_spill] sm:$0xff]  ;;  %v6659_v29 = vsel %vm1152_vm1, %v6657_v57, %v6658_v32 }
 0x370   : > { %v18334_v59 = vadd.f32 %v5424_v51, %v20255_v55  ;;  %v11645_v44 = vpop.f32.mrb[208].mxu0  ;;  %7065 = vmatprep.mubr.f32.mxu1 %v6656_v46  ;;  %v6808_v51 = vsel %vm1281_vm0, %v6806_v21, %v6807_v2  ;;  %v12590_v46 = vpack.c.bf16 %v10698_v22, %v10697_v54  ;;  %v6812_v55 = vrot.slane %v18328_v4, 2  ;;  %v10699_v32 = vld [vmem:[%s19937_s1 + $0xb70] sm:$0xff]  ;;  %v18363_v54 = vld [vmem:[%s13472_s10 + $0x160] sm:$0xff]  ;;  %v18366_v22 = vld [vmem:[%s13472_s10 + $0x168] sm:$0x3] }
 0x371   : > { %v18343_v30 = vadd.f32 %v5429_v0, %v20257_v36  ;;  %v5433_v3 = vpop.f32.mrb[209].mxu0  ;;  %11819 = vmatmul.mubr.f32.gmra.mrb[58].mxu0 %v6802_v13  ;;  %v6813_v0 = vrot.slane %v18331_v24, 2  ;;  %v7508_v21 = vrot.slane %v18337_v16, 1  ;;  %v7509_v2 = vrot.slane %v18340_v6, 1 }
 0x372   : > { %20256 = vst [vmem:[#allocation24_spill] sm:$0xff] %v18334_v59  ;;  %v5208_v5 = vpop.f32.mrb[224].mxu1  ;;  %12588 = vmatpush1.bf16.msra.mxu0 %v12587_v39  ;;  %11821 = vmatprep.mubr.f32.mxu0 %v6805_v27  ;;  %v6811_v39 = vsel %vm1281_vm0, %v6809_v45, %v6810_v42  ;;  %v6662_v36 = vsel %vm1152_vm1, %v6660_v63, %v6661_v47  ;;  %v7511_v40 = vrot.slane %v18363_v54, 1 }
 0x373   : > { %20258 = vst [vmem:[#allocation23_spill] sm:$0xff] %v18343_v30  ;;  %v5434_v57 = vadd.f32 %v5433_v3, %v5208_v5  ;;  %v5210_v13 = vpop.f32.mrb[225].mxu1  ;;  %7066 = vmatmul.mubr.f32.gmra.mrb[74].mxu1 %v18151_v50  ;;  %12589 = vmatprep.subr.bf16.mxu0 %v20009_v19  ;;  %v10813_v5 = vld [vmem:[%s19937_s1 + $0xd00] sm:$0xff]  ;;  %v10814_v50 = vld [vmem:[%s19937_s1 + $0xd08] sm:$0xff]  ;;  %v6663_v3 = vrot.slane %v18198_v60, 1  ;;  %v6814_v59 = vsel %vm1281_vm0, %v6812_v55, %v6813_v0  ;;  %v10815_v0 = vld [vmem:[%s19937_s1 + $0xd10] sm:$0xff] }
 0x374   : > { %7070 = vmatprep.mubr.f32.mxu1 %v6659_v29  ;;  %v11648_v27 = vpop.f32.mrb[210].mxu0  ;;  %v6664_v29 = vrot.slane %v18201_v52, 1  ;;  %v12593_v30 = vpack.c.bf16 %v10700_v53, %v10699_v32  ;;  %v7510_v47 = vsel %vm1152_vm1, %v7508_v21, %v7509_v2  ;;  %v18387_v52 = vld [vmem:[%s13472_s10 + $0x170] sm:$0xff]  ;;  %v12675_v63 = vpack.c.bf16 %v10814_v50, %v10813_v5  ;;  %v18392_v55 = vld [vmem:[%s13472_s10 + $0x178] sm:$0x3] }
 0x375   : > { %v18375_v45 = vadd.f32 %v5434_v57, %v17658_v18  ;;  %11822 = vmatmul.mubr.f32.gmra.mrb[60].mxu0 %v6808_v51  ;;  %v5443_v42 = vpop.f32.mrb[211].mxu0  ;;  %v7512_v18 = vrot.slane %v18366_v22, 1  ;;  %v6667_v21 = vrot.slane %v18228_v8, 1 }
 0x376   : > { %v5213_v13 = vpop.f32.mrb[226].mxu1  ;;  %12591 = vmatpush1.bf16.msra.mxu0 %v12590_v46  ;;  %11824 = vmatprep.mubr.f32.mxu0 %v6811_v39  ;;  %v6665_v32 = vsel %vm1152_vm1, %v6663_v3, %v6664_v29  ;;  %v6666_v39 = vrot.slane %v18225_v61, 1  ;;  %v18414_v3 = vld [vmem:[%s13472_s10 + $0x188] sm:$0x3] }
 0x377   : > { %v5439_v51 = vadd.f32 %v11645_v44, %v5213_v13  ;;  %v5215_v57 = vpop.f32.mrb[227].mxu1  ;;  %7071 = vmatmul.mubr.f32.gmra.mrb[76].mxu1 %v18162_v17  ;;  %12592 = vmatprep.subr.bf16.mxu0 %v20009_v19  ;;  %v10816_v17 = vld [vmem:[%s19937_s1 + $0xd18] sm:$0xff]  ;;  %v7513_v5 = vsel %vm1152_vm1, %v7511_v40, %v7512_v18  ;;  %v18411_v13 = vld [vmem:[%s13472_s10 + $0x180] sm:$0xff]  ;;  %v6669_v18 = vrot.slane %v18236_v20, 1 }
 0x378   : > { %7075 = vmatprep.mubr.f32.mxu1 %v6662_v36  ;;  %v18389_v46 = vpop.f32.mrb[212].mxu0  ;;  %v12679_v29 = vpack.c.bf16 %v10816_v17, %v10815_v0  ;;  %v10817_v40 = vld [vmem:[%s19937_s1 + $0xd20] sm:$0xff]  ;;  %v7517_v0 = vrot.slane %v18411_v13, 1  ;;  %v7518_v17 = vrot.slane %v18414_v3, 1 }
 0x379   : > { %v18401_v44 = vadd.f32 %v5439_v51, %v17661_v11  ;;  %11825 = vmatmul.mubr.f32.gmra.mrb[62].mxu0 %v6814_v59  ;;  %v5453_v53 = vpop.f32.mrb[213].mxu0  ;;  %v7514_v11 = vrot.slane %v18387_v52, 1  ;;  %v7515_v59 = vrot.slane %v18392_v55, 1  ;;  %v6670_v51 = vrot.slane %v18239_v33, 1  ;;  %v18441_v33 = vld [vmem:[%s13472_s10 + $0x198] sm:$0x3] }
 0x37a   : > { %v5218_v2 = vpop.f32.mrb[228].mxu1  ;;  %12594 = vmatpush1.bf16.msra.mxu0 %v12593_v30  ;;  %7877 = vmatprep.mubr.f32.mxu0 %v7510_v47 }
 0x37b   : > { %v5444_v50 = vadd.f32 %v5443_v42, %v5218_v2  ;;  %v5220_v36 = vpop.f32.mrb[229].mxu1  ;;  %7076 = vmatmul.mubr.f32.gmra.mrb[78].mxu1 %v18188_v49  ;;  %12676 = vmatprep.subr.bf16.mxu0 %v12675_v63  ;;  %v10818_v49 = vld [vmem:[%s19937_s1 + $0xd28] sm:$0xff]  ;;  %v6668_v42 = vsel %vm1152_vm1, %v6666_v39, %v6667_v21  ;;  %v7516_v39 = vsel %vm1152_vm1, %v7514_v11, %v7515_v59  ;;  %v18438_v21 = vld [vmem:[%s13472_s10 + $0x190] sm:$0xff]  ;;  %v6673_v11 = vrot.slane %v18264_v38, 1 }
 0x37c   : > { %7080 = vmatprep.mubr.f32.mxu1 %v6665_v32  ;;  %v18416_v8 = vpop.f32.mrb[214].mxu0  ;;  %v12683_v2 = vpack.c.bf16 %v10818_v49, %v10817_v40  ;;  %v6672_v36 = vrot.slane %v18261_v31, 1  ;;  %v7519_v49 = vsel %vm1152_vm1, %v7517_v0, %v7518_v17  ;;  %v6675_v17 = vrot.slane %v18271_v1, 1 }
 0x37d   : > { %v18425_v30 = vadd.f32 %v5444_v50, %v17682_v35  ;;  %7878 = vmatmul.mubr.f32.vlgmr.msra.gmra.mrb[64].mxu0 %v18337_v16  ;;  %v18431_v57 = vpop.f32.mrb[215].mxu0 }
 0x37e   : > { %v5223_v47 = vpop.f32.mrb[230].mxu1  ;;  %7882 = vmatprep.mubr.f32.mxu0 %v7513_v5  ;;  %12678 = vmatpush3.bf16.msra.mxu0 %v12675_v63  ;;  %v10819_v5 = vld [vmem:[%s19937_s1 + $0xd30] sm:$0xff]  ;;  %v6671_v63 = vsel %vm1152_vm1, %v6669_v18, %v6670_v51  ;;  %v18465_v18 = vld [vmem:[%s13472_s10 + $0x1a0] sm:$0xff]  ;;  %v18468_v51 = vld [vmem:[%s13472_s10 + $0x1a8] sm:$0x3]  ;;  %v6674_v0 = vsel %vm1152_vm1, %v6672_v36, %v6673_v11 }
 0x37f   : > { %v5449_v35 = vadd.f32 %v11648_v27, %v5223_v47  ;;  %v5225_v32 = vpop.f32.mrb[231].mxu1  ;;  %7081 = vmatmul.mubr.f32.gmra.mrb[80].mxu1 %v18198_v60  ;;  %12680 = vmatprep.subr.bf16.mxu0 %v12679_v29  ;;  %v10820_v27 = vld [vmem:[%s19937_s1 + $0xd38] sm:$0xff]  ;;  %v18493_v11 = vld [vmem:[%s13472_s10 + $0x1b0] sm:$0xff] }
 0x380   : > { %7085 = vmatprep.mubr.f32.mxu1 %v6668_v42  ;;  %v18443_v50 = vpop.f32.mrb[216].mxu0  ;;  %v12687_v38 = vpack.c.bf16 %v10820_v27, %v10819_v5 }
 0x381   : > { %v18452_v60 = vadd.f32 %v5449_v35, %v17702_v37  ;;  %7883 = vmatmul.mubr.f32.gmra.mrb[66].mxu0 %v18363_v54  ;;  %v18458_v59 = vpop.f32.mrb[217].mxu0  ;;  %v7520_v37 = vrot.slane %v18438_v21, 1  ;;  %v7521_v35 = vrot.slane %v18441_v33, 1 }
 0x382   : > { %v5228_v40 = vpop.f32.mrb[232].mxu1  ;;  %7887 = vmatprep.mubr.f32.mxu0 %v7516_v39  ;;  %12682 = vmatpush3.bf16.msra.mxu0 %v12679_v29  ;;  %v6676_v39 = vrot.slane %v18274_v43, 1 }
 0x383   : > { %v5454_v42 = vadd.f32 %v5453_v53, %v5228_v40  ;;  %v5230_v47 = vpop.f32.mrb[233].mxu1  ;;  %7086 = vmatmul.mubr.f32.gmra.mrb[82].mxu1 %v18225_v61  ;;  %12684 = vmatprep.subr.bf16.mxu0 %v12683_v2  ;;  %v10821_v53 = vld [vmem:[%s19937_s1 + $0xd40] sm:$0xff]  ;;  %v10822_v61 = vld [vmem:[%s19937_s1 + $0xd48] sm:$0xff]  ;;  %v7524_v40 = vrot.slane %v18468_v51, 1  ;;  %v7522_v36 = vsel %vm1152_vm1, %v7520_v37, %v7521_v35  ;;  %v6678_v35 = vrot.slane %v18296_v58, 1 }
 0x384   : > { %7090 = vmatprep.mubr.f32.mxu1 %v6671_v63  ;;  %v18470_v32 = vpop.f32.mrb[218].mxu0  ;;  %v7523_v63 = vrot.slane %v18465_v18, 1  ;;  %v12691_v43 = vpack.c.bf16 %v10822_v61, %v10821_v53  ;;  %v18496_v47 = vld [vmem:[%s13472_s10 + $0x1b8] sm:$0x3]  ;;  %v6677_v37 = vsel %vm1152_vm1, %v6675_v17, %v6676_v39  ;;  %v6679_v53 = vrot.slane %v18299_v28, 1  ;;  %v18521_v39 = vld [vmem:[%s13472_s10 + $0x1c0] sm:$0xff] }
 0x385   : > { %v18479_v29 = vadd.f32 %v5454_v42, %v17725_v62  ;;  %7888 = vmatmul.mubr.f32.gmra.mrb[68].mxu0 %v18387_v52  ;;  %v18485_v5 = vpop.f32.mrb[219].mxu0  ;;  %v7527_v17 = vrot.slane %v18496_v47, 1 }
 0x386   : > { %v5233_v27 = vpop.f32.mrb[234].mxu1  ;;  %7892 = vmatprep.mubr.f32.mxu0 %v7519_v49  ;;  %12686 = vmatpush3.bf16.msra.mxu0 %v12683_v2  ;;  %v10823_v2 = vld [vmem:[%s19937_s1 + $0xd50] sm:$0xff] }
 0x387   : > { %v5459_v62 = vadd.f32 %v18389_v46, %v5233_v27  ;;  %v5235_v42 = vpop.f32.mrb[235].mxu1  ;;  %7091 = vmatmul.mubr.f32.gmra.mrb[84].mxu1 %v18236_v20  ;;  %12688 = vmatprep.subr.bf16.mxu0 %v12687_v38  ;;  %v10824_v46 = vld [vmem:[%s19937_s1 + $0xd58] sm:$0xff]  ;;  %v7525_v27 = vsel %vm1152_vm1, %v7523_v63, %v7524_v40  ;;  %v6680_v63 = vsel %vm1152_vm1, %v6678_v35, %v6679_v53  ;;  %v6681_v40 = vrot.slane %v18305_v10, 1  ;;  %v18549_v53 = vld [vmem:[%s13472_s10 + $0x1f0] sm:$0xff] }
 0x388   : > { %7095 = vmatprep.mubr.f32.mxu1 %v6674_v0  ;;  %v18498_v49 = vpop.f32.mrb[220].mxu0  ;;  %v12695_v28 = vpack.c.bf16 %v10824_v46, %v10823_v2  ;;  %v6682_v2 = vrot.slane %v18308_v48, 1 }
 0x389   : > { %v18507_v20 = vadd.f32 %v5459_v62, %v17750_v56  ;;  %7893 = vmatmul.mubr.f32.gmra.mrb[70].mxu0 %v18411_v13  ;;  %v18513_v61 = vpop.f32.mrb[221].mxu0  ;;  %v7526_v62 = vrot.slane %v18493_v11, 1 }
 0x38a   : > { %v5238_v0 = vpop.f32.mrb[236].mxu1  ;;  %7897 = vmatprep.mubr.f32.mxu0 %v7522_v36  ;;  %12690 = vmatpush3.bf16.msra.mxu0 %v12687_v38 }
 0x38b   : > { %20259 = vst [vmem:[#allocation26_spill] sm:$0xff] %v18507_v20  ;;  %v5464_v42 = vadd.f32 %v18431_v57, %v5238_v0  ;;  %v5240_v56 = vpop.f32.mrb[237].mxu1  ;;  %7096 = vmatmul.mubr.f32.gmra.mrb[86].mxu1 %v18261_v31  ;;  %v18524_v20 = vld [vmem:[%s13472_s10 + $0x1c8] sm:$0x3]  ;;  %12692 = vmatprep.subr.bf16.mxu0 %v12691_v43  ;;  %v10825_v57 = vld [vmem:[%s19937_s1 + $0xd60] sm:$0xff]  ;;  %v7529_v0 = vrot.slane %v18521_v39, 1  ;;  %v7528_v35 = vsel %vm1152_vm1, %v7526_v62, %v7527_v17 }
 0x38c   : > { %7100 = vmatprep.mubr.f32.mxu1 %v6677_v37  ;;  %v18526_v36 = vpop.f32.mrb[222].mxu0  ;;  %v10826_v31 = vld [vmem:[%s19937_s1 + $0xd68] sm:$0xff]  ;;  %v7530_v56 = vrot.slane %v18524_v20, 1  ;;  %v6683_v62 = vsel %vm1152_vm1, %v6681_v40, %v6682_v2  ;;  %v6684_v17 = vrot.slane %v18328_v4, 1 }
 0x38d   : > { %v18535_v38 = vadd.f32 %v5464_v42, %v17778_v23  ;;  %7898 = vmatmul.mubr.f32.gmra.mrb[72].mxu0 %v18438_v21  ;;  %v18541_v46 = vpop.f32.mrb[223].mxu0  ;;  %v12699_v48 = vpack.c.bf16 %v10826_v31, %v10825_v57  ;;  %v6685_v57 = vrot.slane %v18331_v24, 1  ;;  %v18578_v24 = vld [vmem:[%s13472_s10 + $0x208] sm:$0x3] }
 0x38e   : > { %v5243_v37 = vpop.f32.mrb[238].mxu1  ;;  %7902 = vmatprep.mubr.f32.mxu0 %v7525_v27  ;;  %12694 = vmatpush3.bf16.msra.mxu0 %v12691_v43  ;;  %v10827_v43 = vld [vmem:[%s19937_s1 + $0xd70] sm:$0xff] }
 0x38f   : > { %20260 = vst [vmem:[#allocation25_spill] sm:$0xff] %v18535_v38  ;;  %v5469_v23 = vadd.f32 %v18416_v8, %v5243_v37  ;;  %v5245_v42 = vpop.f32.mrb[239].mxu1  ;;  %7101 = vmatmul.mubr.f32.gmra.mrb[88].mxu1 %v18271_v1  ;;  %12696 = vmatprep.subr.bf16.mxu0 %v12695_v28  ;;  %v18552_v38 = vld [vmem:[%s13472_s10 + $0x1f8] sm:$0x3]  ;;  %v7531_v37 = vsel %vm1152_vm1, %v7529_v0, %v7530_v56  ;;  %v7637_v0 = vrot.slane %v18340_v6, 2  ;;  %v7640_v6 = vrot.slane %v18366_v22, 2 }
 0x390   : > { %7105 = vmatprep.mubr.f32.mxu1 %v6680_v63  ;;  %v18554_v27 = vpop.f32.mrb[224].mxu0  ;;  %v10828_v8 = vld [vmem:[%s19937_s1 + $0xd78] sm:$0xff]  ;;  %v7533_v40 = vrot.slane %v18552_v38, 1  ;;  %v10782_v22 = vld [vmem:[%s19937_s1 + $0xc08] sm:$0xff] }
 0x391   : > { %v18563_v1 = vadd.f32 %v5469_v23, %v17807_v7  ;;  %7903 = vmatmul.mubr.f32.gmra.mrb[74].mxu0 %v18465_v18  ;;  %v6047_v31 = vpop.f32.mrb[225].mxu0  ;;  %v7532_v23 = vrot.slane %v18549_v53, 1  ;;  %v12703_v2 = vpack.c.bf16 %v10828_v8, %v10827_v43 }
 0x392   : > { %v5248_v63 = vpop.f32.mrb[240].mxu1  ;;  %7907 = vmatprep.mubr.f32.mxu0 %v7528_v35  ;;  %12698 = vmatpush3.bf16.msra.mxu0 %v12695_v28 }
 0x393   : > { %20261 = vst [vmem:[#allocation28_spill] sm:$0xff] %v18563_v1  ;;  %v5474_v42 = vadd.f32 %v18458_v59, %v5248_v63  ;;  %v5250_v7 = vpop.f32.mrb[241].mxu1  ;;  %7106 = vmatmul.mubr.f32.gmra.mrb[90].mxu1 %v18296_v58  ;;  %12700 = vmatprep.subr.bf16.mxu0 %v12699_v48  ;;  %v18575_v1 = vld [vmem:[%s13472_s10 + $0x200] sm:$0xff]  ;;  %v6686_v58 = vsel %vm1152_vm1, %v6684_v17, %v6685_v57  ;;  %v7636_v59 = vrot.slane %v18337_v16, 2  ;;  %v7536_v17 = vrot.slane %v18578_v24, 1  ;;  %v18597_v57 = vld [vmem:[%s13472_s10 + $0x210] sm:$0xff] }
 0x394   : > { %7110 = vmatprep.mubr.f32.mxu1 %v6683_v62  ;;  %v18580_v35 = vpop.f32.mrb[226].mxu0  ;;  %v7535_v31 = vrot.slane %v18575_v1, 1  ;;  %v7639_v16 = vrot.slane %v18363_v54, 2  ;;  %v10781_v54 = vld [vmem:[%s19937_s1 + $0xc00] sm:$0xff] }
 0x395   : > { %v18583_v28 = vadd.f32 %v5474_v42, %v17839_v25  ;;  %7908 = vmatmul.mubr.f32.gmra.mrb[76].mxu0 %v18493_v11  ;;  %v6052_v56 = vpop.f32.mrb[227].mxu0  ;;  %v7534_v25 = vsel %vm1152_vm1, %v7532_v23, %v7533_v40  ;;  %v7638_v63 = vsel %vm1281_vm0, %v7636_v59, %v7637_v0  ;;  %v7643_v42 = vrot.slane %v18392_v55, 2 }
 0x396   : > { %v5253_v43 = vpop.f32.mrb[242].mxu1  ;;  %7912 = vmatprep.mubr.f32.mxu0 %v7531_v37  ;;  %12702 = vmatpush3.bf16.msra.mxu0 %v12699_v48  ;;  %v18600_v48 = vld [vmem:[%s13472_s10 + $0x218] sm:$0x3]  ;;  %v7642_v37 = vrot.slane %v18387_v52, 2  ;;  %v7538_v59 = vrot.slane %v18597_v57, 1  ;;  %v7646_v52 = vrot.slane %v18414_v3, 2  ;;  %v7641_v55 = vsel %vm1281_vm0, %v7639_v16, %v7640_v6 }
 0x397   : > { %v5479_v8 = vadd.f32 %v18443_v50, %v5253_v43  ;;  %v5255_v62 = vpop.f32.mrb[243].mxu1  ;;  %7111 = vmatmul.mubr.f32.gmra.mrb[92].mxu1 %v18305_v10  ;;  %12704 = vmatprep.subr.bf16.mxu0 %v12703_v2  ;;  %v7539_v0 = vrot.slane %v18600_v48, 1  ;;  %v12628_v56 = vpack.c.bf16 %v10782_v22, %v10781_v54  ;;  %v7645_v43 = vrot.slane %v18411_v13, 2  ;;  %v10783_v3 = vld [vmem:[%s19937_s1 + $0xc10] sm:$0xff]  ;;  %v10784_v13 = vld [vmem:[%s19937_s1 + $0xc18] sm:$0xff] }
 0x398   : > { %7115 = vmatprep.mubr.f32.mxu1 %v6686_v58  ;;  %v18602_v50 = vpop.f32.mrb[228].mxu0  ;;  %v7537_v58 = vsel %vm1152_vm1, %v7535_v31, %v7536_v17  ;;  %v7644_v62 = vsel %vm1281_vm0, %v7642_v37, %v7643_v42  ;;  %v7649_v31 = vrot.slane %v18441_v33, 2  ;;  %v7652_v37 = vrot.slane %v18468_v51, 2 }
 0x399   : > { %v18605_v10 = vadd.f32 %v5479_v8, %v17866_v34  ;;  %7913 = vmatmul.mubr.f32.gmra.mrb[78].mxu0 %v18521_v39  ;;  %v6057_v7 = vpop.f32.mrb[229].mxu0  ;;  %v12631_v33 = vpack.c.bf16 %v10784_v13, %v10783_v3  ;;  %v7651_v42 = vrot.slane %v18465_v18, 2  ;;  %v10786_v18 = vld [vmem:[%s19937_s1 + $0xc28] sm:$0xff]  ;;  %v7658_v3 = vrot.slane %v18524_v20, 2 }
 0x39a   : > { %v5258_v34 = vpop.f32.mrb[244].mxu1  ;;  %7917 = vmatprep.mubr.f32.mxu0 %v7534_v25  ;;  %12706 = vmatpush3.bf16.msra.mxu0 %v12703_v2  ;;  %v18626_v2 = vld [vmem:[%s13472_s10 + $0x220] sm:$0xff]  ;;  %v7648_v25 = vrot.slane %v18438_v21, 2  ;;  %v7647_v21 = vsel %vm1281_vm0, %v7645_v43, %v7646_v52  ;;  %v18654_v7 = vld [vmem:[%s13472_s10 + $0x230] sm:$0xff]  ;;  %v7657_v13 = vrot.slane %v18521_v39, 2  ;;  %v10788_v39 = vld [vmem:[%s19937_s1 + $0xc38] sm:$0xff] }
 0x39b   : > { %v5484_v23 = vadd.f32 %v18485_v5, %v5258_v34  ;;  %v5260_v40 = vpop.f32.mrb[245].mxu1  ;;  %7116 = vmatmul.mubr.f32.gmra.mrb[94].mxu1 %v18328_v4  ;;  %v18629_v5 = vld [vmem:[%s13472_s10 + $0x228] sm:$0x3]  ;;  %v7541_v54 = vrot.slane %v18626_v2, 1  ;;  %v7544_v43 = vrot.slane %v18654_v7, 1 }
 0x39c   : > { %11859 = vmatprep.mubr.f32.mxu1 %v7638_v63  ;;  %v18631_v8 = vpop.f32.mrb[230].mxu0  ;;  %v7540_v63 = vsel %vm1152_vm1, %v7538_v59, %v7539_v0  ;;  %v7542_v22 = vrot.slane %v18629_v5, 1  ;;  %v7650_v51 = vsel %vm1281_vm0, %v7648_v25, %v7649_v31  ;;  %v10785_v40 = vld [vmem:[%s19937_s1 + $0xc20] sm:$0xff]  ;;  %v7655_v59 = vrot.slane %v18496_v47, 2 }
 0x39d   : > { %v18634_v4 = vadd.f32 %v5484_v23, %v17895_v14  ;;  %7918 = vmatmul.mubr.f32.gmra.mrb[80].mxu0 %v18549_v53  ;;  %v6062_v17 = vpop.f32.mrb[231].mxu0  ;;  %v12634_v47 = vpack.c.bf16 %v10786_v18, %v10785_v40  ;;  %v18683_v25 = vld [vmem:[%s13472_s10 + $0x240] sm:$0xff]  ;;  %v18712_v40 = vld [vmem:[%s13472_s10 + $0x250] sm:$0xff] }
 0x39e   : > { %v5263_v14 = vpop.f32.mrb[246].mxu1  ;;  %7922 = vmatprep.mubr.f32.mxu0 %v7537_v58  ;;  %v7654_v58 = vrot.slane %v18493_v11, 2  ;;  %v7653_v11 = vsel %vm1281_vm0, %v7651_v42, %v7652_v37  ;;  %v7664_v42 = vrot.slane %v18578_v24, 2 }
 0x39f   : > { %v5489_v16 = vadd.f32 %v18470_v32, %v5263_v14  ;;  %v5265_v6 = vpop.f32.mrb[247].mxu1  ;;  %11860 = vmatmul.mubr.f32.vlgmr.msra.gmra.mrb[96].mxu1 %v7641_v55  ;;  %v18657_v32 = vld [vmem:[%s13472_s10 + $0x238] sm:$0x3]  ;;  %v10787_v14 = vld [vmem:[%s19937_s1 + $0xc30] sm:$0xff] }
 0x3a0   : > { %12629 = vmatpush1.bf16.msra.mxu1 %v12628_v56  ;;  %11862 = vmatprep.mubr.f32.mxu1 %v7644_v62  ;;  %v18659_v34 = vpop.f32.mrb[232].mxu0  ;;  %v7543_v56 = vsel %vm1152_vm1, %v7541_v54, %v7542_v22  ;;  %v7545_v62 = vrot.slane %v18657_v32, 1  ;;  %v7656_v20 = vsel %vm1281_vm0, %v7654_v58, %v7655_v59  ;;  %v7661_v6 = vrot.slane %v18552_v38, 2  ;;  %v10789_v59 = vld [vmem:[%s19937_s1 + $0xc40] sm:$0xff] }
 0x3a1   : > { %v18662_v23 = vadd.f32 %v5489_v16, %v17923_v12  ;;  %7923 = vmatmul.mubr.f32.gmra.mrb[82].mxu0 %v18575_v1  ;;  %12630 = vmatprep.subr.bf16.mxu1 %v20009_v19  ;;  %v6067_v12 = vpop.f32.mrb[233].mxu0  ;;  %v7660_v16 = vrot.slane %v18549_v53, 2  ;;  %v7659_v38 = vsel %vm1281_vm0, %v7657_v13, %v7658_v3  ;;  %v12637_v53 = vpack.c.bf16 %v10788_v39, %v10787_v14  ;;  %v18741_v13 = vld [vmem:[%s13472_s10 + $0x260] sm:$0xff]  ;;  %v10791_v39 = vld [vmem:[%s19937_s1 + $0xc50] sm:$0xff] }
 0x3a2   : > { %v5268_v0 = vpop.f32.mrb[248].mxu1  ;;  %7927 = vmatprep.mubr.f32.mxu0 %v7540_v63  ;;  %v7546_v37 = vsel %vm1152_vm1, %v7544_v43, %v7545_v62  ;;  %v7666_v12 = vrot.slane %v18597_v57, 2  ;;  %v7550_v62 = vrot.slane %v18712_v40, 1 }
 0x3a3   : > { %v5494_v52 = vadd.f32 %v18513_v61, %v5268_v0  ;;  %v5270_v55 = vpop.f32.mrb[249].mxu1  ;;  %11863 = vmatmul.mubr.f32.gmra.mrb[98].mxu1 %v7647_v21  ;;  %v18686_v61 = vld [vmem:[%s13472_s10 + $0x248] sm:$0x3]  ;;  %v7547_v21 = vrot.slane %v18683_v25, 1  ;;  %v7662_v24 = vsel %vm1281_vm0, %v7660_v16, %v7661_v6  ;;  %v7667_v0 = vrot.slane %v18600_v48, 2 }
 0x3a4   : > { %12632 = vmatpush1.bf16.msra.mxu1 %v12631_v33  ;;  %11865 = vmatprep.mubr.f32.mxu1 %v7650_v51  ;;  %v18688_v31 = vpop.f32.mrb[234].mxu0  ;;  %v7548_v33 = vrot.slane %v18686_v61, 1  ;;  %v7663_v51 = vrot.slane %v18575_v1, 2  ;;  %v10790_v1 = vld [vmem:[%s19937_s1 + $0xc48] sm:$0xff]  ;;  %v7672_v16 = vrot.slane %v18654_v7, 2  ;;  %v7673_v6 = vrot.slane %v18657_v32, 2 }
 0x3a5   : > { %v18691_v17 = vadd.f32 %v5494_v52, %v17950_v9  ;;  %7928 = vmatmul.mubr.f32.gmra.mrb[84].mxu0 %v18597_v57  ;;  %12633 = vmatprep.subr.bf16.mxu1 %v20009_v19  ;;  %v6072_v9 = vpop.f32.mrb[235].mxu0  ;;  %v12640_v48 = vpack.c.bf16 %v10790_v1, %v10789_v59  ;;  %v10794_v59 = vld [vmem:[%s19937_s1 + $0xc68] sm:$0xff]  ;;  %v7678_v1 = vrot.slane %v18712_v40, 2 }
 0x3a6   : > { %v5273_v63 = vpop.f32.mrb[250].mxu1  ;;  %7932 = vmatprep.mubr.f32.mxu0 %v7543_v56  ;;  %v7549_v43 = vsel %vm1152_vm1, %v7547_v21, %v7548_v33  ;;  %v7665_v57 = vsel %vm1281_vm0, %v7663_v51, %v7664_v42  ;;  %v7675_v42 = vrot.slane %v18683_v25, 2 }
 0x3a7   : > { %v5499_v54 = vadd.f32 %v18498_v49, %v5273_v63  ;;  %v5275_v22 = vpop.f32.mrb[251].mxu1  ;;  %11866 = vmatmul.mubr.f32.gmra.mrb[100].mxu1 %v7653_v11  ;;  %v18715_v49 = vld [vmem:[%s13472_s10 + $0x258] sm:$0x3]  ;;  %v7670_v11 = vrot.slane %v18629_v5, 2  ;;  %v7668_v5 = vsel %vm1281_vm0, %v7666_v12, %v7667_v0 }
 0x3a8   : > { %12635 = vmatpush1.bf16.msra.mxu1 %v12634_v47  ;;  %11868 = vmatprep.mubr.f32.mxu1 %v7656_v20  ;;  %v18717_v18 = vpop.f32.mrb[236].mxu0  ;;  %v7551_v3 = vrot.slane %v18715_v49, 1  ;;  %v7669_v47 = vrot.slane %v18626_v2, 2  ;;  %v7679_v12 = vrot.slane %v18715_v49, 2 }
 0x3a9   : > { %v18720_v58 = vadd.f32 %v5499_v54, %v17980_v41  ;;  %7933 = vmatmul.mubr.f32.gmra.mrb[86].mxu0 %v18626_v2  ;;  %12636 = vmatprep.subr.bf16.mxu1 %v20009_v19  ;;  %v6077_v41 = vpop.f32.mrb[237].mxu0  ;;  %v10792_v2 = vld [vmem:[%s19937_s1 + $0xc58] sm:$0xff] }
 0x3aa   : > { %v5278_v52 = vpop.f32.mrb[252].mxu1  ;;  %7937 = vmatprep.mubr.f32.mxu0 %v7546_v37  ;;  %v7552_v22 = vsel %vm1152_vm1, %v7550_v62, %v7551_v3  ;;  %v7553_v37 = vrot.slane %v18741_v13, 1  ;;  %v7671_v32 = vsel %vm1281_vm0, %v7669_v47, %v7670_v11  ;;  %v12643_v33 = vpack.c.bf16 %v10792_v2, %v10791_v39  ;;  %v20262_v47 = vld [vmem:[#allocation12_spill] sm:$0xff]  ;;  %v18816_v2 = vld [vmem:[%s13472_s10 + $0x2a0] sm:$0xff] }
 0x3ab   : > { %v5504_v55 = vadd.f32 %v18541_v46, %v5278_v52  ;;  %v5280_v56 = vpop.f32.mrb[253].mxu1  ;;  %11869 = vmatmul.mubr.f32.gmra.mrb[102].mxu1 %v7659_v38  ;;  %v18744_v46 = vld [vmem:[%s13472_s10 + $0x268] sm:$0x3]  ;;  %v18770_v38 = vld [vmem:[%s13472_s10 + $0x290] sm:$0xff]  ;;  %v7681_v41 = vrot.slane %v18741_v13, 2 }
 0x3ac   : > { %12638 = vmatpush1.bf16.msra.mxu1 %v12637_v53  ;;  %11871 = vmatprep.mubr.f32.mxu1 %v7662_v24  ;;  %v18746_v20 = vpop.f32.mrb[238].mxu0  ;;  %v7554_v21 = vrot.slane %v18744_v46, 1  ;;  %v10793_v24 = vld [vmem:[%s19937_s1 + $0xc60] sm:$0xff] }
 0x3ad   : > { %v18749_v14 = vadd.f32 %v5504_v55, %v18010_v26  ;;  %7938 = vmatmul.mubr.f32.gmra.mrb[88].mxu0 %v18654_v7  ;;  %12639 = vmatprep.subr.bf16.mxu1 %v20009_v19  ;;  %v6082_v26 = vpop.f32.mrb[239].mxu0  ;;  %v7676_v7 = vrot.slane %v18686_v61, 2  ;;  %v7674_v61 = vsel %vm1281_vm0, %v7672_v16, %v7673_v6  ;;  %v12646_v11 = vpack.c.bf16 %v10794_v59, %v10793_v24  ;;  %v10640_v16 = vld [vmem:[%s13472_s10 + $0x2a8] sm:$0x3] }
 0x3ae   : > { %v5283_v9 = vpop.f32.mrb[254].mxu1  ;;  %7942 = vmatprep.mubr.f32.mxu0 %v7549_v43  ;;  %v7555_v56 = vsel %vm1152_vm1, %v7553_v37, %v7554_v21  ;;  %v7556_v43 = vrot.slane %v18770_v38, 1  ;;  %v20263_v26 = vld [vmem:[#allocation8_spill] sm:$0xff]  ;;  %v7687_v24 = vrot.slane %v18816_v2, 2  ;;  %v7688_v59 = vrot.slane %v10640_v16, 2 }
 0x3af   : > { %v5509_v63 = vadd.f32 %v18526_v36, %v5283_v9  ;;  %v5285_v54 = vpop.f32.mrb[255].mxu1  ;;  %11872 = vmatmul.mubr.f32.gmra.mrb[104].mxu1 %v7665_v57  ;;  %v18773_v36 = vld [vmem:[%s13472_s10 + $0x298] sm:$0x3]  ;;  %v7677_v3 = vsel %vm1281_vm0, %v7675_v42, %v7676_v7  ;;  %v7559_v42 = vrot.slane %v18816_v2, 1 }
 0x3b0   : > { %12641 = vmatpush1.bf16.msra.mxu1 %v12640_v48  ;;  %11874 = vmatprep.mubr.f32.mxu1 %v7668_v5  ;;  %v18775_v53 = vpop.f32.mrb[240].mxu0  ;;  %v7557_v62 = vrot.slane %v18773_v36, 1  ;;  %v10796_v57 = vld [vmem:[%s19937_s1 + $0xc78] sm:$0xff]  ;;  %v7684_v5 = vrot.slane %v18770_v38, 2  ;;  %v7685_v39 = vrot.slane %v18773_v36, 2  ;;  %v7560_v36 = vrot.slane %v10640_v16, 1 }
 0x3b1   : > { %v18778_v51 = vadd.f32 %v5509_v63, %v18042_v15  ;;  %7943 = vmatmul.mubr.f32.gmra.mrb[90].mxu0 %v18683_v25  ;;  %12642 = vmatprep.subr.bf16.mxu1 %v20009_v19  ;;  %v6087_v15 = vpop.f32.mrb[241].mxu0  ;;  %v7682_v25 = vrot.slane %v18744_v46, 2 }
 0x3b2   : > { %v11701_v0 = vpop.f32.mrb[0].mxu1  ;;  %7947 = vmatprep.mubr.f32.mxu0 %v7552_v22  ;;  %v18827_v22 = vld [vmem:[%s13472_s10 + $0x2b8] sm:$0x3]  ;;  %v7558_v7 = vsel %vm1152_vm1, %v7556_v43, %v7557_v62 }
 0x3b3   : > { %v6276_v52 = vadd.f32 %v11701_v0, %v18580_v35  ;;  %v6270_v55 = vpop.f32.mrb[1].mxu1  ;;  %11875 = vmatmul.mubr.f32.gmra.mrb[106].mxu1 %v7671_v32  ;;  %v10795_v35 = vld [vmem:[%s19937_s1 + $0xc70] sm:$0xff]  ;;  %v7683_v54 = vsel %vm1281_vm0, %v7681_v41, %v7682_v25  ;;  %v18834_v32 = vld [vmem:[%s19937_s1 + $0xc80] sm:$0xff]  ;;  %v7686_v0 = vsel %vm1281_vm0, %v7684_v5, %v7685_v39  ;;  %v7691_v25 = vrot.slane %v18827_v22, 2  ;;  %v18879_v39 = vld [vmem:[%s13472_s10 + $0x2e8] sm:$0x3] }
 0x3b4   : > { %v6271_v49 = vadd.f32 %v6270_v55, %v18554_v27  ;;  %12644 = vmatpush1.bf16.msra.mxu1 %v12643_v33  ;;  %11877 = vmatprep.mubr.f32.mxu1 %v7674_v61  ;;  %v18805_v48 = vpop.f32.mrb[242].mxu0  ;;  %v7680_v27 = vsel %vm1281_vm0, %v7678_v1, %v7679_v12  ;;  %v18839_v33 = vld [vmem:[%s19937_s1 + $0xc88] sm:$0xff]  ;;  %v12649_v61 = vpack.c.bf16 %v10796_v57, %v10795_v35  ;;  %v20264_v12 = vld [vmem:[#allocation15_spill] sm:$0xff] }
 0x3b5   : > { %v18808_v46 = vadd.f32 %v6276_v52, %v20262_v47  ;;  %7948 = vmatmul.mubr.f32.gmra.mrb[92].mxu0 %v18712_v40  ;;  %12645 = vmatprep.subr.bf16.mxu1 %v20009_v19  ;;  %v6092_v6 = vpop.f32.mrb[243].mxu0  ;;  %v18824_v40 = vld [vmem:[%s13472_s10 + $0x2b0] sm:$0xff]  ;;  %v18855_v41 = vld [vmem:[%s13472_s10 + $0x2c0] sm:$0xff]  ;;  %v18858_v52 = vld [vmem:[%s13472_s10 + $0x2c8] sm:$0x3]  ;;  %v7561_v57 = vsel %vm1152_vm1, %v7559_v42, %v7560_v36 }
 0x3b6   : > { %v18820_v9 = vadd.f32 %v6271_v49, %v20263_v26  ;;  %v11704_v63 = vpop.f32.mrb[2].mxu1  ;;  %7952 = vmatprep.mubr.f32.mxu0 %v7555_v56  ;;  %v20265_v56 = vld [vmem:[#allocation31_spill] sm:$0xff]  ;;  %v18866_v49 = vld [vmem:[%s13472_s10 + $0x2d0] sm:$0xff]  ;;  %v7562_v47 = vrot.slane %v18824_v40, 1  ;;  %v7689_v6 = vsel %vm1281_vm0, %v7687_v24, %v7688_v59  ;;  %v7694_v26 = vrot.slane %v18858_v52, 2  ;;  %v20267_v42 = vld [vmem:[#allocation14_spill] sm:$0xff] }
 0x3b7   : > { %v6286_v37 = vadd.f32 %v11704_v63, %v18631_v8  ;;  %v6280_v21 = vpop.f32.mrb[3].mxu1  ;;  %11878 = vmatmul.mubr.f32.gmra.mrb[108].mxu1 %v7677_v3  ;;  %v18869_v3 = vld [vmem:[%s13472_s10 + $0x2d8] sm:$0x3]  ;;  %v18876_v5 = vld [vmem:[%s13472_s10 + $0x2e0] sm:$0xff]  ;;  %v18907_v24 = vld [vmem:[%s13472_s10 + $0x2f0] sm:$0xff] }
 0x3b8   : > { %v6281_v8 = vadd.f32 %v6280_v21, %v18602_v50  ;;  %12647 = vmatpush1.bf16.msra.mxu1 %v12646_v11  ;;  %11880 = vmatprep.mubr.f32.mxu1 %v7680_v27  ;;  %v18844_v1 = vpop.f32.mrb[244].mxu0  ;;  %v7690_v50 = vrot.slane %v18824_v40, 2  ;;  %v7563_v27 = vrot.slane %v18827_v22, 1  ;;  %v10800_v21 = vld [vmem:[%s19937_s1 + $0xc98] sm:$0xff] }
 0x3b9   : > { %v18847_v15 = vadd.f32 %v6286_v37, %v20264_v12  ;;  %7953 = vmatmul.mubr.f32.gmra.mrb[94].mxu0 %v18741_v13  ;;  %12648 = vmatprep.subr.bf16.mxu1 %v20009_v19  ;;  %v6097_v55 = vpop.f32.mrb[245].mxu0  ;;  %v12652_v13 = vpack.c.bf16 %v18839_v33, %v18834_v32  ;;  %v10799_v37 = vld [vmem:[%s19937_s1 + $0xc90] sm:$0xff]  ;;  %v7697_v32 = vrot.slane %v18869_v3, 2  ;;  %v18910_v59 = vld [vmem:[%s13472_s10 + $0x2f8] sm:$0x3] }
 0x3ba   : > { %v18861_v43 = vadd.f32 %v6281_v8, %v20265_v56  ;;  %v11707_v62 = vpop.f32.mrb[4].mxu1  ;;  %7957 = vmatprep.mubr.f32.mxu0 %v7558_v7  ;;  %v7696_v7 = vrot.slane %v18866_v49, 2  ;;  %v7699_v8 = vrot.slane %v18876_v5, 2  ;;  %v7566_v55 = vrot.slane %v18858_v52, 1  ;;  %v10802_v52 = vld [vmem:[%s19937_s1 + $0xca8] sm:$0xff] }
 0x3bb   : > { %v6296_v11 = vadd.f32 %v11707_v62, %v18688_v31  ;;  %v6290_v35 = vpop.f32.mrb[5].mxu1  ;;  %11881 = vmatmul.mubr.f32.gmra.mrb[110].mxu1 %v7683_v54  ;;  %v7693_v31 = vrot.slane %v18855_v41, 2  ;;  %v20266_v54 = vld [vmem:[#allocation9_spill] sm:$0xff] }
 0x3bc   : > { %v6291_v16 = vadd.f32 %v6290_v35, %v18659_v34  ;;  %12650 = vmatpush1.bf16.msra.mxu1 %v12649_v61  ;;  %11883 = vmatprep.mubr.f32.mxu1 %v7686_v0  ;;  %v18885_v63 = vpop.f32.mrb[246].mxu0  ;;  %v7692_v34 = vsel %vm1281_vm0, %v7690_v50, %v7691_v25  ;;  %v7700_v61 = vrot.slane %v18879_v39, 2  ;;  %v7564_v50 = vsel %vm1152_vm1, %v7562_v47, %v7563_v27 }
 0x3bd   : > { %v18888_v22 = vadd.f32 %v6296_v11, %v20266_v54  ;;  %7958 = vmatmul.mubr.f32.gmra.mrb[96].mxu0 %v18770_v38  ;;  %12651 = vmatprep.subr.bf16.mxu1 %v20009_v19  ;;  %v6102_v33 = vpop.f32.mrb[247].mxu0  ;;  %v7565_v25 = vrot.slane %v18855_v41, 1  ;;  %v7695_v62 = vsel %vm1281_vm0, %v7693_v31, %v7694_v26  ;;  %v12655_v11 = vpack.c.bf16 %v10800_v21, %v10799_v37  ;;  %v18938_v31 = vld [vmem:[%s13472_s10 + $0x308] sm:$0x3]  ;;  %v20269_v26 = vld [vmem:[#allocation19_spill] sm:$0xff]  ;;  %v18945_v37 = vld [vmem:[%s13472_s10 + $0x330] sm:$0xff] }
 0x3be   : > { %v18902_v36 = vadd.f32 %v6291_v16, %v20267_v42  ;;  %v11710_v38 = vpop.f32.mrb[6].mxu1  ;;  %7962 = vmatprep.mubr.f32.mxu0 %v7561_v57  ;;  %v20268_v57 = vld [vmem:[#allocation18_spill] sm:$0xff]  ;;  %v7702_v27 = vrot.slane %v18907_v24, 2  ;;  %v7703_v16 = vrot.slane %v18910_v59, 2  ;;  %v7568_v42 = vrot.slane %v18866_v49, 1 }
 0x3bf   : > { %v6306_v12 = vadd.f32 %v11710_v38, %v18746_v20  ;;  %v6300_v0 = vpop.f32.mrb[7].mxu1  ;;  %11884 = vmatmul.mubr.f32.gmra.mrb[112].mxu1 %v7689_v6  ;;  %v10801_v20 = vld [vmem:[%s19937_s1 + $0xca0] sm:$0xff]  ;;  %v18948_v21 = vld [vmem:[%s13472_s10 + $0x338] sm:$0x3]  ;;  %v7567_v33 = vsel %vm1152_vm1, %v7565_v25, %v7566_v55  ;;  %v7569_v38 = vrot.slane %v18869_v3, 1  ;;  %v20271_v25 = vld [vmem:[#allocation13_spill] sm:$0xff] }
 0x3c0   : > { %v6301_v56 = vadd.f32 %v6300_v0, %v18717_v18  ;;  %12653 = vmatpush1.bf16.msra.mxu1 %v12652_v13  ;;  %11886 = vmatprep.mubr.f32.mxu1 %v7692_v34  ;;  %v18918_v35 = vpop.f32.mrb[248].mxu0  ;;  %v7698_v13 = vsel %vm1281_vm0, %v7696_v7, %v7697_v32  ;;  %v18935_v6 = vld [vmem:[%s13472_s10 + $0x300] sm:$0xff]  ;;  %v18958_v0 = vld [vmem:[%s13472_s10 + $0x348] sm:$0x3]  ;;  %v7704_v3 = vsel %vm1281_vm0, %v7702_v27, %v7703_v16  ;;  %v18983_v16 = vld [vmem:[%s13472_s10 + $0x350] sm:$0xff] }
 0x3c1   : > { %v18927_v18 = vadd.f32 %v6306_v12, %v20268_v57  ;;  %7963 = vmatmul.mubr.f32.gmra.mrb[98].mxu0 %v18816_v2  ;;  %12654 = vmatprep.subr.bf16.mxu1 %v20009_v19  ;;  %v6107_v47 = vpop.f32.mrb[249].mxu0  ;;  %v7701_v2 = vsel %vm1281_vm0, %v7699_v8, %v7700_v61  ;;  %v18955_v12 = vld [vmem:[%s13472_s10 + $0x340] sm:$0xff]  ;;  %v12658_v61 = vpack.c.bf16 %v10802_v52, %v10801_v20  ;;  %v7708_v20 = vrot.slane %v18945_v37, 2  ;;  %v20273_v57 = vld [vmem:[#allocation22_spill] sm:$0xff] }
 0x3c2   : > { %v18941_v54 = vadd.f32 %v6301_v56, %v20269_v26  ;;  %v11713_v34 = vpop.f32.mrb[8].mxu1  ;;  %7967 = vmatprep.mubr.f32.mxu0 %v7564_v50  ;;  %v7706_v56 = vrot.slane %v18938_v31, 2  ;;  %v7709_v52 = vrot.slane %v18948_v21, 2  ;;  %v7711_v47 = vrot.slane %v18955_v12, 2  ;;  %v18986_v26 = vld [vmem:[%s13472_s10 + $0x358] sm:$0x3] }
 0x3c3   : > { %v6316_v7 = vadd.f32 %v11713_v34, %v18805_v48  ;;  %v6310_v32 = vpop.f32.mrb[9].mxu1  ;;  %11887 = vmatmul.mubr.f32.gmra.mrb[114].mxu1 %v7695_v62  ;;  %v7705_v48 = vrot.slane %v18935_v6, 2  ;;  %v10803_v62 = vld [vmem:[%s19937_s1 + $0xcb0] sm:$0xff]  ;;  %v7712_v27 = vrot.slane %v18958_v0, 2 }
 0x3c4   : > { %20270 = vst [vmem:[#allocation27_spill] sm:$0xff] %v18941_v54  ;;  %v6311_v8 = vadd.f32 %v6310_v32, %v18775_v53  ;;  %12656 = vmatpush1.bf16.msra.mxu1 %v12655_v11  ;;  %11889 = vmatprep.mubr.f32.mxu1 %v7698_v13  ;;  %v6110_v50 = vpop.f32.mrb[250].mxu0  ;;  %v10804_v11 = vld [vmem:[%s19937_s1 + $0xcb8] sm:$0xff]  ;;  %v7570_v32 = vsel %vm1152_vm1, %v7568_v42, %v7569_v38 }
 0x3c5   : > { %v18964_v55 = vadd.f32 %v6316_v7, %v20271_v25  ;;  %7968 = vmatmul.mubr.f32.gmra.mrb[100].mxu0 %v18824_v40  ;;  %12657 = vmatprep.subr.bf16.mxu1 %v20009_v19  ;;  %v6112_v53 = vpop.f32.mrb[251].mxu0  ;;  %v7571_v25 = vrot.slane %v18876_v5, 1  ;;  %v7710_v38 = vsel %vm1281_vm0, %v7708_v20, %v7709_v52  ;;  %v19022_v20 = vld [vmem:[%s13472_s10 + $0x378] sm:$0x3] }
 0x3c6   : > { %v18978_v13 = vadd.f32 %v6311_v8, %v20273_v57  ;;  %v11716_v40 = vpop.f32.mrb[10].mxu1  ;;  %7972 = vmatprep.mubr.f32.mxu0 %v7567_v33  ;;  %v7572_v8 = vrot.slane %v18879_v39, 1  ;;  %v7707_v53 = vsel %vm1281_vm0, %v7705_v48, %v7706_v56  ;;  %v10806_v39 = vld [vmem:[%s19937_s1 + $0xcc8] sm:$0xff]  ;;  %v7715_v48 = vrot.slane %v18986_v26, 2  ;;  %v19009_v56 = vld [vmem:[%s13472_s10 + $0x360] sm:$0xff] }
 0x3c7   : > { %20272 = vst [vmem:[#allocation30_spill] sm:$0xff] %v18964_v55  ;;  %v6326_v34 = vadd.f32 %v11716_v40, %v18885_v63  ;;  %v6320_v7 = vpop.f32.mrb[11].mxu1  ;;  %11890 = vmatmul.mubr.f32.gmra.mrb[116].mxu1 %v7701_v2  ;;  %v10805_v63 = vld [vmem:[%s19937_s1 + $0xcc0] sm:$0xff]  ;;  %v20275_v2 = vld [vmem:[#allocation21_spill] sm:$0xff] }
 0x3c8   : > { %20274 = vst [vmem:[#allocation29_spill] sm:$0xff] %v18978_v13  ;;  %v6321_v33 = vadd.f32 %v6320_v7, %v18844_v1  ;;  %12659 = vmatpush1.bf16.msra.mxu1 %v12658_v61  ;;  %11892 = vmatprep.mubr.f32.mxu1 %v7704_v3  ;;  %v6115_v57 = vpop.f32.mrb[252].mxu0  ;;  %v12661_v13 = vpack.c.bf16 %v10804_v11, %v10803_v62  ;;  %v7714_v61 = vrot.slane %v18983_v16, 2  ;;  %v19012_v3 = vld [vmem:[%s13472_s10 + $0x368] sm:$0x3]  ;;  %v19028_v55 = vld [vmem:[%s13472_s10 + $0x380] sm:$0xff] }
 0x3c9   : > { %v19001_v42 = vadd.f32 %v6326_v34, %v20275_v2  ;;  %7973 = vmatmul.mubr.f32.gmra.mrb[102].mxu0 %v18855_v41  ;;  %12660 = vmatprep.subr.bf16.mxu1 %v20009_v19  ;;  %v6117_v1 = vpop.f32.mrb[253].mxu0  ;;  %v20277_v62 = vld [vmem:[#allocation16_spill] sm:$0xff]  ;;  %v7713_v41 = vsel %vm1281_vm0, %v7711_v47, %v7712_v27  ;;  %v19019_v34 = vld [vmem:[%s13472_s10 + $0x370] sm:$0xff]  ;;  %v7573_v2 = vsel %vm1152_vm1, %v7571_v25, %v7572_v8 }
 0x3ca   : > { %v19015_v11 = vadd.f32 %v6321_v33, %v20277_v62  ;;  %v11719_v40 = vpop.f32.mrb[12].mxu1  ;;  %7977 = vmatprep.mubr.f32.mxu0 %v7570_v32  ;;  %v7574_v1 = vrot.slane %v18907_v24, 1  ;;  %v19031_v33 = vld [vmem:[%s13472_s10 + $0x388] sm:$0x3]  ;;  %v12664_v27 = vpack.c.bf16 %v10806_v39, %v10805_v63  ;;  %v20279_v25 = vld [vmem:[#allocation17_spill] sm:$0xff]  ;;  %v10808_v63 = vld [vmem:[%s19937_s1 + $0xcd8] sm:$0xff] }
 0x3cb   : > { %20276 = vst [vmem:[#allocation32_spill] sm:$0xff] %v19001_v42  ;;  %v6336_v52 = vadd.f32 %v11719_v40, %v6110_v50  ;;  %v6330_v7 = vpop.f32.mrb[13].mxu1  ;;  %11893 = vmatmul.mubr.f32.gmra.mrb[118].mxu1 %v7707_v53  ;;  %v7575_v42 = vrot.slane %v18910_v59, 1  ;;  %v7717_v50 = vrot.slane %v19009_v56, 2  ;;  %v7718_v53 = vrot.slane %v19012_v3, 2  ;;  %v20281_v62 = vld [vmem:[#allocation20_spill] sm:$0xff] }
 0x3cc   : > { %20278 = vst [vmem:[#allocation11_spill] sm:$0xff] %v19015_v11  ;;  %v6331_v32 = vadd.f32 %v6330_v7, %v18918_v35  ;;  %12662 = vmatpush1.bf16.msra.mxu1 %v12661_v13  ;;  %v6120_v47 = vpop.f32.mrb[254].mxu0  ;;  %11895 = vmatprep.mubr.f32.mxu1 %v7710_v38  ;;  %v7716_v35 = vsel %vm1281_vm0, %v7714_v61, %v7715_v48  ;;  %v10807_v13 = vld [vmem:[%s19937_s1 + $0xcd0] sm:$0xff]  ;;  %v7720_v39 = vrot.slane %v19019_v34, 2  ;;  %v7721_v38 = vrot.slane %v19022_v20, 2 }
 0x3cd   : > { %v19037_v8 = vadd.f32 %v6336_v52, %v20279_v25  ;;  %7978 = vmatmul.mubr.f32.gmra.mrb[104].mxu0 %v18866_v49  ;;  %12663 = vmatprep.subr.bf16.mxu1 %v20009_v19  ;;  %v6122_v59 = vpop.f32.mrb[255].mxu0  ;;  %v7723_v52 = vrot.slane %v19028_v55, 2  ;;  %v7724_v61 = vrot.slane %v19031_v33, 2  ;;  %v19056_v48 = vld [vmem:[%s13472_s10 + $0x390] sm:$0xff]  ;;  %v19059_v7 = vld [vmem:[%s13472_s10 + $0x398] sm:$0x3]  ;;  %v12667_v54 = vpack.c.bf16 %v10808_v63, %v10807_v13 }
 0x3ce   : > { %v19051_v40 = vadd.f32 %v6331_v32, %v20281_v62  ;;  %v11722_v49 = vpop.f32.mrb[14].mxu1  ;;  %7982 = vmatprep.mubr.f32.mxu0 %v7573_v2  ;;  %v7577_v11 = vrot.slane %v18935_v6, 1  ;;  %v7578_v32 = vrot.slane %v18938_v31, 1  ;;  %v20283_v31 = vld [vmem:[#allocation23_spill] sm:$0xff]  ;;  %v20285_v13 = vld [vmem:[#allocation24_spill] sm:$0xff] }
 0x3cf   : > { %20280 = vst [vmem:[#allocation10_spill] sm:$0xff] %v19037_v8  ;;  %v6346_v25 = vadd.f32 %v11722_v49, %v6120_v47  ;;  %v6340_v59 = vpop.f32.mrb[15].mxu1  ;;  %11896 = vmatmul.mubr.f32.gmra.mrb[120].mxu1 %v7713_v41  ;;  %v7576_v8 = vsel %vm1152_vm1, %v7574_v1, %v7575_v42  ;;  %v10809_v41 = vld [vmem:[%s19937_s1 + $0xce0] sm:$0xff]  ;;  %v10810_v42 = vld [vmem:[%s19937_s1 + $0xce8] sm:$0xff]  ;;  %v7722_v47 = vsel %vm1281_vm0, %v7720_v39, %v7721_v38 }
 0x3d0   : > { %20282 = vst [vmem:[#allocation7_spill] sm:$0xff] %v19051_v40  ;;  %v6341_v62 = vadd.f32 %v6340_v59, %v6115_v57  ;;  %12665 = vmatpush1.bf16.msra.mxu1 %v12664_v27  ;;  %11898 = vmatprep.mubr.f32.mxu1 %v7716_v35  ;;  %v6125_v2 = vpop.f32.mrb[0].mxu0  ;;  %v7719_v40 = vsel %vm1281_vm0, %v7717_v50, %v7718_v53  ;;  %v7726_v27 = vrot.slane %v19056_v48, 2  ;;  %v7727_v50 = vrot.slane %v19059_v7, 2  ;;  %v19080_v53 = vld [vmem:[%s13472_s10 + $0x3a0] sm:$0xff] }
 0x3d1   : > { %v19072_v1 = vadd.f32 %v6346_v25, %v20283_v31  ;;  %7983 = vmatmul.mubr.f32.gmra.mrb[106].mxu0 %v18876_v5  ;;  %12666 = vmatprep.subr.bf16.mxu1 %v20009_v19  ;;  %v6127_v57 = vpop.f32.mrb[1].mxu0  ;;  %v19083_v35 = vld [vmem:[%s13472_s10 + $0x3a8] sm:$0x3]  ;;  %v19089_v25 = vld [vmem:[%s13472_s10 + $0x160] sm:$0xff]  ;;  %v7725_v39 = vsel %vm1281_vm0, %v7723_v52, %v7724_v61  ;;  %v7579_v38 = vsel %vm1152_vm1, %v7577_v11, %v7578_v32  ;;  %v7580_v31 = vrot.slane %v18945_v37, 1 }
 0x3d2   : > { %v19086_v63 = vadd.f32 %v6341_v62, %v20285_v13  ;;  %v11725_v49 = vpop.f32.mrb[16].mxu1  ;;  %7987 = vmatprep.mubr.f32.mxu0 %v7576_v8  ;;  %v19092_v5 = vld [vmem:[%s13472_s10 + $0x168] sm:$0x3]  ;;  %v7581_v57 = vrot.slane %v18948_v21, 1  ;;  %v12670_v8 = vpack.c.bf16 %v10810_v42, %v10809_v41  ;;  %v7729_v13 = vrot.slane %v19080_v53, 2  ;;  %v10812_v21 = vld [vmem:[%s19937_s1 + $0xcf8] sm:$0xff] }
 0x3d3   : > { %20284 = vst [vmem:[#allocation12_spill] sm:$0xff] %v19072_v1  ;;  %v6350_v59 = vpop.f32.mrb[17].mxu1  ;;  %11899 = vmatmul.mubr.f32.gmra.mrb[122].mxu1 %v7719_v40  ;;  %v7728_v52 = vsel %vm1281_vm0, %v7726_v27, %v7727_v50  ;;  %v8425_v61 = vrot.slane %v19089_v25, 1  ;;  %v8426_v32 = vrot.slane %v19092_v5, 1  ;;  %v19115_v41 = vld [vmem:[%s13472_s10 + $0x170] sm:$0xff] }
 0x3d4   : > { %20286 = vst [vmem:[#allocation8_spill] sm:$0xff] %v19086_v63  ;;  %v6351_v1 = vadd.f32 %v6350_v59, %v6125_v2  ;;  %12668 = vmatpush1.bf16.msra.mxu1 %v12667_v54  ;;  %v6130_v62 = vpop.f32.mrb[2].mxu0  ;;  %11901 = vmatprep.mubr.f32.mxu1 %v7722_v47  ;;  %v7730_v63 = vrot.slane %v19083_v35, 2  ;;  %v10811_v54 = vld [vmem:[%s19937_s1 + $0xcf0] sm:$0xff]  ;;  %v19118_v42 = vld [vmem:[%s13472_s10 + $0x178] sm:$0x3]  ;;  %v7582_v50 = vsel %vm1152_vm1, %v7580_v31, %v7581_v57 }
 0x3d5   : > { %v6356_v40 = vadd.f32 %v11725_v49, %v6130_v62  ;;  %7988 = vmatmul.mubr.f32.gmra.mrb[108].mxu0 %v18907_v24  ;;  %12669 = vmatprep.subr.bf16.mxu1 %v20009_v19  ;;  %v6132_v11 = vpop.f32.mrb[3].mxu0  ;;  %v7583_v49 = vrot.slane %v18955_v12, 1  ;;  %v7584_v59 = vrot.slane %v18958_v0, 1  ;;  %v8428_v31 = vrot.slane %v19115_v41, 1 }
 0x3d6   : > { %v19112_v2 = vadd.f32 %v6351_v1, %v18375_v45  ;;  %v11728_v24 = vpop.f32.mrb[18].mxu1  ;;  %7992 = vmatprep.mubr.f32.mxu0 %v7579_v38  ;;  %v7731_v1 = vsel %vm1281_vm0, %v7729_v13, %v7730_v63  ;;  %v12673_v38 = vpack.c.bf16 %v10812_v21, %v10811_v54  ;;  %v8429_v57 = vrot.slane %v19118_v42, 1 }
 0x3d7   : > { %v19121_v47 = vadd.f32 %v6356_v40, %v18401_v44  ;;  %v6360_v27 = vpop.f32.mrb[19].mxu1  ;;  %11902 = vmatmul.mubr.f32.gmra.mrb[124].mxu1 %v7725_v39  ;;  %v8427_v39 = vsel %vm1152_vm1, %v8425_v61, %v8426_v32  ;;  %v19136_v40 = vld [vmem:[%s13472_s10 + $0x188] sm:$0x3]  ;;  %v7587_v11 = vrot.slane %v18986_v26, 1 }
 0x3d8   : > { %12671 = vmatpush1.bf16.msra.mxu1 %v12670_v8  ;;  %v6135_v45 = vpop.f32.mrb[4].mxu0  ;;  %11904 = vmatprep.mubr.f32.mxu1 %v7728_v52  ;;  %v19133_v8 = vld [vmem:[%s13472_s10 + $0x180] sm:$0xff]  ;;  %v8432_v32 = vrot.slane %v19136_v40, 1 }
 0x3d9   : > { %v6361_v62 = vadd.f32 %v6360_v27, %v6135_v45  ;;  %7993 = vmatmul.mubr.f32.gmra.mrb[110].mxu0 %v18935_v6  ;;  %12672 = vmatprep.subr.bf16.mxu1 %v20009_v19  ;;  %v6137_v44 = vpop.f32.mrb[5].mxu0  ;;  %v7585_v19 = vsel %vm1152_vm1, %v7583_v49, %v7584_v59  ;;  %v7586_v6 = vrot.slane %v18983_v16, 1  ;;  %v8431_v61 = vrot.slane %v19133_v8, 1  ;;  %v19154_v49 = vld [vmem:[%s13472_s10 + $0x198] sm:$0x3] }
 0x3da   : > { %v11731_v0 = vpop.f32.mrb[20].mxu1  ;;  %7997 = vmatprep.mubr.f32.mxu0 %v7582_v50  ;;  %v19151_v50 = vld [vmem:[%s13472_s10 + $0x190] sm:$0xff]  ;;  %v7589_v59 = vrot.slane %v19009_v56, 1  ;;  %v7590_v45 = vrot.slane %v19012_v3, 1 }
 0x3db   : > { %v19139_v63 = vadd.f32 %v6361_v62, %v18425_v30  ;;  %v6370_v13 = vpop.f32.mrb[21].mxu1  ;;  %11905 = vmatmul.mubr.f32.gmra.mrb[126].mxu1 %v7731_v1  ;;  %v8430_v30 = vsel %vm1152_vm1, %v8428_v31, %v8429_v57  ;;  %v8434_v44 = vrot.slane %v19151_v50, 1  ;;  %v19170_v57 = vld [vmem:[%s13472_s10 + $0x1a0] sm:$0xff] }
 0x3dc   : > { %12674 = vmatpush1.bf16.msra.mxu1 %v12673_v38  ;;  %v6140_v52 = vpop.f32.mrb[6].mxu0  ;;  %8794 = vmatprep.mubr.f32.mxu1 %v8427_v39  ;;  %v8435_v39 = vrot.slane %v19154_v49, 1 }
 0x3dd   : > { %v6366_v54 = vadd.f32 %v11728_v24, %v6140_v52  ;;  %7998 = vmatmul.mubr.f32.gmra.mrb[112].mxu0 %v18945_v37  ;;  %v6142_v21 = vpop.f32.mrb[7].mxu0  ;;  %v7588_v37 = vsel %vm1152_vm1, %v7586_v6, %v7587_v11  ;;  %v7592_v6 = vrot.slane %v19019_v34, 1  ;;  %v7593_v11 = vrot.slane %v19022_v20, 1  ;;  %v20287_v20 = vld [vmem:[#allocation26_spill] sm:$0xff] }
 0x3de   : > { %v19148_v27 = vpop.f32.mrb[22].mxu1  ;;  %8002 = vmatprep.mubr.f32.mxu0 %v7585_v19  ;;  %v19173_v19 = vld [vmem:[%s13472_s10 + $0x1a8] sm:$0x3] }
 0x3df   : > { %v19157_v26 = vadd.f32 %v6366_v54, %v18452_v60  ;;  %v6380_v24 = vpop.f32.mrb[23].mxu1  ;;  %8795 = vmatmul.mubr.f32.vlgmr.msra.gmra.mrb[128].mxu1 %v19089_v25  ;;  %v8433_v60 = vsel %vm1152_vm1, %v8431_v61, %v8432_v32  ;;  %v8438_v61 = vrot.slane %v19173_v19, 1 }
 0x3e0   : > { %v6145_v1 = vpop.f32.mrb[8].mxu0  ;;  %8799 = vmatprep.mubr.f32.mxu1 %v8430_v30  ;;  %v8437_v30 = vrot.slane %v19170_v57, 1 }
 0x3e1   : > { %v6371_v38 = vadd.f32 %v6370_v13, %v6145_v1  ;;  %8003 = vmatmul.mubr.f32.gmra.mrb[114].mxu0 %v18955_v12  ;;  %v6147_v62 = vpop.f32.mrb[9].mxu0  ;;  %v7591_v12 = vsel %vm1152_vm1, %v7589_v59, %v7590_v45  ;;  %v19192_v59 = vld [vmem:[%s13472_s10 + $0x1b8] sm:$0x3]  ;;  %v7595_v1 = vrot.slane %v19028_v55, 1 }
 0x3e2   : > { %v19167_v31 = vpop.f32.mrb[24].mxu1  ;;  %8007 = vmatprep.mubr.f32.mxu0 %v7588_v37  ;;  %v19189_v37 = vld [vmem:[%s13472_s10 + $0x1b0] sm:$0xff] }
 0x3e3   : > { %v19176_v3 = vadd.f32 %v6371_v38, %v18479_v29  ;;  %v6390_v13 = vpop.f32.mrb[25].mxu1  ;;  %8800 = vmatmul.mubr.f32.gmra.mrb[130].mxu1 %v19115_v41  ;;  %v8436_v29 = vsel %vm1152_vm1, %v8434_v44, %v8435_v39  ;;  %v7596_v38 = vrot.slane %v19031_v33, 1  ;;  %v8439_v39 = vsel %vm1152_vm1, %v8437_v30, %v8438_v61  ;;  %v20288_v33 = vld [vmem:[#allocation25_spill] sm:$0xff] }
 0x3e4   : > { %v6150_v52 = vpop.f32.mrb[10].mxu0  ;;  %8804 = vmatprep.mubr.f32.mxu1 %v8433_v60  ;;  %v7599_v30 = vrot.slane %v19059_v7, 1  ;;  %v20290_v7 = vld [vmem:[#allocation28_spill] sm:$0xff] }
 0x3e5   : > { %v6376_v54 = vadd.f32 %v11731_v0, %v6150_v52  ;;  %8008 = vmatmul.mubr.f32.gmra.mrb[116].mxu0 %v18983_v16  ;;  %v6152_v21 = vpop.f32.mrb[11].mxu0  ;;  %v7594_v16 = vsel %vm1152_vm1, %v7592_v6, %v7593_v11  ;;  %v8441_v52 = vrot.slane %v19192_v59, 1  ;;  %v19210_v6 = vld [vmem:[%s13472_s10 + $0x1c0] sm:$0xff]  ;;  %v19213_v11 = vld [vmem:[%s13472_s10 + $0x1c8] sm:$0x3] }
 0x3e6   : > { %v19186_v32 = vpop.f32.mrb[26].mxu1  ;;  %8012 = vmatprep.mubr.f32.mxu0 %v7591_v12  ;;  %v8440_v12 = vrot.slane %v19189_v37, 1 }
 0x3e7   : > { %v19195_v45 = vadd.f32 %v6376_v54, %v20287_v20  ;;  %v19197_v0 = vpop.f32.mrb[27].mxu1  ;;  %8805 = vmatmul.mubr.f32.gmra.mrb[132].mxu1 %v19133_v8 }
 0x3e8   : > { %v6155_v62 = vpop.f32.mrb[12].mxu0  ;;  %8809 = vmatprep.mubr.f32.mxu1 %v8436_v29  ;;  %v7598_v29 = vrot.slane %v19056_v48, 1 }
 0x3e9   : > { %v6381_v60 = vadd.f32 %v6380_v24, %v6155_v62  ;;  %8013 = vmatmul.mubr.f32.gmra.mrb[118].mxu0 %v19009_v56  ;;  %v6157_v44 = vpop.f32.mrb[13].mxu0  ;;  %v7597_v56 = vsel %vm1152_vm1, %v7595_v1, %v7596_v38  ;;  %v8442_v62 = vsel %vm1152_vm1, %v8440_v12, %v8441_v52  ;;  %v19232_v1 = vld [vmem:[%s13472_s10 + $0x1d0] sm:$0xff]  ;;  %v19235_v38 = vld [vmem:[%s13472_s10 + $0x1d8] sm:$0x3]  ;;  %v7601_v12 = vrot.slane %v19080_v53, 1 }
 0x3ea   : > { %v19207_v54 = vpop.f32.mrb[28].mxu1  ;;  %8017 = vmatprep.mubr.f32.mxu0 %v7594_v16  ;;  %v8444_v44 = vrot.slane %v19213_v11, 1  ;;  %v7602_v52 = vrot.slane %v19083_v35, 1 }
 0x3eb   : > { %v19216_v21 = vadd.f32 %v6381_v60, %v20288_v33  ;;  %v19218_v24 = vpop.f32.mrb[29].mxu1  ;;  %8810 = vmatmul.mubr.f32.gmra.mrb[134].mxu1 %v19151_v50  ;;  %v8443_v60 = vrot.slane %v19210_v6, 1 }
 0x3ec   : > { %v6160_v61 = vpop.f32.mrb[14].mxu0  ;;  %8814 = vmatprep.mubr.f32.mxu1 %v8439_v39 }
 0x3ed   : > { %20289 = vst [vmem:[#allocation15_spill] sm:$0xff] %v19216_v21  ;;  %v6386_v20 = vadd.f32 %v19148_v27, %v6160_v61  ;;  %8018 = vmatmul.mubr.f32.gmra.mrb[120].mxu0 %v19019_v34  ;;  %v6162_v16 = vpop.f32.mrb[15].mxu0  ;;  %v7600_v34 = vsel %vm1152_vm1, %v7598_v29, %v7599_v30  ;;  %v19253_v29 = vld [vmem:[%s13472_s10 + $0x200] sm:$0xff]  ;;  %v19256_v30 = vld [vmem:[%s13472_s10 + $0x208] sm:$0x3] }
 0x3ee   : > { %v19229_v33 = vpop.f32.mrb[30].mxu1  ;;  %8022 = vmatprep.mubr.f32.mxu0 %v7597_v56 }
 0x3ef   : > { %v19238_v39 = vadd.f32 %v6386_v20, %v20290_v7  ;;  %v19240_v27 = vpop.f32.mrb[31].mxu1  ;;  %8815 = vmatmul.mubr.f32.gmra.mrb[136].mxu1 %v19170_v57  ;;  %v8445_v20 = vsel %vm1152_vm1, %v8443_v60, %v8444_v44  ;;  %v8446_v7 = vrot.slane %v19232_v1, 1  ;;  %v8554_v60 = vrot.slane %v19092_v5, 2  ;;  %v19275_v5 = vld [vmem:[%s13472_s10 + $0x210] sm:$0xff] }
 0x3f0   : > { %v6165_v56 = vpop.f32.mrb[16].mxu0  ;;  %8819 = vmatprep.mubr.f32.mxu1 %v8442_v62  ;;  %v8553_v62 = vrot.slane %v19089_v25, 2 }
 0x3f1   : > { %20291 = vst [vmem:[#allocation31_spill] sm:$0xff] %v19238_v39  ;;  %v6391_v61 = vadd.f32 %v6390_v13, %v6165_v56  ;;  %8023 = vmatmul.mubr.f32.gmra.mrb[122].mxu0 %v19028_v55  ;;  %v6167_v16 = vpop.f32.mrb[17].mxu0  ;;  %v8447_v39 = vrot.slane %v19235_v38, 1  ;;  %v7603_v55 = vsel %vm1152_vm1, %v7601_v12, %v7602_v52  ;;  %v8556_v12 = vrot.slane %v19115_v41, 2 }
 0x3f2   : > { %v19250_v21 = vpop.f32.mrb[32].mxu1  ;;  %8027 = vmatprep.mubr.f32.mxu0 %v7600_v34  ;;  %v8450_v16 = vrot.slane %v19256_v30, 1  ;;  %v8557_v52 = vrot.slane %v19118_v42, 2  ;;  %v8559_v41 = vrot.slane %v19133_v8, 2  ;;  %v8560_v42 = vrot.slane %v19136_v40, 2 }
 0x3f3   : > { %v19259_v35 = vadd.f32 %v6391_v61, %v18583_v28  ;;  %v6964_v13 = vpop.f32.mrb[33].mxu1  ;;  %8820 = vmatmul.mubr.f32.gmra.mrb[138].mxu1 %v19189_v37  ;;  %v8448_v28 = vsel %vm1152_vm1, %v8446_v7, %v8447_v39  ;;  %v8449_v61 = vrot.slane %v19253_v29, 1  ;;  %v8555_v39 = vsel %vm1281_vm0, %v8553_v62, %v8554_v60 }
 0x3f4   : > { %v6170_v44 = vpop.f32.mrb[18].mxu0  ;;  %8824 = vmatprep.mubr.f32.mxu1 %v8445_v20  ;;  %v19278_v20 = vld [vmem:[%s13472_s10 + $0x218] sm:$0x3]  ;;  %v8563_v62 = vrot.slane %v19154_v49, 2  ;;  %v8558_v8 = vsel %vm1281_vm0, %v8556_v12, %v8557_v52  ;;  %v8562_v40 = vrot.slane %v19151_v50, 2  ;;  %v8565_v49 = vrot.slane %v19170_v57, 2 }
 0x3f5   : > { %v6396_v34 = vadd.f32 %v19167_v31, %v6170_v44  ;;  %8028 = vmatmul.mubr.f32.gmra.mrb[124].mxu0 %v19056_v48  ;;  %v6172_v56 = vpop.f32.mrb[19].mxu0  ;;  %v8452_v44 = vrot.slane %v19275_v5, 1 }
 0x3f6   : > { %v19272_v25 = vpop.f32.mrb[34].mxu1  ;;  %8032 = vmatprep.mubr.f32.mxu0 %v7603_v55  ;;  %v19298_v56 = vld [vmem:[%s13472_s10 + $0x220] sm:$0xff]  ;;  %v8564_v57 = vsel %vm1281_vm0, %v8562_v40, %v8563_v62 }
 0x3f7   : > { %v19281_v48 = vadd.f32 %v6396_v34, %v18605_v10  ;;  %v6969_v31 = vpop.f32.mrb[35].mxu1  ;;  %8825 = vmatmul.mubr.f32.gmra.mrb[140].mxu1 %v19210_v6  ;;  %v8451_v10 = vsel %vm1152_vm1, %v8449_v61, %v8450_v16  ;;  %v8453_v34 = vrot.slane %v19278_v20, 1  ;;  %v8561_v61 = vsel %vm1281_vm0, %v8559_v41, %v8560_v42 }
 0x3f8   : > { %v6175_v7 = vpop.f32.mrb[20].mxu0  ;;  %8829 = vmatprep.mubr.f32.mxu1 %v8448_v28  ;;  %v8566_v16 = vrot.slane %v19173_v19, 2  ;;  %v8455_v31 = vrot.slane %v19298_v56, 1  ;;  %v8569_v41 = vrot.slane %v19192_v59, 2  ;;  %v8568_v19 = vrot.slane %v19189_v37, 2 }
 0x3f9   : > { %v6401_v13 = vadd.f32 %v19197_v0, %v6175_v7  ;;  %8033 = vmatmul.mubr.f32.gmra.mrb[126].mxu0 %v19080_v53  ;;  %v6177_v55 = vpop.f32.mrb[21].mxu0  ;;  %v19301_v0 = vld [vmem:[%s13472_s10 + $0x228] sm:$0x3]  ;;  %v19320_v7 = vld [vmem:[%s13472_s10 + $0x230] sm:$0xff]  ;;  %v8571_v59 = vrot.slane %v19210_v6, 2 }
 0x3fa   : > { %v19293_v60 = vpop.f32.mrb[36].mxu1  ;;  %11939 = vmatprep.mubr.f32.mxu0 %v8555_v39  ;;  %v8456_v39 = vrot.slane %v19301_v0, 1  ;;  %v8570_v6 = vsel %vm1281_vm0, %v8568_v19, %v8569_v41 }
 0x3fb   : > { %v19304_v53 = vadd.f32 %v6401_v13, %v18634_v4  ;;  %v6974_v28 = vpop.f32.mrb[37].mxu1  ;;  %8830 = vmatmul.mubr.f32.gmra.mrb[142].mxu1 %v19232_v1  ;;  %v8454_v4 = vsel %vm1152_vm1, %v8452_v44, %v8453_v34  ;;  %v8572_v44 = vrot.slane %v19213_v11, 2  ;;  %v8574_v11 = vrot.slane %v19232_v1, 2 }
 0x3fc   : > { %v6180_v12 = vpop.f32.mrb[22].mxu0  ;;  %8834 = vmatprep.mubr.f32.mxu1 %v8451_v10  ;;  %v8567_v10 = vsel %vm1281_vm0, %v8565_v49, %v8566_v16  ;;  %v8575_v28 = vrot.slane %v19235_v38, 2  ;;  %v19342_v49 = vld [vmem:[%s13472_s10 + $0x240] sm:$0xff]  ;;  %v8577_v38 = vrot.slane %v19253_v29, 2 }
 0x3fd   : > { %v6406_v50 = vadd.f32 %v19186_v32, %v6180_v12  ;;  %11940 = vmatmul.mubr.f32.vlgmr.msra.gmra.mrb[128].mxu0 %v8558_v8  ;;  %v6182_v52 = vpop.f32.mrb[23].mxu0  ;;  %v19323_v32 = vld [vmem:[%s13472_s10 + $0x238] sm:$0x3]  ;;  %v8458_v8 = vrot.slane %v19320_v7, 1 }
 0x3fe   : > { %v19315_v42 = vpop.f32.mrb[38].mxu1  ;;  %11942 = vmatprep.mubr.f32.mxu0 %v8561_v61  ;;  %v8459_v40 = vrot.slane %v19323_v32, 1  ;;  %v8578_v52 = vrot.slane %v19256_v30, 2  ;;  %v8580_v30 = vrot.slane %v19275_v5, 2 }
 0x3ff   : > { %v19326_v13 = vadd.f32 %v6406_v50, %v18662_v23  ;;  %v6979_v55 = vpop.f32.mrb[39].mxu1  ;;  %8835 = vmatmul.mubr.f32.gmra.mrb[144].mxu1 %v19253_v29  ;;  %v8457_v23 = vsel %vm1152_vm1, %v8455_v31, %v8456_v39  ;;  %v8573_v50 = vsel %vm1281_vm0, %v8571_v59, %v8572_v44  ;;  %v8461_v39 = vrot.slane %v19342_v49, 1 }
 0x400   : > { %v6185_v34 = vpop.f32.mrb[24].mxu0  ;;  %8839 = vmatprep.mubr.f32.mxu1 %v8454_v4  ;;  %v8576_v29 = vsel %vm1281_vm0, %v8574_v11, %v8575_v28  ;;  %v19364_v55 = vld [vmem:[%s13472_s10 + $0x250] sm:$0xff]  ;;  %v8579_v44 = vsel %vm1281_vm0, %v8577_v38, %v8578_v52  ;;  %v8587_v28 = vrot.slane %v19323_v32, 2  ;;  %v8589_v38 = vrot.slane %v19342_v49, 2 }
 0x401   : > { %v6411_v37 = vadd.f32 %v19218_v24, %v6185_v34  ;;  %11943 = vmatmul.mubr.f32.gmra.mrb[130].mxu0 %v8564_v57  ;;  %v6187_v62 = vpop.f32.mrb[25].mxu0  ;;  %v19345_v24 = vld [vmem:[%s13472_s10 + $0x248] sm:$0x3]  ;;  %v8581_v57 = vrot.slane %v19278_v20, 2  ;;  %v8583_v20 = vrot.slane %v19298_v56, 2  ;;  %v8584_v34 = vrot.slane %v19301_v0, 2 }
 0x402   : > { %v19337_v61 = vpop.f32.mrb[40].mxu1  ;;  %11945 = vmatprep.mubr.f32.mxu0 %v8567_v10  ;;  %v8462_v41 = vrot.slane %v19345_v24, 1  ;;  %v8586_v0 = vrot.slane %v19320_v7, 2  ;;  %v8590_v32 = vrot.slane %v19345_v24, 2 }
 0x403   : > { %v19348_v16 = vadd.f32 %v6411_v37, %v18691_v17  ;;  %v6984_v12 = vpop.f32.mrb[41].mxu1  ;;  %8840 = vmatmul.mubr.f32.gmra.mrb[146].mxu1 %v19275_v5  ;;  %v8460_v17 = vsel %vm1152_vm1, %v8458_v8, %v8459_v40 }
 0x404   : > { %v6190_v4 = vpop.f32.mrb[26].mxu0  ;;  %8844 = vmatprep.mubr.f32.mxu1 %v8457_v23  ;;  %v8464_v23 = vrot.slane %v19364_v55, 1  ;;  %v8588_v24 = vsel %vm1281_vm0, %v8586_v0, %v8587_v28 }
 0x405   : > { %v6416_v1 = vadd.f32 %v19207_v54, %v6190_v4  ;;  %11946 = vmatmul.mubr.f32.gmra.mrb[132].mxu0 %v8570_v6  ;;  %v6192_v31 = vpop.f32.mrb[27].mxu0  ;;  %v19367_v54 = vld [vmem:[%s13472_s10 + $0x258] sm:$0x3]  ;;  %v19386_v6 = vld [vmem:[%s13472_s10 + $0x260] sm:$0xff] }
 0x406   : > { %v19359_v19 = vpop.f32.mrb[42].mxu1  ;;  %11948 = vmatprep.mubr.f32.mxu0 %v8573_v50  ;;  %v8465_v8 = vrot.slane %v19367_v54, 1  ;;  %v8585_v50 = vsel %vm1281_vm0, %v8583_v20, %v8584_v34  ;;  %v8467_v31 = vrot.slane %v19386_v6, 1 }
 0x407   : > { %v19370_v10 = vadd.f32 %v6416_v1, %v18720_v58  ;;  %v6989_v59 = vpop.f32.mrb[43].mxu1  ;;  %8845 = vmatmul.mubr.f32.gmra.mrb[148].mxu1 %v19298_v56  ;;  %v8463_v58 = vsel %vm1152_vm1, %v8461_v39, %v8462_v41  ;;  %v8582_v56 = vsel %vm1281_vm0, %v8580_v30, %v8581_v57  ;;  %v8593_v39 = vrot.slane %v19367_v54, 2  ;;  %v19405_v57 = vld [vmem:[%s13472_s10 + $0x270] sm:$0xff]  ;;  %v19415_v54 = vld [vmem:[%s13472_s10 + $0x2a0] sm:$0xff] }
 0x408   : > { %v6195_v37 = vpop.f32.mrb[28].mxu0  ;;  %8849 = vmatprep.mubr.f32.mxu1 %v8460_v17  ;;  %v8592_v41 = vrot.slane %v19364_v55, 2  ;;  %v8591_v59 = vsel %vm1281_vm0, %v8589_v38, %v8590_v32  ;;  %v10752_v32 = vld [vmem:[%s13472_s10 + $0x2b8] sm:$0x3] }
 0x409   : > { %v6421_v5 = vadd.f32 %v19240_v27, %v6195_v37  ;;  %11949 = vmatmul.mubr.f32.gmra.mrb[134].mxu0 %v8576_v29  ;;  %v6197_v62 = vpop.f32.mrb[29].mxu0  ;;  %v10746_v27 = vld [vmem:[%s13472_s10 + $0x268] sm:$0x3] }
 0x40a   : > { %v19380_v40 = vpop.f32.mrb[44].mxu1  ;;  %11951 = vmatprep.mubr.f32.mxu0 %v8579_v44  ;;  %v8468_v17 = vrot.slane %v10746_v27, 1  ;;  %v8595_v44 = vrot.slane %v19386_v6, 2  ;;  %v8596_v20 = vrot.slane %v10746_v27, 2  ;;  %v10750_v37 = vld [vmem:[%s13472_s10 + $0x2a8] sm:$0x3]  ;;  %v8594_v28 = vsel %vm1281_vm0, %v8592_v41, %v8593_v39 }
 0x40b   : > { %v19390_v11 = vadd.f32 %v6421_v5, %v18749_v14  ;;  %v6994_v12 = vpop.f32.mrb[45].mxu1  ;;  %8850 = vmatmul.mubr.f32.gmra.mrb[150].mxu1 %v19320_v7  ;;  %v8466_v14 = vsel %vm1152_vm1, %v8464_v23, %v8465_v8  ;;  %v8602_v38 = vrot.slane %v10750_v37, 2  ;;  %v8474_v39 = vrot.slane %v10750_v37, 1  ;;  %v19464_v37 = vld [vmem:[%s13472_s10 + $0x2d8] sm:$0x3] }
 0x40c   : > { %v6200_v52 = vpop.f32.mrb[30].mxu0  ;;  %8854 = vmatprep.mubr.f32.mxu1 %v8463_v58  ;;  %v8597_v12 = vsel %vm1281_vm0, %v8595_v44, %v8596_v20 }
 0x40d   : > { %v6426_v4 = vadd.f32 %v19229_v33, %v6200_v52  ;;  %11952 = vmatmul.mubr.f32.gmra.mrb[136].mxu0 %v8582_v56  ;;  %v6202_v1 = vpop.f32.mrb[31].mxu0  ;;  %v10748_v33 = vld [vmem:[%s13472_s10 + $0x278] sm:$0x3] }
 0x40e   : > { %v19399_v7 = vpop.f32.mrb[46].mxu1  ;;  %11954 = vmatprep.mubr.f32.mxu0 %v8585_v50  ;;  %v8471_v58 = vrot.slane %v10748_v33, 1  ;;  %v8599_v56 = vrot.slane %v10748_v33, 2  ;;  %v8601_v50 = vrot.slane %v19415_v54, 2  ;;  %v19440_v1 = vld [vmem:[%s13472_s10 + $0x2c0] sm:$0xff]  ;;  %v8605_v33 = vrot.slane %v10752_v32, 2 }
 0x40f   : > { %v19409_v29 = vadd.f32 %v6426_v4, %v18778_v51  ;;  %v6999_v30 = vpop.f32.mrb[47].mxu1  ;;  %8855 = vmatmul.mubr.f32.gmra.mrb[152].mxu1 %v19342_v49  ;;  %v8469_v51 = vsel %vm1152_vm1, %v8467_v31, %v8468_v17  ;;  %v8470_v49 = vrot.slane %v19405_v57, 1  ;;  %v8473_v17 = vrot.slane %v19415_v54, 1 }
 0x410   : > { %v11781_v34 = vpop.f32.mrb[32].mxu0  ;;  %8859 = vmatprep.mubr.f32.mxu1 %v8466_v14  ;;  %v8603_v44 = vsel %vm1281_vm0, %v8601_v50, %v8602_v38  ;;  %v8607_v20 = vrot.slane %v19440_v1, 2 }
 0x411   : > { %v7193_v5 = vadd.f32 %v11781_v34, %v19272_v25  ;;  %v7187_v62 = vpop.f32.mrb[33].mxu0  ;;  %11955 = vmatmul.mubr.f32.gmra.mrb[138].mxu0 %v8588_v24  ;;  %v8598_v25 = vrot.slane %v19405_v57, 2  ;;  %v8472_v31 = vsel %vm1152_vm1, %v8470_v49, %v8471_v58  ;;  %v19461_v34 = vld [vmem:[%s13472_s10 + $0x2d0] sm:$0xff]  ;;  %v8475_v58 = vsel %vm1152_vm1, %v8473_v17, %v8474_v39  ;;  %v19504_v17 = vld [vmem:[%s13472_s10 + $0x308] sm:$0x3] }
 0x412   : > { %v19421_v23 = vpop.f32.mrb[48].mxu1  ;;  %v7188_v8 = vadd.f32 %v7187_v62, %v19250_v21  ;;  %11957 = vmatprep.mubr.f32.mxu0 %v8591_v59  ;;  %v19433_v21 = vld [vmem:[%s13472_s10 + $0x2b0] sm:$0xff] }
 0x413   : > { %v19427_v0 = vadd.f32 %v7193_v5, %v18808_v46  ;;  %v7004_v27 = vpop.f32.mrb[49].mxu1  ;;  %8860 = vmatmul.mubr.f32.gmra.mrb[154].mxu1 %v19364_v55  ;;  %v19443_v46 = vld [vmem:[%s13472_s10 + $0x2c8] sm:$0x3]  ;;  %v8600_v41 = vsel %vm1281_vm0, %v8598_v25, %v8599_v56 }
 0x414   : > { %v19437_v52 = vadd.f32 %v7188_v8, %v18820_v9  ;;  %v11784_v4 = vpop.f32.mrb[34].mxu0  ;;  %8864 = vmatprep.mubr.f32.mxu1 %v8469_v51  ;;  %v19473_v51 = vld [vmem:[%s13472_s10 + $0x2e8] sm:$0x3]  ;;  %v8476_v8 = vrot.slane %v19433_v21, 1  ;;  %v8611_v27 = vrot.slane %v19464_v37, 2 }
 0x415   : > { %v7203_v14 = vadd.f32 %v11784_v4, %v19315_v42  ;;  %v7197_v55 = vpop.f32.mrb[35].mxu0  ;;  %11958 = vmatmul.mubr.f32.gmra.mrb[140].mxu0 %v8594_v28  ;;  %v8604_v42 = vrot.slane %v19433_v21, 2  ;;  %v8477_v28 = vrot.slane %v10752_v32, 1  ;;  %v19492_v4 = vld [vmem:[%s13472_s10 + $0x2f0] sm:$0xff] }
 0x416   : > { %v19448_v24 = vpop.f32.mrb[50].mxu1  ;;  %v7198_v9 = vadd.f32 %v7197_v55, %v19293_v60  ;;  %11960 = vmatprep.mubr.f32.mxu0 %v8597_v12  ;;  %v8608_v60 = vrot.slane %v19443_v46, 2 }
 0x417   : > { %v19454_v30 = vadd.f32 %v7203_v14, %v18847_v15  ;;  %v7009_v59 = vpop.f32.mrb[51].mxu1  ;;  %8865 = vmatmul.mubr.f32.gmra.mrb[156].mxu1 %v19386_v6  ;;  %v19470_v15 = vld [vmem:[%s13472_s10 + $0x2e0] sm:$0xff]  ;;  %v8606_v25 = vsel %vm1281_vm0, %v8604_v42, %v8605_v33  ;;  %v19495_v14 = vld [vmem:[%s13472_s10 + $0x2f8] sm:$0x3]  ;;  %v8480_v42 = vrot.slane %v19443_v46, 1 }
 0x418   : > { %v19467_v5 = vadd.f32 %v7198_v9, %v18861_v43  ;;  %v11787_v62 = vpop.f32.mrb[36].mxu0  ;;  %8869 = vmatprep.mubr.f32.mxu1 %v8472_v31  ;;  %v8609_v38 = vsel %vm1281_vm0, %v8607_v20, %v8608_v60  ;;  %v8613_v32 = vrot.slane %v19470_v15, 2  ;;  %v8478_v9 = vsel %vm1152_vm1, %v8476_v8, %v8477_v28 }
 0x419   : > { %v7213_v6 = vadd.f32 %v11787_v62, %v19359_v19  ;;  %v7207_v49 = vpop.f32.mrb[37].mxu0  ;;  %11961 = vmatmul.mubr.f32.gmra.mrb[142].mxu0 %v8600_v41  ;;  %v8610_v19 = vrot.slane %v19461_v34, 2  ;;  %v8479_v41 = vrot.slane %v19440_v1, 1 }
 0x41a   : > { %v19478_v56 = vpop.f32.mrb[52].mxu1  ;;  %v7208_v43 = vadd.f32 %v7207_v49, %v19337_v61  ;;  %11963 = vmatprep.mubr.f32.mxu0 %v8603_v44  ;;  %v8614_v61 = vrot.slane %v19473_v51, 2  ;;  %v8617_v44 = vrot.slane %v19495_v14, 2  ;;  %v19525_v49 = vld [vmem:[%s13472_s10 + $0x318] sm:$0x3] }
 0x41b   : > { %v19485_v12 = vadd.f32 %v7213_v6, %v18888_v22  ;;  %v7014_v50 = vpop.f32.mrb[53].mxu1  ;;  %8870 = vmatmul.mubr.f32.gmra.mrb[158].mxu1 %v19405_v57  ;;  %v19501_v22 = vld [vmem:[%s13472_s10 + $0x300] sm:$0xff]  ;;  %v8612_v59 = vsel %vm1281_vm0, %v8610_v19, %v8611_v27  ;;  %v19522_v6 = vld [vmem:[%s13472_s10 + $0x310] sm:$0xff]  ;;  %v8481_v19 = vsel %vm1152_vm1, %v8479_v41, %v8480_v42  ;;  %v8482_v27 = vrot.slane %v19461_v34, 1 }
 0x41c   : > { %v19498_v55 = vadd.f32 %v7208_v43, %v18902_v36  ;;  %v11790_v31 = vpop.f32.mrb[38].mxu0  ;;  %8874 = vmatprep.mubr.f32.mxu1 %v8475_v58  ;;  %v8615_v46 = vsel %vm1281_vm0, %v8613_v32, %v8614_v61  ;;  %v8619_v62 = vrot.slane %v19501_v22, 2  ;;  %v20292_v58 = vld [vmem:[#allocation27_spill] sm:$0xff]  ;;  %v19534_v43 = vld [vmem:[%s13472_s10 + $0x348] sm:$0x3]  ;;  %v8483_v50 = vrot.slane %v19464_v37, 1 }
 0x41d   : > { %v7223_v57 = vadd.f32 %v11790_v31, %v19399_v7  ;;  %v7217_v39 = vpop.f32.mrb[39].mxu0  ;;  %11964 = vmatmul.mubr.f32.gmra.mrb[144].mxu0 %v8606_v25  ;;  %v8616_v7 = vrot.slane %v19492_v4, 2  ;;  %v8623_v31 = vrot.slane %v19525_v49, 2  ;;  %v19552_v42 = vld [vmem:[%s13472_s10 + $0x350] sm:$0xff] }
 0x41e   : > { %v7017_v36 = vpop.f32.mrb[54].mxu1  ;;  %v7218_v33 = vadd.f32 %v7217_v39, %v19380_v40  ;;  %11966 = vmatprep.mubr.f32.mxu0 %v8609_v38  ;;  %v8620_v40 = vrot.slane %v19504_v17, 2 }
 0x41f   : > { %v19515_v20 = vadd.f32 %v7223_v57, %v18927_v18  ;;  %v7019_v60 = vpop.f32.mrb[55].mxu1  ;;  %8875 = vmatmul.mubr.f32.gmra.mrb[160].mxu1 %v19415_v54  ;;  %v19531_v18 = vld [vmem:[%s13472_s10 + $0x340] sm:$0xff]  ;;  %v8618_v61 = vsel %vm1281_vm0, %v8616_v7, %v8617_v44  ;;  %v20293_v57 = vld [vmem:[#allocation30_spill] sm:$0xff] }
 0x420   : > { %v19528_v8 = vadd.f32 %v7218_v33, %v20292_v58  ;;  %v11793_v28 = vpop.f32.mrb[40].mxu0  ;;  %8879 = vmatprep.mubr.f32.mxu1 %v8478_v9  ;;  %v8621_v37 = vsel %vm1281_vm0, %v8619_v62, %v8620_v40  ;;  %v8625_v41 = vrot.slane %v19531_v18, 2  ;;  %v19555_v33 = vld [vmem:[%s13472_s10 + $0x358] sm:$0x3]  ;;  %v19561_v60 = vld [vmem:[%s13472_s10 + $0x360] sm:$0xff]  ;;  %v8484_v62 = vsel %vm1152_vm1, %v8482_v27, %v8483_v50  ;;  %v20297_v27 = vld [vmem:[#allocation32_spill] sm:$0xff] }
 0x421   : > { %v7233_v54 = vadd.f32 %v11793_v28, %v19448_v24  ;;  %v7227_v25 = vpop.f32.mrb[41].mxu0  ;;  %11967 = vmatmul.mubr.f32.gmra.mrb[146].mxu0 %v8612_v59  ;;  %v8622_v24 = vrot.slane %v19522_v6, 2  ;;  %v20295_v59 = vld [vmem:[#allocation29_spill] sm:$0xff]  ;;  %v8485_v40 = vrot.slane %v19470_v15, 1  ;;  %v8486_v28 = vrot.slane %v19473_v51, 1 }
 0x422   : > { %v7022_v38 = vpop.f32.mrb[56].mxu1  ;;  %v7228_v32 = vadd.f32 %v7227_v25, %v19421_v23  ;;  %11969 = vmatprep.mubr.f32.mxu0 %v8615_v46  ;;  %v8626_v23 = vrot.slane %v19534_v43, 2  ;;  %v19564_v46 = vld [vmem:[%s13472_s10 + $0x368] sm:$0x3] }
 0x423   : > { %v19545_v39 = vadd.f32 %v7233_v54, %v20293_v57  ;;  %v7024_v9 = vpop.f32.mrb[57].mxu1  ;;  %8880 = vmatmul.mubr.f32.gmra.mrb[162].mxu1 %v19433_v21 }
 0x424   : > { %v19558_v7 = vadd.f32 %v7228_v32, %v20295_v59  ;;  %v11796_v44 = vpop.f32.mrb[42].mxu0  ;;  %8884 = vmatprep.mubr.f32.mxu1 %v8481_v19  ;;  %v8624_v19 = vsel %vm1281_vm0, %v8622_v24, %v8623_v31  ;;  %v8629_v32 = vrot.slane %v19555_v33, 2  ;;  %v8627_v51 = vsel %vm1281_vm0, %v8625_v41, %v8626_v23  ;;  %v19581_v9 = vld [vmem:[%s13472_s10 + $0x370] sm:$0xff]  ;;  %v20299_v24 = vld [vmem:[#allocation11_spill] sm:$0xff] }
 0x425   : > { %20294 = vst [vmem:[#allocation9_spill] sm:$0xff] %v19545_v39  ;;  %v7243_v21 = vadd.f32 %v11796_v44, %v7017_v36  ;;  %v7237_v58 = vpop.f32.mrb[43].mxu0  ;;  %11970 = vmatmul.mubr.f32.gmra.mrb[148].mxu0 %v8618_v61  ;;  %v8628_v36 = vrot.slane %v19552_v42, 2  ;;  %v8631_v61 = vrot.slane %v19561_v60, 2  ;;  %v19590_v44 = vld [vmem:[%s13472_s10 + $0x380] sm:$0xff]  ;;  %v8487_v41 = vsel %vm1152_vm1, %v8485_v40, %v8486_v28 }
 0x426   : > { %20296 = vst [vmem:[#allocation14_spill] sm:$0xff] %v19558_v7  ;;  %v7027_v54 = vpop.f32.mrb[58].mxu1  ;;  %v7238_v25 = vadd.f32 %v7237_v58, %v19478_v56  ;;  %11972 = vmatprep.mubr.f32.mxu0 %v8621_v37  ;;  %v8632_v56 = vrot.slane %v19564_v46, 2  ;;  %v19584_v37 = vld [vmem:[%s13472_s10 + $0x378] sm:$0x3]  ;;  %v8488_v23 = vrot.slane %v19492_v4, 1 }
 0x427   : > { %v19574_v50 = vadd.f32 %v7243_v21, %v20297_v27  ;;  %v7029_v57 = vpop.f32.mrb[59].mxu1  ;;  %8885 = vmatmul.mubr.f32.gmra.mrb[164].mxu1 %v19440_v1  ;;  %v19593_v21 = vld [vmem:[%s13472_s10 + $0x388] sm:$0x3]  ;;  %v8489_v27 = vrot.slane %v19495_v14, 1 }
 0x428   : > { %v19587_v31 = vadd.f32 %v7238_v25, %v20299_v24  ;;  %v11799_v59 = vpop.f32.mrb[44].mxu0  ;;  %8889 = vmatprep.mubr.f32.mxu1 %v8484_v62  ;;  %v8630_v62 = vsel %vm1281_vm0, %v8628_v36, %v8629_v32  ;;  %v8634_v24 = vrot.slane %v19581_v9, 2  ;;  %v8633_v14 = vsel %vm1281_vm0, %v8631_v61, %v8632_v56  ;;  %v20303_v36 = vld [vmem:[#allocation7_spill] sm:$0xff] }
 0x429   : > { %20298 = vst [vmem:[#allocation18_spill] sm:$0xff] %v19574_v50  ;;  %v7253_v1 = vadd.f32 %v11799_v59, %v7027_v54  ;;  %v7247_v58 = vpop.f32.mrb[45].mxu0  ;;  %11973 = vmatmul.mubr.f32.gmra.mrb[150].mxu0 %v8624_v19  ;;  %v8635_v54 = vrot.slane %v19584_v37, 2  ;;  %v20301_v59 = vld [vmem:[#allocation10_spill] sm:$0xff]  ;;  %v8637_v19 = vrot.slane %v19590_v44, 2  ;;  %v8490_v61 = vsel %vm1152_vm1, %v8488_v23, %v8489_v27 }
 0x42a   : > { %20300 = vst [vmem:[#allocation19_spill] sm:$0xff] %v19587_v31  ;;  %v7032_v57 = vpop.f32.mrb[60].mxu1  ;;  %v7248_v25 = vadd.f32 %v7247_v58, %v7022_v38  ;;  %11975 = vmatprep.mubr.f32.mxu0 %v8627_v51  ;;  %v8638_v38 = vrot.slane %v19593_v21, 2  ;;  %v19609_v51 = vld [vmem:[%s13472_s10 + $0x390] sm:$0xff]  ;;  %v19612_v58 = vld [vmem:[%s13472_s10 + $0x398] sm:$0x3] }
 0x42b   : > { %v19602_v40 = vadd.f32 %v7253_v1, %v20301_v59  ;;  %v7034_v28 = vpop.f32.mrb[61].mxu1  ;;  %8890 = vmatmul.mubr.f32.gmra.mrb[166].mxu1 %v19461_v34  ;;  %v19618_v1 = vld [vmem:[%s13472_s10 + $0x3a0] sm:$0xff]  ;;  %v19621_v59 = vld [vmem:[%s13472_s10 + $0x3a8] sm:$0x3]  ;;  %v8491_v56 = vrot.slane %v19501_v22, 1 }
 0x42c   : > { %v19615_v32 = vadd.f32 %v7248_v25, %v20303_v36  ;;  %v11802_v31 = vpop.f32.mrb[46].mxu0  ;;  %8894 = vmatprep.mubr.f32.mxu1 %v8487_v41  ;;  %v8492_v28 = vrot.slane %v19504_v17, 1  ;;  %v8636_v25 = vsel %vm1281_vm0, %v8634_v24, %v8635_v54  ;;  %v8640_v41 = vrot.slane %v19609_v51, 2 }
 0x42d   : > { %20302 = vst [vmem:[#allocation13_spill] sm:$0xff] %v19602_v40  ;;  %v7257_v34 = vpop.f32.mrb[47].mxu0  ;;  %11976 = vmatmul.mubr.f32.gmra.mrb[152].mxu0 %v8630_v62  ;;  %v8641_v36 = vrot.slane %v19612_v58, 2  ;;  %v8639_v23 = vsel %vm1281_vm0, %v8637_v19, %v8638_v38  ;;  %v8643_v27 = vrot.slane %v19618_v1, 2  ;;  %v8644_v17 = vrot.slane %v19621_v59, 2  ;;  %v19634_v62 = vld [vmem:[%s13472_s10 + $0x3b0] sm:$0xff] }
 0x42e   : > { %20304 = vst [vmem:[#allocation22_spill] sm:$0xff] %v19615_v32  ;;  %v7037_v40 = vpop.f32.mrb[62].mxu1  ;;  %v7258_v50 = vadd.f32 %v7257_v34, %v7032_v57  ;;  %11978 = vmatprep.mubr.f32.mxu0 %v8633_v14  ;;  %v19637_v57 = vld [vmem:[%s13472_s10 + $0x3b8] sm:$0x3]  ;;  %v20305_v14 = vld [vmem:[#allocation8_spill] sm:$0xff]  ;;  %v8495_v19 = vrot.slane %v19525_v49, 1 }
 0x42f   : > { %v7263_v32 = vadd.f32 %v11802_v31, %v7037_v40  ;;  %v7039_v7 = vpop.f32.mrb[63].mxu1  ;;  %8895 = vmatmul.mubr.f32.gmra.mrb[168].mxu1 %v19470_v15  ;;  %v20307_v34 = vld [vmem:[#allocation12_spill] sm:$0xff]  ;;  %v8493_v15 = vsel %vm1152_vm1, %v8491_v56, %v8492_v28  ;;  %v8494_v40 = vrot.slane %v19522_v6, 1  ;;  %v8642_v39 = vsel %vm1281_vm0, %v8640_v41, %v8641_v36 }
 0x430   : > { %v19640_v24 = vadd.f32 %v7258_v50, %v20305_v14  ;;  %v11805_v54 = vpop.f32.mrb[48].mxu0  ;;  %8899 = vmatprep.mubr.f32.mxu1 %v8490_v61  ;;  %v8646_v50 = vrot.slane %v19634_v62, 2  ;;  %v8647_v14 = vrot.slane %v19637_v57, 2  ;;  %v8497_v41 = vrot.slane %v19531_v18, 1 }
 0x431   : > { %v19643_v31 = vadd.f32 %v7263_v32, %v20307_v34  ;;  %v7267_v7 = vpop.f32.mrb[49].mxu0  ;;  %11979 = vmatmul.mubr.f32.gmra.mrb[154].mxu0 %v8636_v25  ;;  %v8645_v32 = vsel %vm1281_vm0, %v8643_v27, %v8644_v17  ;;  %v8496_v25 = vsel %vm1152_vm1, %v8494_v40, %v8495_v19  ;;  %v8498_v36 = vrot.slane %v19534_v43, 1 }
 0x432   : > { %20306 = vst [vmem:[#allocation21_spill] sm:$0xff] %v19640_v24  ;;  %v7042_v38 = vpop.f32.mrb[64].mxu1  ;;  %11981 = vmatprep.mubr.f32.mxu0 %v8639_v23  ;;  %v8501_v43 = vrot.slane %v19555_v33, 1 }
 0x433   : > { %v7268_v61 = vadd.f32 %v7267_v7, %v7042_v38  ;;  %v7044_v24 = vpop.f32.mrb[65].mxu1  ;;  %8900 = vmatmul.mubr.f32.gmra.mrb[170].mxu1 %v19492_v4  ;;  %v8499_v17 = vsel %vm1152_vm1, %v8497_v41, %v8498_v36  ;;  %v8503_v38 = vrot.slane %v19561_v60, 1  ;;  %v8507_v41 = vrot.slane %v19584_v37, 1 }
 0x434   : > { %8904 = vmatprep.mubr.f32.mxu1 %v8493_v15  ;;  %v11808_v56 = vpop.f32.mrb[50].mxu0  ;;  %v8648_v24 = vsel %vm1281_vm0, %v8646_v50, %v8647_v14  ;;  %v8500_v15 = vrot.slane %v19552_v42, 1  ;;  %v8504_v50 = vrot.slane %v19564_v46, 1 }
 0x435   : > { %v19654_v28 = vadd.f32 %v7268_v61, %v19112_v2  ;;  %v7277_v49 = vpop.f32.mrb[51].mxu0  ;;  %11982 = vmatmul.mubr.f32.gmra.mrb[156].mxu0 %v8642_v39 }
 0x436   : > { %v7047_v23 = vpop.f32.mrb[66].mxu1  ;;  %11984 = vmatprep.mubr.f32.mxu0 %v8645_v32 }
 0x437   : > { %v7273_v4 = vadd.f32 %v11805_v54, %v7047_v23  ;;  %v7049_v34 = vpop.f32.mrb[67].mxu1  ;;  %8905 = vmatmul.mubr.f32.gmra.mrb[172].mxu1 %v19501_v22 }
 0x438   : > { %8909 = vmatprep.mubr.f32.mxu1 %v8496_v25  ;;  %v11811_v27 = vpop.f32.mrb[52].mxu0  ;;  %v8506_v25 = vrot.slane %v19581_v9, 1  ;;  %v8510_v34 = vrot.slane %v19593_v21, 1 }
 0x439   : > { %v19662_v2 = vadd.f32 %v7273_v4, %v19121_v47  ;;  %v7287_v7 = vpop.f32.mrb[53].mxu0  ;;  %11985 = vmatmul.mubr.f32.gmra.mrb[158].mxu0 %v8648_v24  ;;  %v8502_v47 = vsel %vm1152_vm1, %v8500_v15, %v8501_v43  ;;  %v8509_v4 = vrot.slane %v19590_v44, 1 }
 0x43a   : > { %v7052_v39 = vpop.f32.mrb[68].mxu1 }
 0x43b   : > { %v7278_v40 = vadd.f32 %v7277_v49, %v7052_v39  ;;  %v7054_v19 = vpop.f32.mrb[69].mxu1  ;;  %8910 = vmatmul.mubr.f32.gmra.mrb[174].mxu1 %v19522_v6  ;;  %v8512_v39 = vrot.slane %v19609_v51, 1 }
 0x43c   : > { %8914 = vmatprep.mubr.f32.mxu1 %v8499_v17  ;;  %v11814_v22 = vpop.f32.mrb[54].mxu0 }
 0x43d   : > { %v19669_v54 = vadd.f32 %v7278_v40, %v19139_v63  ;;  %v7297_v14 = vpop.f32.mrb[55].mxu0  ;;  %v8505_v63 = vsel %vm1152_vm1, %v8503_v38, %v8504_v50  ;;  %v8513_v40 = vrot.slane %v19612_v58, 1 }
 0x43e   : > { %v7057_v61 = vpop.f32.mrb[70].mxu1 }
 0x43f   : > { %v7283_v33 = vadd.f32 %v11808_v56, %v7057_v61  ;;  %v7059_v32 = vpop.f32.mrb[71].mxu1  ;;  %8915 = vmatmul.mubr.f32.gmra.mrb[176].mxu1 %v19531_v18  ;;  %v8515_v61 = vrot.slane %v19618_v1, 1 }
 0x440   : > { %8919 = vmatprep.mubr.f32.mxu1 %v8502_v47  ;;  %v11817_v49 = vpop.f32.mrb[56].mxu0 }
 0x441   : > { %v19676_v6 = vadd.f32 %v7283_v33, %v19157_v26  ;;  %v7307_v36 = vpop.f32.mrb[57].mxu0  ;;  %v8508_v26 = vsel %vm1152_vm1, %v8506_v25, %v8507_v41  ;;  %v8516_v33 = vrot.slane %v19621_v59, 1 }
 0x442   : > { %v7062_v23 = vpop.f32.mrb[72].mxu1 }
 0x443   : > { %v7288_v46 = vadd.f32 %v7287_v7, %v7062_v23  ;;  %v7064_v24 = vpop.f32.mrb[73].mxu1  ;;  %8920 = vmatmul.mubr.f32.gmra.mrb[178].mxu1 %v19552_v42  ;;  %v8517_v23 = vsel %vm1152_vm1, %v8515_v61, %v8516_v33 }
 0x444   : > { %8924 = vmatprep.mubr.f32.mxu1 %v8505_v63  ;;  %v19682_v56 = vpop.f32.mrb[58].mxu0  ;;  %v8519_v24 = vrot.slane %v19637_v57, 1 }
 0x445   : > { %v19685_v18 = vadd.f32 %v7288_v46, %v19176_v3  ;;  %v7317_v17 = vpop.f32.mrb[59].mxu0  ;;  %v8511_v3 = vsel %vm1152_vm1, %v8509_v4, %v8510_v34  ;;  %v8518_v46 = vrot.slane %v19634_v62, 1 }
 0x446   : > { %v7067_v37 = vpop.f32.mrb[74].mxu1 }
 0x447   : > { %v7293_v15 = vadd.f32 %v11811_v27, %v7067_v37  ;;  %v7069_v43 = vpop.f32.mrb[75].mxu1  ;;  %8925 = vmatmul.mubr.f32.gmra.mrb[180].mxu1 %v19561_v60  ;;  %v20308_v27 = vld [vmem:[#allocation15_spill] sm:$0xff]  ;;  %v8520_v37 = vsel %vm1152_vm1, %v8518_v46, %v8519_v24 }
 0x448   : > { %8929 = vmatprep.mubr.f32.mxu1 %v8508_v26  ;;  %v19691_v42 = vpop.f32.mrb[60].mxu0 }
 0x449   : > { %v19694_v7 = vadd.f32 %v7293_v15, %v19195_v45  ;;  %v7327_v19 = vpop.f32.mrb[61].mxu0  ;;  %v8514_v45 = vsel %vm1152_vm1, %v8512_v39, %v8513_v40 }
 0x44a   : > { %v7072_v21 = vpop.f32.mrb[76].mxu1 }
 0x44b   : > { %v7298_v47 = vadd.f32 %v7297_v14, %v7072_v21  ;;  %v7074_v38 = vpop.f32.mrb[77].mxu1  ;;  %8930 = vmatmul.mubr.f32.gmra.mrb[182].mxu1 %v19581_v9  ;;  %v20309_v14 = vld [vmem:[#allocation31_spill] sm:$0xff] }
 0x44c   : > { %8934 = vmatprep.mubr.f32.mxu1 %v8511_v3  ;;  %v19700_v60 = vpop.f32.mrb[62].mxu0 }
 0x44d   : > { %v19703_v50 = vadd.f32 %v7298_v47, %v20308_v27  ;;  %v7337_v32 = vpop.f32.mrb[63].mxu0 }
 0x44e   : > { %v7077_v58 = vpop.f32.mrb[78].mxu1 }
 0x44f   : > { %v7303_v63 = vadd.f32 %v11814_v22, %v7077_v58  ;;  %v7079_v25 = vpop.f32.mrb[79].mxu1  ;;  %8935 = vmatmul.mubr.f32.gmra.mrb[184].mxu1 %v19590_v44 }
 0x450   : > { %8939 = vmatprep.mubr.f32.mxu1 %v8514_v45  ;;  %v19709_v9 = vpop.f32.mrb[64].mxu0 }
 0x451   : > { %v19712_v41 = vadd.f32 %v7303_v63, %v20309_v14  ;;  %v7881_v26 = vpop.f32.mrb[65].mxu0 }
 0x452   : > { %v7082_v59 = vpop.f32.mrb[80].mxu1 }
 0x453   : > { %v7308_v4 = vadd.f32 %v7307_v36, %v7082_v59  ;;  %v7084_v34 = vpop.f32.mrb[81].mxu1  ;;  %8940 = vmatmul.mubr.f32.gmra.mrb[186].mxu1 %v19609_v51 }
 0x454   : > { %8944 = vmatprep.mubr.f32.mxu1 %v8517_v23  ;;  %v7884_v44 = vpop.f32.mrb[66].mxu0 }
 0x455   : > { %v19719_v22 = vadd.f32 %v7308_v4, %v19259_v35  ;;  %v7886_v15 = vpop.f32.mrb[67].mxu0 }
 0x456   : > { %v7087_v43 = vpop.f32.mrb[82].mxu1 }
 0x457   : > { %v7313_v3 = vadd.f32 %v11817_v49, %v7087_v43  ;;  %v7089_v39 = vpop.f32.mrb[83].mxu1  ;;  %8945 = vmatmul.mubr.f32.gmra.mrb[188].mxu1 %v19618_v1 }
 0x458   : > { %8949 = vmatprep.mubr.f32.mxu1 %v8520_v37  ;;  %v7889_v57 = vpop.f32.mrb[68].mxu0 }
 0x459   : > { %v19724_v36 = vadd.f32 %v7313_v3, %v19281_v48  ;;  %v7891_v40 = vpop.f32.mrb[69].mxu0 }
 0x45a   : > { %v7092_v51 = vpop.f32.mrb[84].mxu1 }
 0x45b   : > { %v7318_v21 = vadd.f32 %v7317_v17, %v7092_v51  ;;  %v7094_v47 = vpop.f32.mrb[85].mxu1  ;;  %8950 = vmatmul.mubr.f32.gmra.mrb[190].mxu1 %v19634_v62 }
 0x45c   : > { %v7894_v35 = vpop.f32.mrb[70].mxu0 }
 0x45d   : > { %v19728_v38 = vadd.f32 %v7318_v21, %v19304_v53  ;;  %v7896_v27 = vpop.f32.mrb[71].mxu0 }
 0x45e   : > { %v7097_v49 = vpop.f32.mrb[86].mxu1 }
 0x45f   : > { %v7323_v45 = vadd.f32 %v19682_v56, %v7097_v49  ;;  %v7099_v1 = vpop.f32.mrb[87].mxu1 }
 0x460   : > { %v7899_v61 = vpop.f32.mrb[72].mxu0 }
 0x461   : > { %v19732_v33 = vadd.f32 %v7323_v45, %v19326_v13  ;;  %v7901_v48 = vpop.f32.mrb[73].mxu0 }
 0x462   : > { %v7102_v58 = vpop.f32.mrb[88].mxu1 }
 0x463   : > { %v7328_v63 = vadd.f32 %v7327_v19, %v7102_v58  ;;  %v7104_v17 = vpop.f32.mrb[89].mxu1 }
 0x464   : > { %v7904_v25 = vpop.f32.mrb[74].mxu0 }
 0x465   : > { %v19735_v62 = vadd.f32 %v7328_v63, %v19348_v16  ;;  %v7906_v14 = vpop.f32.mrb[75].mxu0 }
 0x466   : > { %v7107_v53 = vpop.f32.mrb[90].mxu1 }
 0x467   : > { %v7333_v23 = vadd.f32 %v19691_v42, %v7107_v53  ;;  %v7109_v46 = vpop.f32.mrb[91].mxu1 }
 0x468   : > { %v7909_v24 = vpop.f32.mrb[76].mxu0 }
 0x469   : > { %v19739_v56 = vadd.f32 %v7333_v23, %v19370_v10  ;;  %v7911_v26 = vpop.f32.mrb[77].mxu0 }
 0x46a   : > { %v7112_v13 = vpop.f32.mrb[92].mxu1 }
 0x46b   : > { %v7338_v59 = vadd.f32 %v7337_v32, %v7112_v13  ;;  %v7114_v4 = vpop.f32.mrb[93].mxu1 }
 0x46c   : > { %v7914_v34 = vpop.f32.mrb[78].mxu0 }
 0x46d   : > { %v19742_v19 = vadd.f32 %v7338_v59, %v19390_v11  ;;  %v7916_v37 = vpop.f32.mrb[79].mxu0 }
 0x46e   : > { %v7117_v16 = vpop.f32.mrb[94].mxu1 }
 0x46f   : > { %v7343_v15 = vadd.f32 %v19700_v60, %v7117_v16  ;;  %v7119_v43 = vpop.f32.mrb[95].mxu1  ;;  %v20310_v16 = vld [vmem:[#allocation9_spill] sm:$0xff] }
 0x470   : > { %v7919_v3 = vpop.f32.mrb[80].mxu0 }
 0x471   : > { %v19746_v42 = vadd.f32 %v7343_v15, %v19409_v29  ;;  %v7921_v39 = vpop.f32.mrb[81].mxu0 }
 0x472   : > { %v11861_v10 = vpop.f32.mrb[96].mxu1 }
 0x473   : > { %v8110_v40 = vadd.f32 %v11861_v10, %v7884_v44  ;;  %v8104_v51 = vpop.f32.mrb[97].mxu1 }
 0x474   : > { %v8105_v32 = vadd.f32 %v8104_v51, %v19709_v9  ;;  %v7924_v21 = vpop.f32.mrb[82].mxu0  ;;  %v20312_v51 = vld [vmem:[#allocation18_spill] sm:$0xff] }
 0x475   : > { %v19750_v47 = vadd.f32 %v8110_v40, %v19427_v0  ;;  %v7926_v11 = vpop.f32.mrb[83].mxu0 }
 0x476   : > { %v19753_v27 = vadd.f32 %v8105_v32, %v19437_v52  ;;  %v11864_v60 = vpop.f32.mrb[98].mxu1 }
 0x477   : > { %v8120_v49 = vadd.f32 %v11864_v60, %v7894_v35  ;;  %v8114_v45 = vpop.f32.mrb[99].mxu1 }
 0x478   : > { %v8115_v1 = vadd.f32 %v8114_v45, %v7889_v57  ;;  %v7929_v29 = vpop.f32.mrb[84].mxu0 }
 0x479   : > { %v19756_v48 = vadd.f32 %v8120_v49, %v19454_v30  ;;  %v7931_v44 = vpop.f32.mrb[85].mxu0 }
 0x47a   : > { %v19759_v58 = vadd.f32 %v8115_v1, %v19467_v5  ;;  %v11867_v9 = vpop.f32.mrb[100].mxu1  ;;  %v20314_v44 = vld [vmem:[#allocation13_spill] sm:$0xff] }
 0x47b   : > { %v8130_v63 = vadd.f32 %v11867_v9, %v7904_v25  ;;  %v8124_v0 = vpop.f32.mrb[101].mxu1 }
 0x47c   : > { %v8125_v17 = vadd.f32 %v8124_v0, %v7899_v61  ;;  %v7934_v14 = vpop.f32.mrb[86].mxu0  ;;  %v20315_v0 = vld [vmem:[#allocation22_spill] sm:$0xff] }
 0x47d   : > { %v19762_v52 = vadd.f32 %v8130_v63, %v19485_v12  ;;  %v7936_v53 = vpop.f32.mrb[87].mxu0 }
 0x47e   : > { %v19765_v35 = vadd.f32 %v8125_v17, %v19498_v55  ;;  %v11870_v57 = vpop.f32.mrb[102].mxu1 }
 0x47f   : > { %v8140_v23 = vadd.f32 %v11870_v57, %v7914_v34  ;;  %v8134_v30 = vpop.f32.mrb[103].mxu1  ;;  %v20311_v34 = vld [vmem:[#allocation14_spill] sm:$0xff] }
 0x480   : > { %v8135_v46 = vadd.f32 %v8134_v30, %v7909_v24  ;;  %v7939_v26 = vpop.f32.mrb[88].mxu0 }
 0x481   : > { %v19768_v5 = vadd.f32 %v8140_v23, %v19515_v20  ;;  %v7941_v13 = vpop.f32.mrb[89].mxu0 }
 0x482   : > { %v19771_v25 = vadd.f32 %v8135_v46, %v19528_v8  ;;  %v11873_v61 = vpop.f32.mrb[104].mxu1  ;;  %v20316_v13 = vld [vmem:[#allocation21_spill] sm:$0xff] }
 0x483   : > { %v8150_v59 = vadd.f32 %v11873_v61, %v7924_v21  ;;  %v8144_v12 = vpop.f32.mrb[105].mxu1  ;;  %v20313_v21 = vld [vmem:[#allocation19_spill] sm:$0xff] }
 0x484   : > { %v8145_v4 = vadd.f32 %v8144_v12, %v7919_v3  ;;  %v7944_v37 = vpop.f32.mrb[90].mxu0 }
 0x485   : > { %v19774_v55 = vadd.f32 %v8150_v59, %v20310_v16  ;;  %v7946_v15 = vpop.f32.mrb[91].mxu0 }
 0x486   : > { %v19777_v43 = vadd.f32 %v8145_v4, %v20311_v34  ;;  %v11876_v24 = vpop.f32.mrb[106].mxu1 }
 0x487   : > { %v8160_v39 = vadd.f32 %v11876_v24, %v7934_v14  ;;  %v8154_v20 = vpop.f32.mrb[107].mxu1 }
 0x488   : > { %v8155_v10 = vadd.f32 %v8154_v20, %v7929_v29  ;;  %v7949_v40 = vpop.f32.mrb[92].mxu0 }
 0x489   : > { %v19780_v8 = vadd.f32 %v8160_v39, %v20312_v51  ;;  %v7951_v32 = vpop.f32.mrb[93].mxu0 }
 0x48a   : > { %v19783_v11 = vadd.f32 %v8155_v10, %v20313_v21  ;;  %v11879_v3 = vpop.f32.mrb[108].mxu1 }
 0x48b   : > { %v8170_v60 = vadd.f32 %v11879_v3, %v7944_v37  ;;  %v8164_v49 = vpop.f32.mrb[109].mxu1 }
 0x48c   : > { %v8165_v45 = vadd.f32 %v8164_v49, %v7939_v26  ;;  %v7954_v1 = vpop.f32.mrb[94].mxu0 }
 0x48d   : > { %v19786_v9 = vadd.f32 %v8170_v60, %v20314_v44  ;;  %v7956_v63 = vpop.f32.mrb[95].mxu0 }
 0x48e   : > { %v19789_v17 = vadd.f32 %v8165_v45, %v20315_v0  ;;  %v11882_v29 = vpop.f32.mrb[110].mxu1 }
 0x48f   : > { %v8180_v14 = vadd.f32 %v11882_v29, %v7954_v1  ;;  %v8174_v53 = vpop.f32.mrb[111].mxu1 }
 0x490   : > { %v8175_v57 = vadd.f32 %v8174_v53, %v7949_v40  ;;  %v7959_v23 = vpop.f32.mrb[96].mxu0 }
 0x491   : > { %v19792_v30 = vadd.f32 %v8180_v14, %v19643_v31  ;;  %v7961_v46 = vpop.f32.mrb[97].mxu0 }
 0x492   : > { %v19795_v61 = vadd.f32 %v8175_v57, %v20316_v13  ;;  %v11885_v26 = vpop.f32.mrb[112].mxu1 }
 0x493   : > { %v8184_v59 = vpop.f32.mrb[113].mxu1 }
 0x494   : > { %v8185_v12 = vadd.f32 %v8184_v59, %v7959_v23  ;;  %v7964_v4 = vpop.f32.mrb[98].mxu0 }
 0x495   : > { %v8190_v37 = vadd.f32 %v11885_v26, %v7964_v4  ;;  %v7966_v16 = vpop.f32.mrb[99].mxu0 }
 0x496   : > { %v19798_v15 = vadd.f32 %v8185_v12, %v19654_v28  ;;  %v11888_v34 = vpop.f32.mrb[114].mxu1 }
 0x497   : > { %v19801_v24 = vadd.f32 %v8190_v37, %v19662_v2  ;;  %v8194_v39 = vpop.f32.mrb[115].mxu1 }
 0x498   : > { %v7969_v31 = vpop.f32.mrb[100].mxu0 }
 0x499   : > { %v8195_v20 = vadd.f32 %v8194_v39, %v7969_v31  ;;  %v7971_v10 = vpop.f32.mrb[101].mxu0 }
 0x49a   : > { %v11891_v40 = vpop.f32.mrb[116].mxu1 }
 0x49b   : > { %v19804_v51 = vadd.f32 %v8195_v20, %v19669_v54  ;;  %v8204_v32 = vpop.f32.mrb[117].mxu1 }
 0x49c   : > { %v7974_v21 = vpop.f32.mrb[102].mxu0 }
 0x49d   : > { %v8200_v3 = vadd.f32 %v11888_v34, %v7974_v21  ;;  %v7976_v60 = vpop.f32.mrb[103].mxu0 }
 0x49e   : > { %v11894_v49 = vpop.f32.mrb[118].mxu1 }
 0x49f   : > { %v19807_v28 = vadd.f32 %v8200_v3, %v19676_v6  ;;  %v8214_v45 = vpop.f32.mrb[119].mxu1 }
 0x4a0   : > { %v7979_v1 = vpop.f32.mrb[104].mxu0 }
 0x4a1   : > { %v8205_v2 = vadd.f32 %v8204_v32, %v7979_v1  ;;  %v7981_v44 = vpop.f32.mrb[105].mxu0 }
 0x4a2   : > { %v11897_v63 = vpop.f32.mrb[120].mxu1 }
 0x4a3   : > { %v19810_v0 = vadd.f32 %v8205_v2, %v19685_v18  ;;  %v8224_v29 = vpop.f32.mrb[121].mxu1 }
 0x4a4   : > { %v7984_v14 = vpop.f32.mrb[106].mxu0 }
 0x4a5   : > { %v8210_v54 = vadd.f32 %v11891_v40, %v7984_v14  ;;  %v7986_v53 = vpop.f32.mrb[107].mxu0 }
 0x4a6   : > { %v11900_v57 = vpop.f32.mrb[122].mxu1 }
 0x4a7   : > { %v19813_v23 = vadd.f32 %v8210_v54, %v19694_v7  ;;  %v8234_v46 = vpop.f32.mrb[123].mxu1 }
 0x4a8   : > { %v7989_v13 = vpop.f32.mrb[108].mxu0 }
 0x4a9   : > { %v8215_v6 = vadd.f32 %v8214_v45, %v7989_v13  ;;  %v7991_v26 = vpop.f32.mrb[109].mxu0 }
 0x4aa   : > { %v11903_v59 = vpop.f32.mrb[124].mxu1 }
 0x4ab   : > { %v19816_v12 = vadd.f32 %v8215_v6, %v19703_v50  ;;  %v8244_v4 = vpop.f32.mrb[125].mxu1 }
 0x4ac   : > { %v7994_v37 = vpop.f32.mrb[110].mxu0 }
 0x4ad   : > { %v8220_v18 = vadd.f32 %v11894_v49, %v7994_v37  ;;  %v7996_v16 = vpop.f32.mrb[111].mxu0 }
 0x4ae   : > { %v11906_v34 = vpop.f32.mrb[126].mxu1 }
 0x4af   : > { %v19819_v39 = vadd.f32 %v8220_v18, %v19712_v41  ;;  %v8254_v31 = vpop.f32.mrb[127].mxu1 }
 0x4b0   : > { %v7999_v20 = vpop.f32.mrb[112].mxu0 }
 0x4b1   : > { %v8225_v7 = vadd.f32 %v8224_v29, %v7999_v20  ;;  %v8001_v10 = vpop.f32.mrb[113].mxu0 }
 0x4b2   : > { %v8796_v40 = vpop.f32.mrb[128].mxu1 }
 0x4b3   : > { %v19822_v32 = vadd.f32 %v8225_v7, %v19719_v22  ;;  %v8798_v21 = vpop.f32.mrb[129].mxu1 }
 0x4b4   : > { %v8004_v3 = vpop.f32.mrb[114].mxu0 }
 0x4b5   : > { %v8230_v50 = vadd.f32 %v11897_v63, %v8004_v3  ;;  %v8006_v60 = vpop.f32.mrb[115].mxu0 }
 0x4b6   : > { %v8801_v45 = vpop.f32.mrb[130].mxu1 }
 0x4b7   : > { %v19825_v49 = vadd.f32 %v8230_v50, %v19724_v36  ;;  %v8803_v1 = vpop.f32.mrb[131].mxu1 }
 0x4b8   : > { %v8009_v2 = vpop.f32.mrb[116].mxu0 }
 0x4b9   : > { %v8235_v41 = vadd.f32 %v8234_v46, %v8009_v2  ;;  %v8011_v44 = vpop.f32.mrb[117].mxu0 }
 0x4ba   : > { %v8806_v14 = vpop.f32.mrb[132].mxu1 }
 0x4bb   : > { %v19828_v29 = vadd.f32 %v8235_v41, %v19728_v38  ;;  %v8808_v54 = vpop.f32.mrb[133].mxu1 }
 0x4bc   : > { %v8014_v53 = vpop.f32.mrb[118].mxu0 }
 0x4bd   : > { %v8240_v22 = vadd.f32 %v11900_v57, %v8014_v53  ;;  %v8016_v13 = vpop.f32.mrb[119].mxu0 }
 0x4be   : > { %v8811_v6 = vpop.f32.mrb[134].mxu1 }
 0x4bf   : > { %v19831_v63 = vadd.f32 %v8240_v22, %v19732_v33  ;;  %v8813_v26 = vpop.f32.mrb[135].mxu1 }
 0x4c0   : > { %v8019_v37 = vpop.f32.mrb[120].mxu0 }
 0x4c1   : > { %v8245_v36 = vadd.f32 %v8244_v4, %v8019_v37  ;;  %v8021_v18 = vpop.f32.mrb[121].mxu0 }
 0x4c2   : > { %v8816_v16 = vpop.f32.mrb[136].mxu1 }
 0x4c3   : > { %v19834_v46 = vadd.f32 %v8245_v36, %v19735_v62  ;;  %v8818_v20 = vpop.f32.mrb[137].mxu1 }
 0x4c4   : > { %v8024_v7 = vpop.f32.mrb[122].mxu0 }
 0x4c5   : > { %v8250_v38 = vadd.f32 %v11903_v59, %v8024_v7  ;;  %v8026_v10 = vpop.f32.mrb[123].mxu0 }
 0x4c6   : > { %v8821_v21 = vpop.f32.mrb[138].mxu1 }
 0x4c7   : > { %v19837_v57 = vadd.f32 %v8250_v38, %v19739_v56  ;;  %v8823_v3 = vpop.f32.mrb[139].mxu1 }
 0x4c8   : > { %v8029_v50 = vpop.f32.mrb[124].mxu0 }
 0x4c9   : > { %v8255_v33 = vadd.f32 %v8254_v31, %v8029_v50  ;;  %v8031_v60 = vpop.f32.mrb[125].mxu0 }
 0x4ca   : > { %v8826_v1 = vpop.f32.mrb[140].mxu1 }
 0x4cb   : > { %v19840_v4 = vadd.f32 %v8255_v33, %v19742_v19  ;;  %v8828_v2 = vpop.f32.mrb[141].mxu1 }
 0x4cc   : > { %v8034_v62 = vpop.f32.mrb[126].mxu0 }
 0x4cd   : > { %v8260_v41 = vadd.f32 %v11906_v34, %v8034_v62  ;;  %v8036_v44 = vpop.f32.mrb[127].mxu0 }
 0x4ce   : > { %v8831_v54 = vpop.f32.mrb[142].mxu1 }
 0x4cf   : > { %v19843_v59 = vadd.f32 %v8260_v41, %v19746_v42  ;;  %v8833_v56 = vpop.f32.mrb[143].mxu1 }
 0x4d0   : > { %v11941_v53 = vpop.f32.mrb[128].mxu0 }
 0x4d1   : > { %v9027_v22 = vadd.f32 %v11941_v53, %v8801_v45  ;;  %v9021_v13 = vpop.f32.mrb[129].mxu0 }
 0x4d2   : > { %v8836_v31 = vpop.f32.mrb[144].mxu1  ;;  %v9022_v26 = vadd.f32 %v9021_v13, %v8796_v40 }
 0x4d3   : > { %v9181_v37 = vadd.f32 %v9027_v22, %v19750_v47  ;;  %v8838_v19 = vpop.f32.mrb[145].mxu1 }
 0x4d4   : > { %v9180_v36 = vadd.f32 %v9022_v26, %v19753_v27  ;;  %v11944_v18 = vpop.f32.mrb[130].mxu0 }
 0x4d5   : > { %9213 = vst [vmem:[%s12904_s6 + $0x8] sm:$0xff] %v9181_v37  ;;  %v9282_v34 = vmul.f32 %v9181_v37, %v9181_v37  ;;  %v9037_v20 = vadd.f32 %v11944_v18, %v8811_v6  ;;  %v9031_v7 = vpop.f32.mrb[131].mxu0 }
 0x4d6   : > { %9212 = vst [vmem:[%s12904_s6] sm:$0xff] %v9180_v36  ;;  %v9244_v42 = vadd.f32 %v9181_v37, %v9180_v36  ;;  %v9281_v38 = vmul.f32 %v9180_v36, %v9180_v36  ;;  %v8841_v10 = vpop.f32.mrb[146].mxu1  ;;  %v9032_v45 = vadd.f32 %v9031_v7, %v8806_v14 }
 0x4d7   : > { %v9183_v3 = vadd.f32 %v9037_v20, %v19756_v48  ;;  %v8843_v40 = vpop.f32.mrb[147].mxu1 }
 0x4d8   : > { %v9313_v50 = vadd.f32 %v9282_v34, %v9281_v38  ;;  %v9182_v47 = vadd.f32 %v9032_v45, %v19759_v58  ;;  %v11947_v33 = vpop.f32.mrb[132].mxu0 }
 0x4d9   : > { %9215 = vst [vmem:[%s12904_s6 + $0x18] sm:$0xff] %v9183_v3  ;;  %v9047_v27 = vadd.f32 %v11947_v33, %v8821_v21  ;;  %v9041_v60 = vpop.f32.mrb[133].mxu0  ;;  %v9284_v56 = vmul.f32 %v9183_v3, %v9183_v3 }
 0x4da   : > { %9214 = vst [vmem:[%s12904_s6 + $0x10] sm:$0xff] %v9182_v47  ;;  %v9245_v6 = vadd.f32 %v9244_v42, %v9182_v47  ;;  %v9283_v2 = vmul.f32 %v9182_v47, %v9182_v47  ;;  %v8846_v62 = vpop.f32.mrb[148].mxu1  ;;  %v9042_v41 = vadd.f32 %v9041_v60, %v8816_v16 }
 0x4db   : > { %v9185_v44 = vadd.f32 %v9047_v27, %v19762_v52  ;;  %v8848_v14 = vpop.f32.mrb[149].mxu1 }
 0x4dc   : > { %v9314_v48 = vadd.f32 %v9313_v50, %v9283_v2  ;;  %v9184_v53 = vadd.f32 %v9042_v41, %v19765_v35  ;;  %v9246_v22 = vadd.f32 %v9245_v6, %v9183_v3  ;;  %v11950_v58 = vpop.f32.mrb[134].mxu0 }
 0x4dd   : > { %9217 = vst [vmem:[%s12904_s6 + $0x28] sm:$0xff] %v9185_v44  ;;  %v9057_v13 = vadd.f32 %v11950_v58, %v8831_v54  ;;  %v9051_v21 = vpop.f32.mrb[135].mxu0  ;;  %v9286_v34 = vmul.f32 %v9185_v44, %v9185_v44 }
 0x4de   : > { %9216 = vst [vmem:[%s12904_s6 + $0x20] sm:$0xff] %v9184_v53  ;;  %v9247_v26 = vadd.f32 %v9246_v22, %v9184_v53  ;;  %v9285_v37 = vmul.f32 %v9184_v53, %v9184_v53  ;;  %v9315_v19 = vadd.f32 %v9314_v48, %v9284_v56  ;;  %v8851_v36 = vpop.f32.mrb[150].mxu1  ;;  %v9052_v16 = vadd.f32 %v9051_v21, %v8826_v1 }
 0x4df   : > { %v9187_v52 = vadd.f32 %v9057_v13, %v19768_v5  ;;  %v8853_v18 = vpop.f32.mrb[151].mxu1 }
 0x4e0   : > { %v9316_v20 = vadd.f32 %v9315_v19, %v9285_v37  ;;  %v9186_v35 = vadd.f32 %v9052_v16, %v19771_v25  ;;  %v9248_v7 = vadd.f32 %v9247_v26, %v9185_v44  ;;  %v11953_v42 = vpop.f32.mrb[136].mxu0 }
 0x4e1   : > { %9219 = vst [vmem:[%s12904_s6 + $0x38] sm:$0xff] %v9187_v52  ;;  %v9067_v54 = vadd.f32 %v11953_v42, %v8841_v10  ;;  %v9061_v38 = vpop.f32.mrb[137].mxu0  ;;  %v9288_v33 = vmul.f32 %v9187_v52, %v9187_v52 }
 0x4e2   : > { %9218 = vst [vmem:[%s12904_s6 + $0x30] sm:$0xff] %v9186_v35  ;;  %v9249_v45 = vadd.f32 %v9248_v7, %v9186_v35  ;;  %v9287_v3 = vmul.f32 %v9186_v35, %v9186_v35  ;;  %v9317_v40 = vadd.f32 %v9316_v20, %v9286_v34  ;;  %v8856_v50 = vpop.f32.mrb[152].mxu1  ;;  %v9062_v1 = vadd.f32 %v9061_v38, %v8836_v31 }
 0x4e3   : > { %v9189_v5 = vadd.f32 %v9067_v54, %v19774_v55  ;;  %v8858_v47 = vpop.f32.mrb[153].mxu1 }
 0x4e4   : > { %v9318_v27 = vadd.f32 %v9317_v40, %v9287_v3  ;;  %v9188_v25 = vadd.f32 %v9062_v1, %v19777_v43  ;;  %v9250_v60 = vadd.f32 %v9249_v45, %v9187_v52  ;;  %v11956_v6 = vpop.f32.mrb[138].mxu0 }
 0x4e5   : > { %9221 = vst [vmem:[%s12904_s6 + $0x48] sm:$0xff] %v9189_v5  ;;  %v9077_v10 = vadd.f32 %v11956_v6, %v8851_v36  ;;  %v9071_v2 = vpop.f32.mrb[139].mxu0  ;;  %v9290_v53 = vmul.f32 %v9189_v5, %v9189_v5 }
 0x4e6   : > { %9220 = vst [vmem:[%s12904_s6 + $0x40] sm:$0xff] %v9188_v25  ;;  %v9251_v41 = vadd.f32 %v9250_v60, %v9188_v25  ;;  %v9289_v44 = vmul.f32 %v9188_v25, %v9188_v25  ;;  %v9319_v14 = vadd.f32 %v9318_v27, %v9288_v33  ;;  %v8861_v56 = vpop.f32.mrb[154].mxu1  ;;  %v9072_v31 = vadd.f32 %v9071_v2, %v8846_v62 }
 0x4e7   : > { %v9191_v55 = vadd.f32 %v9077_v10, %v19780_v8  ;;  %v8863_v48 = vpop.f32.mrb[155].mxu1 }
 0x4e8   : > { %v9320_v22 = vadd.f32 %v9319_v14, %v9289_v44  ;;  %v9190_v43 = vadd.f32 %v9072_v31, %v19783_v11  ;;  %v9252_v58 = vadd.f32 %v9251_v41, %v9189_v5  ;;  %v11959_v13 = vpop.f32.mrb[140].mxu0 }
 0x4e9   : > { %9223 = vst [vmem:[%s12904_s6 + $0x58] sm:$0xff] %v9191_v55  ;;  %v9087_v21 = vadd.f32 %v11959_v13, %v8861_v56  ;;  %v9081_v26 = vpop.f32.mrb[141].mxu0  ;;  %v9292_v18 = vmul.f32 %v9191_v55, %v9191_v55 }
 0x4ea   : > { %9222 = vst [vmem:[%s12904_s6 + $0x50] sm:$0xff] %v9190_v43  ;;  %v9253_v37 = vadd.f32 %v9252_v58, %v9190_v43  ;;  %v9291_v19 = vmul.f32 %v9190_v43, %v9190_v43  ;;  %v9321_v36 = vadd.f32 %v9320_v22, %v9290_v53  ;;  %v8866_v16 = vpop.f32.mrb[156].mxu1  ;;  %v9082_v62 = vadd.f32 %v9081_v26, %v8856_v50 }
 0x4eb   : > { %v9193_v8 = vadd.f32 %v9087_v21, %v19786_v9  ;;  %v8868_v52 = vpop.f32.mrb[157].mxu1 }
 0x4ec   : > { %v9322_v34 = vadd.f32 %v9321_v36, %v9291_v19  ;;  %v9192_v11 = vadd.f32 %v9082_v62, %v19789_v17  ;;  %v9254_v20 = vadd.f32 %v9253_v37, %v9191_v55  ;;  %v11962_v35 = vpop.f32.mrb[142].mxu0 }
 0x4ed   : > { %9225 = vst [vmem:[%s12904_s6 + $0x68] sm:$0xff] %v9193_v8  ;;  %v9091_v7 = vpop.f32.mrb[143].mxu0  ;;  %v9294_v9 = vmul.f32 %v9193_v8, %v9193_v8 }
 0x4ee   : > { %9224 = vst [vmem:[%s12904_s6 + $0x60] sm:$0xff] %v9192_v11  ;;  %v9255_v42 = vadd.f32 %v9254_v20, %v9192_v11  ;;  %v9293_v54 = vmul.f32 %v9192_v11, %v9192_v11  ;;  %v9323_v38 = vadd.f32 %v9322_v34, %v9292_v18  ;;  %v8871_v45 = vpop.f32.mrb[158].mxu1  ;;  %v9092_v3 = vadd.f32 %v9091_v7, %v8866_v16 }
 0x4ef   : > { %v9097_v40 = vadd.f32 %v11962_v35, %v8871_v45  ;;  %v8873_v50 = vpop.f32.mrb[159].mxu1 }
 0x4f0   : > { %v9324_v1 = vadd.f32 %v9323_v38, %v9293_v54  ;;  %v9194_v5 = vadd.f32 %v9092_v3, %v19795_v61  ;;  %v9256_v47 = vadd.f32 %v9255_v42, %v9193_v8  ;;  %v11965_v17 = vpop.f32.mrb[144].mxu0 }
 0x4f1   : > { %v9195_v33 = vadd.f32 %v9097_v40, %v19792_v30  ;;  %v9101_v27 = vpop.f32.mrb[145].mxu0 }
 0x4f2   : > { %9226 = vst [vmem:[%s12904_s6 + $0x70] sm:$0xff] %v9194_v5  ;;  %v9257_v25 = vadd.f32 %v9256_v47, %v9194_v5  ;;  %v9295_v60 = vmul.f32 %v9194_v5, %v9194_v5  ;;  %v9325_v6 = vadd.f32 %v9324_v1, %v9294_v9  ;;  %v8876_v10 = vpop.f32.mrb[160].mxu1 }
 0x4f3   : > { %9227 = vst [vmem:[%s12904_s6 + $0x78] sm:$0xff] %v9195_v33  ;;  %v9102_v2 = vadd.f32 %v9101_v27, %v8876_v10  ;;  %v8878_v41 = vpop.f32.mrb[161].mxu1  ;;  %v9296_v44 = vmul.f32 %v9195_v33, %v9195_v33 }
 0x4f4   : > { %v9326_v14 = vadd.f32 %v9325_v6, %v9295_v60  ;;  %v9258_v56 = vadd.f32 %v9257_v25, %v9195_v33  ;;  %v11968_v31 = vpop.f32.mrb[146].mxu0 }
 0x4f5   : > { %v9196_v61 = vadd.f32 %v9102_v2, %v19798_v15  ;;  %v9111_v55 = vpop.f32.mrb[147].mxu0 }
 0x4f6   : > { %v9327_v48 = vadd.f32 %v9326_v14, %v9296_v44  ;;  %v8881_v30 = vpop.f32.mrb[162].mxu1 }
 0x4f7   : > { %9228 = vst [vmem:[%s12904_s6 + $0x80] sm:$0xff] %v9196_v61  ;;  %v9259_v53 = vadd.f32 %v9258_v56, %v9196_v61  ;;  %v9297_v22 = vmul.f32 %v9196_v61, %v9196_v61  ;;  %v9107_v43 = vadd.f32 %v11965_v17, %v8881_v30  ;;  %v8883_v58 = vpop.f32.mrb[163].mxu1 }
 0x4f8   : > { %v11971_v13 = vpop.f32.mrb[148].mxu0 }
 0x4f9   : > { %v9328_v21 = vadd.f32 %v9327_v48, %v9297_v22  ;;  %v9197_v26 = vadd.f32 %v9107_v43, %v19801_v24  ;;  %v9121_v37 = vpop.f32.mrb[149].mxu0 }
 0x4fa   : > { %v8886_v19 = vpop.f32.mrb[164].mxu1 }
 0x4fb   : > { %9229 = vst [vmem:[%s12904_s6 + $0x88] sm:$0xff] %v9197_v26  ;;  %v9260_v36 = vadd.f32 %v9259_v53, %v9197_v26  ;;  %v9298_v16 = vmul.f32 %v9197_v26, %v9197_v26  ;;  %v9112_v62 = vadd.f32 %v9111_v55, %v8886_v19  ;;  %v8888_v15 = vpop.f32.mrb[165].mxu1 }
 0x4fc   : > { %v11974_v8 = vpop.f32.mrb[150].mxu0 }
 0x4fd   : > { %v9329_v52 = vadd.f32 %v9328_v21, %v9298_v16  ;;  %v9198_v18 = vadd.f32 %v9112_v62, %v19804_v51  ;;  %v9131_v34 = vpop.f32.mrb[151].mxu0 }
 0x4fe   : > { %v8891_v11 = vpop.f32.mrb[166].mxu1 }
 0x4ff   : > { %9230 = vst [vmem:[%s12904_s6 + $0x90] sm:$0xff] %v9198_v18  ;;  %v9261_v20 = vadd.f32 %v9260_v36, %v9198_v18  ;;  %v9299_v35 = vmul.f32 %v9198_v18, %v9198_v18  ;;  %v9117_v7 = vadd.f32 %v11968_v31, %v8891_v11  ;;  %v8893_v42 = vpop.f32.mrb[167].mxu1 }
 0x500   : > { %v11977_v24 = vpop.f32.mrb[152].mxu0 }
 0x501   : > { %v9330_v54 = vadd.f32 %v9329_v52, %v9299_v35  ;;  %v9199_v38 = vadd.f32 %v9117_v7, %v19807_v28  ;;  %v9141_v45 = vpop.f32.mrb[153].mxu0 }
 0x502   : > { %v8896_v3 = vpop.f32.mrb[168].mxu1 }
 0x503   : > { %9231 = vst [vmem:[%s12904_s6 + $0x98] sm:$0xff] %v9199_v38  ;;  %v9262_v40 = vadd.f32 %v9261_v20, %v9199_v38  ;;  %v9300_v50 = vmul.f32 %v9199_v38, %v9199_v38  ;;  %v9122_v9 = vadd.f32 %v9121_v37, %v8896_v3  ;;  %v8898_v1 = vpop.f32.mrb[169].mxu1 }
 0x504   : > { %v11980_v51 = vpop.f32.mrb[154].mxu0 }
 0x505   : > { %v9331_v5 = vadd.f32 %v9330_v54, %v9300_v50  ;;  %v9200_v47 = vadd.f32 %v9122_v9, %v19810_v0  ;;  %v9151_v17 = vpop.f32.mrb[155].mxu0 }
 0x506   : > { %v8901_v33 = vpop.f32.mrb[170].mxu1 }
 0x507   : > { %9232 = vst [vmem:[%s12904_s6 + $0xa0] sm:$0xff] %v9200_v47  ;;  %v9263_v27 = vadd.f32 %v9262_v40, %v9200_v47  ;;  %v9301_v25 = vmul.f32 %v9200_v47, %v9200_v47  ;;  %v9127_v60 = vadd.f32 %v11971_v13, %v8901_v33  ;;  %v8903_v6 = vpop.f32.mrb[171].mxu1 }
 0x508   : > { %v19887_v28 = vpop.f32.mrb[156].mxu0 }
 0x509   : > { %v9332_v10 = vadd.f32 %v9331_v5, %v9301_v25  ;;  %v9201_v2 = vadd.f32 %v9127_v60, %v19813_v23  ;;  %v9161_v41 = vpop.f32.mrb[157].mxu0 }
 0x50a   : > { %v8906_v44 = vpop.f32.mrb[172].mxu1 }
 0x50b   : > { %9233 = vst [vmem:[%s12904_s6 + $0xa8] sm:$0xff] %v9201_v2  ;;  %v9264_v14 = vadd.f32 %v9263_v27, %v9201_v2  ;;  %v9302_v56 = vmul.f32 %v9201_v2, %v9201_v2  ;;  %v9132_v0 = vadd.f32 %v9131_v34, %v8906_v44  ;;  %v8908_v31 = vpop.f32.mrb[173].mxu1 }
 0x50c   : > { %v19891_v61 = vpop.f32.mrb[158].mxu0 }
 0x50d   : > { %v9333_v55 = vadd.f32 %v9332_v10, %v9302_v56  ;;  %v9202_v48 = vadd.f32 %v9132_v0, %v19816_v12  ;;  %v9171_v30 = vpop.f32.mrb[159].mxu0 }
 0x50e   : > { %v8911_v53 = vpop.f32.mrb[174].mxu1 }
 0x50f   : > { %9234 = vst [vmem:[%s12904_s6 + $0xb0] sm:$0xff] %v9202_v48  ;;  %v9265_v22 = vadd.f32 %v9264_v14, %v9202_v48  ;;  %v9303_v43 = vmul.f32 %v9202_v48, %v9202_v48  ;;  %v9137_v23 = vadd.f32 %v11974_v8, %v8911_v53  ;;  %v8913_v58 = vpop.f32.mrb[175].mxu1 }
 0x511   : > { %v9334_v13 = vadd.f32 %v9333_v55, %v9303_v43  ;;  %v9203_v21 = vadd.f32 %v9137_v23, %v19819_v39 }
 0x512   : > { %v8916_v26 = vpop.f32.mrb[176].mxu1 }
 0x513   : > { %9235 = vst [vmem:[%s12904_s6 + $0xb8] sm:$0xff] %v9203_v21  ;;  %v9266_v37 = vadd.f32 %v9265_v22, %v9203_v21  ;;  %v9304_v19 = vmul.f32 %v9203_v21, %v9203_v21  ;;  %v9142_v36 = vadd.f32 %v9141_v45, %v8916_v26  ;;  %v8918_v16 = vpop.f32.mrb[177].mxu1 }
 0x515   : > { %v9335_v62 = vadd.f32 %v9334_v13, %v9304_v19  ;;  %v9204_v12 = vadd.f32 %v9142_v36, %v19822_v32 }
 0x516   : > { %v8921_v15 = vpop.f32.mrb[178].mxu1 }
 0x517   : > { %9236 = vst [vmem:[%s12904_s6 + $0xc0] sm:$0xff] %v9204_v12  ;;  %v9267_v52 = vadd.f32 %v9266_v37, %v9204_v12  ;;  %v9305_v18 = vmul.f32 %v9204_v12, %v9204_v12  ;;  %v9147_v8 = vadd.f32 %v11977_v24, %v8921_v15  ;;  %v8923_v34 = vpop.f32.mrb[179].mxu1 }
 0x519   : > { %v9336_v11 = vadd.f32 %v9335_v62, %v9305_v18  ;;  %v9205_v39 = vadd.f32 %v9147_v8, %v19825_v49 }
 0x51a   : > { %v8926_v20 = vpop.f32.mrb[180].mxu1 }
 0x51b   : > { %9237 = vst [vmem:[%s12904_s6 + $0xc8] sm:$0xff] %v9205_v39  ;;  %v9268_v35 = vadd.f32 %v9267_v52, %v9205_v39  ;;  %v9306_v7 = vmul.f32 %v9205_v39, %v9205_v39  ;;  %v9152_v42 = vadd.f32 %v9151_v17, %v8926_v20  ;;  %v8928_v54 = vpop.f32.mrb[181].mxu1 }
 0x51d   : > { %v9337_v38 = vadd.f32 %v9336_v11, %v9306_v7  ;;  %v9206_v32 = vadd.f32 %v9152_v42, %v19828_v29 }
 0x51e   : > { %v8931_v45 = vpop.f32.mrb[182].mxu1 }
 0x51f   : > { %9238 = vst [vmem:[%s12904_s6 + $0xd0] sm:$0xff] %v9206_v32  ;;  %v9269_v3 = vadd.f32 %v9268_v35, %v9206_v32  ;;  %v9307_v40 = vmul.f32 %v9206_v32, %v9206_v32  ;;  %v9157_v24 = vadd.f32 %v11980_v51, %v8931_v45  ;;  %v8933_v50 = vpop.f32.mrb[183].mxu1 }
 0x521   : > { %v9338_v9 = vadd.f32 %v9337_v38, %v9307_v40  ;;  %v9207_v49 = vadd.f32 %v9157_v24, %v19831_v63 }
 0x522   : > { %v8936_v1 = vpop.f32.mrb[184].mxu1 }
 0x523   : > { %9239 = vst [vmem:[%s12904_s6 + $0xd8] sm:$0xff] %v9207_v49  ;;  %v9270_v5 = vadd.f32 %v9269_v3, %v9207_v49  ;;  %v9308_v47 = vmul.f32 %v9207_v49, %v9207_v49  ;;  %v9162_v17 = vadd.f32 %v9161_v41, %v8936_v1  ;;  %v8938_v33 = vpop.f32.mrb[185].mxu1 }
 0x525   : > { %v9339_v27 = vadd.f32 %v9338_v9, %v9308_v47  ;;  %v9208_v29 = vadd.f32 %v9162_v17, %v19834_v46 }
 0x526   : > { %v8941_v25 = vpop.f32.mrb[186].mxu1 }
 0x527   : > { %9240 = vst [vmem:[%s12904_s6 + $0xe0] sm:$0xff] %v9208_v29  ;;  %v9271_v60 = vadd.f32 %v9270_v5, %v9208_v29  ;;  %v9309_v6 = vmul.f32 %v9208_v29, %v9208_v29  ;;  %v9167_v51 = vadd.f32 %v19887_v28, %v8941_v25  ;;  %v8943_v10 = vpop.f32.mrb[187].mxu1 }
 0x529   : > { %v9340_v2 = vadd.f32 %v9339_v27, %v9309_v6  ;;  %v9209_v63 = vadd.f32 %v9167_v51, %v19837_v57 }
 0x52a   : > { %v8946_v44 = vpop.f32.mrb[188].mxu1 }
 0x52b   : > { %9241 = vst [vmem:[%s12904_s6 + $0xe8] sm:$0xff] %v9209_v63  ;;  %v9272_v14 = vadd.f32 %v9271_v60, %v9209_v63  ;;  %v9310_v41 = vmul.f32 %v9209_v63, %v9209_v63  ;;  %v9172_v56 = vadd.f32 %v9171_v30, %v8946_v44  ;;  %v8948_v0 = vpop.f32.mrb[189].mxu1 }
 0x52d   : > { %v9341_v31 = vadd.f32 %v9340_v2, %v9310_v41  ;;  %v9210_v46 = vadd.f32 %v9172_v56, %v19840_v4 }
 0x52e   : > { %v8951_v55 = vpop.f32.mrb[190].mxu1 }
 0x52f   : > { %9242 = vst [vmem:[%s12904_s6 + $0xf0] sm:$0xff] %v9210_v46  ;;  %v9273_v48 = vadd.f32 %v9272_v14, %v9210_v46  ;;  %v9311_v53 = vmul.f32 %v9210_v46, %v9210_v46  ;;  %v9177_v28 = vadd.f32 %v19891_v61, %v8951_v55  ;;  %v8953_v22 = vpop.f32.mrb[191].mxu1 }
 0x531   : > { %v9342_v43 = vadd.f32 %v9341_v31, %v9311_v53  ;;  %v9211_v57 = vadd.f32 %v9177_v28, %v19843_v59 }
 0x533   : > { %9243 = vst [vmem:[%s12904_s6 + $0xf8] sm:$0xff] %v9211_v57  ;;  %v9274_v23 = vadd.f32 %v9273_v48, %v9211_v57  ;;  %v9312_v58 = vmul.f32 %v9211_v57, %v9211_v57 }
 0x535   : > { %v9275_v13 = vrot.slane %v9274_v23, 4  ;;  %v9343_v21 = vadd.f32 %v9342_v43, %v9312_v58 }
 0x537   : > { %v9276_v30 = vadd.f32 %v9275_v13, %v9274_v23  ;;  %v9344_v26 = vrot.slane %v9343_v21, 4 }
 0x539   : > { %v9277_v37 = vrot.slane %v9276_v30, 2  ;;  %v9345_v19 = vadd.f32 %v9344_v26, %v9343_v21 }
 0x53b   : > { %v9278_v4 = vadd.f32 %v9277_v37, %v9276_v30  ;;  %v9346_v36 = vrot.slane %v9345_v19, 2 }
 0x53d   : > { %v9279_v16 = vrot.slane %v9278_v4, 1  ;;  %v9347_v62 = vadd.f32 %v9346_v36, %v9345_v19  ;;  %9354 = sbr.rel (%p9568_p9) target bundleno = 1349 (0x545), region = 110 }
 0x53f   : > { %v9348_v12 = vrot.slane %v9347_v62, 1  ;;  %v9280_v61 = vadd.f32 %v9279_v16, %v9278_v4 }
 0x541   : > { %v9349_v15 = vadd.f32 %v9348_v12, %v9347_v62 }
 0x543   : > { %v9351_v52 = vsel %vm9350_vm2, %v9280_v61, %v9349_v15 }
 0x544   : > { %9355 = vst [vmem:[%s12897_s26] sm:$0x3] %v9351_v52 }
 0x545 PF: > { %p10830_p11 = scmp.le.s32.totalorder %s12817_s12, 0 }
 0x547   : > { %9359 = sbr.rel (%p10830_p11) target bundleno = 1359 (0x54f), region = 114 }
 0x54b   : > { %v9360_v59 = vld [vmem:[%s12897_s26] sm:$0x3] (!%p10830_p11) }
 0x54c   : > { %v9361_v18 = vadd.f32 (!%p10830_p11), %v9360_v59, %v9351_v52 }
 0x54e   : > { %9362 = vst [vmem:[%s12897_s26] sm:$0x3] %v9361_v18 }
 0x54f PF: > { %s14_s16 = sadd.s32 1, %s12833_s16   ;;  %s20317_s12 = smov %s12825_s14 }
 0x550   : > { %p11_p12 = scmp.ge.s32.totalorder %s14_s16, 6   ;;  %s20318_s13 = smov %s12829_s15 }
 0x551   : > { %s20319_s14 = smov %s20322_s17  ;;  %s20320_s15 = smov %s20326_s18 }
 0x552   :  { %13 = sbr.rel (!%p11_p12) target bundleno = 3 (0x3), region = 206 }
 0x559   :  { %9409 = vsyncmov [#allocation3] }
 0x55c   :  { %s9410_s26 = vpop.sfrf %9409 }
 0x55d   :  { %p10833_p13 = scmp.ne.s32.totalorder %s9410_s26, 0 }
 0x55f   :  { %9414 = shalt.err (%p10833_p13)  }
 0x560   :  { %9416 = vsyncmov [#allocation3 + $0x1] }
 0x563   :  { %s9417_s6 = vpop.sfrf %9416 }
 0x564   :  { %p10834_p0 = scmp.ne.s32.totalorder %s9417_s6, 0 }
 0x566   :  { %9421 = shalt.err (%p10834_p0)  }

</bundles_post_ra>
